<compile_context>
chip_gen: v7x
topology: tpu7x:2x2x1
jax: 0.10.0
libtpu: 0.0.40
codegen_flags: <defaults>
</compile_context>

<pallas_src>
import functools

import jax
import jax.numpy as jnp
from jax import lax
from jax.experimental import pallas as pl
from jax.experimental.pallas import tpu as pltpu

EPS = 1e-5
KK = 5            # conv kernel size (both convs)
STRIDE = 2
C_IN, C1, C2 = 3, 16, 32
KP = 128          # padded conv1 im2col K  (5*5*3 = 75 -> 128)
C1P = 128         # padded conv1 out channels (lane width)
C2P = 128         # padded conv2 out channels
OUTP = 128        # padded fc output width
FC_GROUP = 3      # fc positions fused per GEMM (K = FC_GROUP * 128)


def _conv_out(size, k=KK, s=STRIDE):
    return (size - (k - 1) - 1) // s + 1


def _round_up(x, m):
    return ((x + m - 1) // m) * m


# ----------------------------------------------------------------------------
# Fused Pallas kernel
# ----------------------------------------------------------------------------
def _make_fused_kernel(*, Hh, Wh, Ho2, Wo2, n_pad, m1_real, m2_real):
    """Hh/Wh: parity-grid sizes of the conv1 output; n_pad: padded batch (multiple of 8);
    m1_real / m2_real: number of *valid* rows for the BN1 / BN2 batch statistics."""
    HB, WB = 2 * Hh, 2 * Wh
    R1 = WB * n_pad                    # conv1 rows per parity-row stripe
    P = Ho2 * Wo2                      # conv2 spatial positions
    M2p = P * n_pad
    NPAIR = (KK * KK + 1) // 2         # conv2 tap pairs (25 taps -> 13 K=256 GEMMs)
    inv_m1 = 1.0 / float(m1_real)
    inv_m2 = 1.0 / float(m2_real)

    def kernel(p1_ref, m1_ref, w1_ref, g1_ref, b1_ref,
               w2_ref, g2_ref, b2_ref, m2_ref,
               wfc_ref, bfc_ref, o_ref, y1_s, y2_s):
        # ---- conv1: stripe-tiled im2col GEMM (bf16 MXU) + BN1 channel sums ----------------
        w1 = w1_ref[...]                                                     # (KP, C1P) bf16
        s1 = jnp.zeros((1, C1P), jnp.float32)
        for hb in range(HB):
            a = p1_ref[pl.ds(hb * R1, R1), :]                                # (R1, KP) bf16
            y = jnp.dot(a, w1, preferred_element_type=jnp.float32)           # (R1, C1P) f32
            m = m1_ref[pl.ds(hb * R1, R1), :]                                # (R1, 1)
            s1 = s1 + jnp.sum(y * m, axis=0, keepdims=True)
            y1_s[hb] = y.reshape(WB, n_pad, C1P)
        mu1 = s1 * inv_m1

        # ---- BN1 variance: numerically-safe two-pass form over the VMEM scratch ----------
        v1 = jnp.zeros((1, C1P), jnp.float32)
        for hb in range(HB):
            m = m1_ref[pl.ds(hb * R1, R1), :]
            d = (y1_s[hb].reshape(R1, C1P) - mu1) * m
            v1 = v1 + jnp.sum(d * d, axis=0, keepdims=True)
        scale1 = g1_ref[...] * lax.rsqrt(v1 * inv_m1 + EPS)
        shift1 = b1_ref[...] - mu1 * scale1

        # ---- BN1 apply + ReLU, in place in the scratch ------------------------------------
        for hb in range(HB):
            y = y1_s[hb].reshape(R1, C1P)
            y1_s[hb] = jnp.maximum(y * scale1 + shift1, 0.0).reshape(WB, n_pad, C1P)

        # ---- conv2: tap-pair fused GEMMs (K=256) over contiguous parity windows ----------
        y2_s[...] = jnp.zeros_like(y2_s)
        for j in range(NPAIR):
            halves = []
            for t in (2 * j, 2 * j + 1):
                t = min(t, KK * KK - 1)          # odd tail: duplicated patch, zero weights
                kh, kw = t // KK, t % KK
                hb0 = (kh % 2) * Hh + kh // 2
                wb0 = (kw % 2) * Wh + kw // 2
                win = y1_s[pl.ds(hb0, Ho2), pl.ds(wb0, Wo2), :, :]   # (Ho2,Wo2,n_pad,C1P)
                halves.append(win.reshape(M2p, C1P).astype(jnp.bfloat16))
            patch = jnp.concatenate(halves, axis=1)                  # (M2p, 2*C1P) bf16
            y2_s[...] += jnp.dot(patch, w2_ref[j],
                                 preferred_element_type=jnp.float32)

        # ---- BN2 (two-pass, masked batch stats) + ReLU -----------------------------------
        y2 = y2_s[...]                                               # (M2p, C2P) f32
        m2 = m2_ref[...]                                             # (M2p, 1)
        mu2 = jnp.sum(y2 * m2, axis=0, keepdims=True) * inv_m2
        d2 = (y2 - mu2) * m2
        var2 = jnp.sum(d2 * d2, axis=0, keepdims=True) * inv_m2
        scale2 = g2_ref[...] * lax.rsqrt(var2 + EPS)
        shift2 = b2_ref[...] - mu2 * scale2
        y2a = jnp.maximum(y2 * scale2 + shift2, 0.0)                 # (M2p, C2P) f32

        # ---- fc1: contiguous position slices, grouped into K = FC_GROUP*128 GEMMs --------
        out = jnp.zeros((n_pad, OUTP), jnp.float32) + bfc_ref[...]
        for g0 in range(0, P, FC_GROUP):
            gend = min(g0 + FC_GROUP, P)
            flat = jnp.concatenate(
                [y2a[p * n_pad:(p + 1) * n_pad, :] for p in range(g0, gend)], axis=1)
            wblk = wfc_ref[pl.ds(g0 * C2P, (gend - g0) * C2P), :]
            out = out + jnp.dot(flat.astype(jnp.bfloat16), wblk,
                                preferred_element_type=jnp.float32)
        o_ref[...] = out

    return kernel


# ----------------------------------------------------------------------------
# Host-side helpers (run under jit, pure layout plumbing)
# ----------------------------------------------------------------------------
def _im2col_nhwc(x):
    """5x5 stride-2 patches: (N,H,W,C) -> (N,Ho,Wo,25*C), feature order (kh,kw,c)."""
    N, H, W, C = x.shape
    Ho, Wo = _conv_out(H), _conv_out(W)
    cols = []
    for kh in range(KK):
        for kw in range(KK):
            cols.append(x[:, kh: kh + STRIDE * (Ho - 1) + 1: STRIDE,
                             kw: kw + STRIDE * (Wo - 1) + 1: STRIDE, :])
    p = jnp.stack(cols, axis=3)                       # (N, Ho, Wo, 25, C)
    return p.reshape(N, Ho, Wo, KK * KK * C)


def _parity_reorder(a, Hh, Wh):
    """(N,Ho,Wo,F) -> (2*Hh, 2*Wh, N, F): block [ph*Hh+i, pw*Wh+j] = a[:, 2*i+ph, 2*j+pw].
    Unused (dummy) rows/cols for odd Ho/Wo stay zero and are excluded via the masks."""
    N, Ho, Wo, F = a.shape
    at = jnp.transpose(a, (1, 2, 0, 3))               # (Ho, Wo, N, F)
    out = jnp.zeros((2 * Hh, 2 * Wh, N, F), a.dtype)
    for ph in range(2):
        for pw in range(2):
            blk = at[ph::2, pw::2]
            out = out.at[ph * Hh: ph * Hh + blk.shape[0],
                         pw * Wh: pw * Wh + blk.shape[1]].set(blk)
    return out


def prepare_dqn_params(params, height, width, outputs):
    """One-time weight packing into 128-lane GEMM form (batch-size independent).
    Conv biases are dropped: they cancel exactly under training-mode BatchNorm."""
    Ho1, Wo1 = _conv_out(height), _conv_out(width)
    Ho2, Wo2 = _conv_out(Ho1), _conv_out(Wo1)
    P = Ho2 * Wo2

    # conv1: (Cout,Cin,Kh,Kw) -> (Kh*Kw*Cin, Cout) -> zero-pad to (128,128), bf16.
    w1 = jnp.transpose(params["conv1_w"], (2, 3, 1, 0)).reshape(KK * KK * C_IN, C1)
    w1 = jnp.pad(w1, ((0, KP - KK * KK * C_IN), (0, C1P - C1))).astype(jnp.bfloat16)
    g1 = jnp.pad(params["bn1_g"], (0, C1P - C1)).reshape(1, C1P).astype(jnp.float32)
    b1 = jnp.pad(params["bn1_b"], (0, C1P - C1)).reshape(1, C1P).astype(jnp.float32)

    # conv2: per-tap (Cin,Cout) blocks, padded to (26,128,128) (tap 25 = zeros) and fused in
    # K=256 pairs -> (13, 256, 128), bf16.
    w2 = jnp.transpose(params["conv2_w"], (2, 3, 1, 0)).reshape(KK * KK, C1, C2)
    w2 = jnp.pad(w2, ((0, 1), (0, C1P - C1), (0, C2P - C2))).astype(jnp.bfloat16)
    w2 = w2.reshape((KK * KK + 1) // 2, 2 * C1P, C2P)
    g2 = jnp.pad(params["bn2_g"], (0, C2P - C2)).reshape(1, C2P).astype(jnp.float32)
    b2 = jnp.pad(params["bn2_b"], (0, C2P - C2)).reshape(1, C2P).astype(jnp.float32)

    # fc1: PyTorch flattens NCHW (feature = c*P + p); regroup per spatial position p so the
    # kernel's contiguous position slices line up: stacked row index = p*128 + c.
    wfc = params["fc1_w"].reshape(outputs, C2, P)
    wfc = jnp.transpose(wfc, (2, 1, 0))               # (P, C2, O)
    wfc = jnp.pad(wfc, ((0, 0), (0, C2P - C2), (0, OUTP - outputs))).astype(jnp.bfloat16)
    wfc = wfc.reshape(P * C2P, OUTP)
    bfc = jnp.pad(params["fc1_b"], (0, OUTP - outputs)).reshape(1, OUTP).astype(jnp.float32)

    return {"w1": w1, "g1": g1, "b1": b1,
            "w2": w2, "g2": g2, "b2": b2,
            "wfc": wfc, "bfc": bfc}


# ----------------------------------------------------------------------------
# Forward pass (one fused pallas_call, no grid -> no input double buffering)
# ----------------------------------------------------------------------------
@functools.partial(jax.jit, static_argnames=("outputs",))
def dqn_forward(x_nchw, prep, *, outputs):
    """Equivalent to DQN.forward(x) with BatchNorm in training mode (batch statistics)."""
    x = jnp.transpose(x_nchw, (0, 2, 3, 1)).astype(jnp.float32)      # NCHW -> NHWC
    N, H, W, _ = x.shape
    n_pad = _round_up(max(N, 1), 8)
    x = jnp.pad(x, ((0, n_pad - N), (0, 0), (0, 0), (0, 0)))

    Ho1, Wo1 = _conv_out(H), _conv_out(W)
    Ho2, Wo2 = _conv_out(Ho1), _conv_out(Wo1)
    Hh, Wh = (Ho1 + 1) // 2, (Wo1 + 1) // 2
    P = Ho2 * Wo2
    M1p = 4 * Hh * Wh * n_pad
    M2p = P * n_pad
    assert prep["wfc"].shape[0] == P * C2P, "prepared params do not match input resolution"

    # conv1 im2col (XLA side), reordered into the stride-2 parity layout the kernel slices.
    patches = _im2col_nhwc(x)                                        # (n_pad, Ho1, Wo1, 75)
    valid = jnp.zeros((n_pad, Ho1, Wo1, 1), jnp.float32).at[:N].set(1.0)
    p1 = _parity_reorder(patches, Hh, Wh).reshape(M1p, KK * KK * C_IN)
    p1 = jnp.pad(p1, ((0, 0), (0, KP - KK * KK * C_IN))).astype(jnp.bfloat16)
    m1 = _parity_reorder(valid, Hh, Wh).reshape(M1p, 1)
    m2 = jnp.tile((jnp.arange(n_pad) < N).astype(jnp.float32)[:, None], (P, 1))

    kernel = _make_fused_kernel(Hh=Hh, Wh=Wh, Ho2=Ho2, Wo2=Wo2, n_pad=n_pad,
                                m1_real=N * Ho1 * Wo1, m2_real=N * Ho2 * Wo2)
    args = (p1, m1, prep["w1"], prep["g1"], prep["b1"],
            prep["w2"], prep["g2"], prep["b2"], m2,
            prep["wfc"], prep["bfc"])
    vmem = pl.BlockSpec(memory_space=pltpu.MemorySpace.VMEM)

    out_padded = pl.pallas_call(
        kernel,
        out_shape=jax.ShapeDtypeStruct((n_pad, OUTP), jnp.float32),
        in_specs=[vmem] * len(args),
        out_specs=vmem,
        scratch_shapes=[
            pltpu.VMEM((2 * Hh, 2 * Wh, n_pad, C1P), jnp.float32),   # conv1 activations
            pltpu.VMEM((M2p, C2P), jnp.float32),                     # conv2 accumulator
        ],
    )(*args)

    return out_padded[:N, :outputs]


# ----------------------------------------------------------------------------
# Pure-JAX reference (for validation only)
# ----------------------------------------------------------------------------
def dqn_reference(x_nchw, params):
    def conv(x, w, b, s):
        y = lax.conv_general_dilated(
            x, w, (s, s), "VALID", dimension_numbers=("NCHW", "OIHW", "NCHW"))
        return y + b[None, :, None, None]

    def bn(x, g, b):
        mu = jnp.mean(x, axis=(0, 2, 3), keepdims=True)
        var = jnp.mean(jnp.square(x - mu), axis=(0, 2, 3), keepdims=True)
        return (x - mu) * lax.rsqrt(var + EPS) * g[None, :, None, None] + b[None, :, None, None]

    x = jnp.maximum(bn(conv(x_nchw, params["conv1_w"], params["conv1_b"], 2),
                       params["bn1_g"], params["bn1_b"]), 0.0)
    x = jnp.maximum(bn(conv(x, params["conv2_w"], params["conv2_b"], 2),
                       params["bn2_g"], params["bn2_b"]), 0.0)
    x = x.reshape(x.shape[0], -1)
    return x @ params["fc1_w"].T + params["fc1_b"]


# ----------------------------------------------------------------------------
# Deterministic parameter construction (shapes per DQN.__init__)
# ----------------------------------------------------------------------------
def make_params(height, width, outputs, key):
    ch = _conv_out(_conv_out(height))
    cw = _conv_out(_conv_out(width))
    lin_in = ch * cw * 32

    ks = jax.random.split(key, 6)
    return {
        "conv1_w": 0.1 * jax.random.normal(ks[0], (16, 3, 5, 5), jnp.float32),
        "conv1_b": 0.1 * jax.random.normal(ks[1], (16,), jnp.float32),
        "bn1_g": jnp.ones((16,), jnp.float32),   # PyTorch BatchNorm2d default affine
        "bn1_b": jnp.zeros((16,), jnp.float32),
        "conv2_w": 0.1 * jax.random.normal(ks[2], (32, 16, 5, 5), jnp.float32),
        "conv2_b": 0.1 * jax.random.normal(ks[3], (32,), jnp.float32),
        "bn2_g": jnp.ones((32,), jnp.float32),
        "bn2_b": jnp.zeros((32,), jnp.float32),
        "fc1_w": 0.1 * jax.random.normal(ks[4], (outputs, lin_in), jnp.float32),
        "fc1_b": 0.1 * jax.random.normal(ks[5], (outputs,), jnp.float32),
    }


# TODO(synk): DQN.sample_action's host-side epsilon-greedy randomness / argmax is not a kernel
#             concern and is intentionally not implemented here.

if __name__ == "__main__":
    key = jax.random.PRNGKey(0)
    k_x, k_p = jax.random.split(key)

    B, C, H, W, OUT = 2, 3, 24, 24, 4
    x = jax.random.normal(k_x, (B, C, H, W), jnp.float32)
    params = make_params(H, W, OUT, k_p)
    prepped = prepare_dqn_params(params, H, W, OUT)

    out = jax.block_until_ready(dqn_forward(x, prepped, outputs=OUT))
    ref = jax.block_until_ready(dqn_reference(x, params))

    assert out.shape == (B, OUT), out.shape
    # bf16 MXU operands (f32 accumulation) vs the pure-f32 reference -> loosened tolerance.
    err = jnp.max(jnp.abs(out - ref))
    assert jnp.allclose(out, ref, rtol=5e-2, atol=1e-1), f"mismatch: max abs err {err}"

    print("KERNEL_OK")
</pallas_src>

<mosaic_0001>
module attributes {stable_mosaic.version = 11 : i64} {
  func.func @kernel(%arg0: memref<800x128xbf16, #tpu.memory_space<vmem>>, %arg1: memref<800x1xf32, #tpu.memory_space<vmem>>, %arg2: memref<128x128xbf16, #tpu.memory_space<vmem>>, %arg3: memref<1x128xf32, #tpu.memory_space<vmem>>, %arg4: memref<1x128xf32, #tpu.memory_space<vmem>>, %arg5: memref<13x256x128xbf16, #tpu.memory_space<vmem>>, %arg6: memref<1x128xf32, #tpu.memory_space<vmem>>, %arg7: memref<1x128xf32, #tpu.memory_space<vmem>>, %arg8: memref<72x1xf32, #tpu.memory_space<vmem>>, %arg9: memref<1152x128xbf16, #tpu.memory_space<vmem>>, %arg10: memref<1x128xf32, #tpu.memory_space<vmem>>, %arg11: memref<8x128xf32, #tpu.memory_space<vmem>>, %arg12: memref<10x10x8x128xf32, #tpu.memory_space<vmem>>, %arg13: memref<72x128xf32, #tpu.memory_space<vmem>>) attributes {dimension_semantics = [], scalar_prefetch = 0 : i64, scratch_operands = 2 : i64, tpu.core_type = #tpu.core_type<tc>} {
    %c0 = arith.constant 0 : index
    %c0_0 = arith.constant 0 : index
    %0 = vector.load %arg2[%c0, %c0_0] : memref<128x128xbf16, #tpu.memory_space<vmem>>, vector<128x128xbf16>
    %cst = arith.constant 0.000000e+00 : f32
    %1 = vector.broadcast %cst : f32 to vector<1x128xf32>
    %c0_1 = arith.constant 0 : index
    %c0_2 = arith.constant 0 : index
    %2 = vector.load %arg0[%c0_1, %c0_2] : memref<800x128xbf16, #tpu.memory_space<vmem>>, vector<80x128xbf16>
    %cst_3 = arith.constant dense<0.000000e+00> : vector<80x128xf32>
    %3 = tpu.matmul %2, %0, %cst_3 {dimension_numbers = #tpu.dot_dimension_numbers<[1], [0], [0], [1], [0, 0, 1, 1], [], []>} : vector<80x128xbf16>, vector<128x128xbf16>, vector<80x128xf32> -> vector<80x128xf32>
    %c0_4 = arith.constant 0 : index
    %c0_5 = arith.constant 0 : index
    %4 = vector.load %arg1[%c0_4, %c0_5] : memref<800x1xf32, #tpu.memory_space<vmem>>, vector<80x1xf32>
    %5 = vector.broadcast %4 : vector<80x1xf32> to vector<80x128xf32>
    %6 = arith.mulf %3, %5 : vector<80x128xf32>
    %cst_6 = arith.constant dense<0.000000e+00> : vector<128xf32>
    %7 = vector.multi_reduction <add>, %6, %cst_6 [0] : vector<80x128xf32> to vector<128xf32>
    %8 = vector.shape_cast %7 : vector<128xf32> to vector<1x128xf32>
    %9 = arith.addf %1, %8 : vector<1x128xf32>
    %10 = vector.shape_cast %3 : vector<80x128xf32> to vector<10x8x128xf32>
    %c0_7 = arith.constant 0 : index
    %c0_8 = arith.constant 0 : index
    %c0_9 = arith.constant 0 : index
    %c0_10 = arith.constant 0 : index
    %11 = vector.load %arg12[%c0_7, %c0_8, %c0_9, %c0_10] : memref<10x10x8x128xf32, #tpu.memory_space<vmem>>, vector<1x10x8x128xf32>
    %12 = vector.shape_cast %11 : vector<1x10x8x128xf32> to vector<10x8x128xf32>
    %13 = vector.shape_cast %10 : vector<10x8x128xf32> to vector<1x10x8x128xf32>
    tpu.vector_store %arg12[%c0_7, %c0_8, %c0_9, %c0_10], %13 {strides = array<i32>} : memref<10x10x8x128xf32, #tpu.memory_space<vmem>>, vector<1x10x8x128xf32>,
    %c80 = arith.constant 80 : index
    %c0_11 = arith.constant 0 : index
    %14 = vector.load %arg0[%c80, %c0_11] : memref<800x128xbf16, #tpu.memory_space<vmem>>, vector<80x128xbf16>
    %cst_12 = arith.constant dense<0.000000e+00> : vector<80x128xf32>
    %15 = tpu.matmul %14, %0, %cst_12 {dimension_numbers = #tpu.dot_dimension_numbers<[1], [0], [0], [1], [0, 0, 1, 1], [], []>} : vector<80x128xbf16>, vector<128x128xbf16>, vector<80x128xf32> -> vector<80x128xf32>
    %c80_13 = arith.constant 80 : index
    %c0_14 = arith.constant 0 : index
    %16 = vector.load %arg1[%c80_13, %c0_14] : memref<800x1xf32, #tpu.memory_space<vmem>>, vector<80x1xf32>
    %17 = vector.broadcast %16 : vector<80x1xf32> to vector<80x128xf32>
    %18 = arith.mulf %15, %17 : vector<80x128xf32>
    %cst_15 = arith.constant dense<0.000000e+00> : vector<128xf32>
    %19 = vector.multi_reduction <add>, %18, %cst_15 [0] : vector<80x128xf32> to vector<128xf32>
    %20 = vector.shape_cast %19 : vector<128xf32> to vector<1x128xf32>
    %21 = arith.addf %9, %20 : vector<1x128xf32>
    %22 = vector.shape_cast %15 : vector<80x128xf32> to vector<10x8x128xf32>
    %c1 = arith.constant 1 : index
    %c0_16 = arith.constant 0 : index
    %c0_17 = arith.constant 0 : index
    %c0_18 = arith.constant 0 : index
    %23 = vector.load %arg12[%c1, %c0_16, %c0_17, %c0_18] : memref<10x10x8x128xf32, #tpu.memory_space<vmem>>, vector<1x10x8x128xf32>
    %24 = vector.shape_cast %23 : vector<1x10x8x128xf32> to vector<10x8x128xf32>
    %25 = vector.shape_cast %22 : vector<10x8x128xf32> to vector<1x10x8x128xf32>
    tpu.vector_store %arg12[%c1, %c0_16, %c0_17, %c0_18], %25 {strides = array<i32>} : memref<10x10x8x128xf32, #tpu.memory_space<vmem>>, vector<1x10x8x128xf32>,
    %c160 = arith.constant 160 : index
    %c0_19 = arith.constant 0 : index
    %26 = vector.load %arg0[%c160, %c0_19] : memref<800x128xbf16, #tpu.memory_space<vmem>>, vector<80x128xbf16>
    %cst_20 = arith.constant dense<0.000000e+00> : vector<80x128xf32>
    %27 = tpu.matmul %26, %0, %cst_20 {dimension_numbers = #tpu.dot_dimension_numbers<[1], [0], [0], [1], [0, 0, 1, 1], [], []>} : vector<80x128xbf16>, vector<128x128xbf16>, vector<80x128xf32> -> vector<80x128xf32>
    %c160_21 = arith.constant 160 : index
    %c0_22 = arith.constant 0 : index
    %28 = vector.load %arg1[%c160_21, %c0_22] : memref<800x1xf32, #tpu.memory_space<vmem>>, vector<80x1xf32>
    %29 = vector.broadcast %28 : vector<80x1xf32> to vector<80x128xf32>
    %30 = arith.mulf %27, %29 : vector<80x128xf32>
    %cst_23 = arith.constant dense<0.000000e+00> : vector<128xf32>
    %31 = vector.multi_reduction <add>, %30, %cst_23 [0] : vector<80x128xf32> to vector<128xf32>
    %32 = vector.shape_cast %31 : vector<128xf32> to vector<1x128xf32>
    %33 = arith.addf %21, %32 : vector<1x128xf32>
    %34 = vector.shape_cast %27 : vector<80x128xf32> to vector<10x8x128xf32>
    %c2 = arith.constant 2 : index
    %c0_24 = arith.constant 0 : index
    %c0_25 = arith.constant 0 : index
    %c0_26 = arith.constant 0 : index
    %35 = vector.load %arg12[%c2, %c0_24, %c0_25, %c0_26] : memref<10x10x8x128xf32, #tpu.memory_space<vmem>>, vector<1x10x8x128xf32>
    %36 = vector.shape_cast %35 : vector<1x10x8x128xf32> to vector<10x8x128xf32>
    %37 = vector.shape_cast %34 : vector<10x8x128xf32> to vector<1x10x8x128xf32>
    tpu.vector_store %arg12[%c2, %c0_24, %c0_25, %c0_26], %37 {strides = array<i32>} : memref<10x10x8x128xf32, #tpu.memory_space<vmem>>, vector<1x10x8x128xf32>,
    %c240 = arith.constant 240 : index
    %c0_27 = arith.constant 0 : index
    %38 = vector.load %arg0[%c240, %c0_27] : memref<800x128xbf16, #tpu.memory_space<vmem>>, vector<80x128xbf16>
    %cst_28 = arith.constant dense<0.000000e+00> : vector<80x128xf32>
    %39 = tpu.matmul %38, %0, %cst_28 {dimension_numbers = #tpu.dot_dimension_numbers<[1], [0], [0], [1], [0, 0, 1, 1], [], []>} : vector<80x128xbf16>, vector<128x128xbf16>, vector<80x128xf32> -> vector<80x128xf32>
    %c240_29 = arith.constant 240 : index
    %c0_30 = arith.constant 0 : index
    %40 = vector.load %arg1[%c240_29, %c0_30] : memref<800x1xf32, #tpu.memory_space<vmem>>, vector<80x1xf32>
    %41 = vector.broadcast %40 : vector<80x1xf32> to vector<80x128xf32>
    %42 = arith.mulf %39, %41 : vector<80x128xf32>
    %cst_31 = arith.constant dense<0.000000e+00> : vector<128xf32>
    %43 = vector.multi_reduction <add>, %42, %cst_31 [0] : vector<80x128xf32> to vector<128xf32>
    %44 = vector.shape_cast %43 : vector<128xf32> to vector<1x128xf32>
    %45 = arith.addf %33, %44 : vector<1x128xf32>
    %46 = vector.shape_cast %39 : vector<80x128xf32> to vector<10x8x128xf32>
    %c3 = arith.constant 3 : index
    %c0_32 = arith.constant 0 : index
    %c0_33 = arith.constant 0 : index
    %c0_34 = arith.constant 0 : index
    %47 = vector.load %arg12[%c3, %c0_32, %c0_33, %c0_34] : memref<10x10x8x128xf32, #tpu.memory_space<vmem>>, vector<1x10x8x128xf32>
    %48 = vector.shape_cast %47 : vector<1x10x8x128xf32> to vector<10x8x128xf32>
    %49 = vector.shape_cast %46 : vector<10x8x128xf32> to vector<1x10x8x128xf32>
    tpu.vector_store %arg12[%c3, %c0_32, %c0_33, %c0_34], %49 {strides = array<i32>} : memref<10x10x8x128xf32, #tpu.memory_space<vmem>>, vector<1x10x8x128xf32>,
    %c320 = arith.constant 320 : index
    %c0_35 = arith.constant 0 : index
    %50 = vector.load %arg0[%c320, %c0_35] : memref<800x128xbf16, #tpu.memory_space<vmem>>, vector<80x128xbf16>
    %cst_36 = arith.constant dense<0.000000e+00> : vector<80x128xf32>
    %51 = tpu.matmul %50, %0, %cst_36 {dimension_numbers = #tpu.dot_dimension_numbers<[1], [0], [0], [1], [0, 0, 1, 1], [], []>} : vector<80x128xbf16>, vector<128x128xbf16>, vector<80x128xf32> -> vector<80x128xf32>
    %c320_37 = arith.constant 320 : index
    %c0_38 = arith.constant 0 : index
    %52 = vector.load %arg1[%c320_37, %c0_38] : memref<800x1xf32, #tpu.memory_space<vmem>>, vector<80x1xf32>
    %53 = vector.broadcast %52 : vector<80x1xf32> to vector<80x128xf32>
    %54 = arith.mulf %51, %53 : vector<80x128xf32>
    %cst_39 = arith.constant dense<0.000000e+00> : vector<128xf32>
    %55 = vector.multi_reduction <add>, %54, %cst_39 [0] : vector<80x128xf32> to vector<128xf32>
    %56 = vector.shape_cast %55 : vector<128xf32> to vector<1x128xf32>
    %57 = arith.addf %45, %56 : vector<1x128xf32>
    %58 = vector.shape_cast %51 : vector<80x128xf32> to vector<10x8x128xf32>
    %c4 = arith.constant 4 : index
    %c0_40 = arith.constant 0 : index
    %c0_41 = arith.constant 0 : index
    %c0_42 = arith.constant 0 : index
    %59 = vector.load %arg12[%c4, %c0_40, %c0_41, %c0_42] : memref<10x10x8x128xf32, #tpu.memory_space<vmem>>, vector<1x10x8x128xf32>
    %60 = vector.shape_cast %59 : vector<1x10x8x128xf32> to vector<10x8x128xf32>
    %61 = vector.shape_cast %58 : vector<10x8x128xf32> to vector<1x10x8x128xf32>
    tpu.vector_store %arg12[%c4, %c0_40, %c0_41, %c0_42], %61 {strides = array<i32>} : memref<10x10x8x128xf32, #tpu.memory_space<vmem>>, vector<1x10x8x128xf32>,
    %c400 = arith.constant 400 : index
    %c0_43 = arith.constant 0 : index
    %62 = vector.load %arg0[%c400, %c0_43] : memref<800x128xbf16, #tpu.memory_space<vmem>>, vector<80x128xbf16>
    %cst_44 = arith.constant dense<0.000000e+00> : vector<80x128xf32>
    %63 = tpu.matmul %62, %0, %cst_44 {dimension_numbers = #tpu.dot_dimension_numbers<[1], [0], [0], [1], [0, 0, 1, 1], [], []>} : vector<80x128xbf16>, vector<128x128xbf16>, vector<80x128xf32> -> vector<80x128xf32>
    %c400_45 = arith.constant 400 : index
    %c0_46 = arith.constant 0 : index
    %64 = vector.load %arg1[%c400_45, %c0_46] : memref<800x1xf32, #tpu.memory_space<vmem>>, vector<80x1xf32>
    %65 = vector.broadcast %64 : vector<80x1xf32> to vector<80x128xf32>
    %66 = arith.mulf %63, %65 : vector<80x128xf32>
    %cst_47 = arith.constant dense<0.000000e+00> : vector<128xf32>
    %67 = vector.multi_reduction <add>, %66, %cst_47 [0] : vector<80x128xf32> to vector<128xf32>
    %68 = vector.shape_cast %67 : vector<128xf32> to vector<1x128xf32>
    %69 = arith.addf %57, %68 : vector<1x128xf32>
    %70 = vector.shape_cast %63 : vector<80x128xf32> to vector<10x8x128xf32>
    %c5 = arith.constant 5 : index
    %c0_48 = arith.constant 0 : index
    %c0_49 = arith.constant 0 : index
    %c0_50 = arith.constant 0 : index
    %71 = vector.load %arg12[%c5, %c0_48, %c0_49, %c0_50] : memref<10x10x8x128xf32, #tpu.memory_space<vmem>>, vector<1x10x8x128xf32>
    %72 = vector.shape_cast %71 : vector<1x10x8x128xf32> to vector<10x8x128xf32>
    %73 = vector.shape_cast %70 : vector<10x8x128xf32> to vector<1x10x8x128xf32>
    tpu.vector_store %arg12[%c5, %c0_48, %c0_49, %c0_50], %73 {strides = array<i32>} : memref<10x10x8x128xf32, #tpu.memory_space<vmem>>, vector<1x10x8x128xf32>,
    %c480 = arith.constant 480 : index
    %c0_51 = arith.constant 0 : index
    %74 = vector.load %arg0[%c480, %c0_51] : memref<800x128xbf16, #tpu.memory_space<vmem>>, vector<80x128xbf16>
    %cst_52 = arith.constant dense<0.000000e+00> : vector<80x128xf32>
    %75 = tpu.matmul %74, %0, %cst_52 {dimension_numbers = #tpu.dot_dimension_numbers<[1], [0], [0], [1], [0, 0, 1, 1], [], []>} : vector<80x128xbf16>, vector<128x128xbf16>, vector<80x128xf32> -> vector<80x128xf32>
    %c480_53 = arith.constant 480 : index
    %c0_54 = arith.constant 0 : index
    %76 = vector.load %arg1[%c480_53, %c0_54] : memref<800x1xf32, #tpu.memory_space<vmem>>, vector<80x1xf32>
    %77 = vector.broadcast %76 : vector<80x1xf32> to vector<80x128xf32>
    %78 = arith.mulf %75, %77 : vector<80x128xf32>
    %cst_55 = arith.constant dense<0.000000e+00> : vector<128xf32>
    %79 = vector.multi_reduction <add>, %78, %cst_55 [0] : vector<80x128xf32> to vector<128xf32>
    %80 = vector.shape_cast %79 : vector<128xf32> to vector<1x128xf32>
    %81 = arith.addf %69, %80 : vector<1x128xf32>
    %82 = vector.shape_cast %75 : vector<80x128xf32> to vector<10x8x128xf32>
    %c6 = arith.constant 6 : index
    %c0_56 = arith.constant 0 : index
    %c0_57 = arith.constant 0 : index
    %c0_58 = arith.constant 0 : index
    %83 = vector.load %arg12[%c6, %c0_56, %c0_57, %c0_58] : memref<10x10x8x128xf32, #tpu.memory_space<vmem>>, vector<1x10x8x128xf32>
    %84 = vector.shape_cast %83 : vector<1x10x8x128xf32> to vector<10x8x128xf32>
    %85 = vector.shape_cast %82 : vector<10x8x128xf32> to vector<1x10x8x128xf32>
    tpu.vector_store %arg12[%c6, %c0_56, %c0_57, %c0_58], %85 {strides = array<i32>} : memref<10x10x8x128xf32, #tpu.memory_space<vmem>>, vector<1x10x8x128xf32>,
    %c560 = arith.constant 560 : index
    %c0_59 = arith.constant 0 : index
    %86 = vector.load %arg0[%c560, %c0_59] : memref<800x128xbf16, #tpu.memory_space<vmem>>, vector<80x128xbf16>
    %cst_60 = arith.constant dense<0.000000e+00> : vector<80x128xf32>
    %87 = tpu.matmul %86, %0, %cst_60 {dimension_numbers = #tpu.dot_dimension_numbers<[1], [0], [0], [1], [0, 0, 1, 1], [], []>} : vector<80x128xbf16>, vector<128x128xbf16>, vector<80x128xf32> -> vector<80x128xf32>
    %c560_61 = arith.constant 560 : index
    %c0_62 = arith.constant 0 : index
    %88 = vector.load %arg1[%c560_61, %c0_62] : memref<800x1xf32, #tpu.memory_space<vmem>>, vector<80x1xf32>
    %89 = vector.broadcast %88 : vector<80x1xf32> to vector<80x128xf32>
    %90 = arith.mulf %87, %89 : vector<80x128xf32>
    %cst_63 = arith.constant dense<0.000000e+00> : vector<128xf32>
    %91 = vector.multi_reduction <add>, %90, %cst_63 [0] : vector<80x128xf32> to vector<128xf32>
    %92 = vector.shape_cast %91 : vector<128xf32> to vector<1x128xf32>
    %93 = arith.addf %81, %92 : vector<1x128xf32>
    %94 = vector.shape_cast %87 : vector<80x128xf32> to vector<10x8x128xf32>
    %c7 = arith.constant 7 : index
    %c0_64 = arith.constant 0 : index
    %c0_65 = arith.constant 0 : index
    %c0_66 = arith.constant 0 : index
    %95 = vector.load %arg12[%c7, %c0_64, %c0_65, %c0_66] : memref<10x10x8x128xf32, #tpu.memory_space<vmem>>, vector<1x10x8x128xf32>
    %96 = vector.shape_cast %95 : vector<1x10x8x128xf32> to vector<10x8x128xf32>
    %97 = vector.shape_cast %94 : vector<10x8x128xf32> to vector<1x10x8x128xf32>
    tpu.vector_store %arg12[%c7, %c0_64, %c0_65, %c0_66], %97 {strides = array<i32>} : memref<10x10x8x128xf32, #tpu.memory_space<vmem>>, vector<1x10x8x128xf32>,
    %c640 = arith.constant 640 : index
    %c0_67 = arith.constant 0 : index
    %98 = vector.load %arg0[%c640, %c0_67] : memref<800x128xbf16, #tpu.memory_space<vmem>>, vector<80x128xbf16>
    %cst_68 = arith.constant dense<0.000000e+00> : vector<80x128xf32>
    %99 = tpu.matmul %98, %0, %cst_68 {dimension_numbers = #tpu.dot_dimension_numbers<[1], [0], [0], [1], [0, 0, 1, 1], [], []>} : vector<80x128xbf16>, vector<128x128xbf16>, vector<80x128xf32> -> vector<80x128xf32>
    %c640_69 = arith.constant 640 : index
    %c0_70 = arith.constant 0 : index
    %100 = vector.load %arg1[%c640_69, %c0_70] : memref<800x1xf32, #tpu.memory_space<vmem>>, vector<80x1xf32>
    %101 = vector.broadcast %100 : vector<80x1xf32> to vector<80x128xf32>
    %102 = arith.mulf %99, %101 : vector<80x128xf32>
    %cst_71 = arith.constant dense<0.000000e+00> : vector<128xf32>
    %103 = vector.multi_reduction <add>, %102, %cst_71 [0] : vector<80x128xf32> to vector<128xf32>
    %104 = vector.shape_cast %103 : vector<128xf32> to vector<1x128xf32>
    %105 = arith.addf %93, %104 : vector<1x128xf32>
    %106 = vector.shape_cast %99 : vector<80x128xf32> to vector<10x8x128xf32>
    %c8 = arith.constant 8 : index
    %c0_72 = arith.constant 0 : index
    %c0_73 = arith.constant 0 : index
    %c0_74 = arith.constant 0 : index
    %107 = vector.load %arg12[%c8, %c0_72, %c0_73, %c0_74] : memref<10x10x8x128xf32, #tpu.memory_space<vmem>>, vector<1x10x8x128xf32>
    %108 = vector.shape_cast %107 : vector<1x10x8x128xf32> to vector<10x8x128xf32>
    %109 = vector.shape_cast %106 : vector<10x8x128xf32> to vector<1x10x8x128xf32>
    tpu.vector_store %arg12[%c8, %c0_72, %c0_73, %c0_74], %109 {strides = array<i32>} : memref<10x10x8x128xf32, #tpu.memory_space<vmem>>, vector<1x10x8x128xf32>,
    %c720 = arith.constant 720 : index
    %c0_75 = arith.constant 0 : index
    %110 = vector.load %arg0[%c720, %c0_75] : memref<800x128xbf16, #tpu.memory_space<vmem>>, vector<80x128xbf16>
    %cst_76 = arith.constant dense<0.000000e+00> : vector<80x128xf32>
    %111 = tpu.matmul %110, %0, %cst_76 {dimension_numbers = #tpu.dot_dimension_numbers<[1], [0], [0], [1], [0, 0, 1, 1], [], []>} : vector<80x128xbf16>, vector<128x128xbf16>, vector<80x128xf32> -> vector<80x128xf32>
    %c720_77 = arith.constant 720 : index
    %c0_78 = arith.constant 0 : index
    %112 = vector.load %arg1[%c720_77, %c0_78] : memref<800x1xf32, #tpu.memory_space<vmem>>, vector<80x1xf32>
    %113 = vector.broadcast %112 : vector<80x1xf32> to vector<80x128xf32>
    %114 = arith.mulf %111, %113 : vector<80x128xf32>
    %cst_79 = arith.constant dense<0.000000e+00> : vector<128xf32>
    %115 = vector.multi_reduction <add>, %114, %cst_79 [0] : vector<80x128xf32> to vector<128xf32>
    %116 = vector.shape_cast %115 : vector<128xf32> to vector<1x128xf32>
    %117 = arith.addf %105, %116 : vector<1x128xf32>
    %118 = vector.shape_cast %111 : vector<80x128xf32> to vector<10x8x128xf32>
    %c9 = arith.constant 9 : index
    %c0_80 = arith.constant 0 : index
    %c0_81 = arith.constant 0 : index
    %c0_82 = arith.constant 0 : index
    %119 = vector.load %arg12[%c9, %c0_80, %c0_81, %c0_82] : memref<10x10x8x128xf32, #tpu.memory_space<vmem>>, vector<1x10x8x128xf32>
    %120 = vector.shape_cast %119 : vector<1x10x8x128xf32> to vector<10x8x128xf32>
    %121 = vector.shape_cast %118 : vector<10x8x128xf32> to vector<1x10x8x128xf32>
    tpu.vector_store %arg12[%c9, %c0_80, %c0_81, %c0_82], %121 {strides = array<i32>} : memref<10x10x8x128xf32, #tpu.memory_space<vmem>>, vector<1x10x8x128xf32>,
    %cst_83 = arith.constant 5.000000e-03 : f32
    %122 = vector.broadcast %cst_83 : f32 to vector<1x128xf32>
    %123 = arith.mulf %117, %122 : vector<1x128xf32>
    %cst_84 = arith.constant 0.000000e+00 : f32
    %124 = vector.broadcast %cst_84 : f32 to vector<1x128xf32>
    %c0_85 = arith.constant 0 : index
    %c0_86 = arith.constant 0 : index
    %125 = vector.load %arg1[%c0_85, %c0_86] : memref<800x1xf32, #tpu.memory_space<vmem>>, vector<80x1xf32>
    %c0_87 = arith.constant 0 : index
    %c0_88 = arith.constant 0 : index
    %c0_89 = arith.constant 0 : index
    %c0_90 = arith.constant 0 : index
    %126 = vector.load %arg12[%c0_87, %c0_88, %c0_89, %c0_90] : memref<10x10x8x128xf32, #tpu.memory_space<vmem>>, vector<1x10x8x128xf32>
    %127 = vector.shape_cast %126 : vector<1x10x8x128xf32> to vector<10x8x128xf32>
    %128 = vector.shape_cast %127 : vector<10x8x128xf32> to vector<80x128xf32>
    %129 = vector.broadcast %123 : vector<1x128xf32> to vector<80x128xf32>
    %130 = arith.subf %128, %129 : vector<80x128xf32>
    %131 = vector.broadcast %125 : vector<80x1xf32> to vector<80x128xf32>
    %132 = arith.mulf %130, %131 : vector<80x128xf32>
    %133 = arith.mulf %132, %132 : vector<80x128xf32>
    %cst_91 = arith.constant dense<0.000000e+00> : vector<128xf32>
    %134 = vector.multi_reduction <add>, %133, %cst_91 [0] : vector<80x128xf32> to vector<128xf32>
    %135 = vector.shape_cast %134 : vector<128xf32> to vector<1x128xf32>
    %136 = arith.addf %124, %135 : vector<1x128xf32>
    %c80_92 = arith.constant 80 : index
    %c0_93 = arith.constant 0 : index
    %137 = vector.load %arg1[%c80_92, %c0_93] : memref<800x1xf32, #tpu.memory_space<vmem>>, vector<80x1xf32>
    %c1_94 = arith.constant 1 : index
    %c0_95 = arith.constant 0 : index
    %c0_96 = arith.constant 0 : index
    %c0_97 = arith.constant 0 : index
    %138 = vector.load %arg12[%c1_94, %c0_95, %c0_96, %c0_97] : memref<10x10x8x128xf32, #tpu.memory_space<vmem>>, vector<1x10x8x128xf32>
    %139 = vector.shape_cast %138 : vector<1x10x8x128xf32> to vector<10x8x128xf32>
    %140 = vector.shape_cast %139 : vector<10x8x128xf32> to vector<80x128xf32>
    %141 = vector.broadcast %123 : vector<1x128xf32> to vector<80x128xf32>
    %142 = arith.subf %140, %141 : vector<80x128xf32>
    %143 = vector.broadcast %137 : vector<80x1xf32> to vector<80x128xf32>
    %144 = arith.mulf %142, %143 : vector<80x128xf32>
    %145 = arith.mulf %144, %144 : vector<80x128xf32>
    %cst_98 = arith.constant dense<0.000000e+00> : vector<128xf32>
    %146 = vector.multi_reduction <add>, %145, %cst_98 [0] : vector<80x128xf32> to vector<128xf32>
    %147 = vector.shape_cast %146 : vector<128xf32> to vector<1x128xf32>
    %148 = arith.addf %136, %147 : vector<1x128xf32>
    %c160_99 = arith.constant 160 : index
    %c0_100 = arith.constant 0 : index
    %149 = vector.load %arg1[%c160_99, %c0_100] : memref<800x1xf32, #tpu.memory_space<vmem>>, vector<80x1xf32>
    %c2_101 = arith.constant 2 : index
    %c0_102 = arith.constant 0 : index
    %c0_103 = arith.constant 0 : index
    %c0_104 = arith.constant 0 : index
    %150 = vector.load %arg12[%c2_101, %c0_102, %c0_103, %c0_104] : memref<10x10x8x128xf32, #tpu.memory_space<vmem>>, vector<1x10x8x128xf32>
    %151 = vector.shape_cast %150 : vector<1x10x8x128xf32> to vector<10x8x128xf32>
    %152 = vector.shape_cast %151 : vector<10x8x128xf32> to vector<80x128xf32>
    %153 = vector.broadcast %123 : vector<1x128xf32> to vector<80x128xf32>
    %154 = arith.subf %152, %153 : vector<80x128xf32>
    %155 = vector.broadcast %149 : vector<80x1xf32> to vector<80x128xf32>
    %156 = arith.mulf %154, %155 : vector<80x128xf32>
    %157 = arith.mulf %156, %156 : vector<80x128xf32>
    %cst_105 = arith.constant dense<0.000000e+00> : vector<128xf32>
    %158 = vector.multi_reduction <add>, %157, %cst_105 [0] : vector<80x128xf32> to vector<128xf32>
    %159 = vector.shape_cast %158 : vector<128xf32> to vector<1x128xf32>
    %160 = arith.addf %148, %159 : vector<1x128xf32>
    %c240_106 = arith.constant 240 : index
    %c0_107 = arith.constant 0 : index
    %161 = vector.load %arg1[%c240_106, %c0_107] : memref<800x1xf32, #tpu.memory_space<vmem>>, vector<80x1xf32>
    %c3_108 = arith.constant 3 : index
    %c0_109 = arith.constant 0 : index
    %c0_110 = arith.constant 0 : index
    %c0_111 = arith.constant 0 : index
    %162 = vector.load %arg12[%c3_108, %c0_109, %c0_110, %c0_111] : memref<10x10x8x128xf32, #tpu.memory_space<vmem>>, vector<1x10x8x128xf32>
    %163 = vector.shape_cast %162 : vector<1x10x8x128xf32> to vector<10x8x128xf32>
    %164 = vector.shape_cast %163 : vector<10x8x128xf32> to vector<80x128xf32>
    %165 = vector.broadcast %123 : vector<1x128xf32> to vector<80x128xf32>
    %166 = arith.subf %164, %165 : vector<80x128xf32>
    %167 = vector.broadcast %161 : vector<80x1xf32> to vector<80x128xf32>
    %168 = arith.mulf %166, %167 : vector<80x128xf32>
    %169 = arith.mulf %168, %168 : vector<80x128xf32>
    %cst_112 = arith.constant dense<0.000000e+00> : vector<128xf32>
    %170 = vector.multi_reduction <add>, %169, %cst_112 [0] : vector<80x128xf32> to vector<128xf32>
    %171 = vector.shape_cast %170 : vector<128xf32> to vector<1x128xf32>
    %172 = arith.addf %160, %171 : vector<1x128xf32>
    %c320_113 = arith.constant 320 : index
    %c0_114 = arith.constant 0 : index
    %173 = vector.load %arg1[%c320_113, %c0_114] : memref<800x1xf32, #tpu.memory_space<vmem>>, vector<80x1xf32>
    %c4_115 = arith.constant 4 : index
    %c0_116 = arith.constant 0 : index
    %c0_117 = arith.constant 0 : index
    %c0_118 = arith.constant 0 : index
    %174 = vector.load %arg12[%c4_115, %c0_116, %c0_117, %c0_118] : memref<10x10x8x128xf32, #tpu.memory_space<vmem>>, vector<1x10x8x128xf32>
    %175 = vector.shape_cast %174 : vector<1x10x8x128xf32> to vector<10x8x128xf32>
    %176 = vector.shape_cast %175 : vector<10x8x128xf32> to vector<80x128xf32>
    %177 = vector.broadcast %123 : vector<1x128xf32> to vector<80x128xf32>
    %178 = arith.subf %176, %177 : vector<80x128xf32>
    %179 = vector.broadcast %173 : vector<80x1xf32> to vector<80x128xf32>
    %180 = arith.mulf %178, %179 : vector<80x128xf32>
    %181 = arith.mulf %180, %180 : vector<80x128xf32>
    %cst_119 = arith.constant dense<0.000000e+00> : vector<128xf32>
    %182 = vector.multi_reduction <add>, %181, %cst_119 [0] : vector<80x128xf32> to vector<128xf32>
    %183 = vector.shape_cast %182 : vector<128xf32> to vector<1x128xf32>
    %184 = arith.addf %172, %183 : vector<1x128xf32>
    %c400_120 = arith.constant 400 : index
    %c0_121 = arith.constant 0 : index
    %185 = vector.load %arg1[%c400_120, %c0_121] : memref<800x1xf32, #tpu.memory_space<vmem>>, vector<80x1xf32>
    %c5_122 = arith.constant 5 : index
    %c0_123 = arith.constant 0 : index
    %c0_124 = arith.constant 0 : index
    %c0_125 = arith.constant 0 : index
    %186 = vector.load %arg12[%c5_122, %c0_123, %c0_124, %c0_125] : memref<10x10x8x128xf32, #tpu.memory_space<vmem>>, vector<1x10x8x128xf32>
    %187 = vector.shape_cast %186 : vector<1x10x8x128xf32> to vector<10x8x128xf32>
    %188 = vector.shape_cast %187 : vector<10x8x128xf32> to vector<80x128xf32>
    %189 = vector.broadcast %123 : vector<1x128xf32> to vector<80x128xf32>
    %190 = arith.subf %188, %189 : vector<80x128xf32>
    %191 = vector.broadcast %185 : vector<80x1xf32> to vector<80x128xf32>
    %192 = arith.mulf %190, %191 : vector<80x128xf32>
    %193 = arith.mulf %192, %192 : vector<80x128xf32>
    %cst_126 = arith.constant dense<0.000000e+00> : vector<128xf32>
    %194 = vector.multi_reduction <add>, %193, %cst_126 [0] : vector<80x128xf32> to vector<128xf32>
    %195 = vector.shape_cast %194 : vector<128xf32> to vector<1x128xf32>
    %196 = arith.addf %184, %195 : vector<1x128xf32>
    %c480_127 = arith.constant 480 : index
    %c0_128 = arith.constant 0 : index
    %197 = vector.load %arg1[%c480_127, %c0_128] : memref<800x1xf32, #tpu.memory_space<vmem>>, vector<80x1xf32>
    %c6_129 = arith.constant 6 : index
    %c0_130 = arith.constant 0 : index
    %c0_131 = arith.constant 0 : index
    %c0_132 = arith.constant 0 : index
    %198 = vector.load %arg12[%c6_129, %c0_130, %c0_131, %c0_132] : memref<10x10x8x128xf32, #tpu.memory_space<vmem>>, vector<1x10x8x128xf32>
    %199 = vector.shape_cast %198 : vector<1x10x8x128xf32> to vector<10x8x128xf32>
    %200 = vector.shape_cast %199 : vector<10x8x128xf32> to vector<80x128xf32>
    %201 = vector.broadcast %123 : vector<1x128xf32> to vector<80x128xf32>
    %202 = arith.subf %200, %201 : vector<80x128xf32>
    %203 = vector.broadcast %197 : vector<80x1xf32> to vector<80x128xf32>
    %204 = arith.mulf %202, %203 : vector<80x128xf32>
    %205 = arith.mulf %204, %204 : vector<80x128xf32>
    %cst_133 = arith.constant dense<0.000000e+00> : vector<128xf32>
    %206 = vector.multi_reduction <add>, %205, %cst_133 [0] : vector<80x128xf32> to vector<128xf32>
    %207 = vector.shape_cast %206 : vector<128xf32> to vector<1x128xf32>
    %208 = arith.addf %196, %207 : vector<1x128xf32>
    %c560_134 = arith.constant 560 : index
    %c0_135 = arith.constant 0 : index
    %209 = vector.load %arg1[%c560_134, %c0_135] : memref<800x1xf32, #tpu.memory_space<vmem>>, vector<80x1xf32>
    %c7_136 = arith.constant 7 : index
    %c0_137 = arith.constant 0 : index
    %c0_138 = arith.constant 0 : index
    %c0_139 = arith.constant 0 : index
    %210 = vector.load %arg12[%c7_136, %c0_137, %c0_138, %c0_139] : memref<10x10x8x128xf32, #tpu.memory_space<vmem>>, vector<1x10x8x128xf32>
    %211 = vector.shape_cast %210 : vector<1x10x8x128xf32> to vector<10x8x128xf32>
    %212 = vector.shape_cast %211 : vector<10x8x128xf32> to vector<80x128xf32>
    %213 = vector.broadcast %123 : vector<1x128xf32> to vector<80x128xf32>
    %214 = arith.subf %212, %213 : vector<80x128xf32>
    %215 = vector.broadcast %209 : vector<80x1xf32> to vector<80x128xf32>
    %216 = arith.mulf %214, %215 : vector<80x128xf32>
    %217 = arith.mulf %216, %216 : vector<80x128xf32>
    %cst_140 = arith.constant dense<0.000000e+00> : vector<128xf32>
    %218 = vector.multi_reduction <add>, %217, %cst_140 [0] : vector<80x128xf32> to vector<128xf32>
    %219 = vector.shape_cast %218 : vector<128xf32> to vector<1x128xf32>
    %220 = arith.addf %208, %219 : vector<1x128xf32>
    %c640_141 = arith.constant 640 : index
    %c0_142 = arith.constant 0 : index
    %221 = vector.load %arg1[%c640_141, %c0_142] : memref<800x1xf32, #tpu.memory_space<vmem>>, vector<80x1xf32>
    %c8_143 = arith.constant 8 : index
    %c0_144 = arith.constant 0 : index
    %c0_145 = arith.constant 0 : index
    %c0_146 = arith.constant 0 : index
    %222 = vector.load %arg12[%c8_143, %c0_144, %c0_145, %c0_146] : memref<10x10x8x128xf32, #tpu.memory_space<vmem>>, vector<1x10x8x128xf32>
    %223 = vector.shape_cast %222 : vector<1x10x8x128xf32> to vector<10x8x128xf32>
    %224 = vector.shape_cast %223 : vector<10x8x128xf32> to vector<80x128xf32>
    %225 = vector.broadcast %123 : vector<1x128xf32> to vector<80x128xf32>
    %226 = arith.subf %224, %225 : vector<80x128xf32>
    %227 = vector.broadcast %221 : vector<80x1xf32> to vector<80x128xf32>
    %228 = arith.mulf %226, %227 : vector<80x128xf32>
    %229 = arith.mulf %228, %228 : vector<80x128xf32>
    %cst_147 = arith.constant dense<0.000000e+00> : vector<128xf32>
    %230 = vector.multi_reduction <add>, %229, %cst_147 [0] : vector<80x128xf32> to vector<128xf32>
    %231 = vector.shape_cast %230 : vector<128xf32> to vector<1x128xf32>
    %232 = arith.addf %220, %231 : vector<1x128xf32>
    %c720_148 = arith.constant 720 : index
    %c0_149 = arith.constant 0 : index
    %233 = vector.load %arg1[%c720_148, %c0_149] : memref<800x1xf32, #tpu.memory_space<vmem>>, vector<80x1xf32>
    %c9_150 = arith.constant 9 : index
    %c0_151 = arith.constant 0 : index
    %c0_152 = arith.constant 0 : index
    %c0_153 = arith.constant 0 : index
    %234 = vector.load %arg12[%c9_150, %c0_151, %c0_152, %c0_153] : memref<10x10x8x128xf32, #tpu.memory_space<vmem>>, vector<1x10x8x128xf32>
    %235 = vector.shape_cast %234 : vector<1x10x8x128xf32> to vector<10x8x128xf32>
    %236 = vector.shape_cast %235 : vector<10x8x128xf32> to vector<80x128xf32>
    %237 = vector.broadcast %123 : vector<1x128xf32> to vector<80x128xf32>
    %238 = arith.subf %236, %237 : vector<80x128xf32>
    %239 = vector.broadcast %233 : vector<80x1xf32> to vector<80x128xf32>
    %240 = arith.mulf %238, %239 : vector<80x128xf32>
    %241 = arith.mulf %240, %240 : vector<80x128xf32>
    %cst_154 = arith.constant dense<0.000000e+00> : vector<128xf32>
    %242 = vector.multi_reduction <add>, %241, %cst_154 [0] : vector<80x128xf32> to vector<128xf32>
    %243 = vector.shape_cast %242 : vector<128xf32> to vector<1x128xf32>
    %244 = arith.addf %232, %243 : vector<1x128xf32>
    %c0_155 = arith.constant 0 : index
    %c0_156 = arith.constant 0 : index
    %245 = vector.load %arg3[%c0_155, %c0_156] : memref<1x128xf32, #tpu.memory_space<vmem>>, vector<1x128xf32>
    %cst_157 = arith.constant 5.000000e-03 : f32
    %246 = vector.broadcast %cst_157 : f32 to vector<1x128xf32>
    %247 = arith.mulf %244, %246 : vector<1x128xf32>
    %cst_158 = arith.constant 9.99999974E-6 : f32
    %248 = vector.broadcast %cst_158 : f32 to vector<1x128xf32>
    %249 = arith.addf %247, %248 : vector<1x128xf32>
    %250 = math.rsqrt %249 : vector<1x128xf32>
    %251 = arith.mulf %245, %250 : vector<1x128xf32>
    %c0_159 = arith.constant 0 : index
    %c0_160 = arith.constant 0 : index
    %252 = vector.load %arg4[%c0_159, %c0_160] : memref<1x128xf32, #tpu.memory_space<vmem>>, vector<1x128xf32>
    %253 = arith.mulf %123, %251 : vector<1x128xf32>
    %254 = arith.subf %252, %253 : vector<1x128xf32>
    %c0_161 = arith.constant 0 : index
    %c0_162 = arith.constant 0 : index
    %c0_163 = arith.constant 0 : index
    %c0_164 = arith.constant 0 : index
    %255 = vector.load %arg12[%c0_161, %c0_162, %c0_163, %c0_164] : memref<10x10x8x128xf32, #tpu.memory_space<vmem>>, vector<1x10x8x128xf32>
    %256 = vector.shape_cast %255 : vector<1x10x8x128xf32> to vector<10x8x128xf32>
    %257 = vector.shape_cast %256 : vector<10x8x128xf32> to vector<80x128xf32>
    %258 = vector.broadcast %251 : vector<1x128xf32> to vector<80x128xf32>
    %259 = arith.mulf %257, %258 : vector<80x128xf32>
    %260 = vector.broadcast %254 : vector<1x128xf32> to vector<80x128xf32>
    %261 = arith.addf %259, %260 : vector<80x128xf32>
    %cst_165 = arith.constant 0.000000e+00 : f32
    %262 = vector.broadcast %cst_165 : f32 to vector<80x128xf32>
    %263 = arith.maximumf %261, %262 : vector<80x128xf32>
    %264 = vector.shape_cast %263 : vector<80x128xf32> to vector<10x8x128xf32>
    %c0_166 = arith.constant 0 : index
    %c0_167 = arith.constant 0 : index
    %c0_168 = arith.constant 0 : index
    %c0_169 = arith.constant 0 : index
    %265 = vector.load %arg12[%c0_166, %c0_167, %c0_168, %c0_169] : memref<10x10x8x128xf32, #tpu.memory_space<vmem>>, vector<1x10x8x128xf32>
    %266 = vector.shape_cast %265 : vector<1x10x8x128xf32> to vector<10x8x128xf32>
    %267 = vector.shape_cast %264 : vector<10x8x128xf32> to vector<1x10x8x128xf32>
    tpu.vector_store %arg12[%c0_166, %c0_167, %c0_168, %c0_169], %267 {strides = array<i32>} : memref<10x10x8x128xf32, #tpu.memory_space<vmem>>, vector<1x10x8x128xf32>,
    %c1_170 = arith.constant 1 : index
    %c0_171 = arith.constant 0 : index
    %c0_172 = arith.constant 0 : index
    %c0_173 = arith.constant 0 : index
    %268 = vector.load %arg12[%c1_170, %c0_171, %c0_172, %c0_173] : memref<10x10x8x128xf32, #tpu.memory_space<vmem>>, vector<1x10x8x128xf32>
    %269 = vector.shape_cast %268 : vector<1x10x8x128xf32> to vector<10x8x128xf32>
    %270 = vector.shape_cast %269 : vector<10x8x128xf32> to vector<80x128xf32>
    %271 = vector.broadcast %251 : vector<1x128xf32> to vector<80x128xf32>
    %272 = arith.mulf %270, %271 : vector<80x128xf32>
    %273 = vector.broadcast %254 : vector<1x128xf32> to vector<80x128xf32>
    %274 = arith.addf %272, %273 : vector<80x128xf32>
    %cst_174 = arith.constant 0.000000e+00 : f32
    %275 = vector.broadcast %cst_174 : f32 to vector<80x128xf32>
    %276 = arith.maximumf %274, %275 : vector<80x128xf32>
    %277 = vector.shape_cast %276 : vector<80x128xf32> to vector<10x8x128xf32>
    %c1_175 = arith.constant 1 : index
    %c0_176 = arith.constant 0 : index
    %c0_177 = arith.constant 0 : index
    %c0_178 = arith.constant 0 : index
    %278 = vector.load %arg12[%c1_175, %c0_176, %c0_177, %c0_178] : memref<10x10x8x128xf32, #tpu.memory_space<vmem>>, vector<1x10x8x128xf32>
    %279 = vector.shape_cast %278 : vector<1x10x8x128xf32> to vector<10x8x128xf32>
    %280 = vector.shape_cast %277 : vector<10x8x128xf32> to vector<1x10x8x128xf32>
    tpu.vector_store %arg12[%c1_175, %c0_176, %c0_177, %c0_178], %280 {strides = array<i32>} : memref<10x10x8x128xf32, #tpu.memory_space<vmem>>, vector<1x10x8x128xf32>,
    %c2_179 = arith.constant 2 : index
    %c0_180 = arith.constant 0 : index
    %c0_181 = arith.constant 0 : index
    %c0_182 = arith.constant 0 : index
    %281 = vector.load %arg12[%c2_179, %c0_180, %c0_181, %c0_182] : memref<10x10x8x128xf32, #tpu.memory_space<vmem>>, vector<1x10x8x128xf32>
    %282 = vector.shape_cast %281 : vector<1x10x8x128xf32> to vector<10x8x128xf32>
    %283 = vector.shape_cast %282 : vector<10x8x128xf32> to vector<80x128xf32>
    %284 = vector.broadcast %251 : vector<1x128xf32> to vector<80x128xf32>
    %285 = arith.mulf %283, %284 : vector<80x128xf32>
    %286 = vector.broadcast %254 : vector<1x128xf32> to vector<80x128xf32>
    %287 = arith.addf %285, %286 : vector<80x128xf32>
    %cst_183 = arith.constant 0.000000e+00 : f32
    %288 = vector.broadcast %cst_183 : f32 to vector<80x128xf32>
    %289 = arith.maximumf %287, %288 : vector<80x128xf32>
    %290 = vector.shape_cast %289 : vector<80x128xf32> to vector<10x8x128xf32>
    %c2_184 = arith.constant 2 : index
    %c0_185 = arith.constant 0 : index
    %c0_186 = arith.constant 0 : index
    %c0_187 = arith.constant 0 : index
    %291 = vector.load %arg12[%c2_184, %c0_185, %c0_186, %c0_187] : memref<10x10x8x128xf32, #tpu.memory_space<vmem>>, vector<1x10x8x128xf32>
    %292 = vector.shape_cast %291 : vector<1x10x8x128xf32> to vector<10x8x128xf32>
    %293 = vector.shape_cast %290 : vector<10x8x128xf32> to vector<1x10x8x128xf32>
    tpu.vector_store %arg12[%c2_184, %c0_185, %c0_186, %c0_187], %293 {strides = array<i32>} : memref<10x10x8x128xf32, #tpu.memory_space<vmem>>, vector<1x10x8x128xf32>,
    %c3_188 = arith.constant 3 : index
    %c0_189 = arith.constant 0 : index
    %c0_190 = arith.constant 0 : index
    %c0_191 = arith.constant 0 : index
    %294 = vector.load %arg12[%c3_188, %c0_189, %c0_190, %c0_191] : memref<10x10x8x128xf32, #tpu.memory_space<vmem>>, vector<1x10x8x128xf32>
    %295 = vector.shape_cast %294 : vector<1x10x8x128xf32> to vector<10x8x128xf32>
    %296 = vector.shape_cast %295 : vector<10x8x128xf32> to vector<80x128xf32>
    %297 = vector.broadcast %251 : vector<1x128xf32> to vector<80x128xf32>
    %298 = arith.mulf %296, %297 : vector<80x128xf32>
    %299 = vector.broadcast %254 : vector<1x128xf32> to vector<80x128xf32>
    %300 = arith.addf %298, %299 : vector<80x128xf32>
    %cst_192 = arith.constant 0.000000e+00 : f32
    %301 = vector.broadcast %cst_192 : f32 to vector<80x128xf32>
    %302 = arith.maximumf %300, %301 : vector<80x128xf32>
    %303 = vector.shape_cast %302 : vector<80x128xf32> to vector<10x8x128xf32>
    %c3_193 = arith.constant 3 : index
    %c0_194 = arith.constant 0 : index
    %c0_195 = arith.constant 0 : index
    %c0_196 = arith.constant 0 : index
    %304 = vector.load %arg12[%c3_193, %c0_194, %c0_195, %c0_196] : memref<10x10x8x128xf32, #tpu.memory_space<vmem>>, vector<1x10x8x128xf32>
    %305 = vector.shape_cast %304 : vector<1x10x8x128xf32> to vector<10x8x128xf32>
    %306 = vector.shape_cast %303 : vector<10x8x128xf32> to vector<1x10x8x128xf32>
    tpu.vector_store %arg12[%c3_193, %c0_194, %c0_195, %c0_196], %306 {strides = array<i32>} : memref<10x10x8x128xf32, #tpu.memory_space<vmem>>, vector<1x10x8x128xf32>,
    %c4_197 = arith.constant 4 : index
    %c0_198 = arith.constant 0 : index
    %c0_199 = arith.constant 0 : index
    %c0_200 = arith.constant 0 : index
    %307 = vector.load %arg12[%c4_197, %c0_198, %c0_199, %c0_200] : memref<10x10x8x128xf32, #tpu.memory_space<vmem>>, vector<1x10x8x128xf32>
    %308 = vector.shape_cast %307 : vector<1x10x8x128xf32> to vector<10x8x128xf32>
    %309 = vector.shape_cast %308 : vector<10x8x128xf32> to vector<80x128xf32>
    %310 = vector.broadcast %251 : vector<1x128xf32> to vector<80x128xf32>
    %311 = arith.mulf %309, %310 : vector<80x128xf32>
    %312 = vector.broadcast %254 : vector<1x128xf32> to vector<80x128xf32>
    %313 = arith.addf %311, %312 : vector<80x128xf32>
    %cst_201 = arith.constant 0.000000e+00 : f32
    %314 = vector.broadcast %cst_201 : f32 to vector<80x128xf32>
    %315 = arith.maximumf %313, %314 : vector<80x128xf32>
    %316 = vector.shape_cast %315 : vector<80x128xf32> to vector<10x8x128xf32>
    %c4_202 = arith.constant 4 : index
    %c0_203 = arith.constant 0 : index
    %c0_204 = arith.constant 0 : index
    %c0_205 = arith.constant 0 : index
    %317 = vector.load %arg12[%c4_202, %c0_203, %c0_204, %c0_205] : memref<10x10x8x128xf32, #tpu.memory_space<vmem>>, vector<1x10x8x128xf32>
    %318 = vector.shape_cast %317 : vector<1x10x8x128xf32> to vector<10x8x128xf32>
    %319 = vector.shape_cast %316 : vector<10x8x128xf32> to vector<1x10x8x128xf32>
    tpu.vector_store %arg12[%c4_202, %c0_203, %c0_204, %c0_205], %319 {strides = array<i32>} : memref<10x10x8x128xf32, #tpu.memory_space<vmem>>, vector<1x10x8x128xf32>,
    %c5_206 = arith.constant 5 : index
    %c0_207 = arith.constant 0 : index
    %c0_208 = arith.constant 0 : index
    %c0_209 = arith.constant 0 : index
    %320 = vector.load %arg12[%c5_206, %c0_207, %c0_208, %c0_209] : memref<10x10x8x128xf32, #tpu.memory_space<vmem>>, vector<1x10x8x128xf32>
    %321 = vector.shape_cast %320 : vector<1x10x8x128xf32> to vector<10x8x128xf32>
    %322 = vector.shape_cast %321 : vector<10x8x128xf32> to vector<80x128xf32>
    %323 = vector.broadcast %251 : vector<1x128xf32> to vector<80x128xf32>
    %324 = arith.mulf %322, %323 : vector<80x128xf32>
    %325 = vector.broadcast %254 : vector<1x128xf32> to vector<80x128xf32>
    %326 = arith.addf %324, %325 : vector<80x128xf32>
    %cst_210 = arith.constant 0.000000e+00 : f32
    %327 = vector.broadcast %cst_210 : f32 to vector<80x128xf32>
    %328 = arith.maximumf %326, %327 : vector<80x128xf32>
    %329 = vector.shape_cast %328 : vector<80x128xf32> to vector<10x8x128xf32>
    %c5_211 = arith.constant 5 : index
    %c0_212 = arith.constant 0 : index
    %c0_213 = arith.constant 0 : index
    %c0_214 = arith.constant 0 : index
    %330 = vector.load %arg12[%c5_211, %c0_212, %c0_213, %c0_214] : memref<10x10x8x128xf32, #tpu.memory_space<vmem>>, vector<1x10x8x128xf32>
    %331 = vector.shape_cast %330 : vector<1x10x8x128xf32> to vector<10x8x128xf32>
    %332 = vector.shape_cast %329 : vector<10x8x128xf32> to vector<1x10x8x128xf32>
    tpu.vector_store %arg12[%c5_211, %c0_212, %c0_213, %c0_214], %332 {strides = array<i32>} : memref<10x10x8x128xf32, #tpu.memory_space<vmem>>, vector<1x10x8x128xf32>,
    %c6_215 = arith.constant 6 : index
    %c0_216 = arith.constant 0 : index
    %c0_217 = arith.constant 0 : index
    %c0_218 = arith.constant 0 : index
    %333 = vector.load %arg12[%c6_215, %c0_216, %c0_217, %c0_218] : memref<10x10x8x128xf32, #tpu.memory_space<vmem>>, vector<1x10x8x128xf32>
    %334 = vector.shape_cast %333 : vector<1x10x8x128xf32> to vector<10x8x128xf32>
    %335 = vector.shape_cast %334 : vector<10x8x128xf32> to vector<80x128xf32>
    %336 = vector.broadcast %251 : vector<1x128xf32> to vector<80x128xf32>
    %337 = arith.mulf %335, %336 : vector<80x128xf32>
    %338 = vector.broadcast %254 : vector<1x128xf32> to vector<80x128xf32>
    %339 = arith.addf %337, %338 : vector<80x128xf32>
    %cst_219 = arith.constant 0.000000e+00 : f32
    %340 = vector.broadcast %cst_219 : f32 to vector<80x128xf32>
    %341 = arith.maximumf %339, %340 : vector<80x128xf32>
    %342 = vector.shape_cast %341 : vector<80x128xf32> to vector<10x8x128xf32>
    %c6_220 = arith.constant 6 : index
    %c0_221 = arith.constant 0 : index
    %c0_222 = arith.constant 0 : index
    %c0_223 = arith.constant 0 : index
    %343 = vector.load %arg12[%c6_220, %c0_221, %c0_222, %c0_223] : memref<10x10x8x128xf32, #tpu.memory_space<vmem>>, vector<1x10x8x128xf32>
    %344 = vector.shape_cast %343 : vector<1x10x8x128xf32> to vector<10x8x128xf32>
    %345 = vector.shape_cast %342 : vector<10x8x128xf32> to vector<1x10x8x128xf32>
    tpu.vector_store %arg12[%c6_220, %c0_221, %c0_222, %c0_223], %345 {strides = array<i32>} : memref<10x10x8x128xf32, #tpu.memory_space<vmem>>, vector<1x10x8x128xf32>,
    %c7_224 = arith.constant 7 : index
    %c0_225 = arith.constant 0 : index
    %c0_226 = arith.constant 0 : index
    %c0_227 = arith.constant 0 : index
    %346 = vector.load %arg12[%c7_224, %c0_225, %c0_226, %c0_227] : memref<10x10x8x128xf32, #tpu.memory_space<vmem>>, vector<1x10x8x128xf32>
    %347 = vector.shape_cast %346 : vector<1x10x8x128xf32> to vector<10x8x128xf32>
    %348 = vector.shape_cast %347 : vector<10x8x128xf32> to vector<80x128xf32>
    %349 = vector.broadcast %251 : vector<1x128xf32> to vector<80x128xf32>
    %350 = arith.mulf %348, %349 : vector<80x128xf32>
    %351 = vector.broadcast %254 : vector<1x128xf32> to vector<80x128xf32>
    %352 = arith.addf %350, %351 : vector<80x128xf32>
    %cst_228 = arith.constant 0.000000e+00 : f32
    %353 = vector.broadcast %cst_228 : f32 to vector<80x128xf32>
    %354 = arith.maximumf %352, %353 : vector<80x128xf32>
    %355 = vector.shape_cast %354 : vector<80x128xf32> to vector<10x8x128xf32>
    %c7_229 = arith.constant 7 : index
    %c0_230 = arith.constant 0 : index
    %c0_231 = arith.constant 0 : index
    %c0_232 = arith.constant 0 : index
    %356 = vector.load %arg12[%c7_229, %c0_230, %c0_231, %c0_232] : memref<10x10x8x128xf32, #tpu.memory_space<vmem>>, vector<1x10x8x128xf32>
    %357 = vector.shape_cast %356 : vector<1x10x8x128xf32> to vector<10x8x128xf32>
    %358 = vector.shape_cast %355 : vector<10x8x128xf32> to vector<1x10x8x128xf32>
    tpu.vector_store %arg12[%c7_229, %c0_230, %c0_231, %c0_232], %358 {strides = array<i32>} : memref<10x10x8x128xf32, #tpu.memory_space<vmem>>, vector<1x10x8x128xf32>,
    %c8_233 = arith.constant 8 : index
    %c0_234 = arith.constant 0 : index
    %c0_235 = arith.constant 0 : index
    %c0_236 = arith.constant 0 : index
    %359 = vector.load %arg12[%c8_233, %c0_234, %c0_235, %c0_236] : memref<10x10x8x128xf32, #tpu.memory_space<vmem>>, vector<1x10x8x128xf32>
    %360 = vector.shape_cast %359 : vector<1x10x8x128xf32> to vector<10x8x128xf32>
    %361 = vector.shape_cast %360 : vector<10x8x128xf32> to vector<80x128xf32>
    %362 = vector.broadcast %251 : vector<1x128xf32> to vector<80x128xf32>
    %363 = arith.mulf %361, %362 : vector<80x128xf32>
    %364 = vector.broadcast %254 : vector<1x128xf32> to vector<80x128xf32>
    %365 = arith.addf %363, %364 : vector<80x128xf32>
    %cst_237 = arith.constant 0.000000e+00 : f32
    %366 = vector.broadcast %cst_237 : f32 to vector<80x128xf32>
    %367 = arith.maximumf %365, %366 : vector<80x128xf32>
    %368 = vector.shape_cast %367 : vector<80x128xf32> to vector<10x8x128xf32>
    %c8_238 = arith.constant 8 : index
    %c0_239 = arith.constant 0 : index
    %c0_240 = arith.constant 0 : index
    %c0_241 = arith.constant 0 : index
    %369 = vector.load %arg12[%c8_238, %c0_239, %c0_240, %c0_241] : memref<10x10x8x128xf32, #tpu.memory_space<vmem>>, vector<1x10x8x128xf32>
    %370 = vector.shape_cast %369 : vector<1x10x8x128xf32> to vector<10x8x128xf32>
    %371 = vector.shape_cast %368 : vector<10x8x128xf32> to vector<1x10x8x128xf32>
    tpu.vector_store %arg12[%c8_238, %c0_239, %c0_240, %c0_241], %371 {strides = array<i32>} : memref<10x10x8x128xf32, #tpu.memory_space<vmem>>, vector<1x10x8x128xf32>,
    %c9_242 = arith.constant 9 : index
    %c0_243 = arith.constant 0 : index
    %c0_244 = arith.constant 0 : index
    %c0_245 = arith.constant 0 : index
    %372 = vector.load %arg12[%c9_242, %c0_243, %c0_244, %c0_245] : memref<10x10x8x128xf32, #tpu.memory_space<vmem>>, vector<1x10x8x128xf32>
    %373 = vector.shape_cast %372 : vector<1x10x8x128xf32> to vector<10x8x128xf32>
    %374 = vector.shape_cast %373 : vector<10x8x128xf32> to vector<80x128xf32>
    %375 = vector.broadcast %251 : vector<1x128xf32> to vector<80x128xf32>
    %376 = arith.mulf %374, %375 : vector<80x128xf32>
    %377 = vector.broadcast %254 : vector<1x128xf32> to vector<80x128xf32>
    %378 = arith.addf %376, %377 : vector<80x128xf32>
    %cst_246 = arith.constant 0.000000e+00 : f32
    %379 = vector.broadcast %cst_246 : f32 to vector<80x128xf32>
    %380 = arith.maximumf %378, %379 : vector<80x128xf32>
    %381 = vector.shape_cast %380 : vector<80x128xf32> to vector<10x8x128xf32>
    %c9_247 = arith.constant 9 : index
    %c0_248 = arith.constant 0 : index
    %c0_249 = arith.constant 0 : index
    %c0_250 = arith.constant 0 : index
    %382 = vector.load %arg12[%c9_247, %c0_248, %c0_249, %c0_250] : memref<10x10x8x128xf32, #tpu.memory_space<vmem>>, vector<1x10x8x128xf32>
    %383 = vector.shape_cast %382 : vector<1x10x8x128xf32> to vector<10x8x128xf32>
    %384 = vector.shape_cast %381 : vector<10x8x128xf32> to vector<1x10x8x128xf32>
    tpu.vector_store %arg12[%c9_247, %c0_248, %c0_249, %c0_250], %384 {strides = array<i32>} : memref<10x10x8x128xf32, #tpu.memory_space<vmem>>, vector<1x10x8x128xf32>,
    %cst_251 = arith.constant 0.000000e+00 : f32
    %385 = vector.broadcast %cst_251 : f32 to vector<72x128xf32>
    %c0_252 = arith.constant 0 : index
    %c0_253 = arith.constant 0 : index
    %386 = vector.load %arg13[%c0_252, %c0_253] : memref<72x128xf32, #tpu.memory_space<vmem>>, vector<72x128xf32>
    tpu.vector_store %arg13[%c0_252, %c0_253], %385 {strides = array<i32>} : memref<72x128xf32, #tpu.memory_space<vmem>>, vector<72x128xf32>,
    %c0_254 = arith.constant 0 : index
    %c0_255 = arith.constant 0 : index
    %c0_256 = arith.constant 0 : index
    %c0_257 = arith.constant 0 : index
    %387 = vector.load %arg12[%c0_254, %c0_255, %c0_256, %c0_257] : memref<10x10x8x128xf32, #tpu.memory_space<vmem>>, vector<3x3x8x128xf32>
    %388 = vector.shape_cast %387 : vector<3x3x8x128xf32> to vector<72x128xf32>
    %389 = arith.truncf %388 : vector<72x128xf32> to vector<72x128xbf16>
    %c0_258 = arith.constant 0 : index
    %c5_259 = arith.constant 5 : index
    %c0_260 = arith.constant 0 : index
    %c0_261 = arith.constant 0 : index
    %390 = vector.load %arg12[%c0_258, %c5_259, %c0_260, %c0_261] : memref<10x10x8x128xf32, #tpu.memory_space<vmem>>, vector<3x3x8x128xf32>
    %391 = vector.shape_cast %390 : vector<3x3x8x128xf32> to vector<72x128xf32>
    %392 = arith.truncf %391 : vector<72x128xf32> to vector<72x128xbf16>
    %393 = tpu.concatenate %389, %392 in 1 : vector<72x128xbf16>, vector<72x128xbf16> -> vector<72x256xbf16>
    %c0_262 = arith.constant 0 : index
    %c0_263 = arith.constant 0 : index
    %394 = vector.load %arg13[%c0_262, %c0_263] : memref<72x128xf32, #tpu.memory_space<vmem>>, vector<72x128xf32>
    %c0_264 = arith.constant 0 : index
    %c0_265 = arith.constant 0 : index
    %c0_266 = arith.constant 0 : index
    %395 = vector.load %arg5[%c0_264, %c0_265, %c0_266] : memref<13x256x128xbf16, #tpu.memory_space<vmem>>, vector<1x256x128xbf16>
    %396 = vector.shape_cast %395 : vector<1x256x128xbf16> to vector<256x128xbf16>
    %cst_267 = arith.constant dense<0.000000e+00> : vector<72x128xf32>
    %397 = tpu.matmul %393, %396, %cst_267 {dimension_numbers = #tpu.dot_dimension_numbers<[1], [0], [0], [1], [0, 0, 1, 1], [], []>} : vector<72x256xbf16>, vector<256x128xbf16>, vector<72x128xf32> -> vector<72x128xf32>
    %398 = arith.addf %394, %397 : vector<72x128xf32>
    %c0_268 = arith.constant 0 : index
    %c0_269 = arith.constant 0 : index
    %399 = vector.load %arg13[%c0_268, %c0_269] : memref<72x128xf32, #tpu.memory_space<vmem>>, vector<72x128xf32>
    tpu.vector_store %arg13[%c0_268, %c0_269], %398 {strides = array<i32>} : memref<72x128xf32, #tpu.memory_space<vmem>>, vector<72x128xf32>,
    %c0_270 = arith.constant 0 : index
    %c1_271 = arith.constant 1 : index
    %c0_272 = arith.constant 0 : index
    %c0_273 = arith.constant 0 : index
    %400 = vector.load %arg12[%c0_270, %c1_271, %c0_272, %c0_273] : memref<10x10x8x128xf32, #tpu.memory_space<vmem>>, vector<3x3x8x128xf32>
    %401 = vector.shape_cast %400 : vector<3x3x8x128xf32> to vector<72x128xf32>
    %402 = arith.truncf %401 : vector<72x128xf32> to vector<72x128xbf16>
    %c0_274 = arith.constant 0 : index
    %c6_275 = arith.constant 6 : index
    %c0_276 = arith.constant 0 : index
    %c0_277 = arith.constant 0 : index
    %403 = vector.load %arg12[%c0_274, %c6_275, %c0_276, %c0_277] : memref<10x10x8x128xf32, #tpu.memory_space<vmem>>, vector<3x3x8x128xf32>
    %404 = vector.shape_cast %403 : vector<3x3x8x128xf32> to vector<72x128xf32>
    %405 = arith.truncf %404 : vector<72x128xf32> to vector<72x128xbf16>
    %406 = tpu.concatenate %402, %405 in 1 : vector<72x128xbf16>, vector<72x128xbf16> -> vector<72x256xbf16>
    %c0_278 = arith.constant 0 : index
    %c0_279 = arith.constant 0 : index
    %407 = vector.load %arg13[%c0_278, %c0_279] : memref<72x128xf32, #tpu.memory_space<vmem>>, vector<72x128xf32>
    %c1_280 = arith.constant 1 : index
    %c0_281 = arith.constant 0 : index
    %c0_282 = arith.constant 0 : index
    %408 = vector.load %arg5[%c1_280, %c0_281, %c0_282] : memref<13x256x128xbf16, #tpu.memory_space<vmem>>, vector<1x256x128xbf16>
    %409 = vector.shape_cast %408 : vector<1x256x128xbf16> to vector<256x128xbf16>
    %cst_283 = arith.constant dense<0.000000e+00> : vector<72x128xf32>
    %410 = tpu.matmul %406, %409, %cst_283 {dimension_numbers = #tpu.dot_dimension_numbers<[1], [0], [0], [1], [0, 0, 1, 1], [], []>} : vector<72x256xbf16>, vector<256x128xbf16>, vector<72x128xf32> -> vector<72x128xf32>
    %411 = arith.addf %407, %410 : vector<72x128xf32>
    %c0_284 = arith.constant 0 : index
    %c0_285 = arith.constant 0 : index
    %412 = vector.load %arg13[%c0_284, %c0_285] : memref<72x128xf32, #tpu.memory_space<vmem>>, vector<72x128xf32>
    tpu.vector_store %arg13[%c0_284, %c0_285], %411 {strides = array<i32>} : memref<72x128xf32, #tpu.memory_space<vmem>>, vector<72x128xf32>,
    %c0_286 = arith.constant 0 : index
    %c2_287 = arith.constant 2 : index
    %c0_288 = arith.constant 0 : index
    %c0_289 = arith.constant 0 : index
    %413 = vector.load %arg12[%c0_286, %c2_287, %c0_288, %c0_289] : memref<10x10x8x128xf32, #tpu.memory_space<vmem>>, vector<3x3x8x128xf32>
    %414 = vector.shape_cast %413 : vector<3x3x8x128xf32> to vector<72x128xf32>
    %415 = arith.truncf %414 : vector<72x128xf32> to vector<72x128xbf16>
    %c5_290 = arith.constant 5 : index
    %c0_291 = arith.constant 0 : index
    %c0_292 = arith.constant 0 : index
    %c0_293 = arith.constant 0 : index
    %416 = vector.load %arg12[%c5_290, %c0_291, %c0_292, %c0_293] : memref<10x10x8x128xf32, #tpu.memory_space<vmem>>, vector<3x3x8x128xf32>
    %417 = vector.shape_cast %416 : vector<3x3x8x128xf32> to vector<72x128xf32>
    %418 = arith.truncf %417 : vector<72x128xf32> to vector<72x128xbf16>
    %419 = tpu.concatenate %415, %418 in 1 : vector<72x128xbf16>, vector<72x128xbf16> -> vector<72x256xbf16>
    %c0_294 = arith.constant 0 : index
    %c0_295 = arith.constant 0 : index
    %420 = vector.load %arg13[%c0_294, %c0_295] : memref<72x128xf32, #tpu.memory_space<vmem>>, vector<72x128xf32>
    %c2_296 = arith.constant 2 : index
    %c0_297 = arith.constant 0 : index
    %c0_298 = arith.constant 0 : index
    %421 = vector.load %arg5[%c2_296, %c0_297, %c0_298] : memref<13x256x128xbf16, #tpu.memory_space<vmem>>, vector<1x256x128xbf16>
    %422 = vector.shape_cast %421 : vector<1x256x128xbf16> to vector<256x128xbf16>
    %cst_299 = arith.constant dense<0.000000e+00> : vector<72x128xf32>
    %423 = tpu.matmul %419, %422, %cst_299 {dimension_numbers = #tpu.dot_dimension_numbers<[1], [0], [0], [1], [0, 0, 1, 1], [], []>} : vector<72x256xbf16>, vector<256x128xbf16>, vector<72x128xf32> -> vector<72x128xf32>
    %424 = arith.addf %420, %423 : vector<72x128xf32>
    %c0_300 = arith.constant 0 : index
    %c0_301 = arith.constant 0 : index
    %425 = vector.load %arg13[%c0_300, %c0_301] : memref<72x128xf32, #tpu.memory_space<vmem>>, vector<72x128xf32>
    tpu.vector_store %arg13[%c0_300, %c0_301], %424 {strides = array<i32>} : memref<72x128xf32, #tpu.memory_space<vmem>>, vector<72x128xf32>,
    %c5_302 = arith.constant 5 : index
    %c5_303 = arith.constant 5 : index
    %c0_304 = arith.constant 0 : index
    %c0_305 = arith.constant 0 : index
    %426 = vector.load %arg12[%c5_302, %c5_303, %c0_304, %c0_305] : memref<10x10x8x128xf32, #tpu.memory_space<vmem>>, vector<3x3x8x128xf32>
    %427 = vector.shape_cast %426 : vector<3x3x8x128xf32> to vector<72x128xf32>
    %428 = arith.truncf %427 : vector<72x128xf32> to vector<72x128xbf16>
    %c5_306 = arith.constant 5 : index
    %c1_307 = arith.constant 1 : index
    %c0_308 = arith.constant 0 : index
    %c0_309 = arith.constant 0 : index
    %429 = vector.load %arg12[%c5_306, %c1_307, %c0_308, %c0_309] : memref<10x10x8x128xf32, #tpu.memory_space<vmem>>, vector<3x3x8x128xf32>
    %430 = vector.shape_cast %429 : vector<3x3x8x128xf32> to vector<72x128xf32>
    %431 = arith.truncf %430 : vector<72x128xf32> to vector<72x128xbf16>
    %432 = tpu.concatenate %428, %431 in 1 : vector<72x128xbf16>, vector<72x128xbf16> -> vector<72x256xbf16>
    %c0_310 = arith.constant 0 : index
    %c0_311 = arith.constant 0 : index
    %433 = vector.load %arg13[%c0_310, %c0_311] : memref<72x128xf32, #tpu.memory_space<vmem>>, vector<72x128xf32>
    %c3_312 = arith.constant 3 : index
    %c0_313 = arith.constant 0 : index
    %c0_314 = arith.constant 0 : index
    %434 = vector.load %arg5[%c3_312, %c0_313, %c0_314] : memref<13x256x128xbf16, #tpu.memory_space<vmem>>, vector<1x256x128xbf16>
    %435 = vector.shape_cast %434 : vector<1x256x128xbf16> to vector<256x128xbf16>
    %cst_315 = arith.constant dense<0.000000e+00> : vector<72x128xf32>
    %436 = tpu.matmul %432, %435, %cst_315 {dimension_numbers = #tpu.dot_dimension_numbers<[1], [0], [0], [1], [0, 0, 1, 1], [], []>} : vector<72x256xbf16>, vector<256x128xbf16>, vector<72x128xf32> -> vector<72x128xf32>
    %437 = arith.addf %433, %436 : vector<72x128xf32>
    %c0_316 = arith.constant 0 : index
    %c0_317 = arith.constant 0 : index
    %438 = vector.load %arg13[%c0_316, %c0_317] : memref<72x128xf32, #tpu.memory_space<vmem>>, vector<72x128xf32>
    tpu.vector_store %arg13[%c0_316, %c0_317], %437 {strides = array<i32>} : memref<72x128xf32, #tpu.memory_space<vmem>>, vector<72x128xf32>,
    %c5_318 = arith.constant 5 : index
    %c6_319 = arith.constant 6 : index
    %c0_320 = arith.constant 0 : index
    %c0_321 = arith.constant 0 : index
    %439 = vector.load %arg12[%c5_318, %c6_319, %c0_320, %c0_321] : memref<10x10x8x128xf32, #tpu.memory_space<vmem>>, vector<3x3x8x128xf32>
    %440 = vector.shape_cast %439 : vector<3x3x8x128xf32> to vector<72x128xf32>
    %441 = arith.truncf %440 : vector<72x128xf32> to vector<72x128xbf16>
    %c5_322 = arith.constant 5 : index
    %c2_323 = arith.constant 2 : index
    %c0_324 = arith.constant 0 : index
    %c0_325 = arith.constant 0 : index
    %442 = vector.load %arg12[%c5_322, %c2_323, %c0_324, %c0_325] : memref<10x10x8x128xf32, #tpu.memory_space<vmem>>, vector<3x3x8x128xf32>
    %443 = vector.shape_cast %442 : vector<3x3x8x128xf32> to vector<72x128xf32>
    %444 = arith.truncf %443 : vector<72x128xf32> to vector<72x128xbf16>
    %445 = tpu.concatenate %441, %444 in 1 : vector<72x128xbf16>, vector<72x128xbf16> -> vector<72x256xbf16>
    %c0_326 = arith.constant 0 : index
    %c0_327 = arith.constant 0 : index
    %446 = vector.load %arg13[%c0_326, %c0_327] : memref<72x128xf32, #tpu.memory_space<vmem>>, vector<72x128xf32>
    %c4_328 = arith.constant 4 : index
    %c0_329 = arith.constant 0 : index
    %c0_330 = arith.constant 0 : index
    %447 = vector.load %arg5[%c4_328, %c0_329, %c0_330] : memref<13x256x128xbf16, #tpu.memory_space<vmem>>, vector<1x256x128xbf16>
    %448 = vector.shape_cast %447 : vector<1x256x128xbf16> to vector<256x128xbf16>
    %cst_331 = arith.constant dense<0.000000e+00> : vector<72x128xf32>
    %449 = tpu.matmul %445, %448, %cst_331 {dimension_numbers = #tpu.dot_dimension_numbers<[1], [0], [0], [1], [0, 0, 1, 1], [], []>} : vector<72x256xbf16>, vector<256x128xbf16>, vector<72x128xf32> -> vector<72x128xf32>
    %450 = arith.addf %446, %449 : vector<72x128xf32>
    %c0_332 = arith.constant 0 : index
    %c0_333 = arith.constant 0 : index
    %451 = vector.load %arg13[%c0_332, %c0_333] : memref<72x128xf32, #tpu.memory_space<vmem>>, vector<72x128xf32>
    tpu.vector_store %arg13[%c0_332, %c0_333], %450 {strides = array<i32>} : memref<72x128xf32, #tpu.memory_space<vmem>>, vector<72x128xf32>,
    %c1_334 = arith.constant 1 : index
    %c0_335 = arith.constant 0 : index
    %c0_336 = arith.constant 0 : index
    %c0_337 = arith.constant 0 : index
    %452 = vector.load %arg12[%c1_334, %c0_335, %c0_336, %c0_337] : memref<10x10x8x128xf32, #tpu.memory_space<vmem>>, vector<3x3x8x128xf32>
    %453 = vector.shape_cast %452 : vector<3x3x8x128xf32> to vector<72x128xf32>
    %454 = arith.truncf %453 : vector<72x128xf32> to vector<72x128xbf16>
    %c1_338 = arith.constant 1 : index
    %c5_339 = arith.constant 5 : index
    %c0_340 = arith.constant 0 : index
    %c0_341 = arith.constant 0 : index
    %455 = vector.load %arg12[%c1_338, %c5_339, %c0_340, %c0_341] : memref<10x10x8x128xf32, #tpu.memory_space<vmem>>, vector<3x3x8x128xf32>
    %456 = vector.shape_cast %455 : vector<3x3x8x128xf32> to vector<72x128xf32>
    %457 = arith.truncf %456 : vector<72x128xf32> to vector<72x128xbf16>
    %458 = tpu.concatenate %454, %457 in 1 : vector<72x128xbf16>, vector<72x128xbf16> -> vector<72x256xbf16>
    %c0_342 = arith.constant 0 : index
    %c0_343 = arith.constant 0 : index
    %459 = vector.load %arg13[%c0_342, %c0_343] : memref<72x128xf32, #tpu.memory_space<vmem>>, vector<72x128xf32>
    %c5_344 = arith.constant 5 : index
    %c0_345 = arith.constant 0 : index
    %c0_346 = arith.constant 0 : index
    %460 = vector.load %arg5[%c5_344, %c0_345, %c0_346] : memref<13x256x128xbf16, #tpu.memory_space<vmem>>, vector<1x256x128xbf16>
    %461 = vector.shape_cast %460 : vector<1x256x128xbf16> to vector<256x128xbf16>
    %cst_347 = arith.constant dense<0.000000e+00> : vector<72x128xf32>
    %462 = tpu.matmul %458, %461, %cst_347 {dimension_numbers = #tpu.dot_dimension_numbers<[1], [0], [0], [1], [0, 0, 1, 1], [], []>} : vector<72x256xbf16>, vector<256x128xbf16>, vector<72x128xf32> -> vector<72x128xf32>
    %463 = arith.addf %459, %462 : vector<72x128xf32>
    %c0_348 = arith.constant 0 : index
    %c0_349 = arith.constant 0 : index
    %464 = vector.load %arg13[%c0_348, %c0_349] : memref<72x128xf32, #tpu.memory_space<vmem>>, vector<72x128xf32>
    tpu.vector_store %arg13[%c0_348, %c0_349], %463 {strides = array<i32>} : memref<72x128xf32, #tpu.memory_space<vmem>>, vector<72x128xf32>,
    %c1_350 = arith.constant 1 : index
    %c1_351 = arith.constant 1 : index
    %c0_352 = arith.constant 0 : index
    %c0_353 = arith.constant 0 : index
    %465 = vector.load %arg12[%c1_350, %c1_351, %c0_352, %c0_353] : memref<10x10x8x128xf32, #tpu.memory_space<vmem>>, vector<3x3x8x128xf32>
    %466 = vector.shape_cast %465 : vector<3x3x8x128xf32> to vector<72x128xf32>
    %467 = arith.truncf %466 : vector<72x128xf32> to vector<72x128xbf16>
    %c1_354 = arith.constant 1 : index
    %c6_355 = arith.constant 6 : index
    %c0_356 = arith.constant 0 : index
    %c0_357 = arith.constant 0 : index
    %468 = vector.load %arg12[%c1_354, %c6_355, %c0_356, %c0_357] : memref<10x10x8x128xf32, #tpu.memory_space<vmem>>, vector<3x3x8x128xf32>
    %469 = vector.shape_cast %468 : vector<3x3x8x128xf32> to vector<72x128xf32>
    %470 = arith.truncf %469 : vector<72x128xf32> to vector<72x128xbf16>
    %471 = tpu.concatenate %467, %470 in 1 : vector<72x128xbf16>, vector<72x128xbf16> -> vector<72x256xbf16>
    %c0_358 = arith.constant 0 : index
    %c0_359 = arith.constant 0 : index
    %472 = vector.load %arg13[%c0_358, %c0_359] : memref<72x128xf32, #tpu.memory_space<vmem>>, vector<72x128xf32>
    %c6_360 = arith.constant 6 : index
    %c0_361 = arith.constant 0 : index
    %c0_362 = arith.constant 0 : index
    %473 = vector.load %arg5[%c6_360, %c0_361, %c0_362] : memref<13x256x128xbf16, #tpu.memory_space<vmem>>, vector<1x256x128xbf16>
    %474 = vector.shape_cast %473 : vector<1x256x128xbf16> to vector<256x128xbf16>
    %cst_363 = arith.constant dense<0.000000e+00> : vector<72x128xf32>
    %475 = tpu.matmul %471, %474, %cst_363 {dimension_numbers = #tpu.dot_dimension_numbers<[1], [0], [0], [1], [0, 0, 1, 1], [], []>} : vector<72x256xbf16>, vector<256x128xbf16>, vector<72x128xf32> -> vector<72x128xf32>
    %476 = arith.addf %472, %475 : vector<72x128xf32>
    %c0_364 = arith.constant 0 : index
    %c0_365 = arith.constant 0 : index
    %477 = vector.load %arg13[%c0_364, %c0_365] : memref<72x128xf32, #tpu.memory_space<vmem>>, vector<72x128xf32>
    tpu.vector_store %arg13[%c0_364, %c0_365], %476 {strides = array<i32>} : memref<72x128xf32, #tpu.memory_space<vmem>>, vector<72x128xf32>,
    %c1_366 = arith.constant 1 : index
    %c2_367 = arith.constant 2 : index
    %c0_368 = arith.constant 0 : index
    %c0_369 = arith.constant 0 : index
    %478 = vector.load %arg12[%c1_366, %c2_367, %c0_368, %c0_369] : memref<10x10x8x128xf32, #tpu.memory_space<vmem>>, vector<3x3x8x128xf32>
    %479 = vector.shape_cast %478 : vector<3x3x8x128xf32> to vector<72x128xf32>
    %480 = arith.truncf %479 : vector<72x128xf32> to vector<72x128xbf16>
    %c6_370 = arith.constant 6 : index
    %c0_371 = arith.constant 0 : index
    %c0_372 = arith.constant 0 : index
    %c0_373 = arith.constant 0 : index
    %481 = vector.load %arg12[%c6_370, %c0_371, %c0_372, %c0_373] : memref<10x10x8x128xf32, #tpu.memory_space<vmem>>, vector<3x3x8x128xf32>
    %482 = vector.shape_cast %481 : vector<3x3x8x128xf32> to vector<72x128xf32>
    %483 = arith.truncf %482 : vector<72x128xf32> to vector<72x128xbf16>
    %484 = tpu.concatenate %480, %483 in 1 : vector<72x128xbf16>, vector<72x128xbf16> -> vector<72x256xbf16>
    %c0_374 = arith.constant 0 : index
    %c0_375 = arith.constant 0 : index
    %485 = vector.load %arg13[%c0_374, %c0_375] : memref<72x128xf32, #tpu.memory_space<vmem>>, vector<72x128xf32>
    %c7_376 = arith.constant 7 : index
    %c0_377 = arith.constant 0 : index
    %c0_378 = arith.constant 0 : index
    %486 = vector.load %arg5[%c7_376, %c0_377, %c0_378] : memref<13x256x128xbf16, #tpu.memory_space<vmem>>, vector<1x256x128xbf16>
    %487 = vector.shape_cast %486 : vector<1x256x128xbf16> to vector<256x128xbf16>
    %cst_379 = arith.constant dense<0.000000e+00> : vector<72x128xf32>
    %488 = tpu.matmul %484, %487, %cst_379 {dimension_numbers = #tpu.dot_dimension_numbers<[1], [0], [0], [1], [0, 0, 1, 1], [], []>} : vector<72x256xbf16>, vector<256x128xbf16>, vector<72x128xf32> -> vector<72x128xf32>
    %489 = arith.addf %485, %488 : vector<72x128xf32>
    %c0_380 = arith.constant 0 : index
    %c0_381 = arith.constant 0 : index
    %490 = vector.load %arg13[%c0_380, %c0_381] : memref<72x128xf32, #tpu.memory_space<vmem>>, vector<72x128xf32>
    tpu.vector_store %arg13[%c0_380, %c0_381], %489 {strides = array<i32>} : memref<72x128xf32, #tpu.memory_space<vmem>>, vector<72x128xf32>,
    %c6_382 = arith.constant 6 : index
    %c5_383 = arith.constant 5 : index
    %c0_384 = arith.constant 0 : index
    %c0_385 = arith.constant 0 : index
    %491 = vector.load %arg12[%c6_382, %c5_383, %c0_384, %c0_385] : memref<10x10x8x128xf32, #tpu.memory_space<vmem>>, vector<3x3x8x128xf32>
    %492 = vector.shape_cast %491 : vector<3x3x8x128xf32> to vector<72x128xf32>
    %493 = arith.truncf %492 : vector<72x128xf32> to vector<72x128xbf16>
    %c6_386 = arith.constant 6 : index
    %c1_387 = arith.constant 1 : index
    %c0_388 = arith.constant 0 : index
    %c0_389 = arith.constant 0 : index
    %494 = vector.load %arg12[%c6_386, %c1_387, %c0_388, %c0_389] : memref<10x10x8x128xf32, #tpu.memory_space<vmem>>, vector<3x3x8x128xf32>
    %495 = vector.shape_cast %494 : vector<3x3x8x128xf32> to vector<72x128xf32>
    %496 = arith.truncf %495 : vector<72x128xf32> to vector<72x128xbf16>
    %497 = tpu.concatenate %493, %496 in 1 : vector<72x128xbf16>, vector<72x128xbf16> -> vector<72x256xbf16>
    %c0_390 = arith.constant 0 : index
    %c0_391 = arith.constant 0 : index
    %498 = vector.load %arg13[%c0_390, %c0_391] : memref<72x128xf32, #tpu.memory_space<vmem>>, vector<72x128xf32>
    %c8_392 = arith.constant 8 : index
    %c0_393 = arith.constant 0 : index
    %c0_394 = arith.constant 0 : index
    %499 = vector.load %arg5[%c8_392, %c0_393, %c0_394] : memref<13x256x128xbf16, #tpu.memory_space<vmem>>, vector<1x256x128xbf16>
    %500 = vector.shape_cast %499 : vector<1x256x128xbf16> to vector<256x128xbf16>
    %cst_395 = arith.constant dense<0.000000e+00> : vector<72x128xf32>
    %501 = tpu.matmul %497, %500, %cst_395 {dimension_numbers = #tpu.dot_dimension_numbers<[1], [0], [0], [1], [0, 0, 1, 1], [], []>} : vector<72x256xbf16>, vector<256x128xbf16>, vector<72x128xf32> -> vector<72x128xf32>
    %502 = arith.addf %498, %501 : vector<72x128xf32>
    %c0_396 = arith.constant 0 : index
    %c0_397 = arith.constant 0 : index
    %503 = vector.load %arg13[%c0_396, %c0_397] : memref<72x128xf32, #tpu.memory_space<vmem>>, vector<72x128xf32>
    tpu.vector_store %arg13[%c0_396, %c0_397], %502 {strides = array<i32>} : memref<72x128xf32, #tpu.memory_space<vmem>>, vector<72x128xf32>,
    %c6_398 = arith.constant 6 : index
    %c6_399 = arith.constant 6 : index
    %c0_400 = arith.constant 0 : index
    %c0_401 = arith.constant 0 : index
    %504 = vector.load %arg12[%c6_398, %c6_399, %c0_400, %c0_401] : memref<10x10x8x128xf32, #tpu.memory_space<vmem>>, vector<3x3x8x128xf32>
    %505 = vector.shape_cast %504 : vector<3x3x8x128xf32> to vector<72x128xf32>
    %506 = arith.truncf %505 : vector<72x128xf32> to vector<72x128xbf16>
    %c6_402 = arith.constant 6 : index
    %c2_403 = arith.constant 2 : index
    %c0_404 = arith.constant 0 : index
    %c0_405 = arith.constant 0 : index
    %507 = vector.load %arg12[%c6_402, %c2_403, %c0_404, %c0_405] : memref<10x10x8x128xf32, #tpu.memory_space<vmem>>, vector<3x3x8x128xf32>
    %508 = vector.shape_cast %507 : vector<3x3x8x128xf32> to vector<72x128xf32>
    %509 = arith.truncf %508 : vector<72x128xf32> to vector<72x128xbf16>
    %510 = tpu.concatenate %506, %509 in 1 : vector<72x128xbf16>, vector<72x128xbf16> -> vector<72x256xbf16>
    %c0_406 = arith.constant 0 : index
    %c0_407 = arith.constant 0 : index
    %511 = vector.load %arg13[%c0_406, %c0_407] : memref<72x128xf32, #tpu.memory_space<vmem>>, vector<72x128xf32>
    %c9_408 = arith.constant 9 : index
    %c0_409 = arith.constant 0 : index
    %c0_410 = arith.constant 0 : index
    %512 = vector.load %arg5[%c9_408, %c0_409, %c0_410] : memref<13x256x128xbf16, #tpu.memory_space<vmem>>, vector<1x256x128xbf16>
    %513 = vector.shape_cast %512 : vector<1x256x128xbf16> to vector<256x128xbf16>
    %cst_411 = arith.constant dense<0.000000e+00> : vector<72x128xf32>
    %514 = tpu.matmul %510, %513, %cst_411 {dimension_numbers = #tpu.dot_dimension_numbers<[1], [0], [0], [1], [0, 0, 1, 1], [], []>} : vector<72x256xbf16>, vector<256x128xbf16>, vector<72x128xf32> -> vector<72x128xf32>
    %515 = arith.addf %511, %514 : vector<72x128xf32>
    %c0_412 = arith.constant 0 : index
    %c0_413 = arith.constant 0 : index
    %516 = vector.load %arg13[%c0_412, %c0_413] : memref<72x128xf32, #tpu.memory_space<vmem>>, vector<72x128xf32>
    tpu.vector_store %arg13[%c0_412, %c0_413], %515 {strides = array<i32>} : memref<72x128xf32, #tpu.memory_space<vmem>>, vector<72x128xf32>,
    %c2_414 = arith.constant 2 : index
    %c0_415 = arith.constant 0 : index
    %c0_416 = arith.constant 0 : index
    %c0_417 = arith.constant 0 : index
    %517 = vector.load %arg12[%c2_414, %c0_415, %c0_416, %c0_417] : memref<10x10x8x128xf32, #tpu.memory_space<vmem>>, vector<3x3x8x128xf32>
    %518 = vector.shape_cast %517 : vector<3x3x8x128xf32> to vector<72x128xf32>
    %519 = arith.truncf %518 : vector<72x128xf32> to vector<72x128xbf16>
    %c2_418 = arith.constant 2 : index
    %c5_419 = arith.constant 5 : index
    %c0_420 = arith.constant 0 : index
    %c0_421 = arith.constant 0 : index
    %520 = vector.load %arg12[%c2_418, %c5_419, %c0_420, %c0_421] : memref<10x10x8x128xf32, #tpu.memory_space<vmem>>, vector<3x3x8x128xf32>
    %521 = vector.shape_cast %520 : vector<3x3x8x128xf32> to vector<72x128xf32>
    %522 = arith.truncf %521 : vector<72x128xf32> to vector<72x128xbf16>
    %523 = tpu.concatenate %519, %522 in 1 : vector<72x128xbf16>, vector<72x128xbf16> -> vector<72x256xbf16>
    %c0_422 = arith.constant 0 : index
    %c0_423 = arith.constant 0 : index
    %524 = vector.load %arg13[%c0_422, %c0_423] : memref<72x128xf32, #tpu.memory_space<vmem>>, vector<72x128xf32>
    %c10 = arith.constant 10 : index
    %c0_424 = arith.constant 0 : index
    %c0_425 = arith.constant 0 : index
    %525 = vector.load %arg5[%c10, %c0_424, %c0_425] : memref<13x256x128xbf16, #tpu.memory_space<vmem>>, vector<1x256x128xbf16>
    %526 = vector.shape_cast %525 : vector<1x256x128xbf16> to vector<256x128xbf16>
    %cst_426 = arith.constant dense<0.000000e+00> : vector<72x128xf32>
    %527 = tpu.matmul %523, %526, %cst_426 {dimension_numbers = #tpu.dot_dimension_numbers<[1], [0], [0], [1], [0, 0, 1, 1], [], []>} : vector<72x256xbf16>, vector<256x128xbf16>, vector<72x128xf32> -> vector<72x128xf32>
    %528 = arith.addf %524, %527 : vector<72x128xf32>
    %c0_427 = arith.constant 0 : index
    %c0_428 = arith.constant 0 : index
    %529 = vector.load %arg13[%c0_427, %c0_428] : memref<72x128xf32, #tpu.memory_space<vmem>>, vector<72x128xf32>
    tpu.vector_store %arg13[%c0_427, %c0_428], %528 {strides = array<i32>} : memref<72x128xf32, #tpu.memory_space<vmem>>, vector<72x128xf32>,
    %c2_429 = arith.constant 2 : index
    %c1_430 = arith.constant 1 : index
    %c0_431 = arith.constant 0 : index
    %c0_432 = arith.constant 0 : index
    %530 = vector.load %arg12[%c2_429, %c1_430, %c0_431, %c0_432] : memref<10x10x8x128xf32, #tpu.memory_space<vmem>>, vector<3x3x8x128xf32>
    %531 = vector.shape_cast %530 : vector<3x3x8x128xf32> to vector<72x128xf32>
    %532 = arith.truncf %531 : vector<72x128xf32> to vector<72x128xbf16>
    %c2_433 = arith.constant 2 : index
    %c6_434 = arith.constant 6 : index
    %c0_435 = arith.constant 0 : index
    %c0_436 = arith.constant 0 : index
    %533 = vector.load %arg12[%c2_433, %c6_434, %c0_435, %c0_436] : memref<10x10x8x128xf32, #tpu.memory_space<vmem>>, vector<3x3x8x128xf32>
    %534 = vector.shape_cast %533 : vector<3x3x8x128xf32> to vector<72x128xf32>
    %535 = arith.truncf %534 : vector<72x128xf32> to vector<72x128xbf16>
    %536 = tpu.concatenate %532, %535 in 1 : vector<72x128xbf16>, vector<72x128xbf16> -> vector<72x256xbf16>
    %c0_437 = arith.constant 0 : index
    %c0_438 = arith.constant 0 : index
    %537 = vector.load %arg13[%c0_437, %c0_438] : memref<72x128xf32, #tpu.memory_space<vmem>>, vector<72x128xf32>
    %c11 = arith.constant 11 : index
    %c0_439 = arith.constant 0 : index
    %c0_440 = arith.constant 0 : index
    %538 = vector.load %arg5[%c11, %c0_439, %c0_440] : memref<13x256x128xbf16, #tpu.memory_space<vmem>>, vector<1x256x128xbf16>
    %539 = vector.shape_cast %538 : vector<1x256x128xbf16> to vector<256x128xbf16>
    %cst_441 = arith.constant dense<0.000000e+00> : vector<72x128xf32>
    %540 = tpu.matmul %536, %539, %cst_441 {dimension_numbers = #tpu.dot_dimension_numbers<[1], [0], [0], [1], [0, 0, 1, 1], [], []>} : vector<72x256xbf16>, vector<256x128xbf16>, vector<72x128xf32> -> vector<72x128xf32>
    %541 = arith.addf %537, %540 : vector<72x128xf32>
    %c0_442 = arith.constant 0 : index
    %c0_443 = arith.constant 0 : index
    %542 = vector.load %arg13[%c0_442, %c0_443] : memref<72x128xf32, #tpu.memory_space<vmem>>, vector<72x128xf32>
    tpu.vector_store %arg13[%c0_442, %c0_443], %541 {strides = array<i32>} : memref<72x128xf32, #tpu.memory_space<vmem>>, vector<72x128xf32>,
    %c2_444 = arith.constant 2 : index
    %c2_445 = arith.constant 2 : index
    %c0_446 = arith.constant 0 : index
    %c0_447 = arith.constant 0 : index
    %543 = vector.load %arg12[%c2_444, %c2_445, %c0_446, %c0_447] : memref<10x10x8x128xf32, #tpu.memory_space<vmem>>, vector<3x3x8x128xf32>
    %544 = vector.shape_cast %543 : vector<3x3x8x128xf32> to vector<72x128xf32>
    %545 = arith.truncf %544 : vector<72x128xf32> to vector<72x128xbf16>
    %c2_448 = arith.constant 2 : index
    %c2_449 = arith.constant 2 : index
    %c0_450 = arith.constant 0 : index
    %c0_451 = arith.constant 0 : index
    %546 = vector.load %arg12[%c2_448, %c2_449, %c0_450, %c0_451] : memref<10x10x8x128xf32, #tpu.memory_space<vmem>>, vector<3x3x8x128xf32>
    %547 = vector.shape_cast %546 : vector<3x3x8x128xf32> to vector<72x128xf32>
    %548 = arith.truncf %547 : vector<72x128xf32> to vector<72x128xbf16>
    %549 = tpu.concatenate %545, %548 in 1 : vector<72x128xbf16>, vector<72x128xbf16> -> vector<72x256xbf16>
    %c0_452 = arith.constant 0 : index
    %c0_453 = arith.constant 0 : index
    %550 = vector.load %arg13[%c0_452, %c0_453] : memref<72x128xf32, #tpu.memory_space<vmem>>, vector<72x128xf32>
    %c12 = arith.constant 12 : index
    %c0_454 = arith.constant 0 : index
    %c0_455 = arith.constant 0 : index
    %551 = vector.load %arg5[%c12, %c0_454, %c0_455] : memref<13x256x128xbf16, #tpu.memory_space<vmem>>, vector<1x256x128xbf16>
    %552 = vector.shape_cast %551 : vector<1x256x128xbf16> to vector<256x128xbf16>
    %cst_456 = arith.constant dense<0.000000e+00> : vector<72x128xf32>
    %553 = tpu.matmul %549, %552, %cst_456 {dimension_numbers = #tpu.dot_dimension_numbers<[1], [0], [0], [1], [0, 0, 1, 1], [], []>} : vector<72x256xbf16>, vector<256x128xbf16>, vector<72x128xf32> -> vector<72x128xf32>
    %554 = arith.addf %550, %553 : vector<72x128xf32>
    %c0_457 = arith.constant 0 : index
    %c0_458 = arith.constant 0 : index
    %555 = vector.load %arg13[%c0_457, %c0_458] : memref<72x128xf32, #tpu.memory_space<vmem>>, vector<72x128xf32>
    tpu.vector_store %arg13[%c0_457, %c0_458], %554 {strides = array<i32>} : memref<72x128xf32, #tpu.memory_space<vmem>>, vector<72x128xf32>,
    %c0_459 = arith.constant 0 : index
    %c0_460 = arith.constant 0 : index
    %556 = vector.load %arg13[%c0_459, %c0_460] : memref<72x128xf32, #tpu.memory_space<vmem>>, vector<72x128xf32>
    %c0_461 = arith.constant 0 : index
    %c0_462 = arith.constant 0 : index
    %557 = vector.load %arg8[%c0_461, %c0_462] : memref<72x1xf32, #tpu.memory_space<vmem>>, vector<72x1xf32>
    %558 = vector.broadcast %557 : vector<72x1xf32> to vector<72x128xf32>
    %559 = arith.mulf %556, %558 : vector<72x128xf32>
    %cst_463 = arith.constant dense<0.000000e+00> : vector<128xf32>
    %560 = vector.multi_reduction <add>, %559, %cst_463 [0] : vector<72x128xf32> to vector<128xf32>
    %561 = vector.shape_cast %560 : vector<128xf32> to vector<1x128xf32>
    %cst_464 = arith.constant 0.055555556 : f32
    %562 = vector.broadcast %cst_464 : f32 to vector<1x128xf32>
    %563 = arith.mulf %561, %562 : vector<1x128xf32>
    %564 = vector.broadcast %563 : vector<1x128xf32> to vector<72x128xf32>
    %565 = arith.subf %556, %564 : vector<72x128xf32>
    %566 = vector.broadcast %557 : vector<72x1xf32> to vector<72x128xf32>
    %567 = arith.mulf %565, %566 : vector<72x128xf32>
    %568 = arith.mulf %567, %567 : vector<72x128xf32>
    %cst_465 = arith.constant dense<0.000000e+00> : vector<128xf32>
    %569 = vector.multi_reduction <add>, %568, %cst_465 [0] : vector<72x128xf32> to vector<128xf32>
    %570 = vector.shape_cast %569 : vector<128xf32> to vector<1x128xf32>
    %cst_466 = arith.constant 0.055555556 : f32
    %571 = vector.broadcast %cst_466 : f32 to vector<1x128xf32>
    %572 = arith.mulf %570, %571 : vector<1x128xf32>
    %c0_467 = arith.constant 0 : index
    %c0_468 = arith.constant 0 : index
    %573 = vector.load %arg6[%c0_467, %c0_468] : memref<1x128xf32, #tpu.memory_space<vmem>>, vector<1x128xf32>
    %cst_469 = arith.constant 9.99999974E-6 : f32
    %574 = vector.broadcast %cst_469 : f32 to vector<1x128xf32>
    %575 = arith.addf %572, %574 : vector<1x128xf32>
    %576 = math.rsqrt %575 : vector<1x128xf32>
    %577 = arith.mulf %573, %576 : vector<1x128xf32>
    %c0_470 = arith.constant 0 : index
    %c0_471 = arith.constant 0 : index
    %578 = vector.load %arg7[%c0_470, %c0_471] : memref<1x128xf32, #tpu.memory_space<vmem>>, vector<1x128xf32>
    %579 = arith.mulf %563, %577 : vector<1x128xf32>
    %580 = arith.subf %578, %579 : vector<1x128xf32>
    %581 = vector.broadcast %577 : vector<1x128xf32> to vector<72x128xf32>
    %582 = arith.mulf %556, %581 : vector<72x128xf32>
    %583 = vector.broadcast %580 : vector<1x128xf32> to vector<72x128xf32>
    %584 = arith.addf %582, %583 : vector<72x128xf32>
    %cst_472 = arith.constant 0.000000e+00 : f32
    %585 = vector.broadcast %cst_472 : f32 to vector<72x128xf32>
    %586 = arith.maximumf %584, %585 : vector<72x128xf32>
    %cst_473 = arith.constant 0.000000e+00 : f32
    %587 = vector.broadcast %cst_473 : f32 to vector<8x128xf32>
    %c0_474 = arith.constant 0 : index
    %c0_475 = arith.constant 0 : index
    %588 = vector.load %arg10[%c0_474, %c0_475] : memref<1x128xf32, #tpu.memory_space<vmem>>, vector<1x128xf32>
    %589 = vector.broadcast %588 : vector<1x128xf32> to vector<8x128xf32>
    %590 = arith.addf %587, %589 : vector<8x128xf32>
    %591 = vector.extract_strided_slice %586 {offsets = [0, 0], sizes = [8, 128], strides = [1, 1]} : vector<72x128xf32> to vector<8x128xf32>
    %592 = vector.extract_strided_slice %586 {offsets = [8, 0], sizes = [8, 128], strides = [1, 1]} : vector<72x128xf32> to vector<8x128xf32>
    %593 = vector.extract_strided_slice %586 {offsets = [16, 0], sizes = [8, 128], strides = [1, 1]} : vector<72x128xf32> to vector<8x128xf32>
    %594 = tpu.concatenate %591, %592, %593 in 1 : vector<8x128xf32>, vector<8x128xf32>, vector<8x128xf32> -> vector<8x384xf32>
    %c0_476 = arith.constant 0 : index
    %c0_477 = arith.constant 0 : index
    %595 = vector.load %arg9[%c0_476, %c0_477] : memref<1152x128xbf16, #tpu.memory_space<vmem>>, vector<384x128xbf16>
    %596 = arith.truncf %594 : vector<8x384xf32> to vector<8x384xbf16>
    %cst_478 = arith.constant dense<0.000000e+00> : vector<8x128xf32>
    %597 = tpu.matmul %596, %595, %cst_478 {dimension_numbers = #tpu.dot_dimension_numbers<[1], [0], [0], [1], [0, 0, 1, 1], [], []>} : vector<8x384xbf16>, vector<384x128xbf16>, vector<8x128xf32> -> vector<8x128xf32>
    %598 = arith.addf %590, %597 : vector<8x128xf32>
    %599 = vector.extract_strided_slice %586 {offsets = [24, 0], sizes = [8, 128], strides = [1, 1]} : vector<72x128xf32> to vector<8x128xf32>
    %600 = vector.extract_strided_slice %586 {offsets = [32, 0], sizes = [8, 128], strides = [1, 1]} : vector<72x128xf32> to vector<8x128xf32>
    %601 = vector.extract_strided_slice %586 {offsets = [40, 0], sizes = [8, 128], strides = [1, 1]} : vector<72x128xf32> to vector<8x128xf32>
    %602 = tpu.concatenate %599, %600, %601 in 1 : vector<8x128xf32>, vector<8x128xf32>, vector<8x128xf32> -> vector<8x384xf32>
    %c384 = arith.constant 384 : index
    %c0_479 = arith.constant 0 : index
    %603 = vector.load %arg9[%c384, %c0_479] : memref<1152x128xbf16, #tpu.memory_space<vmem>>, vector<384x128xbf16>
    %604 = arith.truncf %602 : vector<8x384xf32> to vector<8x384xbf16>
    %cst_480 = arith.constant dense<0.000000e+00> : vector<8x128xf32>
    %605 = tpu.matmul %604, %603, %cst_480 {dimension_numbers = #tpu.dot_dimension_numbers<[1], [0], [0], [1], [0, 0, 1, 1], [], []>} : vector<8x384xbf16>, vector<384x128xbf16>, vector<8x128xf32> -> vector<8x128xf32>
    %606 = arith.addf %598, %605 : vector<8x128xf32>
    %607 = vector.extract_strided_slice %586 {offsets = [48, 0], sizes = [8, 128], strides = [1, 1]} : vector<72x128xf32> to vector<8x128xf32>
    %608 = vector.extract_strided_slice %586 {offsets = [56, 0], sizes = [8, 128], strides = [1, 1]} : vector<72x128xf32> to vector<8x128xf32>
    %609 = vector.extract_strided_slice %586 {offsets = [64, 0], sizes = [8, 128], strides = [1, 1]} : vector<72x128xf32> to vector<8x128xf32>
    %610 = tpu.concatenate %607, %608, %609 in 1 : vector<8x128xf32>, vector<8x128xf32>, vector<8x128xf32> -> vector<8x384xf32>
    %c768 = arith.constant 768 : index
    %c0_481 = arith.constant 0 : index
    %611 = vector.load %arg9[%c768, %c0_481] : memref<1152x128xbf16, #tpu.memory_space<vmem>>, vector<384x128xbf16>
    %612 = arith.truncf %610 : vector<8x384xf32> to vector<8x384xbf16>
    %cst_482 = arith.constant dense<0.000000e+00> : vector<8x128xf32>
    %613 = tpu.matmul %612, %611, %cst_482 {dimension_numbers = #tpu.dot_dimension_numbers<[1], [0], [0], [1], [0, 0, 1, 1], [], []>} : vector<8x384xbf16>, vector<384x128xbf16>, vector<8x128xf32> -> vector<8x128xf32>
    %614 = arith.addf %606, %613 : vector<8x128xf32>
    %c0_483 = arith.constant 0 : index
    %c0_484 = arith.constant 0 : index
    %615 = vector.load %arg11[%c0_483, %c0_484] : memref<8x128xf32, #tpu.memory_space<vmem>>, vector<8x128xf32>
    tpu.vector_store %arg11[%c0_483, %c0_484], %614 {strides = array<i32>} : memref<8x128xf32, #tpu.memory_space<vmem>>, vector<8x128xf32>,
    return
  }
}

</mosaic_0001>

<bundles_post_ra>
// kernel: dqn_forward.1
= control target key start
LH: loop header
LB: loop body
LE: loop exit
PB: predicated region body
PF: predicated region fallthrough
CT: control target
= control target key end

     0   :  { %v10562_v0 = vmov 0   ;;  %v15591_v5 = vmov 0.0   ;;  %vm10564_vm0 = vmmov 0   ;;  %s15579_s1 = inlined_call_operand.vmem [shape: f32[800,1], index: 1, kind: input, shape index: {}]   ;;  %s15580_s2 = inlined_call_operand.vmem [shape: bf16[128,128], index: 2, kind: input, shape index: {}]   ;;  %s15581_s0 = inlined_call_operand.vmem [shape: bf16[800,128], index: 0, kind: input, shape index: {}]   ;;  %s15582_s8 = inlined_call_operand.vmem [shape: f32[72,1], index: 8, kind: input, shape index: {}]   ;;  %s15583_s5 = inlined_call_operand.vmem [shape: bf16[13,256,128], index: 5, kind: input, shape index: {}]   ;;  %s15584_s3 = inlined_call_operand.vmem [shape: f32[1,128], index: 3, kind: input, shape index: {}]   ;;  %s15585_s4 = inlined_call_operand.vmem [shape: f32[1,128], index: 4, kind: input, shape index: {}]   ;;  %s15586_s9 = inlined_call_operand.vmem [shape: bf16[1152,128], index: 9, kind: input, shape index: {}]   ;;  %s15587_s6 = inlined_call_operand.vmem [shape: f32[1,128], index: 6, kind: input, shape index: {}]   ;;  %s15588_s7 = inlined_call_operand.vmem [shape: f32[1,128], index: 7, kind: input, shape index: {}]   ;;  %s15589_s10 = inlined_call_operand.vmem [shape: f32[1,128], index: 10, kind: input, shape index: {}]   ;;  %s15590_s11 = inlined_call_operand.vmem [shape: f32[8,128], index: 11, kind: output, shape index: {}]  }
   0x1   :  { %10211 = vset.pattern.permute.xlu1 %v10562_v0  ;;  %10210 = vset.pattern.permute.xlu0 %v10562_v0  ;;  %v425_v1 = vld [vmem:[%s15579_s1 + $0x50] sm:$0xff]  ;;  %v216_v2 = vld [vmem:[%s15579_s1] sm:$0xff]  ;;  %v426_v4 = vld [vmem:[%s15579_s1 + $0x58] sm:$0xff] }
   0x2   :  { %437 = vperm.xlu1 %10211, %v425_v1   ;;  %228 = vperm.xlu0 %10210, %v216_v2   ;;  %v10634_v3 = vld [vmem:[%s15580_s2] sm:$0xff]   ;;  %v217_v6 = vld [vmem:[%s15579_s1 + $0x8] sm:$0xff]  ;;  %v218_v9 = vld [vmem:[%s15579_s1 + $0x10] sm:$0xff] }
   0x3   :  { %9775 = vmatprep.subr.bf16.mxu0 %v15591_v5  ;;  %9811 = vmatprep.subr.bf16.mxu1 %v15591_v5  ;;  %v10649_v7 = vld [vmem:[%s15580_s2 + $0x8] sm:$0xff]   ;;  %v427_v8 = vld [vmem:[%s15579_s1 + $0x60] sm:$0xff]  ;;  %v10668_v10 = vld [vmem:[%s15580_s2 + $0x10] sm:$0xff]  }
   0x4   :  { %9776 = vmatpush3.bf16.msra.mxu0 %v10634_v3  ;;  %9812 = vmatpush3.bf16.msra.mxu1 %v10634_v3  ;;  %v636_v11 = vld [vmem:[%s15579_s1 + $0xa8] sm:$0xff]  ;;  %v635_v12 = vld [vmem:[%s15579_s1 + $0xa0] sm:$0xff]  ;;  %v10683_v13 = vld [vmem:[%s15580_s2 + $0x18] sm:$0xff]  }
   0x5   :  { %9777 = vmatprep.subr.bf16.mxu0 %v15591_v5  ;;  %9813 = vmatprep.subr.bf16.mxu1 %v15591_v5  ;;  %v428_v14 = vld [vmem:[%s15579_s1 + $0x68] sm:$0xff]  ;;  %v219_v15 = vld [vmem:[%s15579_s1 + $0x18] sm:$0xff]  ;;  %v10698_v16 = vld [vmem:[%s15580_s2 + $0x20] sm:$0xff]  }
   0x6   :  { %442 = vperm.xlu1 %10211, %v426_v4   ;;  %233 = vperm.xlu0 %10210, %v217_v6   ;;  %v845_v17 = vld [vmem:[%s15579_s1 + $0xf0] sm:$0xff]  ;;  %v10713_v19 = vld [vmem:[%s15580_s2 + $0x28] sm:$0xff]   ;;  %v220_v20 = vld [vmem:[%s15579_s1 + $0x20] sm:$0xff] }
   0x7   :  { %9791 = vmatprep.mubr.msk.bf16.mxu0 %vm10564_vm0, %v15591_v5  ;;  %9827 = vmatprep.mubr.msk.bf16.mxu1 %vm10564_vm0, %v15591_v5  ;;  %v637_v18 = vld [vmem:[%s15579_s1 + $0xb0] sm:$0xff]  ;;  %v846_v21 = vld [vmem:[%s15579_s1 + $0xf8] sm:$0xff]  ;;  %v1055_v26 = vld [vmem:[%s15579_s1 + $0x140] sm:$0xff] }
   0x8   :  { %9778 = vmatpush3.bf16.msra.mxu0 %v10649_v7  ;;  %9814 = vmatpush3.bf16.msra.mxu1 %v10649_v7  ;;  %v10728_v22 = vld [vmem:[%s15580_s2 + $0x30] sm:$0xff]   ;;  %v638_v23 = vld [vmem:[%s15579_s1 + $0xb8] sm:$0xff]  ;;  %v847_v27 = vld [vmem:[%s15579_s1 + $0x100] sm:$0xff] }
   0x9   :  { %9779 = vmatprep.subr.bf16.mxu0 %v15591_v5  ;;  %9815 = vmatprep.subr.bf16.mxu1 %v15591_v5  ;;  %v429_v24 = vld [vmem:[%s15579_s1 + $0x70] sm:$0xff]  ;;  %v10743_v25 = vld [vmem:[%s15580_s2 + $0x38] sm:$0xff]   ;;  %v10220_v28 = vld [vmem:[%s15581_s0] sm:$0xff]  }
   0xa   :  { %447 = vperm.xlu1 %10211, %v427_v8   ;;  %238 = vperm.xlu0 %10210, %v218_v9   ;;  %v10221_v29 = vld [vmem:[%s15581_s0 + $0x28] sm:$0xff]   ;;  %v639_v32 = vld [vmem:[%s15579_s1 + $0xc0] sm:$0xff]  ;;  %v430_v33 = vld [vmem:[%s15579_s1 + $0x78] sm:$0xff] }
   0xb   :  { %v221_v30 = vld [vmem:[%s15579_s1 + $0x28] sm:$0xff]  ;;  %v10223_v35 = vld [vmem:[%s15581_s0 + $0x30] sm:$0xff]   ;;  %v1266_v38 = vld [vmem:[%s15579_s1 + $0x198] sm:$0xff] }
   0xc   :  { %9780 = vmatpush3.bf16.msra.mxu0 %v10668_v10  ;;  %9816 = vmatpush3.bf16.msra.mxu1 %v10668_v10  ;;  %v1056_v31 = vld [vmem:[%s15579_s1 + $0x148] sm:$0xff]  ;;  %v1057_v36 = vld [vmem:[%s15579_s1 + $0x150] sm:$0xff]  ;;  %v10225_v41 = vld [vmem:[%s15581_s0 + $0x38] sm:$0xff]  }
   0xd   :  { %9781 = vmatprep.subr.bf16.mxu0 %v15591_v5  ;;  %9817 = vmatprep.subr.bf16.mxu1 %v15591_v5  ;;  %v10222_v34 = vld [vmem:[%s15581_s0 + $0x8] sm:$0xff]   ;;  %v1265_v39 = vld [vmem:[%s15579_s1 + $0x190] sm:$0xff]  ;;  %v431_v42 = vld [vmem:[%s15579_s1 + $0x80] sm:$0xff] }
   0xe   :  { %652 = vperm.xlu1 %10211, %v636_v11   ;;  %647 = vperm.xlu0 %10210, %v635_v12   ;;  %v848_v37 = vld [vmem:[%s15579_s1 + $0x108] sm:$0xff]  ;;  %v10224_v40 = vld [vmem:[%s15581_s0 + $0x10] sm:$0xff]   ;;  %v10226_v46 = vld [vmem:[%s15581_s0 + $0x18] sm:$0xff]  }
   0xf   :  { %v222_v43 = vld [vmem:[%s15579_s1 + $0x30] sm:$0xff]  ;;  %v640_v45 = vld [vmem:[%s15579_s1 + $0xc8] sm:$0xff]  ;;  %v10227_v47 = vld [vmem:[%s15581_s0 + $0x40] sm:$0xff]  }
  0x10   :  { %9782 = vmatpush3.bf16.msra.mxu0 %v10683_v13  ;;  %9818 = vmatpush3.bf16.msra.mxu1 %v10683_v13  ;;  %v849_v44 = vld [vmem:[%s15579_s1 + $0x110] sm:$0xff]  ;;  %v1267_v48 = vld [vmem:[%s15579_s1 + $0x1a0] sm:$0xff]  ;;  %v1058_v49 = vld [vmem:[%s15579_s1 + $0x158] sm:$0xff] }
  0x11   :  { %9783 = vmatprep.subr.bf16.mxu0 %v15591_v5  ;;  %9819 = vmatprep.subr.bf16.mxu1 %v15591_v5  ;;  %v1476_v50 = vld [vmem:[%s15579_s1 + $0x1e8] sm:$0xff]  ;;  %v1475_v51 = vld [vmem:[%s15579_s1 + $0x1e0] sm:$0xff]  ;;  %v223_v55 = vld [vmem:[%s15579_s1 + $0x38] sm:$0xff] }
  0x12   :  { %452 = vperm.xlu1 %10211, %v428_v14   ;;  %243 = vperm.xlu0 %10210, %v219_v15   ;;  %v10228_v52 = vld [vmem:[%s15581_s0 + $0x20] sm:$0xff]   ;;  %v10229_v53 = vld [vmem:[%s15581_s0 + $0x48] sm:$0xff]   ;;  %v850_v56 = vld [vmem:[%s15579_s1 + $0x118] sm:$0xff] }
  0x13   :  { %v432_v54 = vld [vmem:[%s15579_s1 + $0x88] sm:$0xff]  ;;  %v641_v57 = vld [vmem:[%s15579_s1 + $0xd0] sm:$0xff]  ;;  %v10231_v59 = vld [vmem:[%s15581_s0 + $0x78] sm:$0xff]  }
  0x14   :  { %9784 = vmatpush3.bf16.msra.mxu0 %v10698_v16  ;;  %9820 = vmatpush3.bf16.msra.mxu1 %v10698_v16  ;;  %v10230_v58 = vld [vmem:[%s15581_s0 + $0x50] sm:$0xff]   ;;  %v1268_v60 = vld [vmem:[%s15579_s1 + $0x1a8] sm:$0xff]  ;;  %v1059_v61 = vld [vmem:[%s15579_s1 + $0x160] sm:$0xff] }
  0x15   :  { %9785 = vmatprep.subr.bf16.mxu0 %v15591_v5  ;;  %9821 = vmatprep.subr.bf16.mxu1 %v15591_v5  ;;  %v1685_v62 = vld [vmem:[%s15579_s1 + $0x230] sm:$0xff]  ;;  %v10232_v0 = vld [vmem:[%s15581_s0 + $0x58] sm:$0xff]   ;;  %v10233_v1 = vld [vmem:[%s15581_s0 + $0x80] sm:$0xff]  }
  0x16   :  { %857 = vperm.xlu1 %10211, %v845_v17   ;;  %657 = vperm.xlu0 %10210, %v637_v18   ;;  %v1477_v63 = vld [vmem:[%s15579_s1 + $0x1f0] sm:$0xff]  ;;  %v224_v2 = vld [vmem:[%s15579_s1 + $0x40] sm:$0xff]  ;;  %v1686_v4 = vld [vmem:[%s15579_s1 + $0x238] sm:$0xff] }
  0x17   :  { %v642_v6 = vld [vmem:[%s15579_s1 + $0xd8] sm:$0xff]  ;;  %v433_v8 = vld [vmem:[%s15579_s1 + $0x90] sm:$0xff]  ;;  %v10234_v9 = vld [vmem:[%s15581_s0 + $0x60] sm:$0xff]  }
  0x18   :  { %9786 = vmatpush3.bf16.msra.mxu0 %v10713_v19  ;;  %9822 = vmatpush3.bf16.msra.mxu1 %v10713_v19  ;;  %v10235_v11 = vld [vmem:[%s15581_s0 + $0x88] sm:$0xff]   ;;  %v851_v14 = vld [vmem:[%s15579_s1 + $0x120] sm:$0xff]  ;;  %v1478_v15 = vld [vmem:[%s15579_s1 + $0x1f8] sm:$0xff] }
  0x19   :  { %9787 = vmatprep.subr.bf16.mxu0 %v15591_v5  ;;  %9823 = vmatprep.subr.bf16.mxu1 %v15591_v5  ;;  %v1060_v12 = vld [vmem:[%s15579_s1 + $0x168] sm:$0xff]  ;;  %v1269_v17 = vld [vmem:[%s15579_s1 + $0x1b0] sm:$0xff] }
  0x1a   :  { %248 = vperm.xlu1 %10211, %v220_v20   ;;  %862 = vperm.xlu0 %10210, %v846_v21   ;;  %v10236_v18 = vld [vmem:[%s15581_s0 + $0x68] sm:$0xff]   ;;  %v10237_v20 = vld [vmem:[%s15581_s0 + $0x90] sm:$0xff]   ;;  %v1895_v21 = vld [vmem:[%s15579_s1 + $0x280] sm:$0xff] }
  0x1c   :  { %9788 = vmatpush3.bf16.msra.mxu0 %v10728_v22  ;;  %9824 = vmatpush3.bf16.msra.mxu1 %v10728_v22 }
  0x1d   :  { %9789 = vmatprep.subr.bf16.mxu0 %v15591_v5  ;;  %9825 = vmatprep.subr.bf16.mxu1 %v15591_v5 }
  0x1e   :  { %662 = vperm.xlu1 %10211, %v638_v23   ;;  %457 = vperm.xlu0 %10210, %v429_v24   ;;  %v1687_v23 = vld [vmem:[%s15579_s1 + $0x240] sm:$0xff]  ;;  %v225_v24 = vld [vmem:[%s15579_s1 + $0x48] sm:$0xff] }
  0x20   :  { %9790 = vmatpush3.bf16.msra.mxu0 %v10743_v25  ;;  %9826 = vmatpush3.bf16.msra.mxu1 %v10743_v25 }
  0x21   :  { %9847 = vmatprep.subr.bf16.mxu0 %v15591_v5  ;;  %9883 = vmatprep.subr.bf16.mxu1 %v15591_v5 }
  0x22   :  { %1067 = vperm.xlu1 %10211, %v1055_v26   ;;  %867 = vperm.xlu0 %10210, %v847_v27   ;;  %v1896_v26 = vld [vmem:[%s15579_s1 + $0x288] sm:$0xff]  ;;  %v10238_v27 = vld [vmem:[%s15581_s0 + $0x70] sm:$0xff]  }
  0x23   :  { %9792 = vmatmul.mubr.bf16.vlgmr.msra.gmra.mrb[0].mxu0 %v10220_v28  ;;  %9828 = vmatmul.mubr.bf16.vlgmr.msra.gmra.mrb[0].mxu1 %v10221_v29  ;;  %v10239_v28 = vld [vmem:[%s15581_s0 + $0x98] sm:$0xff]   ;;  %v643_v29 = vld [vmem:[%s15579_s1 + $0xe0] sm:$0xff] }
  0x24   :  { %9795 = vmatprep.mubr.msk.bf16.mxu0 %vm10564_vm0, %v15591_v5  ;;  %9831 = vmatprep.mubr.msk.bf16.mxu1 %vm10564_vm0, %v15591_v5 }
  0x25   :  { %9848 = vmatpush3.bf16.msra.mxu0 %v10634_v3  ;;  %9884 = vmatpush3.bf16.msra.mxu1 %v10634_v3 }
  0x26   :  { %253 = vperm.xlu1 %10211, %v221_v30   ;;  %1072 = vperm.xlu0 %10210, %v1056_v31   ;;  %v434_v30 = vld [vmem:[%s15579_s1 + $0x98] sm:$0xff]  ;;  %v1061_v31 = vld [vmem:[%s15579_s1 + $0x170] sm:$0xff] }
  0x27   :  { %9849 = vmatprep.subr.bf16.mxu0 %v15591_v5  ;;  %9885 = vmatprep.subr.bf16.mxu1 %v15591_v5 }
  0x29   :  { %9850 = vmatpush3.bf16.msra.mxu0 %v10649_v7  ;;  %9886 = vmatpush3.bf16.msra.mxu1 %v10649_v7 }
  0x2a   :  { %667 = vperm.xlu1 %10211, %v639_v32   ;;  %462 = vperm.xlu0 %10210, %v430_v33   ;;  %v852_v32 = vld [vmem:[%s15579_s1 + $0x128] sm:$0xff]  ;;  %v10240_v33 = vld [vmem:[%s15581_s0 + $0xa0] sm:$0xff]  }
  0x2b   :  { %9796 = vmatmul.mubr.bf16.gmra.mrb[4].mxu0 %v10222_v34  ;;  %9832 = vmatmul.mubr.bf16.gmra.mrb[4].mxu1 %v10223_v35  ;;  %v10241_v34 = vld [vmem:[%s15581_s0 + $0xc8] sm:$0xff]   ;;  %v1479_v35 = vld [vmem:[%s15579_s1 + $0x200] sm:$0xff] }
  0x2c   :  { %9799 = vmatprep.mubr.msk.bf16.mxu0 %vm10564_vm0, %v15591_v5  ;;  %9835 = vmatprep.mubr.msk.bf16.mxu1 %vm10564_vm0, %v15591_v5 }
  0x2d   :  { %9851 = vmatprep.subr.bf16.mxu0 %v15591_v5  ;;  %9887 = vmatprep.subr.bf16.mxu1 %v15591_v5 }
  0x2e   :  { %1077 = vperm.xlu1 %10211, %v1057_v36   ;;  %872 = vperm.xlu0 %10210, %v848_v37   ;;  %v1270_v36 = vld [vmem:[%s15579_s1 + $0x1b8] sm:$0xff]  ;;  %v1897_v37 = vld [vmem:[%s15579_s1 + $0x290] sm:$0xff] }
  0x2f   :  { %9852 = vmatpush3.bf16.msra.mxu0 %v10668_v10  ;;  %9888 = vmatpush3.bf16.msra.mxu1 %v10668_v10 }
  0x30   :  { %9853 = vmatprep.subr.bf16.mxu0 %v15591_v5  ;;  %9889 = vmatprep.subr.bf16.mxu1 %v15591_v5 }
  0x32   :  { %1282 = vperm.xlu1 %10211, %v1266_v38   ;;  %1277 = vperm.xlu0 %10210, %v1265_v39   ;;  %v1688_v38 = vld [vmem:[%s15579_s1 + $0x248] sm:$0xff] }
  0x33   :  { %9800 = vmatmul.mubr.bf16.gmra.mrb[8].mxu0 %v10224_v40  ;;  %9836 = vmatmul.mubr.bf16.gmra.mrb[8].mxu1 %v10225_v41  ;;  %v10242_v39 = vld [vmem:[%s15581_s0 + $0xa8] sm:$0xff]   ;;  %v10243_v40 = vld [vmem:[%s15581_s0 + $0xd0] sm:$0xff]  }
  0x34   :  { %9854 = vmatpush3.bf16.msra.mxu0 %v10683_v13  ;;  %9890 = vmatpush3.bf16.msra.mxu1 %v10683_v13  ;;  %v2105_v41 = vld [vmem:[%s15579_s1 + $0x2d0] sm:$0xff] }
  0x35   :  { %9803 = vmatprep.mubr.msk.bf16.mxu0 %vm10564_vm0, %v15591_v5  ;;  %9839 = vmatprep.mubr.msk.bf16.mxu1 %vm10564_vm0, %v15591_v5 }
  0x36   :  { %467 = vperm.xlu1 %10211, %v431_v42   ;;  %258 = vperm.xlu0 %10210, %v222_v43   ;;  %v644_v42 = vld [vmem:[%s15579_s1 + $0xe8] sm:$0xff]  ;;  %v10244_v43 = vld [vmem:[%s15581_s0 + $0xb0] sm:$0xff]  }
  0x37   :  { %9855 = vmatprep.subr.bf16.mxu0 %v15591_v5  ;;  %9891 = vmatprep.subr.bf16.mxu1 %v15591_v5 }
  0x38   :  { %9856 = vmatpush3.bf16.msra.mxu0 %v10698_v16  ;;  %9892 = vmatpush3.bf16.msra.mxu1 %v10698_v16 }
  0x39   :  { %9857 = vmatprep.subr.bf16.mxu0 %v15591_v5  ;;  %9893 = vmatprep.subr.bf16.mxu1 %v15591_v5 }
  0x3a   :  { %877 = vperm.xlu1 %10211, %v849_v44   ;;  %672 = vperm.xlu0 %10210, %v640_v45   ;;  %v10245_v44 = vld [vmem:[%s15581_s0 + $0xd8] sm:$0xff]  }
  0x3b   :  { %9804 = vmatmul.mubr.bf16.gmra.mrb[12].mxu0 %v10226_v46  ;;  %9840 = vmatmul.mubr.bf16.gmra.mrb[12].mxu1 %v10227_v47  ;;  %v1271_v47 = vld [vmem:[%s15579_s1 + $0x1c0] sm:$0xff] }
  0x3c   :  { %9858 = vmatpush3.bf16.msra.mxu0 %v10713_v19  ;;  %9894 = vmatpush3.bf16.msra.mxu1 %v10713_v19 }
  0x3d   :  { %9807 = vmatprep.mubr.msk.bf16.mxu0 %vm10564_vm0, %v15591_v5  ;;  %9843 = vmatprep.mubr.msk.bf16.mxu1 %vm10564_vm0, %v15591_v5 }
  0x3e   :  { %1287 = vperm.xlu1 %10211, %v1267_v48   ;;  %1082 = vperm.xlu0 %10210, %v1058_v49  }
  0x3f   :  { %9859 = vmatprep.subr.bf16.mxu0 %v15591_v5  ;;  %9895 = vmatprep.subr.bf16.mxu1 %v15591_v5 }
  0x40   :  { %9860 = vmatpush3.bf16.msra.mxu0 %v10728_v22  ;;  %9896 = vmatpush3.bf16.msra.mxu1 %v10728_v22 }
  0x41   :  { %9861 = vmatprep.subr.bf16.mxu0 %v15591_v5  ;;  %9897 = vmatprep.subr.bf16.mxu1 %v15591_v5 }
  0x42   :  { %1492 = vperm.xlu1 %10211, %v1476_v50   ;;  %1487 = vperm.xlu0 %10210, %v1475_v51   ;;  %v1689_v50 = vld [vmem:[%s15579_s1 + $0x250] sm:$0xff]  ;;  %v10246_v51 = vld [vmem:[%s15581_s0 + $0xb8] sm:$0xff]  }
  0x43   :  { %9808 = vmatmul.mubr.bf16.gmra.mrb[16].mxu0 %v10228_v52  ;;  %9844 = vmatmul.mubr.bf16.gmra.mrb[16].mxu1 %v10229_v53  ;;  %v10247_v52 = vld [vmem:[%s15581_s0 + $0xe0] sm:$0xff]  }
  0x44   :  { %9862 = vmatpush3.bf16.msra.mxu0 %v10743_v25  ;;  %9898 = vmatpush3.bf16.msra.mxu1 %v10743_v25 }
  0x45   :  { %9863 = vmatprep.mubr.msk.bf16.mxu0 %vm10564_vm0, %v15591_v5  ;;  %9899 = vmatprep.mubr.msk.bf16.mxu1 %vm10564_vm0, %v15591_v5 }
  0x46   :  { %472 = vperm.xlu1 %10211, %v432_v54   ;;  %263 = vperm.xlu0 %10210, %v223_v55   ;;  %v2107_v55 = vld [vmem:[%s15579_s1 + $0x2e0] sm:$0xff] }
  0x47   :  { %9919 = vmatprep.subr.bf16.mxu0 %v15591_v5  ;;  %9955 = vmatprep.subr.bf16.mxu1 %v15591_v5 }
  0x4a   :  { %882 = vperm.xlu1 %10211, %v850_v56   ;;  %677 = vperm.xlu0 %10210, %v641_v57  }
  0x4b   :  { %9864 = vmatmul.mubr.bf16.vlgmr.msra.gmra.mrb[20].mxu0 %v10230_v58  ;;  %9900 = vmatmul.mubr.bf16.vlgmr.msra.gmra.mrb[20].mxu1 %v10231_v59  ;;  %v1063_v58 = vld [vmem:[%s15579_s1 + $0x180] sm:$0xff] }
  0x4c   :  { %9867 = vmatprep.mubr.msk.bf16.mxu0 %vm10564_vm0, %v15591_v5  ;;  %9903 = vmatprep.mubr.msk.bf16.mxu1 %vm10564_vm0, %v15591_v5  ;;  %v10248_v59 = vld [vmem:[%s15581_s0 + $0xc0] sm:$0xff]  }
  0x4d   :  { %9920 = vmatpush3.bf16.msra.mxu0 %v10634_v3  ;;  %9956 = vmatpush3.bf16.msra.mxu1 %v10634_v3 }
  0x4e   :  { %1292 = vperm.xlu1 %10211, %v1268_v60   ;;  %1087 = vperm.xlu0 %10210, %v1059_v61   ;;  %v10249_v60 = vld [vmem:[%s15581_s0 + $0xe8] sm:$0xff]  }
  0x4f   :  { %9921 = vmatprep.subr.bf16.mxu0 %v15591_v5  ;;  %9957 = vmatprep.subr.bf16.mxu1 %v15591_v5 }
  0x51   :  { %9922 = vmatpush3.bf16.msra.mxu0 %v10649_v7  ;;  %9958 = vmatpush3.bf16.msra.mxu1 %v10649_v7 }
  0x52   :  { %1697 = vperm.xlu1 %10211, %v1685_v62   ;;  %1497 = vperm.xlu0 %10210, %v1477_v63   ;;  %v1481_v63 = vld [vmem:[%s15579_s1 + $0x210] sm:$0xff] }
  0x53   :  { %9868 = vmatmul.mubr.bf16.gmra.mrb[24].mxu0 %v10232_v0  ;;  %9904 = vmatmul.mubr.bf16.gmra.mrb[24].mxu1 %v10233_v1 }
  0x54   :  { %9871 = vmatprep.mubr.msk.bf16.mxu0 %vm10564_vm0, %v15591_v5  ;;  %9907 = vmatprep.mubr.msk.bf16.mxu1 %vm10564_vm0, %v15591_v5 }
  0x55   :  { %9923 = vmatprep.subr.bf16.mxu0 %v15591_v5  ;;  %9959 = vmatprep.subr.bf16.mxu1 %v15591_v5 }
  0x56   :  { %268 = vperm.xlu1 %10211, %v224_v2   ;;  %1702 = vperm.xlu0 %10210, %v1686_v4   ;;  %v1899_v2 = vld [vmem:[%s15579_s1 + $0x2a0] sm:$0xff]  ;;  %v10250_v4 = vld [vmem:[%s15581_s0 + $0xf0] sm:$0xff]  }
  0x57   :  { %9924 = vmatpush3.bf16.msra.mxu0 %v10668_v10  ;;  %9960 = vmatpush3.bf16.msra.mxu1 %v10668_v10 }
  0x58   :  { %9925 = vmatprep.subr.bf16.mxu0 %v15591_v5  ;;  %9961 = vmatprep.subr.bf16.mxu1 %v15591_v5 }
  0x5a   :  { %682 = vperm.xlu1 %10211, %v642_v6   ;;  %477 = vperm.xlu0 %10210, %v433_v8   ;;  %v10251_v6 = vld [vmem:[%s15581_s0 + $0x118] sm:$0xff]  }
  0x5b   :  { %9872 = vmatmul.mubr.bf16.gmra.mrb[28].mxu0 %v10234_v9  ;;  %9908 = vmatmul.mubr.bf16.gmra.mrb[28].mxu1 %v10235_v11  ;;  %v1064_v11 = vld [vmem:[%s15579_s1 + $0x188] sm:$0xff] }
  0x5c   :  { %9926 = vmatpush3.bf16.msra.mxu0 %v10683_v13  ;;  %9962 = vmatpush3.bf16.msra.mxu1 %v10683_v13 }
  0x5d   :  { %9875 = vmatprep.mubr.msk.bf16.mxu0 %vm10564_vm0, %v15591_v5  ;;  %9911 = vmatprep.mubr.msk.bf16.mxu1 %vm10564_vm0, %v15591_v5 }
  0x5e   :  { %1092 = vperm.xlu1 %10211, %v1060_v12   ;;  %887 = vperm.xlu0 %10210, %v851_v14   ;;  %v2108_v12 = vld [vmem:[%s15579_s1 + $0x2e8] sm:$0xff] }
  0x5f   :  { %9927 = vmatprep.subr.bf16.mxu0 %v15591_v5  ;;  %9963 = vmatprep.subr.bf16.mxu1 %v15591_v5 }
  0x60   :  { %9928 = vmatpush3.bf16.msra.mxu0 %v10698_v16  ;;  %9964 = vmatpush3.bf16.msra.mxu1 %v10698_v16 }
  0x61   :  { %9929 = vmatprep.subr.bf16.mxu0 %v15591_v5  ;;  %9965 = vmatprep.subr.bf16.mxu1 %v15591_v5 }
  0x62   :  { %1502 = vperm.xlu1 %10211, %v1478_v15   ;;  %1297 = vperm.xlu0 %10210, %v1269_v17   ;;  %v10554_v17 = vld [vmem:[%s15580_s2] sm:$0xff]  }
  0x63   :  { %9876 = vmatmul.mubr.bf16.gmra.mrb[32].mxu0 %v10236_v18  ;;  %9912 = vmatmul.mubr.bf16.gmra.mrb[32].mxu1 %v10237_v20  ;;  %v1482_v18 = vld [vmem:[%s15579_s1 + $0x218] sm:$0xff]  ;;  %v1273_v20 = vld [vmem:[%s15579_s1 + $0x1d0] sm:$0xff] }
  0x64   :  { %9930 = vmatpush3.bf16.msra.mxu0 %v10713_v19  ;;  %9966 = vmatpush3.bf16.msra.mxu1 %v10713_v19 }
  0x65   :  { %9879 = vmatprep.mubr.msk.bf16.mxu0 %vm10564_vm0, %v15591_v5  ;;  %9915 = vmatprep.mubr.msk.bf16.mxu1 %vm10564_vm0, %v15591_v5 }
  0x66   :  { %1907 = vperm.xlu1 %10211, %v1895_v21   ;;  %1707 = vperm.xlu0 %10210, %v1687_v23   ;;  %v10252_v21 = vld [vmem:[%s15581_s0 + $0xf8] sm:$0xff]   ;;  %v10253_v23 = vld [vmem:[%s15581_s0 + $0x120] sm:$0xff]  }
  0x67   :  { %9931 = vmatprep.subr.bf16.mxu0 %v15591_v5  ;;  %9967 = vmatprep.subr.bf16.mxu1 %v15591_v5 }
  0x68   :  { %9932 = vmatpush3.bf16.msra.mxu0 %v10728_v22  ;;  %9968 = vmatpush3.bf16.msra.mxu1 %v10728_v22 }
  0x69   :  { %9933 = vmatprep.subr.bf16.mxu0 %v15591_v5  ;;  %9969 = vmatprep.subr.bf16.mxu1 %v15591_v5 }
  0x6a   :  { %273 = vperm.xlu1 %10211, %v225_v24   ;;  %1912 = vperm.xlu0 %10210, %v1896_v26  }
  0x6b   :  { %9880 = vmatmul.mubr.bf16.gmra.mrb[36].mxu0 %v10238_v27  ;;  %9916 = vmatmul.mubr.bf16.gmra.mrb[36].mxu1 %v10239_v28  ;;  %v10555_v27 = vld [vmem:[%s15580_s2 + $0x8] sm:$0xff]  }
  0x6c   :  { %9934 = vmatpush3.bf16.msra.mxu0 %v10743_v25  ;;  %9970 = vmatpush3.bf16.msra.mxu1 %v10743_v25  ;;  %v1900_v28 = vld [vmem:[%s15579_s1 + $0x2a8] sm:$0xff] }
  0x6d   :  { %9935 = vmatprep.mubr.msk.bf16.mxu0 %vm10564_vm0, %v15591_v5  ;;  %9971 = vmatprep.mubr.msk.bf16.mxu1 %vm10564_vm0, %v15591_v5 }
  0x6e   :  { %687 = vperm.xlu1 %10211, %v643_v29   ;;  %482 = vperm.xlu0 %10210, %v434_v30   ;;  %v1691_v29 = vld [vmem:[%s15579_s1 + $0x260] sm:$0xff] }
  0x6f   :  { %9991 = vmatprep.subr.bf16.mxu0 %v15591_v5  ;;  %10027 = vmatprep.subr.bf16.mxu1 %v15591_v5 }
  0x72   :  { %1097 = vperm.xlu1 %10211, %v1061_v31   ;;  %892 = vperm.xlu0 %10210, %v852_v32   ;;  %v1274_v32 = vld [vmem:[%s15579_s1 + $0x1d8] sm:$0xff] }
  0x73   :  { %9936 = vmatmul.mubr.bf16.vlgmr.msra.gmra.mrb[40].mxu0 %v10240_v33  ;;  %9972 = vmatmul.mubr.bf16.vlgmr.msra.gmra.mrb[40].mxu1 %v10241_v34  ;;  %v2109_v33 = vld [vmem:[%s15579_s1 + $0x2f0] sm:$0xff]  ;;  %v10254_v34 = vld [vmem:[%s15581_s0 + $0x100] sm:$0xff]  }
  0x74   :  { %9939 = vmatprep.mubr.msk.bf16.mxu0 %vm10564_vm0, %v15591_v5  ;;  %9975 = vmatprep.mubr.msk.bf16.mxu1 %vm10564_vm0, %v15591_v5 }
  0x75   :  { %9992 = vmatpush3.bf16.msra.mxu0 %v10634_v3  ;;  %10028 = vmatpush3.bf16.msra.mxu1 %v10634_v3  ;;  %v2106_v3 = vld [vmem:[%s15579_s1 + $0x2d8] sm:$0xff] }
  0x76   :  { %1507 = vperm.xlu1 %10211, %v1479_v35   ;;  %1302 = vperm.xlu0 %10210, %v1270_v36   ;;  %v10255_v35 = vld [vmem:[%s15581_s0 + $0x128] sm:$0xff]   ;;  %v10556_v36 = vld [vmem:[%s15580_s2 + $0x10] sm:$0xff]  }
  0x77   :  { %9993 = vmatprep.subr.bf16.mxu0 %v15591_v5  ;;  %10029 = vmatprep.subr.bf16.mxu1 %v15591_v5 }
  0x79   :  { %9994 = vmatpush3.bf16.msra.mxu0 %v10649_v7  ;;  %10030 = vmatpush3.bf16.msra.mxu1 %v10649_v7  ;;  %v853_v7 = vld [vmem:[%s15579_s1 + $0x130] sm:$0xff] }
  0x7a   :  { %1917 = vperm.xlu1 %10211, %v1897_v37   ;;  %1712 = vperm.xlu0 %10210, %v1688_v38  }
  0x7b   :  { %9940 = vmatmul.mubr.bf16.gmra.mrb[44].mxu0 %v10242_v39  ;;  %9976 = vmatmul.mubr.bf16.gmra.mrb[44].mxu1 %v10243_v40  ;;  %v1692_v39 = vld [vmem:[%s15579_s1 + $0x268] sm:$0xff]  ;;  %v1483_v40 = vld [vmem:[%s15579_s1 + $0x220] sm:$0xff] }
  0x7c   :  { %9943 = vmatprep.mubr.msk.bf16.mxu0 %vm10564_vm0, %v15591_v5  ;;  %9979 = vmatprep.mubr.msk.bf16.mxu1 %vm10564_vm0, %v15591_v5 }
  0x7d   :  { %9995 = vmatprep.subr.bf16.mxu0 %v15591_v5  ;;  %10031 = vmatprep.subr.bf16.mxu1 %v15591_v5 }
  0x7e   :  { %2122 = vperm.xlu1 %10211, %v2106_v3   ;;  %2117 = vperm.xlu0 %10210, %v2105_v41   ;;  %v10557_v3 = vld [vmem:[%s15580_s2 + $0x18] sm:$0xff]  }
  0x7f   :  { %9996 = vmatpush3.bf16.msra.mxu0 %v10668_v10  ;;  %10032 = vmatpush3.bf16.msra.mxu1 %v10668_v10  ;;  %v1062_v10 = vld [vmem:[%s15579_s1 + $0x178] sm:$0xff] }
  0x80   :  { %9997 = vmatprep.subr.bf16.mxu0 %v15591_v5  ;;  %10033 = vmatprep.subr.bf16.mxu1 %v15591_v5 }
  0x81   :  { %v11103_v45 = vpop.permute.xlu1 %437  ;;  %v11105_v46 = vpop.permute.xlu0 %228 }
  0x82   :  { %897 = vperm.xlu1 %10211, %v853_v7   ;;  %692 = vperm.xlu0 %10210, %v644_v42   ;;  %v2110_v42 = vld [vmem:[%s15579_s1 + $0x2f8] sm:$0xff] }
  0x83   :  { %9944 = vmatmul.mubr.bf16.gmra.mrb[48].mxu0 %v10244_v43  ;;  %9980 = vmatmul.mubr.bf16.gmra.mrb[48].mxu1 %v10245_v44  ;;  %v1901_v43 = vld [vmem:[%s15579_s1 + $0x2b0] sm:$0xff]  ;;  %v10256_v44 = vld [vmem:[%s15581_s0 + $0x108] sm:$0xff]  }
  0x84   :  { %9998 = vmatpush3.bf16.msra.mxu0 %v10683_v13  ;;  %10034 = vmatpush3.bf16.msra.mxu1 %v10683_v13  ;;  %v1480_v13 = vld [vmem:[%s15579_s1 + $0x208] sm:$0xff] }
  0x85   :  { %v11115_v48 = vpop.permute.xlu1 %442  ;;  %v11117_v49 = vpop.permute.xlu0 %233  ;;  %9947 = vmatprep.mubr.msk.bf16.mxu0 %vm10564_vm0, %v15591_v5  ;;  %9983 = vmatprep.mubr.msk.bf16.mxu1 %vm10564_vm0, %v15591_v5 }
  0x86   :  { %1307 = vperm.xlu1 %10211, %v1271_v47   ;;  %1102 = vperm.xlu0 %10210, %v1062_v10   ;;  %v10257_v47 = vld [vmem:[%s15581_s0 + $0x130] sm:$0xff]   ;;  %v10558_v10 = vld [vmem:[%s15580_s2 + $0x20] sm:$0xff]  }
  0x87   :  { %9999 = vmatprep.subr.bf16.mxu0 %v15591_v5  ;;  %10035 = vmatprep.subr.bf16.mxu1 %v15591_v5 }
  0x88   :  { %10000 = vmatpush3.bf16.msra.mxu0 %v10698_v16  ;;  %10036 = vmatpush3.bf16.msra.mxu1 %v10698_v16  ;;  %v1898_v16 = vld [vmem:[%s15579_s1 + $0x298] sm:$0xff] }
  0x89   :  { %v11139_v53 = vpop.permute.xlu1 %447  ;;  %v11141_v54 = vpop.permute.xlu0 %238  ;;  %10001 = vmatprep.subr.bf16.mxu0 %v15591_v5  ;;  %10037 = vmatprep.subr.bf16.mxu1 %v15591_v5 }
  0x8a   :  { %1717 = vperm.xlu1 %10211, %v1689_v50   ;;  %1512 = vperm.xlu0 %10210, %v1480_v13  }
  0x8b   :  { %9948 = vmatmul.mubr.bf16.gmra.mrb[52].mxu0 %v10246_v51  ;;  %9984 = vmatmul.mubr.bf16.gmra.mrb[52].mxu1 %v10247_v52  ;;  %v1693_v51 = vld [vmem:[%s15579_s1 + $0x270] sm:$0xff]  ;;  %v1484_v52 = vld [vmem:[%s15579_s1 + $0x228] sm:$0xff] }
  0x8c   :  { %10002 = vmatpush3.bf16.msra.mxu0 %v10713_v19  ;;  %10038 = vmatpush3.bf16.msra.mxu1 %v10713_v19  ;;  %v854_v19 = vld [vmem:[%s15579_s1 + $0x138] sm:$0xff] }
  0x8d   :  { %v11153_v56 = vpop.permute.xlu1 %652  ;;  %v11155_v57 = vpop.permute.xlu0 %647  ;;  %9951 = vmatprep.mubr.msk.bf16.mxu0 %vm10564_vm0, %v15591_v5  ;;  %9987 = vmatprep.mubr.msk.bf16.mxu1 %vm10564_vm0, %v15591_v5 }
  0x8e   :  { %2127 = vperm.xlu1 %10211, %v2107_v55   ;;  %1922 = vperm.xlu0 %10210, %v1898_v16   ;;  %v10559_v55 = vld [vmem:[%s15580_s2 + $0x28] sm:$0xff]  }
  0x8f   :  { %10003 = vmatprep.subr.bf16.mxu0 %v15591_v5  ;;  %10039 = vmatprep.subr.bf16.mxu1 %v15591_v5 }
  0x90   :  { %10004 = vmatpush3.bf16.msra.mxu0 %v10728_v22  ;;  %10040 = vmatpush3.bf16.msra.mxu1 %v10728_v22  ;;  %v1272_v22 = vld [vmem:[%s15579_s1 + $0x1c8] sm:$0xff] }
  0x91   :  { %v11177_v61 = vpop.permute.xlu1 %452  ;;  %v11179_v62 = vpop.permute.xlu0 %243  ;;  %10005 = vmatprep.subr.bf16.mxu0 %v15591_v5  ;;  %10041 = vmatprep.subr.bf16.mxu1 %v15591_v5 }
  0x92   :  { %1107 = vperm.xlu1 %10211, %v1063_v58   ;;  %902 = vperm.xlu0 %10210, %v854_v19   ;;  %v2111_v19 = vld [vmem:[%s15579_s1 + $0x300] sm:$0xff] }
  0x93   :  { %9952 = vmatmul.mubr.bf16.gmra.mrb[56].mxu0 %v10248_v59  ;;  %9988 = vmatmul.mubr.bf16.gmra.mrb[56].mxu1 %v10249_v60  ;;  %v1902_v59 = vld [vmem:[%s15579_s1 + $0x2b8] sm:$0xff]  ;;  %v10258_v60 = vld [vmem:[%s15581_s0 + $0x110] sm:$0xff]  }
  0x94   :  { %10006 = vmatpush3.bf16.msra.mxu0 %v10743_v25  ;;  %10042 = vmatpush3.bf16.msra.mxu1 %v10743_v25  ;;  %v1690_v25 = vld [vmem:[%s15579_s1 + $0x258] sm:$0xff] }
  0x95   :  { %v11191_v0 = vpop.permute.xlu1 %857  ;;  %v11193_v1 = vpop.permute.xlu0 %657  ;;  %10007 = vmatprep.mubr.msk.bf16.mxu0 %vm10564_vm0, %v15591_v5  ;;  %10043 = vmatprep.mubr.msk.bf16.mxu1 %vm10564_vm0, %v15591_v5 }
  0x96   :  { %1517 = vperm.xlu1 %10211, %v1481_v63   ;;  %1312 = vperm.xlu0 %10210, %v1272_v22   ;;  %v10259_v63 = vld [vmem:[%s15581_s0 + $0x138] sm:$0xff]   ;;  %v10560_v22 = vld [vmem:[%s15580_s2 + $0x30] sm:$0xff]  }
  0x97   :  { %10063 = vmatprep.subr.bf16.mxu0 %v15591_v5  ;;  %10099 = vmatprep.subr.bf16.mxu1 %v15591_v5 }
  0x99   :  { %v11213_v8 = vpop.permute.xlu1 %248  ;;  %v11215_v9 = vpop.permute.xlu0 %862 }
  0x9a   :  { %1927 = vperm.xlu1 %10211, %v1899_v2   ;;  %1722 = vperm.xlu0 %10210, %v1690_v25  }
  0x9b   :  { %10008 = vmatmul.mubr.bf16.vlgmr.msra.gmra.mrb[60].mxu0 %v10250_v4  ;;  %10044 = vmatmul.mubr.bf16.vlgmr.msra.gmra.mrb[60].mxu1 %v10251_v6  ;;  %v1903_v4 = vld [vmem:[%s15579_s1 + $0x2c0] sm:$0xff]  ;;  %v1694_v6 = vld [vmem:[%s15579_s1 + $0x278] sm:$0xff] }
  0x9c   :  { %10011 = vmatprep.mubr.msk.bf16.mxu0 %vm10564_vm0, %v15591_v5  ;;  %10047 = vmatprep.mubr.msk.bf16.mxu1 %vm10564_vm0, %v15591_v5 }
  0x9d   :  { %v11227_v14 = vpop.permute.xlu1 %662  ;;  %v11229_v15 = vpop.permute.xlu0 %457  ;;  %10064 = vmatpush3.bf16.msra.mxu0 %v10554_v17  ;;  %10100 = vmatpush3.bf16.msra.mxu1 %v10554_v17 }
  0x9e   :  { %1112 = vperm.xlu1 %10211, %v1064_v11   ;;  %2132 = vperm.xlu0 %10210, %v2108_v12   ;;  %v10561_v11 = vld [vmem:[%s15580_s2 + $0x38] sm:$0xff]  }
  0x9f   :  { %10065 = vmatprep.subr.bf16.mxu0 %v15591_v5  ;;  %10101 = vmatprep.subr.bf16.mxu1 %v15591_v5 }
  0xa1   :  { %v11248_v24 = vpop.permute.xlu1 %1067  ;;  %v11250_v26 = vpop.permute.xlu0 %867  ;;  %10066 = vmatpush3.bf16.msra.mxu0 %v10555_v27  ;;  %10102 = vmatpush3.bf16.msra.mxu1 %v10555_v27 }
  0xa2   :  { %1522 = vperm.xlu1 %10211, %v1482_v18   ;;  %1317 = vperm.xlu0 %10210, %v1273_v20   ;;  %v1904_v18 = vld [vmem:[%s15579_s1 + $0x2c8] sm:$0xff] }
  0xa3   :  { %10012 = vmatmul.mubr.bf16.gmra.mrb[64].mxu0 %v10252_v21  ;;  %10048 = vmatmul.mubr.bf16.gmra.mrb[64].mxu1 %v10253_v23  ;;  %v2112_v20 = vld [vmem:[%s15579_s1 + $0x308] sm:$0xff]  ;;  %v10260_v21 = vld [vmem:[%s15581_s0 + $0x140] sm:$0xff]  }
  0xa4   :  { %10015 = vmatprep.mubr.msk.bf16.mxu0 %vm10564_vm0, %v15591_v5  ;;  %10051 = vmatprep.mubr.msk.bf16.mxu1 %vm10564_vm0, %v15591_v5  ;;  %v10261_v23 = vld [vmem:[%s15581_s0 + $0x168] sm:$0xff]  }
  0xa5   :  { %v11265_v30 = vpop.permute.xlu1 %253  ;;  %v11267_v31 = vpop.permute.xlu0 %1072  ;;  %10067 = vmatprep.subr.bf16.mxu0 %v15591_v5  ;;  %10103 = vmatprep.subr.bf16.mxu1 %v15591_v5 }
  0xa6   :  { %1932 = vperm.xlu1 %10211, %v1900_v28   ;;  %1727 = vperm.xlu0 %10210, %v1691_v29   ;;  %v2114_v29 = vld [vmem:[%s15579_s1 + $0x318] sm:$0xff] }
  0xa7   :  { %10068 = vmatpush3.bf16.msra.mxu0 %v10556_v36  ;;  %10104 = vmatpush3.bf16.msra.mxu1 %v10556_v36  ;;  %v2203_v36 = vld [vmem:[%s15579_s1] sm:$0xff] }
  0xa8   :  { %10069 = vmatprep.subr.bf16.mxu0 %v15591_v5  ;;  %10105 = vmatprep.subr.bf16.mxu1 %v15591_v5 }
  0xa9   :  { %v11288_v37 = vpop.permute.xlu1 %667  ;;  %v11290_v38 = vpop.permute.xlu0 %462 }
  0xaa   :  { %1322 = vperm.xlu1 %10211, %v1274_v32   ;;  %2137 = vperm.xlu0 %10210, %v2109_v33   ;;  %v2113_v32 = vld [vmem:[%s15579_s1 + $0x310] sm:$0xff] }
  0xab   :  { %10016 = vmatmul.mubr.bf16.gmra.mrb[68].mxu0 %v10254_v34  ;;  %10052 = vmatmul.mubr.bf16.gmra.mrb[68].mxu1 %v10255_v35  ;;  %v2204_v35 = vld [vmem:[%s15579_s1 + $0x8] sm:$0xff] }
  0xac   :  { %10070 = vmatpush3.bf16.msra.mxu0 %v10557_v3  ;;  %10106 = vmatpush3.bf16.msra.mxu1 %v10557_v3 }
  0xad   :  { %v11301_v41 = vpop.permute.xlu1 %1077  ;;  %v11303_v7 = vpop.permute.xlu0 %872  ;;  %10019 = vmatprep.mubr.msk.bf16.mxu0 %vm10564_vm0, %v15591_v5  ;;  %10055 = vmatprep.mubr.msk.bf16.mxu1 %vm10564_vm0, %v15591_v5 }
  0xae   :  { %1732 = vperm.xlu1 %10211, %v1692_v39   ;;  %1527 = vperm.xlu0 %10210, %v1483_v40   ;;  %v10262_v39 = vld [vmem:[%s15581_s0 + $0x148] sm:$0xff]   ;;  %v10263_v40 = vld [vmem:[%s15581_s0 + $0x170] sm:$0xff]  }
  0xaf   :  { %10071 = vmatprep.subr.bf16.mxu0 %v15591_v5  ;;  %10107 = vmatprep.subr.bf16.mxu1 %v15591_v5 }
  0xb0   :  { %10072 = vmatpush3.bf16.msra.mxu0 %v10558_v10  ;;  %10108 = vmatpush3.bf16.msra.mxu1 %v10558_v10 }
  0xb1   :  { %v11326_v50 = vpop.permute.xlu1 %1282  ;;  %v11328_v13 = vpop.permute.xlu0 %1277  ;;  %10073 = vmatprep.subr.bf16.mxu0 %v15591_v5  ;;  %10109 = vmatprep.subr.bf16.mxu1 %v15591_v5 }
  0xb2   :  { %2142 = vperm.xlu1 %10211, %v2110_v42   ;;  %1937 = vperm.xlu0 %10210, %v1901_v43   ;;  %v2320_v43 = vld [vmem:[%s15579_s1 + $0x58] sm:$0xff] }
  0xb3   :  { %10020 = vmatmul.mubr.bf16.gmra.mrb[72].mxu0 %v10256_v44  ;;  %10056 = vmatmul.mubr.bf16.gmra.mrb[72].mxu1 %v10257_v47  ;;  %v2319_v44 = vld [vmem:[%s15579_s1 + $0x50] sm:$0xff] }
  0xb4   :  { %10074 = vmatpush3.bf16.msra.mxu0 %v10559_v55  ;;  %10110 = vmatpush3.bf16.msra.mxu1 %v10559_v55  ;;  %v10264_v55 = vld [vmem:[%s15581_s0 + $0x150] sm:$0xff]  }
  0xb5   :  { %v11341_v16 = vpop.permute.xlu1 %467  ;;  %v11343_v58 = vpop.permute.xlu0 %258  ;;  %10023 = vmatprep.mubr.msk.bf16.mxu0 %vm10564_vm0, %v15591_v5  ;;  %10059 = vmatprep.mubr.msk.bf16.mxu1 %vm10564_vm0, %v15591_v5 }
  0xb6   :  { %1737 = vperm.xlu1 %10211, %v1693_v51   ;;  %1532 = vperm.xlu0 %10210, %v1484_v52   ;;  %v2321_v51 = vld [vmem:[%s15579_s1 + $0x60] sm:$0xff]  ;;  %v2205_v52 = vld [vmem:[%s15579_s1 + $0x10] sm:$0xff] }
  0xb7   :  { %10075 = vmatprep.subr.bf16.mxu0 %v15591_v5  ;;  %10111 = vmatprep.subr.bf16.mxu1 %v15591_v5 }
  0xb8   :  { %10076 = vmatpush3.bf16.msra.mxu0 %v10560_v22  ;;  %10112 = vmatpush3.bf16.msra.mxu1 %v10560_v22  ;;  %v2435_v22 = vld [vmem:[%s15579_s1 + $0xa0] sm:$0xff] }
  0xb9   :  { %v11366_v2 = vpop.permute.xlu1 %877  ;;  %v11368_v25 = vpop.permute.xlu0 %672  ;;  %10077 = vmatprep.subr.bf16.mxu0 %v15591_v5  ;;  %10113 = vmatprep.subr.bf16.mxu1 %v15591_v5 }
  0xba   :  { %2147 = vperm.xlu1 %10211, %v2111_v19   ;;  %1942 = vperm.xlu0 %10210, %v1902_v59   ;;  %v10265_v19 = vld [vmem:[%s15581_s0 + $0x178] sm:$0xff]  }
  0xbb   :  { %10024 = vmatmul.mubr.bf16.gmra.mrb[76].mxu0 %v10258_v60  ;;  %10060 = vmatmul.mubr.bf16.gmra.mrb[76].mxu1 %v10259_v63  ;;  %v2436_v63 = vld [vmem:[%s15579_s1 + $0xa8] sm:$0xff] }
  0xbc   :  { %10078 = vmatpush3.bf16.msra.mxu0 %v10561_v11  ;;  %10114 = vmatpush3.bf16.msra.mxu1 %v10561_v11  ;;  %v2322_v11 = vld [vmem:[%s15579_s1 + $0x68] sm:$0xff] }
  0xbd   :  { %v11381_v12 = vpop.permute.xlu1 %1287  ;;  %v11383_v17 = vpop.permute.xlu0 %1082  ;;  %10079 = vmatprep.mubr.msk.bf16.mxu0 %vm10564_vm0, %v15591_v5  ;;  %10115 = vmatprep.mubr.msk.bf16.mxu1 %vm10564_vm0, %v15591_v5 }
  0xbe   :  { %1947 = vperm.xlu1 %10211, %v1903_v4   ;;  %1742 = vperm.xlu0 %10210, %v1694_v6  }
  0xc1   :  { %v11401_v27 = vpop.permute.xlu1 %1492  ;;  %v11403_v28 = vpop.permute.xlu0 %1487 }
  0xc2   :  { %15805 = vst [vmem:[#allocation4_spill] sm:$0xff] %v11401_v27  ;;  %15806 = vst [vmem:[#allocation5_spill] sm:$0xff] %v11403_v28  ;;  %1952 = vperm.xlu1 %10211, %v1904_v18   ;;  %2152 = vperm.xlu0 %10210, %v2112_v20   ;;  %v2206_v18 = vld [vmem:[%s15579_s1 + $0x18] sm:$0xff] }
  0xc3   :  { %10080 = vmatmul.mubr.bf16.vlgmr.msra.gmra.mrb[80].mxu0 %v10260_v21  ;;  %10116 = vmatmul.mubr.bf16.vlgmr.msra.gmra.mrb[80].mxu1 %v10261_v23  ;;  %v10266_v20 = vld [vmem:[%s15581_s0 + $0x158] sm:$0xff]   ;;  %v10267_v21 = vld [vmem:[%s15581_s0 + $0x180] sm:$0xff]  }
  0xc4   :  { %10083 = vmatprep.mubr.msk.bf16.mxu0 %vm10564_vm0, %v15591_v5  ;;  %10119 = vmatprep.mubr.msk.bf16.mxu1 %vm10564_vm0, %v15591_v5 }
  0xc5   :  { %v11415_v33 = vpop.permute.xlu1 %472  ;;  %v11417_v34 = vpop.permute.xlu0 %263 }
  0xc6   :  { %2162 = vperm.xlu1 %10211, %v2114_v29   ;;  %2157 = vperm.xlu0 %10210, %v2113_v32   ;;  %v2551_v32 = vld [vmem:[%s15579_s1 + $0xf0] sm:$0xff] }
  0xc9   :  { %v11431_v3 = vpop.permute.xlu1 %882  ;;  %v11433_v42 = vpop.permute.xlu0 %677 }
  0xca   :  { %2240 = vperm.xlu1 %10211, %v2204_v35   ;;  %2235 = vperm.xlu0 %10210, %v2203_v36   ;;  %v2437_v35 = vld [vmem:[%s15579_s1 + $0xb0] sm:$0xff] }
  0xcb   :  { %10084 = vmatmul.mubr.bf16.gmra.mrb[84].mxu0 %v10262_v39  ;;  %10120 = vmatmul.mubr.bf16.gmra.mrb[84].mxu1 %v10263_v40  ;;  %v2207_v40 = vld [vmem:[%s15579_s1 + $0x20] sm:$0xff] }
  0xcc   :  { %10087 = vmatprep.mubr.msk.bf16.mxu0 %vm10564_vm0, %v15591_v5  ;;  %10123 = vmatprep.mubr.msk.bf16.mxu1 %vm10564_vm0, %v15591_v5 }
  0xcd   :  { %v11445_v47 = vpop.permute.xlu1 %1292  ;;  %v11447_v10 = vpop.permute.xlu0 %1087 }
  0xce   :  { %2356 = vperm.xlu1 %10211, %v2320_v43   ;;  %2351 = vperm.xlu0 %10210, %v2319_v44   ;;  %v2552_v43 = vld [vmem:[%s15579_s1 + $0xf8] sm:$0xff]  ;;  %v10268_v44 = vld [vmem:[%s15581_s0 + $0x160] sm:$0xff]  }
  0xd1   :  { %v11461_v59 = vpop.permute.xlu1 %1697  ;;  %v11463_v60 = vpop.permute.xlu0 %1497 }
  0xd2   :  { %15807 = vst [vmem:[#allocation6_spill] sm:$0xff] %v11461_v59  ;;  %15808 = vst [vmem:[#allocation7_spill] sm:$0xff] %v11463_v60  ;;  %2361 = vperm.xlu1 %10211, %v2321_v51   ;;  %2245 = vperm.xlu0 %10210, %v2205_v52   ;;  %v10269_v51 = vld [vmem:[%s15581_s0 + $0x188] sm:$0xff]  }
  0xd3   :  { %10088 = vmatmul.mubr.bf16.gmra.mrb[88].mxu0 %v10264_v55  ;;  %10124 = vmatmul.mubr.bf16.gmra.mrb[88].mxu1 %v10265_v19  ;;  %v2438_v19 = vld [vmem:[%s15579_s1 + $0xb8] sm:$0xff] }
  0xd4   :  { %10091 = vmatprep.mubr.msk.bf16.mxu0 %vm10564_vm0, %v15591_v5  ;;  %10127 = vmatprep.mubr.msk.bf16.mxu1 %vm10564_vm0, %v15591_v5 }
  0xd5   :  { %v11475_v4 = vpop.permute.xlu1 %268  ;;  %v11477_v6 = vpop.permute.xlu0 %1702 }
  0xd6   :  { %15809 = vst [vmem:[#allocation8_spill] sm:$0xff] %v11477_v6  ;;  %2472 = vperm.xlu1 %10211, %v2436_v63   ;;  %2467 = vperm.xlu0 %10210, %v2435_v22   ;;  %v2323_v63 = vld [vmem:[%s15579_s1 + $0x70] sm:$0xff] }
  0xd9   :  { %v11491_v23 = vpop.permute.xlu1 %682  ;;  %v11493_v29 = vpop.permute.xlu0 %477 }
  0xda   :  { %2366 = vperm.xlu1 %10211, %v2322_v11   ;;  %2250 = vperm.xlu0 %10210, %v2206_v18   ;;  %v2667_v18 = vld [vmem:[%s15579_s1 + $0x140] sm:$0xff] }
  0xdb   :  { %10092 = vmatmul.mubr.bf16.gmra.mrb[92].mxu0 %v10266_v20  ;;  %10128 = vmatmul.mubr.bf16.gmra.mrb[92].mxu1 %v10267_v21  ;;  %v2553_v20 = vld [vmem:[%s15579_s1 + $0x100] sm:$0xff] }
  0xdc   :  { %10095 = vmatprep.mubr.msk.bf16.mxu0 %vm10564_vm0, %v15591_v5  ;;  %10131 = vmatprep.mubr.msk.bf16.mxu1 %vm10564_vm0, %v15591_v5 }
  0xdd   :  { %v11505_v36 = vpop.permute.xlu1 %1092  ;;  %v11507_v39 = vpop.permute.xlu0 %887 }
  0xde   :  { %2583 = vperm.xlu1 %10211, %v2551_v32   ;;  %2477 = vperm.xlu0 %10210, %v2437_v35   ;;  %v2208_v35 = vld [vmem:[%s15579_s1 + $0x28] sm:$0xff] }
  0xe1   :  { %v11521_v52 = vpop.permute.xlu1 %1502  ;;  %v11523_v55 = vpop.permute.xlu0 %1297 }
  0xe2   :  { %15810 = vst [vmem:[#allocation9_spill] sm:$0xff] %v11521_v52  ;;  %2255 = vperm.xlu1 %10211, %v2207_v40   ;;  %2588 = vperm.xlu0 %10210, %v2552_v43   ;;  %v2668_v40 = vld [vmem:[%s15579_s1 + $0x148] sm:$0xff]  ;;  %v2784_v52 = vld [vmem:[%s15579_s1 + $0x198] sm:$0xff] }
  0xe3   :  { %10096 = vmatmul.mubr.bf16.gmra.mrb[96].mxu0 %v10268_v44  ;;  %10132 = vmatmul.mubr.bf16.gmra.mrb[96].mxu1 %v10269_v51  ;;  %v2439_v51 = vld [vmem:[%s15579_s1 + $0xc0] sm:$0xff] }
  0xe5   :  { %v11531_v22 = vpop.permute.xlu1 %1907  ;;  %v11533_v11 = vpop.permute.xlu0 %1707 }
  0xe6   :  { %15811 = vst [vmem:[#allocation10_spill] sm:$0xff] %v11531_v22  ;;  %15812 = vst [vmem:[#allocation11_spill] sm:$0xff] %v11533_v11  ;;  %2482 = vperm.xlu1 %10211, %v2438_v19   ;;  %2371 = vperm.xlu0 %10210, %v2323_v63   ;;  %v2324_v19 = vld [vmem:[%s15579_s1 + $0x78] sm:$0xff]  ;;  %v2783_v11 = vld [vmem:[%s15579_s1 + $0x190] sm:$0xff] }
  0xe9   :  { %v11541_v21 = vpop.permute.xlu1 %273  ;;  %v11543_v32 = vpop.permute.xlu0 %1912 }
  0xea   :  { %15813 = vst [vmem:[#allocation12_spill] sm:$0xff] %v11543_v32  ;;  %2699 = vperm.xlu1 %10211, %v2667_v18   ;;  %2593 = vperm.xlu0 %10210, %v2553_v20   ;;  %v2669_v20 = vld [vmem:[%s15579_s1 + $0x150] sm:$0xff] }
  0xed   :  { %v11551_v43 = vpop.permute.xlu1 %687  ;;  %v11553_v44 = vpop.permute.xlu0 %482 }
  0xee   :  { %2260 = vperm.xlu1 %10211, %v2208_v35   ;;  %2704 = vperm.xlu0 %10210, %v2668_v40   ;;  %v2554_v35 = vld [vmem:[%s15579_s1 + $0x108] sm:$0xff] }
  0xf1   :  { %v11561_v63 = vpop.permute.xlu1 %1097  ;;  %v11563_v18 = vpop.permute.xlu0 %892 }
  0xf2   :  { %15814 = vst [vmem:[#allocation13_spill] sm:$0xff] %v11561_v63  ;;  %2487 = vperm.xlu1 %10211, %v2439_v51   ;;  %2376 = vperm.xlu0 %10210, %v2324_v19  }
  0xf5   :  { %v11571_v40 = vpop.permute.xlu1 %1507  ;;  %v11573_v5 = vpop.permute.xlu0 %1302 }
  0xf6   :  { %15815 = vst [vmem:[#allocation14_spill] sm:$0xff] %v11571_v40  ;;  %15816 = vst [vmem:[#allocation15_spill] sm:$0xff] %v11573_v5  ;;  %2709 = vperm.xlu1 %10211, %v2669_v20   ;;  %2598 = vperm.xlu0 %10210, %v2554_v35   ;;  %v11575_v32 = vpop.f32.mrb[0].mxu0  ;;  %v11577_v22 = vpop.f32.mrb[0].mxu1 }
  0xf7   :  { %15817 = vst [vmem:[#allocation16_spill] sm:$0xff] %v11575_v32  ;;  %15818 = vst [vmem:[#allocation17_spill] sm:$0xff] %v11577_v22  ;;  %v9793_v51 = vpop.f32.mrb[1].mxu0  ;;  %v9829_v19 = vpop.f32.mrb[1].mxu1  ;;  %v276_v20 = vmul.f32 %v11105_v46, %v11575_v32  ;;  %v485_v35 = vmul.f32 %v11103_v45, %v11577_v22  ;;  %v2325_v45 = vld [vmem:[%s15579_s1 + $0x80] sm:$0xff]  ;;  %v2209_v46 = vld [vmem:[%s15579_s1 + $0x30] sm:$0xff] }
  0xf8   :  { %v11585_v60 = vpop.f32.mrb[2].mxu0  ;;  %v11587_v40 = vpop.f32.mrb[2].mxu1 }
  0xf9   :  { %15819 = vst [vmem:[#allocation18_spill] sm:$0xff] %v11585_v60  ;;  %15820 = vst [vmem:[#allocation19_spill] sm:$0xff] %v11587_v40  ;;  %v277_v51 = vmul.f32 %v11117_v49, %v11585_v60  ;;  %v486_v19 = vmul.f32 %v11115_v48, %v11587_v40  ;;  %v11597_v6 = vpop.permute.xlu1 %1917  ;;  %v11599_v27 = vpop.permute.xlu0 %1712 }
  0xfa   :  { %2820 = vperm.xlu1 %10211, %v2784_v52   ;;  %2815 = vperm.xlu0 %10210, %v2783_v11   ;;  %v9794_v59 = vpop.f32.mrb[3].mxu0  ;;  %v9830_v28 = vpop.f32.mrb[3].mxu1 }
  0xfb   :  { %v286_v63 = vadd.f32 %v277_v51, %v276_v20  ;;  %v495_v5 = vadd.f32 %v486_v19, %v485_v35  ;;  %v2555_v51 = vld [vmem:[%s15579_s1 + $0x110] sm:$0xff]  ;;  %v2440_v19 = vld [vmem:[%s15579_s1 + $0xc8] sm:$0xff] }
  0xfd   :  { %v11607_v49 = vpop.permute.xlu1 %2122  ;;  %v11609_v48 = vpop.permute.xlu0 %2117 }
  0xfe   :  { %2381 = vperm.xlu1 %10211, %v2325_v45   ;;  %2265 = vperm.xlu0 %10210, %v2209_v46   ;;  %v11611_v52 = vpop.f32.mrb[4].mxu0  ;;  %v11613_v59 = vpop.f32.mrb[4].mxu1 }
  0xff   :  { %15821 = vst [vmem:[#allocation20_spill] sm:$0xff] %v11611_v52  ;;  %15822 = vst [vmem:[#allocation21_spill] sm:$0xff] %v11613_v59  ;;  %v278_v28 = vmul.f32 %v11141_v54, %v11611_v52  ;;  %v487_v11 = vmul.f32 %v11139_v53, %v11613_v59  ;;  %v9797_v20 = vpop.f32.mrb[5].mxu0  ;;  %v9833_v35 = vpop.f32.mrb[5].mxu1 }
 0x100   :  { %v11625_v45 = vpop.f32.mrb[6].mxu0  ;;  %v11627_v46 = vpop.f32.mrb[6].mxu1 }
 0x101   :  { %15823 = vst [vmem:[#allocation22_spill] sm:$0xff] %v11625_v45  ;;  %15824 = vst [vmem:[#allocation23_spill] sm:$0xff] %v11627_v46  ;;  %v287_v40 = vadd.f32 %v286_v63, %v278_v28  ;;  %v496_v22 = vadd.f32 %v495_v5, %v487_v11  ;;  %v279_v54 = vmul.f32 %v11179_v62, %v11625_v45  ;;  %v11633_v20 = vpop.permute.xlu1 %897  ;;  %v11635_v35 = vpop.permute.xlu0 %692  ;;  %v2785_v5 = vld [vmem:[%s15579_s1 + $0x1a0] sm:$0xff]  ;;  %v2670_v62 = vld [vmem:[%s15579_s1 + $0x158] sm:$0xff] }
 0x102   :  { %v488_v53 = vmul.f32 %v11177_v61, %v11627_v46  ;;  %2603 = vperm.xlu1 %10211, %v2555_v51   ;;  %2492 = vperm.xlu0 %10210, %v2440_v19   ;;  %v9798_v59 = vpop.f32.mrb[7].mxu0  ;;  %v9834_v52 = vpop.f32.mrb[7].mxu1  ;;  %v2900_v51 = vld [vmem:[%s15579_s1 + $0x1e8] sm:$0xff]  ;;  %v2899_v19 = vld [vmem:[%s15579_s1 + $0x1e0] sm:$0xff] }
 0x103   :  { %v288_v60 = vadd.f32 %v287_v40, %v279_v54 }
 0x104   :  { %v497_v32 = vadd.f32 %v496_v22, %v488_v53 }
 0x105   :  { %v11643_v63 = vpop.permute.xlu1 %1307  ;;  %v11645_v61 = vpop.permute.xlu0 %1102 }
 0x106   :  { %2825 = vperm.xlu1 %10211, %v2785_v5   ;;  %2714 = vperm.xlu0 %10210, %v2670_v62   ;;  %v11647_v28 = vpop.f32.mrb[8].mxu0  ;;  %v11649_v59 = vpop.f32.mrb[8].mxu1 }
 0x107   :  { %15825 = vst [vmem:[#allocation24_spill] sm:$0xff] %v11647_v28  ;;  %15826 = vst [vmem:[#allocation25_spill] sm:$0xff] %v11649_v59  ;;  %v280_v22 = vmul.f32 %v11213_v8, %v11647_v28  ;;  %v489_v40 = vmul.f32 %v11229_v15, %v11649_v59  ;;  %v9801_v52 = vpop.f32.mrb[9].mxu0  ;;  %v9837_v11 = vpop.f32.mrb[9].mxu1 }
 0x108   :  { %v11661_v54 = vpop.f32.mrb[10].mxu0  ;;  %v11663_v53 = vpop.f32.mrb[10].mxu1 }
 0x109   :  { %15827 = vst [vmem:[#allocation26_spill] sm:$0xff] %v11661_v54  ;;  %15828 = vst [vmem:[#allocation27_spill] sm:$0xff] %v11663_v53  ;;  %v289_v5 = vadd.f32 %v288_v60, %v280_v22  ;;  %v498_v62 = vadd.f32 %v497_v32, %v489_v40  ;;  %v281_v8 = vmul.f32 %v11265_v30, %v11661_v54  ;;  %v11669_v52 = vpop.permute.xlu1 %1717  ;;  %v11671_v11 = vpop.permute.xlu0 %1512  ;;  %v2326_v60 = vld [vmem:[%s15579_s1 + $0x88] sm:$0xff]  ;;  %v2210_v30 = vld [vmem:[%s15579_s1 + $0x38] sm:$0xff] }
 0x10a   :  { %v490_v15 = vmul.f32 %v11290_v38, %v11663_v53  ;;  %2936 = vperm.xlu1 %10211, %v2900_v51   ;;  %2931 = vperm.xlu0 %10210, %v2899_v19   ;;  %v9802_v59 = vpop.f32.mrb[11].mxu0  ;;  %v9838_v46 = vpop.f32.mrb[11].mxu1 }
 0x10b   :  { %v290_v28 = vadd.f32 %v289_v5, %v281_v8  ;;  %v2556_v5 = vld [vmem:[%s15579_s1 + $0x118] sm:$0xff] }
 0x10c   :  { %v499_v45 = vadd.f32 %v498_v62, %v490_v15  ;;  %v2441_v62 = vld [vmem:[%s15579_s1 + $0xd0] sm:$0xff] }
 0x10d   :  { %v11679_v32 = vpop.permute.xlu1 %2127  ;;  %v11681_v38 = vpop.permute.xlu0 %1922 }
 0x10e   :  { %15829 = vst [vmem:[#allocation28_spill] sm:$0xff] %v11681_v38  ;;  %2386 = vperm.xlu1 %10211, %v2326_v60   ;;  %2270 = vperm.xlu0 %10210, %v2210_v30   ;;  %v11683_v22 = vpop.f32.mrb[12].mxu0  ;;  %v11685_v59 = vpop.f32.mrb[12].mxu1  ;;  %v2672_v38 = vld [vmem:[%s15579_s1 + $0x168] sm:$0xff] }
 0x10f   :  { %15830 = vst [vmem:[#allocation29_spill] sm:$0xff] %v11683_v22  ;;  %15831 = vst [vmem:[#allocation30_spill] sm:$0xff] %v11685_v59  ;;  %v282_v46 = vmul.f32 %v11343_v58, %v11683_v22  ;;  %v491_v40 = vmul.f32 %v11341_v16, %v11685_v59  ;;  %v9805_v51 = vpop.f32.mrb[13].mxu0  ;;  %v9841_v19 = vpop.f32.mrb[13].mxu1 }
 0x110   :  { %v11697_v8 = vpop.f32.mrb[14].mxu0  ;;  %v11699_v15 = vpop.f32.mrb[14].mxu1 }
 0x111   :  { %15832 = vst [vmem:[#allocation31_spill] sm:$0xff] %v11697_v8  ;;  %15833 = vst [vmem:[#allocation32_spill] sm:$0xff] %v11699_v15  ;;  %v291_v60 = vadd.f32 %v290_v28, %v282_v46  ;;  %v500_v30 = vadd.f32 %v499_v45, %v491_v40  ;;  %v283_v58 = vmul.f32 %v11417_v34, %v11697_v8  ;;  %v11705_v51 = vpop.permute.xlu1 %1107  ;;  %v11707_v19 = vpop.permute.xlu0 %902  ;;  %v2786_v45 = vld [vmem:[%s15579_s1 + $0x1a8] sm:$0xff]  ;;  %v2671_v34 = vld [vmem:[%s15579_s1 + $0x160] sm:$0xff] }
 0x112   :  { %v492_v16 = vmul.f32 %v11415_v33, %v11699_v15  ;;  %2608 = vperm.xlu1 %10211, %v2556_v5   ;;  %2497 = vperm.xlu0 %10210, %v2441_v62   ;;  %v9806_v59 = vpop.f32.mrb[15].mxu0  ;;  %v9842_v53 = vpop.f32.mrb[15].mxu1 }
 0x113   :  { %v292_v22 = vadd.f32 %v291_v60, %v283_v58  ;;  %v3015_v60 = vld [vmem:[%s15579_s1 + $0x230] sm:$0xff] }
 0x114   :  { %v501_v54 = vadd.f32 %v500_v30, %v492_v16  ;;  %v2901_v30 = vld [vmem:[%s15579_s1 + $0x1f0] sm:$0xff] }
 0x115   :  { %v11715_v28 = vpop.permute.xlu1 %1517  ;;  %v11717_v33 = vpop.permute.xlu0 %1312 }
 0x116   :  { %2830 = vperm.xlu1 %10211, %v2786_v45   ;;  %2719 = vperm.xlu0 %10210, %v2671_v34   ;;  %v11719_v46 = vpop.f32.mrb[16].mxu0  ;;  %v11721_v59 = vpop.f32.mrb[16].mxu1 }
 0x117   :  { %15834 = vst [vmem:[#allocation33_spill] sm:$0xff] %v11719_v46  ;;  %15835 = vst [vmem:[#allocation34_spill] sm:$0xff] %v11721_v59  ;;  %v284_v53 = vmul.f32 %v11475_v4, %v11719_v46  ;;  %v493_v40 = vmul.f32 %v11493_v29, %v11721_v59  ;;  %v9809_v5 = vpop.f32.mrb[17].mxu0  ;;  %v9845_v62 = vpop.f32.mrb[17].mxu1 }
 0x118   :  { %v11733_v58 = vpop.f32.mrb[18].mxu0  ;;  %v11735_v16 = vpop.f32.mrb[18].mxu1 }
 0x119   :  { %15836 = vst [vmem:[#allocation35_spill] sm:$0xff] %v11733_v58  ;;  %15837 = vst [vmem:[#allocation36_spill] sm:$0xff] %v11735_v16  ;;  %v293_v45 = vadd.f32 %v292_v22, %v284_v53  ;;  %v502_v34 = vadd.f32 %v501_v54, %v493_v40  ;;  %v285_v4 = vmul.f32 %v11541_v21, %v11733_v58  ;;  %v11741_v5 = vpop.permute.xlu1 %1927  ;;  %v11743_v62 = vpop.permute.xlu0 %1722  ;;  %v2211_v54 = vld [vmem:[%s15579_s1 + $0x40] sm:$0xff]  ;;  %v3016_v21 = vld [vmem:[%s15579_s1 + $0x238] sm:$0xff] }
 0x11a   :  { %v494_v29 = vmul.f32 %v11553_v44, %v11735_v16  ;;  %15838 = vst [vmem:[#allocation37_spill] sm:$0xff] %v11741_v5  ;;  %3047 = vperm.xlu1 %10211, %v3015_v60   ;;  %2941 = vperm.xlu0 %10210, %v2901_v30   ;;  %v9810_v59 = vpop.f32.mrb[19].mxu0  ;;  %v9846_v15 = vpop.f32.mrb[19].mxu1 }
 0x11b   :  { %v294_v46 = vadd.f32 %v293_v45, %v285_v4  ;;  %v2442_v4 = vld [vmem:[%s15579_s1 + $0xd8] sm:$0xff] }
 0x11c   :  { %v503_v8 = vadd.f32 %v502_v34, %v494_v29  ;;  %v2327_v29 = vld [vmem:[%s15579_s1 + $0x90] sm:$0xff] }
 0x11d   :  { %v295_v22 = vrot.slane %v294_v46, 4  ;;  %v11751_v53 = vpop.permute.xlu1 %1112  ;;  %v11753_v40 = vpop.permute.xlu0 %2132 }
 0x11e   :  { %v504_v44 = vrot.slane %v503_v8, 4  ;;  %15839 = vst [vmem:[#allocation38_spill] sm:$0xff] %v11753_v40  ;;  %2275 = vperm.xlu1 %10211, %v2211_v54   ;;  %3052 = vperm.xlu0 %10210, %v3016_v21   ;;  %v11755_v59 = vpop.f32.mrb[20].mxu0  ;;  %v11757_v15 = vpop.f32.mrb[20].mxu1 }
 0x11f   :  { %15840 = vst [vmem:[#allocation39_spill] sm:$0xff] %v11755_v59  ;;  %15841 = vst [vmem:[#allocation40_spill] sm:$0xff] %v11757_v15  ;;  %v296_v60 = vadd.f32 %v295_v22, %v294_v46  ;;  %v9865_v45 = vpop.f32.mrb[21].mxu0  ;;  %v9901_v34 = vpop.f32.mrb[21].mxu1  ;;  %v695_v54 = vmul.f32 %v11155_v57, %v11755_v59  ;;  %v905_v21 = vmul.f32 %v11191_v0, %v11757_v15 }
 0x120   :  { %v505_v30 = vadd.f32 %v504_v44, %v503_v8  ;;  %v11769_v16 = vpop.f32.mrb[22].mxu0  ;;  %v11771_v46 = vpop.f32.mrb[22].mxu1 }
 0x121   :  { %15842 = vst [vmem:[#allocation41_spill] sm:$0xff] %v11769_v16  ;;  %15843 = vst [vmem:[#allocation42_spill] sm:$0xff] %v11771_v46  ;;  %v297_v8 = vrot.slane %v296_v60, 2  ;;  %v696_v44 = vmul.f32 %v11153_v56, %v11769_v16  ;;  %v906_v45 = vmul.f32 %v11215_v9, %v11771_v46  ;;  %v11777_v34 = vpop.permute.xlu1 %1522  ;;  %v11779_v58 = vpop.permute.xlu0 %1317  ;;  %v2557_v56 = vld [vmem:[%s15579_s1 + $0x120] sm:$0xff] }
 0x122   :  { %v506_v22 = vrot.slane %v505_v30, 2  ;;  %2502 = vperm.xlu1 %10211, %v2442_v4   ;;  %2391 = vperm.xlu0 %10210, %v2327_v29   ;;  %v9866_v57 = vpop.f32.mrb[23].mxu0  ;;  %v9902_v0 = vpop.f32.mrb[23].mxu1 }
 0x123   :  { %v298_v15 = vadd.f32 %v297_v8, %v296_v60  ;;  %v705_v5 = vadd.f32 %v696_v44, %v695_v54  ;;  %v915_v40 = vadd.f32 %v906_v45, %v905_v21  ;;  %v2902_v45 = vld [vmem:[%s15579_s1 + $0x1f8] sm:$0xff] }
 0x124   :  { %v507_v59 = vadd.f32 %v506_v22, %v505_v30 }
 0x125   :  { %v299_v9 = vrot.slane %v298_v15, 1  ;;  %v11787_v16 = vpop.permute.xlu1 %1932  ;;  %v11789_v4 = vpop.permute.xlu0 %1727 }
 0x126   :  { %v508_v46 = vrot.slane %v507_v59, 1  ;;  %2724 = vperm.xlu1 %10211, %v2672_v38   ;;  %2613 = vperm.xlu0 %10210, %v2557_v56   ;;  %v11791_v60 = vpop.f32.mrb[24].mxu0  ;;  %v11793_v30 = vpop.f32.mrb[24].mxu1  ;;  %v2787_v38 = vld [vmem:[%s15579_s1 + $0x1b0] sm:$0xff] }
 0x127   :  { %15844 = vst [vmem:[#allocation43_spill] sm:$0xff] %v11791_v60  ;;  %15845 = vst [vmem:[#allocation44_spill] sm:$0xff] %v11793_v30  ;;  %v300_v29 = vadd.f32 %v299_v9, %v298_v15  ;;  %v697_v21 = vmul.f32 %v11193_v1, %v11791_v60  ;;  %v907_v8 = vmul.f32 %v11250_v26, %v11793_v30  ;;  %v9869_v22 = vpop.f32.mrb[25].mxu0  ;;  %v9905_v44 = vpop.f32.mrb[25].mxu1 }
 0x128   :  { %v509_v54 = vadd.f32 %v508_v46, %v507_v59  ;;  %v11805_v57 = vpop.f32.mrb[26].mxu0  ;;  %v11807_v15 = vpop.f32.mrb[26].mxu1 }
 0x129   :  { %15846 = vst [vmem:[#allocation45_spill] sm:$0xff] %v11805_v57  ;;  %15847 = vst [vmem:[#allocation46_spill] sm:$0xff] %v11807_v15  ;;  %v706_v1 = vadd.f32 %v705_v5, %v697_v21  ;;  %v916_v46 = vadd.f32 %v915_v40, %v907_v8  ;;  %v698_v26 = vmul.f32 %v11227_v14, %v11805_v57  ;;  %v11813_v0 = vpop.permute.xlu1 %1322  ;;  %v11815_v56 = vpop.permute.xlu0 %2137  ;;  %v3131_v5 = vld [vmem:[%s15579_s1 + $0x280] sm:$0xff] }
 0x12a   :  { %v11809_v59 = vadd.f32 %v509_v54, %v300_v29  ;;  %v908_v9 = vmul.f32 %v11303_v7, %v11807_v15  ;;  %2946 = vperm.xlu1 %10211, %v2902_v45   ;;  %2835 = vperm.xlu0 %10210, %v2787_v38   ;;  %v9870_v22 = vpop.f32.mrb[27].mxu0  ;;  %v9906_v44 = vpop.f32.mrb[27].mxu1  ;;  %v3017_v14 = vld [vmem:[%s15579_s1 + $0x240] sm:$0xff] }
 0x12b   :  { %v707_v30 = vadd.f32 %v706_v1, %v698_v26  ;;  %v3132_v26 = vld [vmem:[%s15579_s1 + $0x288] sm:$0xff] }
 0x12c   :  { %v917_v40 = vadd.f32 %v916_v46, %v908_v9  ;;  %v2212_v46 = vld [vmem:[%s15579_s1 + $0x48] sm:$0xff] }
 0x12d   :  { %v11825_v29 = vpop.permute.xlu1 %1732  ;;  %v11827_v54 = vpop.permute.xlu0 %1527 }
 0x12e   :  { %3163 = vperm.xlu1 %10211, %v3131_v5   ;;  %3057 = vperm.xlu0 %10210, %v3017_v14   ;;  %v11829_v7 = vpop.f32.mrb[28].mxu0  ;;  %v11831_v21 = vpop.f32.mrb[28].mxu1 }
 0x12f   :  { %15848 = vst [vmem:[#allocation47_spill] sm:$0xff] %v11829_v7  ;;  %15849 = vst [vmem:[#allocation48_spill] sm:$0xff] %v11831_v21  ;;  %v699_v8 = vmul.f32 %v11288_v37, %v11829_v7  ;;  %v909_v45 = vmul.f32 %v11366_v2, %v11831_v21  ;;  %v9873_v38 = vpop.f32.mrb[29].mxu0  ;;  %v9909_v1 = vpop.f32.mrb[29].mxu1 }
 0x130   :  { %v11843_v9 = vpop.f32.mrb[30].mxu0  ;;  %v11845_v22 = vpop.f32.mrb[30].mxu1 }
 0x131   :  { %15850 = vst [vmem:[#allocation49_spill] sm:$0xff] %v11843_v9  ;;  %15851 = vst [vmem:[#allocation50_spill] sm:$0xff] %v11845_v22  ;;  %v708_v44 = vadd.f32 %v707_v30, %v699_v8  ;;  %v918_v5 = vadd.f32 %v917_v40, %v909_v45  ;;  %v700_v37 = vmul.f32 %v11368_v25, %v11843_v9  ;;  %v11851_v14 = vpop.permute.xlu1 %2142  ;;  %v11853_v38 = vpop.permute.xlu0 %1937  ;;  %v2443_v30 = vld [vmem:[%s15579_s1 + $0xe0] sm:$0xff]  ;;  %v2328_v25 = vld [vmem:[%s15579_s1 + $0x98] sm:$0xff] }
 0x132   :  { %v910_v2 = vmul.f32 %v11431_v3, %v11845_v22  ;;  %2280 = vperm.xlu1 %10211, %v2212_v46   ;;  %3168 = vperm.xlu0 %10210, %v3132_v26   ;;  %v9874_v1 = vpop.f32.mrb[31].mxu0  ;;  %v9910_v21 = vpop.f32.mrb[31].mxu1 }
 0x133   :  { %v709_v15 = vadd.f32 %v708_v44, %v700_v37  ;;  %v2558_v37 = vld [vmem:[%s15579_s1 + $0x128] sm:$0xff] }
 0x134   :  { %v919_v7 = vadd.f32 %v918_v5, %v910_v2  ;;  %v2673_v5 = vld [vmem:[%s15579_s1 + $0x170] sm:$0xff] }
 0x135   :  { %v11861_v40 = vpop.permute.xlu1 %1737  ;;  %v11863_v3 = vpop.permute.xlu0 %1532 }
 0x136   :  { %2507 = vperm.xlu1 %10211, %v2443_v30   ;;  %2396 = vperm.xlu0 %10210, %v2328_v25   ;;  %v11865_v8 = vpop.f32.mrb[32].mxu0  ;;  %v11867_v45 = vpop.f32.mrb[32].mxu1 }
 0x137   :  { %15852 = vst [vmem:[#allocation51_spill] sm:$0xff] %v11865_v8  ;;  %15853 = vst [vmem:[#allocation52_spill] sm:$0xff] %v11867_v45  ;;  %v701_v21 = vmul.f32 %v11433_v42, %v11865_v8  ;;  %v911_v46 = vmul.f32 %v11507_v39, %v11867_v45  ;;  %v9877_v26 = vpop.f32.mrb[33].mxu0  ;;  %v9913_v44 = vpop.f32.mrb[33].mxu1 }
 0x138   :  { %v11879_v2 = vpop.f32.mrb[34].mxu0  ;;  %v11881_v1 = vpop.f32.mrb[34].mxu1 }
 0x139   :  { %15854 = vst [vmem:[#allocation53_spill] sm:$0xff] %v11879_v2  ;;  %15855 = vst [vmem:[#allocation54_spill] sm:$0xff] %v11881_v1  ;;  %v710_v30 = vadd.f32 %v709_v15, %v701_v21  ;;  %v920_v25 = vadd.f32 %v919_v7, %v911_v46  ;;  %v702_v42 = vmul.f32 %v11491_v23, %v11879_v2  ;;  %v11887_v26 = vpop.permute.xlu1 %2147  ;;  %v11889_v44 = vpop.permute.xlu0 %1942  ;;  %v2903_v15 = vld [vmem:[%s15579_s1 + $0x200] sm:$0xff]  ;;  %v2788_v23 = vld [vmem:[%s15579_s1 + $0x1b8] sm:$0xff] }
 0x13a   :  { %v912_v39 = vmul.f32 %v11563_v18, %v11881_v1  ;;  %2729 = vperm.xlu1 %10211, %v2673_v5   ;;  %2618 = vperm.xlu0 %10210, %v2558_v37   ;;  %v9878_v45 = vpop.f32.mrb[35].mxu0  ;;  %v9914_v22 = vpop.f32.mrb[35].mxu1 }
 0x13b   :  { %v711_v8 = vadd.f32 %v710_v30, %v702_v42  ;;  %v3133_v30 = vld [vmem:[%s15579_s1 + $0x290] sm:$0xff] }
 0x13c   :  { %v921_v9 = vadd.f32 %v920_v25, %v912_v39  ;;  %v3018_v25 = vld [vmem:[%s15579_s1 + $0x248] sm:$0xff] }
 0x13d   :  { %v11897_v7 = vpop.permute.xlu1 %1947  ;;  %v11899_v18 = vpop.permute.xlu0 %1742 }
 0x13e   :  { %2951 = vperm.xlu1 %10211, %v2903_v15   ;;  %2840 = vperm.xlu0 %10210, %v2788_v23   ;;  %v11901_v21 = vpop.f32.mrb[36].mxu0  ;;  %v11903_v45 = vpop.f32.mrb[36].mxu1 }
 0x13f   :  { %15856 = vst [vmem:[#allocation55_spill] sm:$0xff] %v11901_v21  ;;  %15857 = vst [vmem:[#allocation56_spill] sm:$0xff] %v11903_v45  ;;  %v703_v22 = vmul.f32 %v11551_v43, %v11901_v21  ;;  %v913_v46 = vmul.f32 %v11633_v20, %v11903_v45  ;;  %v9881_v5 = vpop.f32.mrb[37].mxu0  ;;  %v9917_v37 = vpop.f32.mrb[37].mxu1 }
 0x140   :  { %v11915_v42 = vpop.f32.mrb[38].mxu0  ;;  %v11917_v39 = vpop.f32.mrb[38].mxu1 }
 0x141   :  { %15858 = vst [vmem:[#allocation57_spill] sm:$0xff] %v11915_v42  ;;  %15859 = vst [vmem:[#allocation58_spill] sm:$0xff] %v11917_v39  ;;  %v712_v15 = vadd.f32 %v711_v8, %v703_v22  ;;  %v922_v23 = vadd.f32 %v921_v9, %v913_v46  ;;  %v704_v43 = vmul.f32 %v11635_v35, %v11915_v42  ;;  %v11923_v5 = vpop.permute.xlu1 %1952  ;;  %v11925_v37 = vpop.permute.xlu0 %2152  ;;  %v3248_v9 = vld [vmem:[%s15579_s1 + $0x2d8] sm:$0xff]  ;;  %v3247_v35 = vld [vmem:[%s15579_s1 + $0x2d0] sm:$0xff] }
 0x142   :  { %v914_v20 = vmul.f32 %v11707_v19, %v11917_v39  ;;  %3173 = vperm.xlu1 %10211, %v3133_v30   ;;  %3062 = vperm.xlu0 %10210, %v3018_v25   ;;  %v9882_v45 = vpop.f32.mrb[39].mxu0  ;;  %v9918_v1 = vpop.f32.mrb[39].mxu1 }
 0x143   :  { %v713_v21 = vadd.f32 %v712_v15, %v704_v43  ;;  %v2559_v43 = vld [vmem:[%s15579_s1 + $0x130] sm:$0xff] }
 0x144   :  { %v923_v2 = vadd.f32 %v922_v23, %v914_v20  ;;  %v2444_v20 = vld [vmem:[%s15579_s1 + $0xe8] sm:$0xff] }
 0x145   :  { %v714_v8 = vrot.slane %v713_v21, 4  ;;  %v11933_v22 = vpop.permute.xlu1 %2162  ;;  %v11935_v46 = vpop.permute.xlu0 %2157 }
 0x146   :  { %v924_v19 = vrot.slane %v923_v2, 4  ;;  %15860 = vst [vmem:[#allocation59_spill] sm:$0xff] %v11933_v22  ;;  %3284 = vperm.xlu1 %10211, %v3248_v9   ;;  %3279 = vperm.xlu0 %10210, %v3247_v35   ;;  %v11937_v45 = vpop.f32.mrb[40].mxu0  ;;  %v11939_v1 = vpop.f32.mrb[40].mxu1  ;;  %v2789_v22 = vld [vmem:[%s15579_s1 + $0x1c0] sm:$0xff] }
 0x147   :  { %15861 = vst [vmem:[#allocation60_spill] sm:$0xff] %v11937_v45  ;;  %15862 = vst [vmem:[#allocation61_spill] sm:$0xff] %v11939_v1  ;;  %v715_v30 = vadd.f32 %v714_v8, %v713_v21  ;;  %v9937_v15 = vpop.f32.mrb[41].mxu0  ;;  %v9973_v23 = vpop.f32.mrb[41].mxu1  ;;  %v1115_v9 = vmul.f32 %v11248_v24, %v11937_v45  ;;  %v1325_v35 = vmul.f32 %v11328_v13, %v11939_v1 }
 0x148   :  { %v925_v25 = vadd.f32 %v924_v19, %v923_v2  ;;  %v11951_v39 = vpop.f32.mrb[42].mxu0  ;;  %v11953_v21 = vpop.f32.mrb[42].mxu1 }
 0x149   :  { %15863 = vst [vmem:[#allocation62_spill] sm:$0xff] %v11951_v39  ;;  %15864 = vst [vmem:[#allocation63_spill] sm:$0xff] %v11953_v21  ;;  %v716_v2 = vrot.slane %v715_v30, 2  ;;  %v1116_v19 = vmul.f32 %v11267_v31, %v11951_v39  ;;  %v1326_v15 = vmul.f32 %v11326_v50, %v11953_v21  ;;  %v11959_v23 = vpop.permute.xlu1 %2240  ;;  %v11961_v42 = vpop.permute.xlu0 %2235  ;;  %v2674_v31 = vld [vmem:[%s15579_s1 + $0x178] sm:$0xff] }
 0x14a   :  { %v926_v8 = vrot.slane %v925_v25, 2  ;;  %15865 = vst [vmem:[#allocation64_spill] sm:$0xff] %v11959_v23  ;;  %15866 = vst [vmem:[#allocation65_spill] sm:$0xff] %v11961_v42  ;;  %2623 = vperm.xlu1 %10211, %v2559_v43   ;;  %2512 = vperm.xlu0 %10210, %v2444_v20   ;;  %v9938_v24 = vpop.f32.mrb[43].mxu0  ;;  %v9974_v13 = vpop.f32.mrb[43].mxu1 }
 0x14b   :  { %v717_v1 = vadd.f32 %v716_v2, %v715_v30  ;;  %v1125_v57 = vadd.f32 %v1116_v19, %v1115_v9  ;;  %v1335_v60 = vadd.f32 %v1326_v15, %v1325_v35  ;;  %v3019_v19 = vld [vmem:[%s15579_s1 + $0x250] sm:$0xff] }
 0x14c   :  { %v927_v45 = vadd.f32 %v926_v8, %v925_v25 }
 0x14d   :  { %v718_v50 = vrot.slane %v717_v1, 1  ;;  %v11969_v21 = vpop.permute.xlu1 %2356  ;;  %v11971_v43 = vpop.permute.xlu0 %2351 }
 0x14e   :  { %v928_v23 = vrot.slane %v927_v45, 1  ;;  %15867 = vst [vmem:[#allocation66_spill] sm:$0xff] %v11969_v21  ;;  %15868 = vst [vmem:[#allocation67_spill] sm:$0xff] %v11971_v43  ;;  %2845 = vperm.xlu1 %10211, %v2789_v22   ;;  %2734 = vperm.xlu0 %10210, %v2674_v31   ;;  %v11973_v30 = vpop.f32.mrb[44].mxu0  ;;  %v11975_v25 = vpop.f32.mrb[44].mxu1  ;;  %v2904_v22 = vld [vmem:[%s15579_s1 + $0x208] sm:$0xff] }
 0x14f   :  { %15869 = vst [vmem:[#allocation68_spill] sm:$0xff] %v11973_v30  ;;  %15870 = vst [vmem:[#allocation69_spill] sm:$0xff] %v11975_v25  ;;  %v719_v20 = vadd.f32 %v718_v50, %v717_v1  ;;  %v1117_v9 = vmul.f32 %v11301_v41, %v11973_v30  ;;  %v1327_v35 = vmul.f32 %v11381_v12, %v11975_v25  ;;  %v9941_v2 = vpop.f32.mrb[45].mxu0  ;;  %v9977_v8 = vpop.f32.mrb[45].mxu1 }
 0x150   :  { %v929_v15 = vadd.f32 %v928_v23, %v927_v45  ;;  %v11987_v24 = vpop.f32.mrb[46].mxu0  ;;  %v11989_v1 = vpop.f32.mrb[46].mxu1 }
 0x151   :  { %15871 = vst [vmem:[#allocation70_spill] sm:$0xff] %v11987_v24  ;;  %15872 = vst [vmem:[#allocation71_spill] sm:$0xff] %v11989_v1  ;;  %v720_v41 = vadd.f32 %v719_v20, %v11809_v59  ;;  %v1126_v13 = vadd.f32 %v1125_v57, %v1117_v9  ;;  %v1336_v31 = vadd.f32 %v1335_v60, %v1327_v35  ;;  %v11994_v50 = vpop.permute.xlu1 %2361  ;;  %v11996_v2 = vpop.permute.xlu0 %2245  ;;  %v3249_v60 = vld [vmem:[%s15579_s1 + $0x2e0] sm:$0xff] }
 0x152   :  { %v1118_v12 = vmul.f32 %v11383_v17, %v11987_v24  ;;  %15873 = vst [vmem:[#allocation72_spill] sm:$0xff] %v11994_v50  ;;  %15874 = vst [vmem:[#allocation73_spill] sm:$0xff] %v11996_v2  ;;  %v1328_v8 = vmul.f32 %v11445_v47, %v11989_v1  ;;  %3067 = vperm.xlu1 %10211, %v3019_v19   ;;  %2956 = vperm.xlu0 %10210, %v2904_v22   ;;  %v9942_v45 = vpop.f32.mrb[47].mxu0  ;;  %v9978_v23 = vpop.f32.mrb[47].mxu1  ;;  %v3134_v17 = vld [vmem:[%s15579_s1 + $0x298] sm:$0xff] }
 0x153   :  { %v12000_v21 = vadd.f32 %v929_v15, %v720_v41  ;;  %v2675_v41 = vld [vmem:[%s15579_s1 + $0x180] sm:$0xff] }
 0x154   :  { %v1127_v43 = vadd.f32 %v1126_v13, %v1118_v12  ;;  %v1337_v57 = vadd.f32 %v1336_v31, %v1328_v8  ;;  %v2560_v13 = vld [vmem:[%s15579_s1 + $0x138] sm:$0xff] }
 0x155   :  { %v12008_v59 = vpop.permute.xlu1 %2472  ;;  %v12010_v20 = vpop.permute.xlu0 %2467 }
 0x156   :  { %15875 = vst [vmem:[#allocation74_spill] sm:$0xff] %v12008_v59  ;;  %15876 = vst [vmem:[#allocation75_spill] sm:$0xff] %v12010_v20  ;;  %3289 = vperm.xlu1 %10211, %v3249_v60   ;;  %3178 = vperm.xlu0 %10210, %v3134_v17   ;;  %v12012_v47 = vpop.f32.mrb[48].mxu0  ;;  %v12014_v9 = vpop.f32.mrb[48].mxu1 }
 0x157   :  { %15877 = vst [vmem:[#allocation76_spill] sm:$0xff] %v12012_v47  ;;  %15878 = vst [vmem:[#allocation77_spill] sm:$0xff] %v12014_v9  ;;  %v1119_v35 = vmul.f32 %v11447_v10, %v12012_v47  ;;  %v1329_v19 = vmul.f32 %v11523_v55, %v12014_v9  ;;  %v9945_v22 = vpop.f32.mrb[49].mxu0  ;;  %v9981_v15 = vpop.f32.mrb[49].mxu1  ;;  %v15881_v55 = vld [vmem:[#allocation15_spill] sm:$0xff] }
 0x158   :  { %v12026_v31 = vpop.f32.mrb[50].mxu0  ;;  %v12028_v12 = vpop.f32.mrb[50].mxu1 }
 0x159   :  { %15879 = vst [vmem:[#allocation78_spill] sm:$0xff] %v12026_v31  ;;  %15880 = vst [vmem:[#allocation79_spill] sm:$0xff] %v12028_v12  ;;  %v1128_v8 = vadd.f32 %v1127_v43, %v1119_v35  ;;  %v1338_v45 = vadd.f32 %v1337_v57, %v1329_v19  ;;  %v1120_v10 = vmul.f32 %v11505_v36, %v12026_v31  ;;  %v12034_v60 = vpop.permute.xlu1 %2366  ;;  %v12036_v17 = vpop.permute.xlu0 %2250  ;;  %v2905_v43 = vld [vmem:[%s15579_s1 + $0x210] sm:$0xff]  ;;  %v2790_v36 = vld [vmem:[%s15579_s1 + $0x1c8] sm:$0xff] }
 0x15a   :  { %v1330_v23 = vmul.f32 %v15881_v55, %v12028_v12  ;;  %15882 = vst [vmem:[#allocation15_spill] sm:$0xff] %v12034_v60  ;;  %15883 = vst [vmem:[#allocation80_spill] sm:$0xff] %v12036_v17  ;;  %2739 = vperm.xlu1 %10211, %v2675_v41   ;;  %2628 = vperm.xlu0 %10210, %v2560_v13   ;;  %v9946_v22 = vpop.f32.mrb[51].mxu0  ;;  %v9982_v15 = vpop.f32.mrb[51].mxu1  ;;  %v15888_v13 = vld [vmem:[#allocation13_spill] sm:$0xff] }
 0x15b   :  { %v1129_v59 = vadd.f32 %v1128_v8, %v1120_v10  ;;  %v3020_v22 = vld [vmem:[%s15579_s1 + $0x258] sm:$0xff] }
 0x15c   :  { %v1339_v20 = vadd.f32 %v1338_v45, %v1330_v23  ;;  %v3135_v23 = vld [vmem:[%s15579_s1 + $0x2a0] sm:$0xff] }
 0x15d   :  { %v12044_v57 = vpop.permute.xlu1 %2583  ;;  %v12046_v35 = vpop.permute.xlu0 %2477 }
 0x15e   :  { %15884 = vst [vmem:[#allocation81_spill] sm:$0xff] %v12044_v57  ;;  %15885 = vst [vmem:[#allocation82_spill] sm:$0xff] %v12046_v35  ;;  %2961 = vperm.xlu1 %10211, %v2905_v43   ;;  %2850 = vperm.xlu0 %10210, %v2790_v36   ;;  %v12048_v19 = vpop.f32.mrb[52].mxu0  ;;  %v12050_v41 = vpop.f32.mrb[52].mxu1 }
 0x15f   :  { %15886 = vst [vmem:[#allocation83_spill] sm:$0xff] %v12048_v19  ;;  %15887 = vst [vmem:[#allocation84_spill] sm:$0xff] %v12050_v41  ;;  %v1121_v8 = vmul.f32 %v15888_v13, %v12048_v19  ;;  %v1331_v45 = vmul.f32 %v11643_v63, %v12050_v41  ;;  %v9949_v10 = vpop.f32.mrb[53].mxu0  ;;  %v9985_v55 = vpop.f32.mrb[53].mxu1 }
 0x160   :  { %v12062_v15 = vpop.f32.mrb[54].mxu0  ;;  %v12064_v43 = vpop.f32.mrb[54].mxu1 }
 0x161   :  { %15889 = vst [vmem:[#allocation13_spill] sm:$0xff] %v12062_v15  ;;  %15890 = vst [vmem:[#allocation85_spill] sm:$0xff] %v12064_v43  ;;  %v1130_v36 = vadd.f32 %v1129_v59, %v1121_v8  ;;  %v1340_v12 = vadd.f32 %v1339_v20, %v1331_v45  ;;  %v1122_v13 = vmul.f32 %v11645_v61, %v12062_v15  ;;  %v12070_v10 = vpop.permute.xlu1 %2255  ;;  %v12072_v55 = vpop.permute.xlu0 %2588  ;;  %v2676_v59 = vld [vmem:[%s15579_s1 + $0x188] sm:$0xff] }
 0x162   :  { %v1332_v63 = vmul.f32 %v11717_v33, %v12064_v43  ;;  %15891 = vst [vmem:[#allocation86_spill] sm:$0xff] %v12070_v10  ;;  %15892 = vst [vmem:[#allocation87_spill] sm:$0xff] %v12072_v55  ;;  %3183 = vperm.xlu1 %10211, %v3135_v23   ;;  %3072 = vperm.xlu0 %10210, %v3020_v22   ;;  %v9950_v41 = vpop.f32.mrb[55].mxu0  ;;  %v9986_v57 = vpop.f32.mrb[55].mxu1  ;;  %v3250_v61 = vld [vmem:[%s15579_s1 + $0x2e8] sm:$0xff]  ;;  %v2906_v22 = vld [vmem:[%s15579_s1 + $0x218] sm:$0xff] }
 0x163   :  { %v1131_v35 = vadd.f32 %v1130_v36, %v1122_v13  ;;  %v2791_v36 = vld [vmem:[%s15579_s1 + $0x1d0] sm:$0xff] }
 0x164   :  { %v1341_v60 = vadd.f32 %v1340_v12, %v1332_v63 }
 0x165   :  { %v12080_v20 = vpop.permute.xlu1 %2482  ;;  %v12082_v33 = vpop.permute.xlu0 %2371 }
 0x166   :  { %15893 = vst [vmem:[#allocation88_spill] sm:$0xff] %v12080_v20  ;;  %15894 = vst [vmem:[#allocation89_spill] sm:$0xff] %v12082_v33  ;;  %2744 = vperm.xlu1 %10211, %v2676_v59   ;;  %3294 = vperm.xlu0 %10210, %v3250_v61   ;;  %v12084_v8 = vpop.f32.mrb[56].mxu0  ;;  %v12086_v41 = vpop.f32.mrb[56].mxu1 }
 0x167   :  { %15895 = vst [vmem:[#allocation90_spill] sm:$0xff] %v12084_v8  ;;  %15896 = vst [vmem:[#allocation91_spill] sm:$0xff] %v12086_v41  ;;  %v1123_v12 = vmul.f32 %v11705_v51, %v12084_v8  ;;  %v1333_v57 = vmul.f32 %v11779_v58, %v12086_v41  ;;  %v9953_v45 = vpop.f32.mrb[57].mxu0  ;;  %v9989_v23 = vpop.f32.mrb[57].mxu1 }
 0x168   :  { %v12098_v13 = vpop.f32.mrb[58].mxu0  ;;  %v12100_v63 = vpop.f32.mrb[58].mxu1 }
 0x169   :  { %15897 = vst [vmem:[#allocation92_spill] sm:$0xff] %v12098_v13  ;;  %15898 = vst [vmem:[#allocation93_spill] sm:$0xff] %v12100_v63  ;;  %v1132_v59 = vadd.f32 %v1131_v35, %v1123_v12  ;;  %v1342_v61 = vadd.f32 %v1341_v60, %v1333_v57  ;;  %v1124_v51 = vmul.f32 %v11751_v53, %v12098_v13  ;;  %v12106_v45 = vpop.permute.xlu1 %2699  ;;  %v12108_v23 = vpop.permute.xlu0 %2593  ;;  %v3136_v60 = vld [vmem:[%s15579_s1 + $0x2a8] sm:$0xff]  ;;  %v3021_v53 = vld [vmem:[%s15579_s1 + $0x260] sm:$0xff] }
 0x16a   :  { %v1334_v58 = vmul.f32 %v11813_v0, %v12100_v63  ;;  %15899 = vst [vmem:[#allocation94_spill] sm:$0xff] %v12106_v45  ;;  %15900 = vst [vmem:[#allocation95_spill] sm:$0xff] %v12108_v23  ;;  %2966 = vperm.xlu1 %10211, %v2906_v22   ;;  %2855 = vperm.xlu0 %10210, %v2791_v36   ;;  %v9954_v41 = vpop.f32.mrb[59].mxu0  ;;  %v9990_v43 = vpop.f32.mrb[59].mxu1  ;;  %v15905_v23 = vld [vmem:[#allocation5_spill] sm:$0xff]  ;;  %v16041_v13 = vld [vmem:[#allocation83_spill] sm:$0xff] }
 0x16b   :  { %v1133_v8 = vadd.f32 %v1132_v59, %v1124_v51  ;;  %v2792_v51 = vld [vmem:[%s15579_s1 + $0x1d8] sm:$0xff] }
 0x16c   :  { %v1343_v15 = vadd.f32 %v1342_v61, %v1334_v58  ;;  %v3251_v58 = vld [vmem:[%s15579_s1 + $0x2f0] sm:$0xff] }
 0x16d   :  { %v1134_v35 = vrot.slane %v1133_v8, 4  ;;  %v12116_v12 = vpop.permute.xlu1 %2260  ;;  %v12118_v57 = vpop.permute.xlu0 %2704 }
 0x16e   :  { %v1344_v0 = vrot.slane %v1343_v15, 4  ;;  %15901 = vst [vmem:[#allocation96_spill] sm:$0xff] %v12116_v12  ;;  %15902 = vst [vmem:[#allocation97_spill] sm:$0xff] %v12118_v57  ;;  %3188 = vperm.xlu1 %10211, %v3136_v60   ;;  %3077 = vperm.xlu0 %10210, %v3021_v53   ;;  %v12120_v41 = vpop.f32.mrb[60].mxu0  ;;  %v12122_v43 = vpop.f32.mrb[60].mxu1  ;;  %v15906_v53 = vld [vmem:[#allocation6_spill] sm:$0xff] }
 0x16f   :  { %15903 = vst [vmem:[#allocation98_spill] sm:$0xff] %v12120_v41  ;;  %15904 = vst [vmem:[#allocation99_spill] sm:$0xff] %v12122_v43  ;;  %v1135_v22 = vadd.f32 %v1134_v35, %v1133_v8  ;;  %v10009_v59 = vpop.f32.mrb[61].mxu0  ;;  %v10045_v61 = vpop.f32.mrb[61].mxu1  ;;  %v1535_v60 = vmul.f32 %v15905_v23, %v12120_v41  ;;  %v1745_v55 = vmul.f32 %v15906_v53, %v12122_v43  ;;  %v3022_v57 = vld [vmem:[%s15579_s1 + $0x268] sm:$0xff] }
 0x170   :  { %v1345_v36 = vadd.f32 %v1344_v0, %v1343_v15  ;;  %v12134_v20 = vpop.f32.mrb[62].mxu0  ;;  %v12136_v8 = vpop.f32.mrb[62].mxu1  ;;  %v15909_v0 = vld [vmem:[#allocation4_spill] sm:$0xff] }
 0x171   :  { %15907 = vst [vmem:[#allocation5_spill] sm:$0xff] %v12134_v20  ;;  %15908 = vst [vmem:[#allocation6_spill] sm:$0xff] %v12136_v8  ;;  %v1136_v15 = vrot.slane %v1135_v22, 2  ;;  %v1536_v59 = vmul.f32 %v15909_v0, %v12134_v20  ;;  %v15910_v61 = vld [vmem:[#allocation8_spill] sm:$0xff]  ;;  %v12142_v50 = vpop.permute.xlu1 %2487  ;;  %v12144_v12 = vpop.permute.xlu0 %2376 }
 0x172   :  { %v1346_v35 = vrot.slane %v1345_v36, 2  ;;  %v1746_v33 = vmul.f32 %v15910_v61, %v12136_v8  ;;  %15911 = vst [vmem:[#allocation4_spill] sm:$0xff] %v12142_v50  ;;  %15912 = vst [vmem:[#allocation8_spill] sm:$0xff] %v12144_v12  ;;  %2860 = vperm.xlu1 %10211, %v2792_v51   ;;  %3299 = vperm.xlu0 %10210, %v3251_v58   ;;  %v10010_v23 = vpop.f32.mrb[63].mxu0  ;;  %v10046_v53 = vpop.f32.mrb[63].mxu1  ;;  %v2907_v0 = vld [vmem:[%s15579_s1 + $0x220] sm:$0xff] }
 0x173   :  { %v1137_v10 = vadd.f32 %v1136_v15, %v1135_v22  ;;  %v1545_v2 = vadd.f32 %v1536_v59, %v1535_v60  ;;  %v15918_v60 = vld [vmem:[#allocation11_spill] sm:$0xff] }
 0x174   :  { %v1347_v17 = vadd.f32 %v1346_v35, %v1345_v36  ;;  %v1755_v42 = vadd.f32 %v1746_v33, %v1745_v55  ;;  %v15917_v33 = vld [vmem:[#allocation7_spill] sm:$0xff] }
 0x175   :  { %v1138_v61 = vrot.slane %v1137_v10, 1  ;;  %v12152_v45 = vpop.permute.xlu1 %2709  ;;  %v12154_v51 = vpop.permute.xlu0 %2598  ;;  %v3252_v23 = vld [vmem:[%s15579_s1 + $0x2f8] sm:$0xff] }
 0x176   :  { %v1348_v50 = vrot.slane %v1347_v17, 1  ;;  %15913 = vst [vmem:[#allocation100_spill] sm:$0xff] %v12152_v45  ;;  %15914 = vst [vmem:[#allocation101_spill] sm:$0xff] %v12154_v51  ;;  %3082 = vperm.xlu1 %10211, %v3022_v57   ;;  %2971 = vperm.xlu0 %10210, %v2907_v0   ;;  %v12156_v22 = vpop.f32.mrb[64].mxu0  ;;  %v12158_v36 = vpop.f32.mrb[64].mxu1  ;;  %v3137_v57 = vld [vmem:[%s15579_s1 + $0x2b0] sm:$0xff] }
 0x177   :  { %15915 = vst [vmem:[#allocation102_spill] sm:$0xff] %v12156_v22  ;;  %15916 = vst [vmem:[#allocation103_spill] sm:$0xff] %v12158_v36  ;;  %v1139_v55 = vadd.f32 %v1138_v61, %v1137_v10  ;;  %v1537_v58 = vmul.f32 %v15917_v33, %v12156_v22  ;;  %v1747_v15 = vmul.f32 %v15918_v60, %v12158_v36  ;;  %v10013_v35 = vpop.f32.mrb[65].mxu0  ;;  %v10049_v59 = vpop.f32.mrb[65].mxu1  ;;  %v15921_v60 = vld [vmem:[#allocation9_spill] sm:$0xff] }
 0x178   :  { %v1349_v53 = vadd.f32 %v1348_v50, %v1347_v17  ;;  %v12170_v0 = vpop.f32.mrb[66].mxu0  ;;  %v12172_v10 = vpop.f32.mrb[66].mxu1 }
 0x179   :  { %15919 = vst [vmem:[#allocation7_spill] sm:$0xff] %v12170_v0  ;;  %15920 = vst [vmem:[#allocation11_spill] sm:$0xff] %v12172_v10  ;;  %v1140_v61 = vadd.f32 %v1139_v55, %v12000_v21  ;;  %v1546_v33 = vadd.f32 %v1545_v2, %v1537_v58  ;;  %v1756_v51 = vadd.f32 %v1755_v42, %v1747_v15  ;;  %v12177_v59 = vpop.permute.xlu1 %2820  ;;  %v12179_v12 = vpop.permute.xlu0 %2815  ;;  %v3023_v42 = vld [vmem:[%s15579_s1 + $0x270] sm:$0xff]  ;;  %v2908_v21 = vld [vmem:[%s15579_s1 + $0x228] sm:$0xff] }
 0x17a   :  { %v1538_v35 = vmul.f32 %v15921_v60, %v12170_v0  ;;  %15922 = vst [vmem:[#allocation9_spill] sm:$0xff] %v12177_v59  ;;  %15923 = vst [vmem:[#allocation104_spill] sm:$0xff] %v12179_v12  ;;  %v1748_v45 = vmul.f32 %v11599_v27, %v12172_v10  ;;  %3304 = vperm.xlu1 %10211, %v3252_v23   ;;  %3193 = vperm.xlu0 %10210, %v3137_v57   ;;  %v10014_v50 = vpop.f32.mrb[67].mxu0  ;;  %v10050_v17 = vpop.f32.mrb[67].mxu1  ;;  %v15927_v23 = vld [vmem:[#allocation14_spill] sm:$0xff] }
 0x17b   :  { %v12183_v19 = vadd.f32 %v1349_v53, %v1140_v61 }
 0x17c   :  { %v1547_v36 = vadd.f32 %v1546_v33, %v1538_v35  ;;  %v1757_v2 = vadd.f32 %v1756_v51, %v1748_v45  ;;  %v3253_v45 = vld [vmem:[%s15579_s1 + $0x300] sm:$0xff]  ;;  %v3138_v51 = vld [vmem:[%s15579_s1 + $0x2b8] sm:$0xff] }
 0x17d   :  { %v12191_v55 = vpop.permute.xlu1 %2381  ;;  %v12193_v58 = vpop.permute.xlu0 %2265 }
 0x17e   :  { %15924 = vst [vmem:[#allocation105_spill] sm:$0xff] %v12191_v55  ;;  %3087 = vperm.xlu1 %10211, %v3023_v42   ;;  %2976 = vperm.xlu0 %10210, %v2908_v21   ;;  %v12195_v27 = vpop.f32.mrb[68].mxu0  ;;  %v12197_v15 = vpop.f32.mrb[68].mxu1  ;;  %v16040_v55 = vld [vmem:[#allocation103_spill] sm:$0xff] }
 0x17f   :  { %15925 = vst [vmem:[#allocation106_spill] sm:$0xff] %v12195_v27  ;;  %15926 = vst [vmem:[#allocation107_spill] sm:$0xff] %v12197_v15  ;;  %v1539_v57 = vmul.f32 %v15927_v23, %v12195_v27  ;;  %v1749_v53 = vmul.f32 %v11669_v52, %v12197_v15  ;;  %v10017_v61 = vpop.f32.mrb[69].mxu0  ;;  %v10053_v33 = vpop.f32.mrb[69].mxu1  ;;  %v15949_v27 = vld [vmem:[#allocation10_spill] sm:$0xff] }
 0x180   :  { %v12209_v60 = vpop.f32.mrb[70].mxu0  ;;  %v12211_v35 = vpop.f32.mrb[70].mxu1 }
 0x181   :  { %15928 = vst [vmem:[#allocation14_spill] sm:$0xff] %v12209_v60  ;;  %15929 = vst [vmem:[#allocation108_spill] sm:$0xff] %v12211_v35  ;;  %v1548_v50 = vadd.f32 %v1547_v36, %v1539_v57  ;;  %v1758_v17 = vadd.f32 %v1757_v2, %v1749_v53  ;;  %v1540_v42 = vmul.f32 %v11671_v11, %v12209_v60  ;;  %v12217_v21 = vpop.permute.xlu1 %2603  ;;  %v12219_v23 = vpop.permute.xlu0 %2492  ;;  %v3139_v36 = vld [vmem:[%s15579_s1 + $0x2c0] sm:$0xff]  ;;  %v3024_v11 = vld [vmem:[%s15579_s1 + $0x278] sm:$0xff] }
 0x182   :  { %v1750_v52 = vmul.f32 %v11743_v62, %v12211_v35  ;;  %15930 = vst [vmem:[#allocation109_spill] sm:$0xff] %v12217_v21  ;;  %15931 = vst [vmem:[#allocation110_spill] sm:$0xff] %v12219_v23  ;;  %3309 = vperm.xlu1 %10211, %v3253_v45   ;;  %3198 = vperm.xlu0 %10210, %v3138_v51   ;;  %v10018_v61 = vpop.f32.mrb[71].mxu0  ;;  %v10054_v33 = vpop.f32.mrb[71].mxu1  ;;  %v7231_v21 = vld [vmem:[%s15582_s8 + $0x38] sm:$0xff] }
 0x183   :  { %v1549_v15 = vadd.f32 %v1548_v50, %v1540_v42  ;;  %v3140_v42 = vld [vmem:[%s15579_s1 + $0x2c8] sm:$0xff] }
 0x184   :  { %v1759_v10 = vadd.f32 %v1758_v17, %v1750_v52  ;;  %v3254_v52 = vld [vmem:[%s15579_s1 + $0x308] sm:$0xff] }
 0x185   :  { %v12227_v2 = vpop.permute.xlu1 %2825  ;;  %v12229_v62 = vpop.permute.xlu0 %2714 }
 0x186   :  { %15932 = vst [vmem:[#allocation111_spill] sm:$0xff] %v12227_v2  ;;  %3203 = vperm.xlu1 %10211, %v3139_v36   ;;  %3092 = vperm.xlu0 %10210, %v3024_v11   ;;  %v12231_v57 = vpop.f32.mrb[72].mxu0  ;;  %v12233_v53 = vpop.f32.mrb[72].mxu1 }
 0x187   :  { %15933 = vst [vmem:[#allocation112_spill] sm:$0xff] %v12231_v57  ;;  %15934 = vst [vmem:[#allocation113_spill] sm:$0xff] %v12233_v53  ;;  %v1541_v45 = vmul.f32 %v11715_v28, %v12231_v57  ;;  %v1751_v51 = vmul.f32 %v11789_v4, %v12233_v53  ;;  %v10021_v50 = vpop.f32.mrb[73].mxu0  ;;  %v10057_v17 = vpop.f32.mrb[73].mxu1 }
 0x188   :  { %v12245_v61 = vpop.f32.mrb[74].mxu0  ;;  %v12247_v33 = vpop.f32.mrb[74].mxu1 }
 0x189   :  { %15935 = vst [vmem:[#allocation114_spill] sm:$0xff] %v12245_v61  ;;  %15936 = vst [vmem:[#allocation115_spill] sm:$0xff] %v12247_v33  ;;  %v1550_v36 = vadd.f32 %v1549_v15, %v1541_v45  ;;  %v1760_v11 = vadd.f32 %v1759_v10, %v1751_v51  ;;  %v1542_v28 = vmul.f32 %v11777_v34, %v12245_v61  ;;  %v12253_v50 = vpop.permute.xlu1 %2936  ;;  %v12255_v17 = vpop.permute.xlu0 %2931  ;;  %v3256_v10 = vld [vmem:[%s15579_s1 + $0x318] sm:$0xff]  ;;  %v3255_v34 = vld [vmem:[%s15579_s1 + $0x310] sm:$0xff] }
 0x18a   :  { %v1752_v4 = vmul.f32 %v11825_v29, %v12247_v33  ;;  %15937 = vst [vmem:[#allocation116_spill] sm:$0xff] %v12253_v50  ;;  %15938 = vst [vmem:[#allocation117_spill] sm:$0xff] %v12255_v17  ;;  %3208 = vperm.xlu1 %10211, %v3140_v42   ;;  %3314 = vperm.xlu0 %10210, %v3254_v52   ;;  %v10022_v53 = vpop.f32.mrb[75].mxu0  ;;  %v10058_v35 = vpop.f32.mrb[75].mxu1 }
 0x18b   :  { %v1551_v57 = vadd.f32 %v1550_v36, %v1542_v28  ;;  %v7225_v36 = vld [vmem:[%s15582_s8 + $0x8] sm:$0xff] }
 0x18c   :  { %v1761_v60 = vadd.f32 %v1760_v11, %v1752_v4  ;;  %v7224_v11 = vld [vmem:[%s15582_s8] sm:$0xff] }
 0x18d   :  { %v12263_v15 = vpop.permute.xlu1 %2386  ;;  %v12265_v29 = vpop.permute.xlu0 %2270 }
 0x18e   :  { %15939 = vst [vmem:[#allocation118_spill] sm:$0xff] %v12263_v15  ;;  %3324 = vperm.xlu1 %10211, %v3256_v10   ;;  %3319 = vperm.xlu0 %10210, %v3255_v34   ;;  %v12267_v45 = vpop.f32.mrb[76].mxu0  ;;  %v12269_v53 = vpop.f32.mrb[76].mxu1 }
 0x18f   :  { %15940 = vst [vmem:[#allocation119_spill] sm:$0xff] %v12267_v45  ;;  %15941 = vst [vmem:[#allocation120_spill] sm:$0xff] %v12269_v53  ;;  %v1543_v35 = vmul.f32 %v11827_v54, %v12267_v45  ;;  %v1753_v51 = vmul.f32 %v11861_v40, %v12269_v53  ;;  %v10025_v42 = vpop.f32.mrb[77].mxu0  ;;  %v10061_v52 = vpop.f32.mrb[77].mxu1 }
 0x190   :  { %v12281_v28 = vpop.f32.mrb[78].mxu0  ;;  %v12283_v4 = vpop.f32.mrb[78].mxu1 }
 0x191   :  { %15942 = vst [vmem:[#allocation121_spill] sm:$0xff] %v12281_v28  ;;  %15943 = vst [vmem:[#allocation122_spill] sm:$0xff] %v12283_v4  ;;  %v1552_v10 = vadd.f32 %v1551_v57, %v1543_v35  ;;  %v1762_v34 = vadd.f32 %v1761_v60, %v1753_v51  ;;  %v1544_v54 = vmul.f32 %v11863_v3, %v12281_v28  ;;  %v12289_v42 = vpop.permute.xlu1 %2608  ;;  %v12291_v52 = vpop.permute.xlu0 %2497  ;;  %v7227_v60 = vld [vmem:[%s15582_s8 + $0x18] sm:$0xff]  ;;  %v7226_v3 = vld [vmem:[%s15582_s8 + $0x10] sm:$0xff] }
 0x192   :  { %v1754_v40 = vmul.f32 %v11899_v18, %v12283_v4  ;;  %15944 = vst [vmem:[#allocation123_spill] sm:$0xff] %v12289_v42  ;;  %15945 = vst [vmem:[#allocation124_spill] sm:$0xff] %v12291_v52  ;;  %7240 = vperm.xlu1 %10211, %v7225_v36   ;;  %7235 = vperm.xlu0 %10210, %v7224_v11   ;;  %v10026_v53 = vpop.f32.mrb[79].mxu0  ;;  %v10062_v45 = vpop.f32.mrb[79].mxu1  ;;  %v16042_v4 = vld [vmem:[#allocation94_spill] sm:$0xff]  ;;  %v16043_v28 = vld [vmem:[#allocation97_spill] sm:$0xff] }
 0x193   :  { %v1553_v33 = vadd.f32 %v1552_v10, %v1544_v54  ;;  %v7229_v54 = vld [vmem:[%s15582_s8 + $0x28] sm:$0xff] }
 0x194   :  { %v1763_v61 = vadd.f32 %v1762_v34, %v1754_v40  ;;  %v7228_v40 = vld [vmem:[%s15582_s8 + $0x20] sm:$0xff] }
 0x195   :  { %v1554_v57 = vrot.slane %v1553_v33, 4  ;;  %v12299_v35 = vpop.permute.xlu1 %2830  ;;  %v12301_v51 = vpop.permute.xlu0 %2719 }
 0x196   :  { %v1764_v18 = vrot.slane %v1763_v61, 4  ;;  %15946 = vst [vmem:[#allocation125_spill] sm:$0xff] %v12299_v35  ;;  %7250 = vperm.xlu1 %10211, %v7227_v60   ;;  %7245 = vperm.xlu0 %10210, %v7226_v3   ;;  %v12303_v53 = vpop.f32.mrb[80].mxu0  ;;  %v12305_v45 = vpop.f32.mrb[80].mxu1 }
 0x197   :  { %15947 = vst [vmem:[#allocation126_spill] sm:$0xff] %v12303_v53  ;;  %15948 = vst [vmem:[#allocation127_spill] sm:$0xff] %v12305_v45  ;;  %v1555_v36 = vadd.f32 %v1554_v57, %v1553_v33  ;;  %v10081_v10 = vpop.f32.mrb[81].mxu0  ;;  %v10117_v34 = vpop.f32.mrb[81].mxu1  ;;  %v1955_v60 = vmul.f32 %v15949_v27, %v12303_v53  ;;  %v2165_v3 = vmul.f32 %v11609_v48, %v12305_v45 }
 0x198   :  { %v1765_v11 = vadd.f32 %v1764_v18, %v1763_v61  ;;  %v12317_v50 = vpop.f32.mrb[82].mxu0  ;;  %v12319_v33 = vpop.f32.mrb[82].mxu1  ;;  %v15952_v18 = vld [vmem:[#allocation12_spill] sm:$0xff] }
 0x199   :  { %15950 = vst [vmem:[#allocation10_spill] sm:$0xff] %v12317_v50  ;;  %15951 = vst [vmem:[#allocation128_spill] sm:$0xff] %v12319_v33  ;;  %v1556_v61 = vrot.slane %v1555_v36, 2  ;;  %v1956_v10 = vmul.f32 %v15952_v18, %v12317_v50  ;;  %v2166_v34 = vmul.f32 %v11607_v49, %v12319_v33  ;;  %v12325_v17 = vpop.permute.xlu1 %3047  ;;  %v12327_v35 = vpop.permute.xlu0 %2941  ;;  %v7230_v49 = vld [vmem:[%s15582_s8 + $0x30] sm:$0xff]  ;;  %v16128_v33 = vld [vmem:[#allocation87_spill] sm:$0xff] }
 0x19a   :  { %v1766_v57 = vrot.slane %v1765_v11, 2  ;;  %15953 = vst [vmem:[#allocation12_spill] sm:$0xff] %v12325_v17  ;;  %15954 = vst [vmem:[#allocation129_spill] sm:$0xff] %v12327_v35  ;;  %7260 = vperm.xlu1 %10211, %v7229_v54   ;;  %7255 = vperm.xlu0 %10210, %v7228_v40   ;;  %v10082_v27 = vpop.f32.mrb[83].mxu0  ;;  %v10118_v48 = vpop.f32.mrb[83].mxu1 }
 0x19b   :  { %v1557_v2 = vadd.f32 %v1556_v61, %v1555_v36  ;;  %v1965_v12 = vadd.f32 %v1956_v10, %v1955_v60  ;;  %v2175_v42 = vadd.f32 %v2166_v34, %v2165_v3  ;;  %v7232_v10 = vld [vmem:[%s15582_s8 + $0x40] sm:$0xff] }
 0x19c   :  { %v1767_v59 = vadd.f32 %v1766_v57, %v1765_v11 }
 0x19d   :  { %v1558_v18 = vrot.slane %v1557_v2, 1  ;;  %v12335_v52 = vpop.permute.xlu1 %2275  ;;  %v12337_v54 = vpop.permute.xlu0 %3052 }
 0x19e   :  { %v1768_v17 = vrot.slane %v1767_v59, 1  ;;  %15955 = vst [vmem:[#allocation130_spill] sm:$0xff] %v12337_v54  ;;  %7270 = vperm.xlu1 %10211, %v7231_v21   ;;  %7265 = vperm.xlu0 %10210, %v7230_v49   ;;  %v12339_v36 = vpop.f32.mrb[84].mxu0  ;;  %v12341_v11 = vpop.f32.mrb[84].mxu1 }
 0x19f   :  { %15956 = vst [vmem:[#allocation131_spill] sm:$0xff] %v12339_v36  ;;  %15957 = vst [vmem:[#allocation132_spill] sm:$0xff] %v12341_v11  ;;  %v1559_v40 = vadd.f32 %v1558_v18, %v1557_v2  ;;  %v1957_v60 = vmul.f32 %v11597_v6, %v12339_v36  ;;  %v2167_v3 = vmul.f32 %v11679_v32, %v12341_v11  ;;  %v10085_v61 = vpop.f32.mrb[85].mxu0  ;;  %v10121_v57 = vpop.f32.mrb[85].mxu1  ;;  %v15960_v6 = vld [vmem:[#allocation28_spill] sm:$0xff] }
 0x1a0   :  { %v1769_v34 = vadd.f32 %v1768_v17, %v1767_v59  ;;  %v12350_v21 = vpop.f32.mrb[86].mxu0  ;;  %v12352_v27 = vpop.f32.mrb[86].mxu1  ;;  %v15963_v61 = vld [vmem:[#allocation38_spill] sm:$0xff] }
 0x1a1   :  { %15958 = vst [vmem:[#allocation133_spill] sm:$0xff] %v12350_v21  ;;  %15959 = vst [vmem:[#allocation134_spill] sm:$0xff] %v12352_v27  ;;  %v1560_v48 = vadd.f32 %v1559_v40, %v12183_v19  ;;  %v1966_v2 = vadd.f32 %v1965_v12, %v1957_v60  ;;  %v2176_v49 = vadd.f32 %v2175_v42, %v2167_v3  ;;  %v12357_v36 = vpop.permute.xlu1 %2502  ;;  %v12359_v32 = vpop.permute.xlu0 %2391  ;;  %v15967_v60 = vld [vmem:[#allocation37_spill] sm:$0xff] }
 0x1a2   :  { %v1958_v18 = vmul.f32 %v15960_v6, %v12350_v21  ;;  %15961 = vst [vmem:[#allocation28_spill] sm:$0xff] %v12357_v36  ;;  %15962 = vst [vmem:[#allocation135_spill] sm:$0xff] %v12359_v32  ;;  %v2168_v57 = vmul.f32 %v15963_v61, %v12352_v27  ;;  %7275 = vperm.xlu0 %10210, %v7232_v10   ;;  %v10086_v59 = vpop.f32.mrb[87].mxu0  ;;  %v10122_v17 = vpop.f32.mrb[87].mxu1 }
 0x1a3   :  { %v12363_v54 = vadd.f32 %v1769_v34, %v1560_v48 }
 0x1a4   :  { %v1967_v35 = vadd.f32 %v1966_v2, %v1958_v18  ;;  %v2177_v23 = vadd.f32 %v2176_v49, %v2168_v57 }
 0x1a5   :  { %v12365_v19 = vpop.permute.xlu1 %2724  ;;  %v12367_v12 = vpop.permute.xlu0 %2613 }
 0x1a6   :  { %15964 = vst [vmem:[#allocation38_spill] sm:$0xff] %v12367_v12  ;;  %v12369_v42 = vpop.f32.mrb[88].mxu0  ;;  %v12371_v40 = vpop.f32.mrb[88].mxu1 }
 0x1a7   :  { %15965 = vst [vmem:[#allocation136_spill] sm:$0xff] %v12369_v42  ;;  %15966 = vst [vmem:[#allocation137_spill] sm:$0xff] %v12371_v40  ;;  %v1959_v3 = vmul.f32 %v15967_v60, %v12369_v42  ;;  %v2169_v10 = vmul.f32 %v11815_v56, %v12371_v40  ;;  %v10089_v6 = vpop.f32.mrb[89].mxu0  ;;  %v10125_v61 = vpop.f32.mrb[89].mxu1 }
 0x1a8   :  { %v12377_v34 = vpop.f32.mrb[90].mxu0  ;;  %v12379_v48 = vpop.f32.mrb[90].mxu1 }
 0x1a9   :  { %15968 = vst [vmem:[#allocation37_spill] sm:$0xff] %v12377_v34  ;;  %15969 = vst [vmem:[#allocation138_spill] sm:$0xff] %v12379_v48  ;;  %v1968_v2 = vadd.f32 %v1967_v35, %v1959_v3  ;;  %v2178_v49 = vadd.f32 %v2177_v23, %v2169_v10  ;;  %v1960_v18 = vmul.f32 %v11787_v16, %v12377_v34  ;;  %v12385_v59 = vpop.permute.xlu1 %2946  ;;  %v12387_v17 = vpop.permute.xlu0 %2835  ;;  %v16118_v11 = vld [vmem:[#allocation28_spill] sm:$0xff] }
 0x1aa   :  { %v2170_v57 = vmul.f32 %v11851_v14, %v12379_v48  ;;  %15970 = vst [vmem:[#allocation139_spill] sm:$0xff] %v12385_v59  ;;  %15971 = vst [vmem:[#allocation140_spill] sm:$0xff] %v12387_v17  ;;  %v10090_v60 = vpop.f32.mrb[91].mxu0  ;;  %v10126_v56 = vpop.f32.mrb[91].mxu1 }
 0x1ab   :  { %v1969_v6 = vadd.f32 %v1968_v2, %v1960_v18 }
 0x1ac   :  { %v2179_v61 = vadd.f32 %v2178_v49, %v2170_v57 }
 0x1ad   :  { %v12389_v42 = vpop.permute.xlu1 %3163  ;;  %v12391_v21 = vpop.permute.xlu0 %3057 }
 0x1ae   :  { %15972 = vst [vmem:[#allocation141_spill] sm:$0xff] %v12389_v42  ;;  %15973 = vst [vmem:[#allocation142_spill] sm:$0xff] %v12391_v21  ;;  %v12393_v35 = vpop.f32.mrb[92].mxu0  ;;  %v12395_v23 = vpop.f32.mrb[92].mxu1 }
 0x1af   :  { %15974 = vst [vmem:[#allocation143_spill] sm:$0xff] %v12393_v35  ;;  %15975 = vst [vmem:[#allocation144_spill] sm:$0xff] %v12395_v23  ;;  %v1961_v16 = vmul.f32 %v11853_v38, %v12393_v35  ;;  %v2171_v14 = vmul.f32 %v11887_v26, %v12395_v23  ;;  %v10093_v3 = vpop.f32.mrb[93].mxu0  ;;  %v10129_v10 = vpop.f32.mrb[93].mxu1 }
 0x1b0   :  { %v12401_v60 = vpop.f32.mrb[94].mxu0  ;;  %v12403_v2 = vpop.f32.mrb[94].mxu1 }
 0x1b1   :  { %15976 = vst [vmem:[#allocation145_spill] sm:$0xff] %v12401_v60  ;;  %15977 = vst [vmem:[#allocation146_spill] sm:$0xff] %v12403_v2  ;;  %v1970_v49 = vadd.f32 %v1969_v6, %v1961_v16  ;;  %v2180_v18 = vadd.f32 %v2179_v61, %v2171_v14  ;;  %v1962_v57 = vmul.f32 %v11889_v44, %v12401_v60  ;;  %v12409_v34 = vpop.permute.xlu1 %2280  ;;  %v12411_v38 = vpop.permute.xlu0 %3168 }
 0x1b2   :  { %v2172_v56 = vmul.f32 %v11925_v37, %v12403_v2  ;;  %15978 = vst [vmem:[#allocation147_spill] sm:$0xff] %v12411_v38  ;;  %v10094_v35 = vpop.f32.mrb[95].mxu0  ;;  %v10130_v26 = vpop.f32.mrb[95].mxu1 }
 0x1b3   :  { %v1971_v3 = vadd.f32 %v1970_v49, %v1962_v57  ;;  %v15985_v26 = vld [vmem:[#allocation59_spill] sm:$0xff] }
 0x1b4   :  { %v2181_v10 = vadd.f32 %v2180_v18, %v2172_v56 }
 0x1b5   :  { %v12413_v42 = vpop.permute.xlu1 %2507  ;;  %v12415_v21 = vpop.permute.xlu0 %2396 }
 0x1b6   :  { %15979 = vst [vmem:[#allocation148_spill] sm:$0xff] %v12413_v42  ;;  %15980 = vst [vmem:[#allocation149_spill] sm:$0xff] %v12415_v21  ;;  %v12417_v6 = vpop.f32.mrb[96].mxu0  ;;  %v12419_v61 = vpop.f32.mrb[96].mxu1 }
 0x1b7   :  { %15981 = vst [vmem:[#allocation150_spill] sm:$0xff] %v12417_v6  ;;  %15982 = vst [vmem:[#allocation151_spill] sm:$0xff] %v12419_v61  ;;  %v1963_v44 = vmul.f32 %v11897_v7, %v12417_v6  ;;  %v2173_v37 = vmul.f32 %v11935_v46, %v12419_v61  ;;  %v10097_v16 = vpop.f32.mrb[97].mxu0  ;;  %v10133_v14 = vpop.f32.mrb[97].mxu1 }
 0x1b8   :  { %v12425_v35 = vpop.f32.mrb[98].mxu0  ;;  %v12427_v49 = vpop.f32.mrb[98].mxu1 }
 0x1b9   :  { %15983 = vst [vmem:[#allocation152_spill] sm:$0xff] %v12425_v35  ;;  %15984 = vst [vmem:[#allocation153_spill] sm:$0xff] %v12427_v49  ;;  %v1972_v18 = vadd.f32 %v1971_v3, %v1963_v44  ;;  %v2182_v57 = vadd.f32 %v2181_v10, %v2173_v37  ;;  %v1964_v56 = vmul.f32 %v11923_v5, %v12425_v35  ;;  %v12433_v38 = vpop.permute.xlu1 %2729  ;;  %v12435_v7 = vpop.permute.xlu0 %2618 }
 0x1ba   :  { %v2174_v60 = vmul.f32 %v15985_v26, %v12427_v49  ;;  %15986 = vst [vmem:[#allocation59_spill] sm:$0xff] %v12435_v7  ;;  %v10098_v6 = vpop.f32.mrb[99].mxu0  ;;  %v10134_v46 = vpop.f32.mrb[99].mxu1  ;;  %v16031_v7 = vld [vmem:[#allocation48_spill] sm:$0xff] }
 0x1bb   :  { %v1973_v16 = vadd.f32 %v1972_v18, %v1964_v56 }
 0x1bc   :  { %v2183_v14 = vadd.f32 %v2182_v57, %v2174_v60 }
 0x1bd   :  { %v1974_v59 = vrot.slane %v1973_v16, 4  ;;  %v12437_v12 = vpop.permute.xlu1 %2951  ;;  %v12439_v3 = vpop.permute.xlu0 %2840 }
 0x1be   :  { %v2184_v17 = vrot.slane %v2183_v14, 4  ;;  %15987 = vst [vmem:[#allocation154_spill] sm:$0xff] %v12437_v12  ;;  %15988 = vst [vmem:[#allocation155_spill] sm:$0xff] %v12439_v3  ;;  %v16015_v3 = vld [vmem:[#allocation39_spill] sm:$0xff] }
 0x1bf   :  { %v1975_v10 = vadd.f32 %v1974_v59, %v1973_v16  ;;  %v16001_v16 = vld [vmem:[#allocation29_spill] sm:$0xff] }
 0x1c0   :  { %v2185_v44 = vadd.f32 %v2184_v17, %v2183_v14  ;;  %v15993_v14 = vld [vmem:[#allocation16_spill] sm:$0xff] }
 0x1c1   :  { %v1976_v5 = vrot.slane %v1975_v10, 2  ;;  %v12441_v36 = vpop.permute.xlu1 %3173  ;;  %v12443_v21 = vpop.permute.xlu0 %3062 }
 0x1c2   :  { %v2186_v37 = vrot.slane %v2185_v44, 2  ;;  %15989 = vst [vmem:[#allocation156_spill] sm:$0xff] %v12441_v36  ;;  %15990 = vst [vmem:[#allocation157_spill] sm:$0xff] %v12443_v21  ;;  %v16029_v36 = vld [vmem:[#allocation44_spill] sm:$0xff] }
 0x1c3   :  { %v1977_v42 = vadd.f32 %v1976_v5, %v1975_v10  ;;  %v16002_v5 = vld [vmem:[#allocation31_spill] sm:$0xff] }
 0x1c4   :  { %v2187_v26 = vadd.f32 %v2186_v37, %v2185_v44  ;;  %v15994_v44 = vld [vmem:[#allocation18_spill] sm:$0xff] }
 0x1c5   :  { %v1978_v6 = vrot.slane %v1977_v42, 1  ;;  %v12446_v56 = vpop.permute.xlu1 %3284  ;;  %v12448_v12 = vpop.permute.xlu0 %3279 }
 0x1c6   :  { %v2188_v46 = vrot.slane %v2187_v26, 1  ;;  %15991 = vst [vmem:[#allocation158_spill] sm:$0xff] %v12446_v56  ;;  %15992 = vst [vmem:[#allocation159_spill] sm:$0xff] %v12448_v12 }
 0x1c7   :  { %v1979_v18 = vadd.f32 %v1978_v6, %v1977_v42  ;;  %v15995_v42 = vld [vmem:[#allocation20_spill] sm:$0xff]  ;;  %v15998_v6 = vld [vmem:[#allocation22_spill] sm:$0xff] }
 0x1c8   :  { %v2189_v57 = vadd.f32 %v2188_v46, %v2187_v26 }
 0x1c9   :  { %v1980_v60 = vadd.f32 %v1979_v18, %v12363_v54  ;;  %v12460_v37 = vpop.permute.xlu1 %2623  ;;  %v12462_v26 = vpop.permute.xlu0 %2512  ;;  %v15999_v18 = vld [vmem:[#allocation24_spill] sm:$0xff]  ;;  %v16003_v54 = vld [vmem:[#allocation33_spill] sm:$0xff] }
 0x1ca   :  { %15996 = vst [vmem:[#allocation160_spill] sm:$0xff] %v12460_v37  ;;  %15997 = vst [vmem:[#allocation161_spill] sm:$0xff] %v12462_v26  ;;  %v16004_v26 = vld [vmem:[#allocation35_spill] sm:$0xff] }
 0x1cb   :  { %v2190_v59 = vadd.f32 %v2189_v57, %v1980_v60  ;;  %v16000_v57 = vld [vmem:[#allocation26_spill] sm:$0xff]  ;;  %v16035_v60 = vld [vmem:[#allocation60_spill] sm:$0xff] }
 0x1cd   :  { %v12450_v17 = vmul.f32 0.005, %v2190_v59  ;;  %v12512_v46 = vpop.permute.xlu1 %2845  ;;  %v12514_v10 = vpop.permute.xlu0 %2734 }
 0x1ce   :  { %16022 = vst [vmem:[#allocation35_spill] sm:$0xff] %v12512_v46  ;;  %16023 = vst [vmem:[#allocation162_spill] sm:$0xff] %v12514_v10  ;;  %v16030_v10 = vld [vmem:[#allocation46_spill] sm:$0xff] }
 0x1cf   :  { %v2687_v21 = vsub.f32 %v16035_v60, %v12450_v17  ;;  %v2688_v46 = vsub.f32 %v11951_v39, %v12450_v17  ;;  %v2689_v59 = vsub.f32 %v11973_v30, %v12450_v17  ;;  %v2690_v49 = vsub.f32 %v11987_v24, %v12450_v17  ;;  %v16036_v60 = vld [vmem:[#allocation61_spill] sm:$0xff]  ;;  %v16037_v39 = vld [vmem:[#allocation63_spill] sm:$0xff]  ;;  %v16046_v24 = vld [vmem:[#allocation100_spill] sm:$0xff] }
 0x1d0   :  { %v2691_v37 = vsub.f32 %v12012_v47, %v12450_v17  ;;  %v2692_v12 = vsub.f32 %v12026_v31, %v12450_v17  ;;  %v2693_v35 = vsub.f32 %v16041_v13, %v12450_v17 }
 0x1d1   :  { %v12564_v32 = vpop.permute.xlu1 %3067  ;;  %v12566_v56 = vpop.permute.xlu0 %2956  ;;  %v2747_v15 = vmul.f32 %v16042_v4, %v2687_v21  ;;  %v2748_v27 = vmul.f32 %v16043_v28, %v2688_v46  ;;  %v2749_v48 = vmul.f32 %v16046_v24, %v2689_v59  ;;  %v2750_v47 = vmul.f32 %v12229_v62, %v2690_v49  ;;  %v16048_v28 = vld [vmem:[#allocation65_spill] sm:$0xff] }
 0x1d2   :  { %16038 = vst [vmem:[#allocation163_spill] sm:$0xff] %v12564_v32  ;;  %16039 = vst [vmem:[#allocation164_spill] sm:$0xff] %v12566_v56  ;;  %v2751_v31 = vmul.f32 %v12301_v51, %v2691_v37  ;;  %v2752_v2 = vmul.f32 %v12365_v19, %v2692_v12  ;;  %v2753_v63 = vmul.f32 %v12433_v38, %v2693_v35  ;;  %v16050_v19 = vld [vmem:[#allocation64_spill] sm:$0xff] }
 0x1d3   :  { %v2757_v61 = vmul.f32 %v2747_v15, %v2747_v15  ;;  %v2758_v13 = vmul.f32 %v2748_v27, %v2748_v27  ;;  %v16047_v4 = vsub.f32 %v15993_v14, %v12450_v17  ;;  %v2759_v46 = vmul.f32 %v2749_v48, %v2749_v48  ;;  %v16052_v27 = vld [vmem:[#allocation73_spill] sm:$0xff]  ;;  %v16058_v35 = vld [vmem:[#allocation96_spill] sm:$0xff] }
 0x1d4   :  { %v2760_v23 = vmul.f32 %v2750_v47, %v2750_v47  ;;  %v2762_v24 = vmul.f32 %v2752_v2, %v2752_v2  ;;  %v2763_v59 = vmul.f32 %v2753_v63, %v2753_v63  ;;  %v16049_v51 = vsub.f32 %v15994_v44, %v12450_v17  ;;  %v16054_v47 = vld [vmem:[#allocation80_spill] sm:$0xff]  ;;  %v16056_v63 = vld [vmem:[#allocation86_spill] sm:$0xff] }
 0x1d5   :  { %v12614_v30 = vpop.permute.xlu1 %3289  ;;  %v12616_v40 = vpop.permute.xlu0 %3178  ;;  %v12627_v21 = vmul.f32 %v16048_v28, %v16047_v4  ;;  %v2767_v62 = vadd.f32 %v2758_v13, %v2757_v61  ;;  %v16051_v15 = vsub.f32 %v15995_v42, %v12450_v17  ;;  %v16053_v48 = vsub.f32 %v15998_v6, %v12450_v17  ;;  %v16094_v42 = vld [vmem:[#allocation149_spill] sm:$0xff] }
 0x1d6   :  { %16044 = vst [vmem:[#allocation94_spill] sm:$0xff] %v12614_v30  ;;  %16045 = vst [vmem:[#allocation97_spill] sm:$0xff] %v12616_v40  ;;  %v2761_v40 = vmul.f32 %v2751_v31, %v2751_v31  ;;  %v12633_v12 = vmul.f32 %v16050_v19, %v16049_v51  ;;  %v16055_v13 = vsub.f32 %v15999_v18, %v12450_v17  ;;  %v16114_v30 = vld [vmem:[#allocation124_spill] sm:$0xff] }
 0x1d7   :  { %v12639_v38 = vmul.f32 %v16052_v27, %v16051_v15  ;;  %v12645_v31 = vmul.f32 %v16054_v47, %v16053_v48  ;;  %v16057_v61 = vsub.f32 %v16000_v57, %v12450_v17  ;;  %v16059_v37 = vsub.f32 %v16001_v16, %v12450_v17 }
 0x1d8   :  { %v12651_v2 = vmul.f32 %v16056_v63, %v16055_v13  ;;  %v2768_v28 = vadd.f32 %v2767_v62, %v2759_v46  ;;  %v16060_v51 = vsub.f32 %v16002_v5, %v12450_v17  ;;  %v16061_v15 = vsub.f32 %v16003_v54, %v12450_v17  ;;  %v16065_v62 = vld [vmem:[#allocation17_spill] sm:$0xff]  ;;  %v16067_v13 = vld [vmem:[#allocation67_spill] sm:$0xff] }
 0x1d9   :  { %v12657_v49 = vmul.f32 %v16058_v35, %v16057_v61  ;;  %v12663_v4 = vmul.f32 %v12193_v58, %v16059_v37  ;;  %v16062_v48 = vsub.f32 %v16004_v26, %v12450_v17  ;;  %v12683_v58 = vpop.permute.xlu1 %2739  ;;  %v12685_v46 = vpop.permute.xlu0 %2628  ;;  %v16068_v61 = vld [vmem:[#allocation19_spill] sm:$0xff]  ;;  %v16070_v35 = vld [vmem:[#allocation66_spill] sm:$0xff]  ;;  %v16071_v26 = vld [vmem:[#allocation21_spill] sm:$0xff] }
 0x1da   :  { %v12669_v19 = vmul.f32 %v12265_v29, %v16060_v51  ;;  %v12675_v27 = vmul.f32 %v12335_v52, %v16061_v15  ;;  %16063 = vst [vmem:[#allocation100_spill] sm:$0xff] %v12683_v58  ;;  %16064 = vst [vmem:[#allocation65_spill] sm:$0xff] %v12685_v46  ;;  %v16066_v29 = vsub.f32 %v16065_v62, %v12450_v17  ;;  %v16073_v51 = vld [vmem:[#allocation72_spill] sm:$0xff]  ;;  %v16076_v5 = vld [vmem:[#allocation15_spill] sm:$0xff] }
 0x1db   :  { %v12681_v47 = vmul.f32 %v12409_v34, %v16062_v48  ;;  %v16069_v52 = vsub.f32 %v16068_v61, %v12450_v17  ;;  %v16072_v34 = vsub.f32 %v16071_v26, %v12450_v17  ;;  %v16074_v48 = vld [vmem:[#allocation23_spill] sm:$0xff]  ;;  %v16079_v61 = vld [vmem:[#allocation89_spill] sm:$0xff]  ;;  %v16082_v26 = vld [vmem:[#allocation8_spill] sm:$0xff] }
 0x1dc   :  { %v12691_v63 = vmul.f32 %v16067_v13, %v16066_v29  ;;  %v16075_v54 = vsub.f32 %v16074_v48, %v12450_v17  ;;  %v2769_v29 = vadd.f32 %v2768_v28, %v2760_v23  ;;  %v16077_v13 = vld [vmem:[#allocation25_spill] sm:$0xff] }
 0x1dd   :  { %v12697_v37 = vmul.f32 %v16070_v35, %v16069_v52  ;;  %v12703_v15 = vmul.f32 %v16073_v51, %v16072_v34  ;;  %v16078_v16 = vsub.f32 %v16077_v13, %v12450_v17  ;;  %v16080_v52 = vld [vmem:[#allocation27_spill] sm:$0xff]  ;;  %v16083_v34 = vld [vmem:[#allocation30_spill] sm:$0xff]  ;;  %v16085_v48 = vld [vmem:[#allocation105_spill] sm:$0xff] }
 0x1de   :  { %v12709_v62 = vmul.f32 %v16076_v5, %v16075_v54  ;;  %v16081_v35 = vsub.f32 %v16080_v52, %v12450_v17  ;;  %v16084_v51 = vsub.f32 %v16083_v34, %v12450_v17  ;;  %v16086_v5 = vld [vmem:[#allocation32_spill] sm:$0xff]  ;;  %v16088_v54 = vld [vmem:[#allocation118_spill] sm:$0xff]  ;;  %v16091_v13 = vld [vmem:[#allocation135_spill] sm:$0xff] }
 0x1df   :  { %v12715_v57 = vmul.f32 %v16079_v61, %v16078_v16  ;;  %v16087_v23 = vsub.f32 %v16086_v5, %v12450_v17  ;;  %v16089_v16 = vld [vmem:[#allocation34_spill] sm:$0xff] }
 0x1e0   :  { %v12721_v18 = vmul.f32 %v16082_v26, %v16081_v35  ;;  %v12727_v6 = vmul.f32 %v16085_v48, %v16084_v51  ;;  %v16090_v61 = vsub.f32 %v16089_v16, %v12450_v17  ;;  %v16092_v26 = vld [vmem:[#allocation36_spill] sm:$0xff]  ;;  %v16095_v48 = vsub.f32 %v16015_v3, %v12450_v17  ;;  %v16096_v51 = vld [vmem:[#allocation75_spill] sm:$0xff]  ;;  %v16099_v16 = vld [vmem:[#allocation74_spill] sm:$0xff] }
 0x1e1   :  { %v12733_v28 = vmul.f32 %v16088_v54, %v16087_v23  ;;  %v16093_v35 = vsub.f32 %v16092_v26, %v12450_v17  ;;  %v2770_v23 = vadd.f32 %v2769_v29, %v2761_v40  ;;  %v16097_v54 = vld [vmem:[#allocation41_spill] sm:$0xff]  ;;  %v16102_v26 = vld [vmem:[#allocation82_spill] sm:$0xff]  ;;  %v16105_v3 = vld [vmem:[#allocation88_spill] sm:$0xff] }
 0x1e2   :  { %v12739_v52 = vmul.f32 %v16091_v13, %v16090_v61  ;;  %v12751_v5 = vmul.f32 %v16096_v51, %v16095_v48  ;;  %v16098_v44 = vsub.f32 %v16097_v54, %v12450_v17  ;;  %v16100_v13 = vld [vmem:[#allocation43_spill] sm:$0xff]  ;;  %v16108_v29 = vld [vmem:[#allocation4_spill] sm:$0xff]  ;;  %v16111_v54 = vld [vmem:[#allocation110_spill] sm:$0xff] }
 0x1e3   :  { %v12745_v34 = vmul.f32 %v16094_v42, %v16093_v35  ;;  %v16101_v61 = vsub.f32 %v16100_v13, %v12450_v17  ;;  %v16103_v42 = vld [vmem:[#allocation45_spill] sm:$0xff]  ;;  %v16106_v48 = vld [vmem:[#allocation47_spill] sm:$0xff] }
 0x1e4   :  { %v12757_v14 = vmul.f32 %v16099_v16, %v16098_v44  ;;  %v16104_v35 = vsub.f32 %v16103_v42, %v12450_v17  ;;  %v16107_v40 = vsub.f32 %v16106_v48, %v12450_v17  ;;  %v16109_v44 = vld [vmem:[#allocation49_spill] sm:$0xff] }
 0x1e5   :  { %v12763_v58 = vmul.f32 %v16102_v26, %v16101_v61  ;;  %v16110_v16 = vsub.f32 %v16109_v44, %v12450_v17  ;;  %v16112_v61 = vld [vmem:[#allocation51_spill] sm:$0xff]  ;;  %v16121_v44 = vld [vmem:[#allocation148_spill] sm:$0xff] }
 0x1e6   :  { %v12769_v46 = vmul.f32 %v16105_v3, %v16104_v35  ;;  %v12775_v51 = vmul.f32 %v16108_v29, %v16107_v40  ;;  %v16113_v26 = vsub.f32 %v16112_v61, %v12450_v17  ;;  %v16116_v3 = vld [vmem:[#allocation53_spill] sm:$0xff]  ;;  %v2771_v40 = vadd.f32 %v2770_v23, %v2762_v24  ;;  %v16119_v29 = vld [vmem:[#allocation55_spill] sm:$0xff] }
 0x1e7   :  { %v12781_v13 = vmul.f32 %v16111_v54, %v16110_v16  ;;  %v16117_v35 = vsub.f32 %v16116_v3, %v12450_v17  ;;  %v16120_v56 = vsub.f32 %v16119_v29, %v12450_v17  ;;  %v16123_v54 = vld [vmem:[#allocation40_spill] sm:$0xff]  ;;  %v16125_v61 = vld [vmem:[#allocation81_spill] sm:$0xff]  ;;  %v16131_v24 = vsub.f32 %v16029_v36, %v12450_v17  ;;  %v16132_v23 = vld [vmem:[#allocation95_spill] sm:$0xff] }
 0x1e8   :  { %v12787_v42 = vmul.f32 %v16114_v30, %v16113_v26  ;;  %v16124_v16 = vsub.f32 %v16123_v54, %v12450_v17  ;;  %v16126_v30 = vld [vmem:[#allocation42_spill] sm:$0xff]  ;;  %v16139_v29 = vld [vmem:[#allocation123_spill] sm:$0xff]  ;;  %v16141_v36 = vld [vmem:[#allocation52_spill] sm:$0xff] }
 0x1e9   :  { %v12793_v48 = vmul.f32 %v16118_v11, %v16117_v35  ;;  %v12799_v32 = vmul.f32 %v16121_v44, %v16120_v56  ;;  %v16127_v26 = vsub.f32 %v16126_v30, %v12450_v17  ;;  %v12811_v11 = vpop.permute.xlu0 %2850  ;;  %v2633_v56 = vmul.f32 %v16132_v23, %v16131_v24  ;;  %v16134_v35 = vld [vmem:[#allocation101_spill] sm:$0xff]  ;;  %v16143_v23 = vld [vmem:[#allocation38_spill] sm:$0xff] }
 0x1ea   :  { %16115 = vst [vmem:[#allocation64_spill] sm:$0xff] %v12787_v42  ;;  %v2631_v45 = vmul.f32 %v16125_v61, %v16124_v16  ;;  %v12809_v42 = vpop.permute.xlu1 %2961  ;;  %16130 = vst [vmem:[#allocation86_spill] sm:$0xff] %v12811_v11  ;;  %v16133_v44 = vsub.f32 %v16030_v10, %v12450_v17  ;;  %v16135_v61 = vsub.f32 %v16031_v7, %v12450_v17  ;;  %v16136_v16 = vld [vmem:[#allocation109_spill] sm:$0xff] }
 0x1eb   :  { %16122 = vst [vmem:[#allocation73_spill] sm:$0xff] %v12799_v32  ;;  %v2632_v3 = vmul.f32 %v16128_v33, %v16127_v26  ;;  %16129 = vst [vmem:[#allocation80_spill] sm:$0xff] %v12809_v42  ;;  %v16137_v33 = vld [vmem:[#allocation50_spill] sm:$0xff]  ;;  %v12829_v42 = vadd.f32 %v2771_v40, %v2763_v59  ;;  %v16142_v24 = vsub.f32 %v16141_v36, %v12450_v17  ;;  %v16149_v59 = vld [vmem:[#allocation111_spill] sm:$0xff] }
 0x1ec   :  { %v2634_v54 = vmul.f32 %v16134_v35, %v16133_v44  ;;  %v2635_v30 = vmul.f32 %v16136_v16, %v16135_v61  ;;  %v16138_v26 = vsub.f32 %v16137_v33, %v12450_v17  ;;  %v16144_v44 = vsub.f32 %v16036_v60, %v12450_v17  ;;  %v16145_v35 = vld [vmem:[#allocation104_spill] sm:$0xff]  ;;  %v16147_v16 = vld [vmem:[#allocation9_spill] sm:$0xff] }
 0x1ed   :  { %16140 = vst [vmem:[#allocation96_spill] sm:$0xff] %v12829_v42  ;;  %v2637_v32 = vmul.f32 %v16143_v23, %v16142_v24  ;;  %v16146_v61 = vsub.f32 %v16037_v39, %v12450_v17  ;;  %v16151_v36 = vld [vmem:[#allocation125_spill] sm:$0xff]  ;;  %v16152_v23 = vsub.f32 %v12014_v9, %v12450_v17  ;;  %v16153_v60 = vld [vmem:[#allocation140_spill] sm:$0xff]  ;;  %v2643_v39 = vmul.f32 %v2633_v56, %v2633_v56  ;;  %v16175_v42 = vld [vmem:[#allocation59_spill] sm:$0xff] }
 0x1ee   :  { %v2636_v11 = vmul.f32 %v16139_v29, %v16138_v26  ;;  %v2863_v10 = vmul.f32 %v16145_v35, %v16144_v44  ;;  %v16148_v29 = vsub.f32 %v11975_v25, %v12450_v17  ;;  %v16150_v26 = vsub.f32 %v11989_v1, %v12450_v17 }
 0x1ef   :  { %v2864_v7 = vmul.f32 %v16147_v16, %v16146_v61  ;;  %v12855_v44 = vmul.f32 %v16153_v60, %v16152_v23  ;;  %v16154_v35 = vsub.f32 %v12120_v41, %v12450_v17  ;;  %v16155_v61 = vld [vmem:[#allocation117_spill] sm:$0xff]  ;;  %v16160_v60 = vsub.f32 %v12170_v0, %v12450_v17  ;;  %v16161_v23 = vld [vmem:[#allocation139_spill] sm:$0xff] }
 0x1f0   :  { %v2865_v40 = vmul.f32 %v16149_v59, %v16148_v29  ;;  %v2866_v24 = vmul.f32 %v16151_v36, %v16150_v26  ;;  %v16156_v29 = vsub.f32 %v12134_v20, %v12450_v17  ;;  %v16157_v59 = vld [vmem:[#allocation116_spill] sm:$0xff]  ;;  %v16158_v36 = vsub.f32 %v12156_v22, %v12450_v17  ;;  %v16159_v26 = vld [vmem:[#allocation129_spill] sm:$0xff] }
 0x1f1   :  { %v12861_v16 = vmul.f32 %v16155_v61, %v16154_v35  ;;  %v12879_v41 = vmul.f32 %v16161_v23, %v16160_v60  ;;  %v16162_v35 = vsub.f32 %v12122_v43, %v12450_v17  ;;  %v16163_v61 = vld [vmem:[#allocation12_spill] sm:$0xff]  ;;  %v16168_v60 = vsub.f32 %v12303_v53, %v12450_v17  ;;  %v16169_v23 = vld [vmem:[#allocation141_spill] sm:$0xff] }
 0x1f2   :  { %v12867_v25 = vmul.f32 %v16157_v59, %v16156_v29  ;;  %v12873_v9 = vmul.f32 %v16159_v26, %v16158_v36  ;;  %v16164_v29 = vsub.f32 %v12136_v8, %v12450_v17  ;;  %v16165_v59 = vld [vmem:[#allocation130_spill] sm:$0xff]  ;;  %v16166_v36 = vsub.f32 %v16040_v55, %v12450_v17 }
 0x1f3   :  { %v12885_v20 = vmul.f32 %v16163_v61, %v16162_v35  ;;  %v16167_v26 = vld [vmem:[#allocation142_spill] sm:$0xff]  ;;  %v12903_v43 = vmul.f32 %v16169_v23, %v16168_v60  ;;  %v16171_v35 = vsub.f32 %v12317_v50, %v12450_v17  ;;  %v16172_v61 = vld [vmem:[#allocation147_spill] sm:$0xff]  ;;  %v2641_v1 = vmul.f32 %v2631_v45, %v2631_v45 }
 0x1f4   :  { %v12891_v22 = vmul.f32 %v16165_v59, %v16164_v29  ;;  %v12897_v0 = vmul.f32 %v16167_v26, %v16166_v36  ;;  %v16173_v29 = vld [vmem:[#allocation54_spill] sm:$0xff]  ;;  %v2642_v55 = vmul.f32 %v2632_v3, %v2632_v3  ;;  %v12913_v36 = vpop.permute.xlu1 %3183  ;;  %v12915_v26 = vpop.permute.xlu0 %3072  ;;  %v2644_v53 = vmul.f32 %v2634_v54, %v2634_v54 }
 0x1f5   :  { %16170 = vst [vmem:[#allocation67_spill] sm:$0xff] %v12903_v43  ;;  %v12909_v8 = vmul.f32 %v16172_v61, %v16171_v35  ;;  %v2578_v59 = vsub.f32 %v16173_v29, %v12450_v17  ;;  %16174 = vst [vmem:[#allocation66_spill] sm:$0xff] %v12915_v26  ;;  %v2645_v33 = vmul.f32 %v2635_v30, %v2635_v30  ;;  %v16176_v30 = vld [vmem:[#allocation64_spill] sm:$0xff] }
 0x1f6   :  { %v2646_v60 = vmul.f32 %v2636_v11, %v2636_v11  ;;  %v2647_v23 = vmul.f32 %v2637_v32, %v2637_v32  ;;  %v2651_v50 = vadd.f32 %v2642_v55, %v2641_v1  ;;  %v2293_v35 = vmul.f32 %v12627_v21, %v12627_v21 }
 0x1f7   :  { %v2638_v43 = vmul.f32 %v16175_v42, %v2578_v59  ;;  %v2294_v61 = vmul.f32 %v12633_v12, %v12633_v12  ;;  %v12924_v45 = vmul.f32 %v12639_v38, %v12639_v38  ;;  %v12928_v3 = vmul.f32 %v12645_v31, %v12645_v31 }
 0x1f8   :  { %v12932_v32 = vmul.f32 %v12651_v2, %v12651_v2  ;;  %v12936_v1 = vmul.f32 %v12657_v49, %v12657_v49  ;;  %v2652_v21 = vadd.f32 %v2651_v50, %v2643_v39  ;;  %v12940_v12 = vmul.f32 %v12663_v4, %v12663_v4 }
 0x1f9   :  { %v2648_v55 = vmul.f32 %v2638_v43, %v2638_v43  ;;  %v12944_v38 = vmul.f32 %v12669_v19, %v12669_v19  ;;  %v12948_v31 = vmul.f32 %v12675_v27, %v12675_v27  ;;  %v12952_v2 = vmul.f32 %v12681_v47, %v12681_v47  ;;  %v12968_v27 = vpop.permute.xlu1 %2744  ;;  %v12970_v47 = vpop.permute.xlu0 %3294 }
 0x1fa   :  { %v2409_v43 = vmul.f32 %v12691_v63, %v12691_v63  ;;  %v2410_v39 = vmul.f32 %v12697_v37, %v12697_v37  ;;  %v2653_v50 = vadd.f32 %v2652_v21, %v2644_v53  ;;  %v2411_v49 = vmul.f32 %v12703_v15, %v12703_v15 }
 0x1fb   :  { %v12962_v4 = vmul.f32 %v12709_v62, %v12709_v62  ;;  %v12966_v19 = vmul.f32 %v12715_v57, %v12715_v57  ;;  %v12974_v63 = vmul.f32 %v12721_v18, %v12721_v18  ;;  %v12978_v53 = vmul.f32 %v12727_v6, %v12727_v6 }
 0x1fc   :  { %v12982_v62 = vmul.f32 %v12733_v28, %v12733_v28  ;;  %v12986_v57 = vmul.f32 %v12739_v52, %v12739_v52  ;;  %v2654_v37 = vadd.f32 %v2653_v50, %v2645_v33  ;;  %v12990_v15 = vmul.f32 %v12745_v34, %v12745_v34 }
 0x1fd   :  { %v2525_v18 = vmul.f32 %v12751_v5, %v12751_v5  ;;  %v2526_v6 = vmul.f32 %v12757_v14, %v12757_v14  ;;  %v2527_v42 = vmul.f32 %v12763_v58, %v12763_v58  ;;  %v2528_v28 = vmul.f32 %v12769_v46, %v12769_v46  ;;  %v16177_v58 = vld [vmem:[#allocation73_spill] sm:$0xff]  ;;  %v13028_v50 = vpop.permute.xlu0 %2855 }
 0x1fe   :  { %v13002_v52 = vmul.f32 %v12775_v51, %v12775_v51  ;;  %v13006_v34 = vmul.f32 %v12781_v13, %v12781_v13  ;;  %v2655_v54 = vadd.f32 %v2654_v37, %v2646_v60  ;;  %v13010_v5 = vmul.f32 %v16176_v30, %v16176_v30  ;;  %16179 = vst [vmem:[#allocation15_spill] sm:$0xff] %v13028_v50  ;;  %v16181_v37 = vld [vmem:[#allocation106_spill] sm:$0xff] }
 0x1ff   :  { %v13014_v14 = vmul.f32 %v12793_v48, %v12793_v48  ;;  %v13018_v46 = vmul.f32 %v16177_v58, %v16177_v58  ;;  %v2873_v11 = vmul.f32 %v2863_v10, %v2863_v10  ;;  %v2874_v51 = vmul.f32 %v2864_v7, %v2864_v7  ;;  %v13026_v48 = vpop.permute.xlu1 %2966 }
 0x200   :  { %v2875_v56 = vmul.f32 %v2865_v40, %v2865_v40  ;;  %v2876_v33 = vmul.f32 %v2866_v24, %v2866_v24  ;;  %v2656_v59 = vadd.f32 %v2655_v54, %v2647_v23  ;;  %v2877_v13 = vmul.f32 %v12855_v44, %v12855_v44  ;;  %16178 = vst [vmem:[#allocation72_spill] sm:$0xff] %v13026_v48 }
 0x201   :  { %v2989_v60 = vmul.f32 %v12861_v16, %v12861_v16  ;;  %v2990_v21 = vmul.f32 %v12867_v25, %v12867_v25  ;;  %v2991_v10 = vmul.f32 %v12873_v9, %v12873_v9  ;;  %v2992_v7 = vmul.f32 %v12879_v41, %v12879_v41  ;;  %v16180_v16 = vld [vmem:[#allocation67_spill] sm:$0xff] }
 0x202   :  { %v3105_v40 = vmul.f32 %v12885_v20, %v12885_v20  ;;  %v3106_v24 = vmul.f32 %v12891_v22, %v12891_v22  ;;  %v13038_v44 = vadd.f32 %v2656_v59, %v2648_v55  ;;  %v3107_v25 = vmul.f32 %v12897_v0, %v12897_v0  ;;  %v16182_v59 = vld [vmem:[#allocation154_spill] sm:$0xff]  ;;  %v16183_v0 = vld [vmem:[#allocation79_spill] sm:$0xff] }
 0x203   :  { %v3221_v23 = vmul.f32 %v16180_v16, %v16180_v16  ;;  %v3222_v9 = vmul.f32 %v12909_v8, %v12909_v8  ;;  %v2923_v41 = vsub.f32 %v16181_v37, %v12450_v17  ;;  %v2999_v54 = vadd.f32 %v2990_v21, %v2989_v60  ;;  %v10270_v8 = vld [vmem:[%s15583_s5 + $0x40] sm:$0xff]   ;;  %v16185_v21 = vld [vmem:[#allocation131_spill] sm:$0xff] }
 0x204   :  { %v2303_v30 = vadd.f32 %v2294_v61, %v2293_v35  ;;  %v2419_v20 = vadd.f32 %v2410_v39, %v2409_v43  ;;  %v2535_v58 = vadd.f32 %v2526_v6, %v2525_v18  ;;  %v2883_v29 = vadd.f32 %v2874_v51, %v2873_v11  ;;  %v13055_v43 = vpop.permute.xlu1 %3188  ;;  %v13057_v39 = vpop.permute.xlu0 %3077  ;;  %v10271_v18 = vld [vmem:[%s15583_s5] sm:$0xff]   ;;  %v16184_v51 = vld [vmem:[#allocation155_spill] sm:$0xff]  ;;  %9084 = vmatprep.subr.bf16.mxu0 %v10270_v8 }
 0x205   :  { %v3115_v22 = vadd.f32 %v3106_v24, %v3105_v40  ;;  %v3231_v55 = vadd.f32 %v3222_v9, %v3221_v23  ;;  %v2983_v50 = vmul.f32 %v16182_v59, %v2923_v41  ;;  %v3000_v48 = vadd.f32 %v2999_v54, %v2991_v10  ;;  %9085 = vmatpush3.bf16.msra.mxu0 %v10271_v18  ;;  %v10273_v9 = vld [vmem:[%s15583_s5 + $0x8] sm:$0xff]   ;;  %v16192_v59 = vld [vmem:[#allocation127_spill] sm:$0xff] }
 0x206   :  { %v2808_v26 = vsub.f32 %v16183_v0, %v12450_v17  ;;  %v2304_v16 = vadd.f32 %v2303_v30, %v12924_v45  ;;  %v2884_v37 = vadd.f32 %v2883_v29, %v2875_v56  ;;  %v2420_v60 = vadd.f32 %v2419_v20, %v2411_v49  ;;  %v16188_v41 = vld [vmem:[#allocation157_spill] sm:$0xff]  ;;  %v16189_v30 = vld [vmem:[#allocation128_spill] sm:$0xff] }
 0x207   :  { %v2536_v35 = vadd.f32 %v2535_v58, %v2527_v42  ;;  %v3116_v61 = vadd.f32 %v3115_v22, %v3107_v25  ;;  %v2993_v6 = vmul.f32 %v2983_v50, %v2983_v50  ;;  %v3001_v11 = vadd.f32 %v3000_v48, %v2992_v7  ;;  %v16186_v25 = vld [vmem:[#allocation156_spill] sm:$0xff]  ;;  %v16187_v48 = vld [vmem:[#allocation11_spill] sm:$0xff]  ;;  %v16191_v58 = vld [vmem:[#allocation158_spill] sm:$0xff] }
 0x208   :  { %v2868_v45 = vmul.f32 %v16184_v51, %v2808_v26  ;;  %v3153_v10 = vsub.f32 %v16185_v21, %v12450_v17  ;;  %v2885_v29 = vadd.f32 %v2884_v37, %v2876_v33  ;;  %v2305_v49 = vadd.f32 %v2304_v16, %v12928_v3  ;;  %v10272_v26 = vld [vmem:[%s15583_s5 + $0x48] sm:$0xff]   ;;  %v10274_v3 = vld [vmem:[%s15583_s5 + $0xc0] sm:$0xff]   ;;  %v13099_v18 = vpop.permute.xlu1 %2860 }
 0x209   :  { %v2421_v42 = vadd.f32 %v2420_v60, %v12962_v4  ;;  %v2537_v56 = vadd.f32 %v2536_v35, %v2528_v28  ;;  %v13067_v40 = vadd.f32 %v3001_v11, %v2993_v6  ;;  %v3038_v50 = vsub.f32 %v16187_v48, %v12450_v17  ;;  %9086 = vmatprep.subr.bf16.mxu0 %v10272_v26  ;;  %v13101_v6 = vpop.permute.xlu0 %3299  ;;  %v16199_v26 = vld [vmem:[#allocation84_spill] sm:$0xff] }
 0x20a   :  { %v2878_v24 = vmul.f32 %v2868_v45, %v2868_v45  ;;  %v3213_v23 = vmul.f32 %v16186_v25, %v3153_v10  ;;  %v2886_v33 = vadd.f32 %v2885_v29, %v2877_v13  ;;  %v2306_v4 = vadd.f32 %v2305_v49, %v12932_v32  ;;  %v16194_v32 = vld [vmem:[#allocation159_spill] sm:$0xff]  ;;  %9087 = vmatpush3.bf16.msra.mxu0 %v10273_v9  ;;  %v10275_v29 = vld [vmem:[%s15583_s5 + $0x50] sm:$0xff]  }
 0x20b   :  { %v2422_v28 = vadd.f32 %v2421_v42, %v12966_v19  ;;  %v2538_v7 = vadd.f32 %v2537_v56, %v13002_v52  ;;  %v3098_v54 = vmul.f32 %v16188_v41, %v3038_v50  ;;  %v16190_v20 = vsub.f32 %v16189_v30, %v12450_v17  ;;  %v10276_v19 = vld [vmem:[%s15583_s5 + $0x80] sm:$0xff]   ;;  %9130 = vmatprep.subr.bf16.mxu1 %v10274_v3  ;;  %v10277_v56 = vld [vmem:[%s15583_s5 + $0x10] sm:$0xff]   ;;  %v16198_v50 = vld [vmem:[#allocation161_spill] sm:$0xff] }
 0x20c   :  { %v3223_v37 = vmul.f32 %v3213_v23, %v3213_v23  ;;  %v16193_v13 = vsub.f32 %v16192_v59, %v12450_v17  ;;  %v2887_v52 = vadd.f32 %v2886_v33, %v2878_v24  ;;  %v2307_v8 = vadd.f32 %v2306_v4, %v12936_v1  ;;  %v10278_v1 = vld [vmem:[%s15583_s5 + $0xc8] sm:$0xff]   ;;  %9131 = vmatpush3.bf16.msra.mxu1 %v10276_v19  ;;  %v16200_v33 = vld [vmem:[#allocation160_spill] sm:$0xff]  ;;  %v10281_v19 = vld [vmem:[%s15583_s5 + $0x18] sm:$0xff]  }
 0x20d   :  { %v3328_v22 = vmul.f32 %v16191_v58, %v16190_v20  ;;  %v2423_v60 = vadd.f32 %v2422_v28, %v12974_v63  ;;  %v2539_v35 = vadd.f32 %v2538_v7, %v13006_v34  ;;  %v3108_v51 = vmul.f32 %v3098_v54, %v3098_v54  ;;  %v10279_v24 = vld [vmem:[%s15583_s5 + $0x88] sm:$0xff]   ;;  %9088 = vmatprep.subr.bf16.mxu0 %v10275_v29  ;;  %v16203_v20 = vld [vmem:[#allocation107_spill] sm:$0xff] }
 0x20e   :  { %v3327_v16 = vmul.f32 %v16194_v32, %v16193_v13  ;;  %v13103_v11 = vadd.f32 %v3231_v55, %v3223_v37  ;;  %v2308_v63 = vadd.f32 %v2307_v8, %v12940_v12  ;;  %v16195_v55 = vld [vmem:[#allocation56_spill] sm:$0xff]  ;;  %v16196_v12 = vld [vmem:[#allocation57_spill] sm:$0xff]  ;;  %v2809_v3 = vsub.f32 %v16199_v26, %v12450_v17  ;;  %9089 = vmatpush3.bf16.msra.mxu0 %v10277_v56  ;;  %v16201_v37 = vld [vmem:[#allocation35_spill] sm:$0xff]  ;;  %v13148_v32 = vpop.permute.xlu1 %3082 }
 0x20f   :  { %v3338_v45 = vmul.f32 %v3328_v22, %v3328_v22  ;;  %v2424_v34 = vadd.f32 %v2423_v60, %v12978_v53  ;;  %v2540_v49 = vadd.f32 %v2539_v35, %v13010_v5  ;;  %v2579_v42 = vsub.f32 %v16195_v55, %v12450_v17  ;;  %v16202_v54 = vld [vmem:[#allocation13_spill] sm:$0xff]  ;;  %9132 = vmatprep.subr.bf16.mxu1 %v10278_v1  ;;  %v10280_v22 = vld [vmem:[%s15583_s5 + $0x58] sm:$0xff]   ;;  %v10283_v8 = vld [vmem:[%s15583_s5 + $0x90] sm:$0xff]  }
 0x210   :  { %v3337_v10 = vmul.f32 %v3327_v16, %v3327_v16  ;;  %v3117_v25 = vadd.f32 %v3116_v61, %v3108_v51  ;;  %v16197_v53 = vsub.f32 %v16196_v12, %v12450_v17  ;;  %v2309_v28 = vadd.f32 %v2308_v63, %v12944_v38  ;;  %v10282_v38 = vld [vmem:[%s15583_s5 + $0xd0] sm:$0xff]   ;;  %v13150_v16 = vpop.permute.xlu0 %2971  ;;  %9133 = vmatpush3.bf16.msra.mxu1 %v10279_v24  ;;  %v16205_v51 = vld [vmem:[#allocation163_spill] sm:$0xff]  ;;  %v16207_v12 = vld [vmem:[#allocation164_spill] sm:$0xff] }
 0x211   :  { %v2639_v4 = vmul.f32 %v16200_v33, %v2579_v42  ;;  %v2425_v7 = vadd.f32 %v2424_v34, %v12982_v62  ;;  %v2541_v9 = vadd.f32 %v2540_v49, %v13014_v14  ;;  %v2869_v41 = vmul.f32 %v16201_v37, %v2809_v3  ;;  %v16204_v35 = vld [vmem:[#allocation162_spill] sm:$0xff]  ;;  %9090 = vmatprep.subr.bf16.mxu0 %v10280_v22  ;;  %v10285_v49 = vld [vmem:[%s15583_s5 + $0x20] sm:$0xff]   ;;  %v16212_v37 = vld [vmem:[#allocation133_spill] sm:$0xff] }
 0x212   :  { %v13122_v23 = vadd.f32 %v3338_v45, %v3337_v10  ;;  %v2524_v5 = vmul.f32 %v16198_v50, %v16197_v53  ;;  %v2694_v30 = vsub.f32 %v16202_v54, %v12450_v17  ;;  %v3039_v58 = vsub.f32 %v16203_v20, %v12450_v17  ;;  %v10284_v10 = vld [vmem:[%s15583_s5 + $0x60] sm:$0xff]   ;;  %9091 = vmatpush3.bf16.msra.mxu0 %v10281_v19  ;;  %v16210_v33 = vld [vmem:[#allocation94_spill] sm:$0xff] }
 0x213   :  { %v2649_v62 = vmul.f32 %v2639_v4, %v2639_v4  ;;  %v2310_v14 = vadd.f32 %v2309_v28, %v12948_v31  ;;  %v2426_v59 = vadd.f32 %v2425_v7, %v12986_v57  ;;  %v2542_v13 = vadd.f32 %v2541_v9, %v13018_v46  ;;  %v16206_v46 = vld [vmem:[#allocation14_spill] sm:$0xff]  ;;  %9134 = vmatprep.subr.bf16.mxu1 %v10282_v38  ;;  %v16211_v28 = vld [vmem:[#allocation96_spill] sm:$0xff] }
 0x214   :  { %v2534_v61 = vmul.f32 %v2524_v5, %v2524_v5  ;;  %v2879_v60 = vmul.f32 %v2869_v41, %v2869_v41  ;;  %v2754_v31 = vmul.f32 %v16204_v35, %v2694_v30  ;;  %v3099_v57 = vmul.f32 %v16205_v51, %v3039_v58  ;;  %v16208_v5 = vld [vmem:[#allocation132_spill] sm:$0xff]  ;;  %9135 = vmatpush3.bf16.msra.mxu1 %v10283_v8  ;;  %v16214_v8 = vld [vmem:[#allocation90_spill] sm:$0xff]  ;;  %v16217_v51 = vld [vmem:[#allocation65_spill] sm:$0xff] }
 0x215   :  { %v2924_v45 = vsub.f32 %v16206_v46, %v12450_v17  ;;  %v2658_v29 = vadd.f32 %v13038_v44, %v2649_v62  ;;  %v2311_v1 = vadd.f32 %v2310_v14, %v12952_v2  ;;  %v2427_v63 = vadd.f32 %v2426_v59, %v12990_v15  ;;  %v10286_v44 = vld [vmem:[%s15583_s5 + $0xd8] sm:$0xff]   ;;  %9092 = vmatprep.subr.bf16.mxu0 %v10284_v10  ;;  %v13189_v62 = vpop.permute.xlu1 %3304  ;;  %v13191_v14 = vpop.permute.xlu0 %3193  ;;  %v10288_v59 = vld [vmem:[%s15583_s5 + $0x68] sm:$0xff]   ;;  %v16215_v35 = vld [vmem:[#allocation58_spill] sm:$0xff] }
 0x216   :  { %v2543_v34 = vadd.f32 %v2542_v13, %v2534_v61  ;;  %v13171_v42 = vadd.f32 %v2887_v52, %v2879_v60  ;;  %v2764_v56 = vmul.f32 %v2754_v31, %v2754_v31  ;;  %v3109_v24 = vmul.f32 %v3099_v57, %v3099_v57  ;;  %v10287_v52 = vld [vmem:[%s15583_s5 + $0x98] sm:$0xff]   ;;  %9136 = vmatprep.subr.bf16.mxu1 %v10286_v44  ;;  %v16213_v13 = vld [vmem:[#allocation97_spill] sm:$0xff] }
 0x217   :  { %v2984_v53 = vmul.f32 %v16207_v12, %v2924_v45  ;;  %v2312_v2 = vrot.slane %v2311_v1, 4  ;;  %v2428_v50 = vrot.slane %v2427_v63, 4  ;;  %v16209_v3 = vsub.f32 %v16208_v5, %v12450_v17  ;;  %9093 = vmatpush3.bf16.msra.mxu0 %v10285_v49  ;;  %v10289_v45 = vld [vmem:[%s15583_s5 + $0xe0] sm:$0xff]   ;;  %v16220_v5 = vld [vmem:[#allocation85_spill] sm:$0xff] }
 0x218   :  { %v2544_v15 = vrot.slane %v2543_v34, 4  ;;  %v2773_v7 = vadd.f32 %v16211_v28, %v2764_v56  ;;  %v13185_v9 = vadd.f32 %v3117_v25, %v3109_v24  ;;  %v3154_v41 = vsub.f32 %v16212_v37, %v12450_v17  ;;  %9137 = vmatpush3.bf16.msra.mxu1 %v10287_v52  ;;  %9094 = vmatprep.subr.bf16.mxu0 %v10288_v59  ;;  %v16218_v56 = vld [vmem:[#allocation100_spill] sm:$0xff]  ;;  %v16222_v59 = vld [vmem:[#allocation86_spill] sm:$0xff] }
 0x219   :  { %v3329_v4 = vmul.f32 %v16210_v33, %v16209_v3  ;;  %v2994_v61 = vmul.f32 %v2984_v53, %v2984_v53  ;;  %v2313_v30 = vadd.f32 %v2312_v2, %v2311_v1  ;;  %v2429_v58 = vadd.f32 %v2428_v50, %v2427_v63  ;;  %v16219_v53 = vld [vmem:[#allocation112_spill] sm:$0xff]  ;;  %9138 = vmatprep.subr.bf16.mxu1 %v10289_v45  ;;  %v10292_v33 = vld [vmem:[%s15583_s5 + $0xe8] sm:$0xff]   ;;  %v10295_v45 = vld [vmem:[%s15583_s5 + $0x30] sm:$0xff]  }
 0x21a   :  { %v2545_v22 = vadd.f32 %v2544_v15, %v2543_v34  ;;  %v3214_v19 = vmul.f32 %v16213_v13, %v3154_v41  ;;  %v2695_v60 = vsub.f32 %v16214_v8, %v12450_v17  ;;  %v16216_v31 = vsub.f32 %v16215_v35, %v12450_v17  ;;  %v10291_v2 = vld [vmem:[%s15583_s5 + $0xa0] sm:$0xff]  }
 0x21b   :  { %v3339_v38 = vmul.f32 %v3329_v4, %v3329_v4  ;;  %v3003_v25 = vadd.f32 %v13067_v40, %v2994_v61  ;;  %v2314_v10 = vrot.slane %v2313_v30, 2  ;;  %v2430_v1 = vrot.slane %v2429_v58, 2  ;;  %v10290_v40 = vld [vmem:[%s15583_s5 + $0x28] sm:$0xff]   ;;  %v16221_v61 = vld [vmem:[#allocation80_spill] sm:$0xff] }
 0x21c   :  { %v2640_v57 = vmul.f32 %v16217_v51, %v16216_v31  ;;  %v2546_v63 = vrot.slane %v2545_v22, 2  ;;  %v3224_v49 = vmul.f32 %v3214_v19, %v3214_v19  ;;  %v2755_v24 = vmul.f32 %v16218_v56, %v2695_v60  ;;  %9095 = vmatpush3.bf16.msra.mxu0 %v10290_v40  ;;  %v13230_v19 = vpop.permute.xlu1 %3087  ;;  %v13232_v60 = vpop.permute.xlu0 %2976  ;;  %9139 = vmatpush3.bf16.msra.mxu1 %v10291_v2  ;;  %v16223_v51 = vld [vmem:[#allocation136_spill] sm:$0xff]  ;;  %v10297_v2 = vld [vmem:[%s15583_s5 + $0xb0] sm:$0xff]  }
 0x21d   :  { %v13208_v34 = vadd.f32 %v13122_v23, %v3339_v38  ;;  %v2925_v44 = vsub.f32 %v16219_v53, %v12450_v17  ;;  %v2315_v23 = vadd.f32 %v2314_v10, %v2313_v30  ;;  %v2431_v50 = vadd.f32 %v2430_v1, %v2429_v58  ;;  %v10293_v30 = vld [vmem:[%s15583_s5 + $0x70] sm:$0xff]   ;;  %9140 = vmatprep.subr.bf16.mxu1 %v10292_v33 }
 0x21e   :  { %v2650_v12 = vmul.f32 %v2640_v57, %v2640_v57  ;;  %v2547_v15 = vadd.f32 %v2546_v63, %v2545_v22  ;;  %v2810_v3 = vsub.f32 %v16220_v5, %v12450_v17  ;;  %v3233_v4 = vadd.f32 %v13103_v11, %v3224_v49  ;;  %v10294_v11 = vld [vmem:[%s15583_s5 + $0xa8] sm:$0xff]   ;;  %9096 = vmatprep.subr.bf16.mxu0 %v10293_v30  ;;  %v10296_v49 = vld [vmem:[%s15583_s5 + $0xf0] sm:$0xff]  }
 0x21f   :  { %v2765_v52 = vmul.f32 %v2755_v24, %v2755_v24  ;;  %v2985_v41 = vmul.f32 %v16221_v61, %v2925_v44  ;;  %v2316_v58 = vrot.slane %v2315_v23, 1  ;;  %v2432_v22 = vrot.slane %v2431_v50, 1  ;;  %v16229_v30 = vld [vmem:[#allocation66_spill] sm:$0xff] }
 0x220   :  { %v2659_v28 = vadd.f32 %v2658_v29, %v2650_v12  ;;  %v2548_v38 = vrot.slane %v2547_v15, 1  ;;  %v2870_v13 = vmul.f32 %v16222_v59, %v2810_v3  ;;  %v3155_v57 = vsub.f32 %v16223_v51, %v12450_v17  ;;  %v16224_v12 = vld [vmem:[#allocation108_spill] sm:$0xff]  ;;  %9097 = vmatpush3.bf16.msra.mxu0 %v10295_v45  ;;  %9141 = vmatpush3.bf16.msra.mxu1 %v10294_v11 }
 0x221   :  { %v2774_v29 = vadd.f32 %v2773_v7, %v2765_v52  ;;  %v2995_v31 = vmul.f32 %v2985_v41, %v2985_v41  ;;  %v2317_v10 = vadd.f32 %v2316_v58, %v2315_v23  ;;  %v2433_v1 = vadd.f32 %v2432_v22, %v2431_v50  ;;  %v16227_v52 = vld [vmem:[#allocation134_spill] sm:$0xff]  ;;  %9142 = vmatprep.subr.bf16.mxu1 %v10296_v49 }
 0x222   :  { %v2660_v35 = vrot.slane %v2659_v28, 4  ;;  %v2549_v63 = vadd.f32 %v2548_v38, %v2547_v15  ;;  %v2880_v40 = vmul.f32 %v2870_v13, %v2870_v13  ;;  %v3215_v24 = vmul.f32 %v12913_v36, %v3155_v57  ;;  %v16225_v15 = vld [vmem:[#allocation92_spill] sm:$0xff]  ;;  %v16231_v13 = vld [vmem:[#allocation91_spill] sm:$0xff] }
 0x223   :  { %v3004_v56 = vadd.f32 %v3003_v25, %v2995_v31  ;;  %v3040_v44 = vsub.f32 %v16224_v12, %v12450_v17  ;;  %v2434_v23 = vadd.f32 %v2433_v1, %v2317_v10  ;;  %v16226_v3 = vsub.f32 %v16225_v15, %v12450_v17  ;;  %v13273_v31 = vpop.permute.xlu0 %3198  ;;  %v10300_v57 = vld [vmem:[%s15583_s5 + $0xf8] sm:$0xff]  }
 0x224   :  { %v2661_v7 = vadd.f32 %v2660_v35, %v2659_v28  ;;  %v2889_v50 = vadd.f32 %v13171_v42, %v2880_v40  ;;  %v16228_v25 = vsub.f32 %v16227_v52, %v12450_v17  ;;  %v10298_v28 = vld [vmem:[%s15583_s5 + $0x78] sm:$0xff]   ;;  %v3225_v41 = vmul.f32 %v3215_v24, %v3215_v24  ;;  %v16230_v42 = vld [vmem:[#allocation114_spill] sm:$0xff]  ;;  %v13271_v35 = vpop.permute.xlu1 %3309  ;;  %v16232_v40 = vld [vmem:[#allocation72_spill] sm:$0xff]  ;;  %9143 = vmatpush3.bf16.msra.mxu1 %v10297_v2 }
 0x225   :  { %v2756_v33 = vmul.f32 %v12968_v27, %v16226_v3  ;;  %v3100_v58 = vmul.f32 %v16229_v30, %v3040_v44  ;;  %v2926_v22 = vsub.f32 %v16230_v42, %v12450_v17  ;;  %v10299_v27 = vld [vmem:[%s15583_s5 + $0x38] sm:$0xff]   ;;  %v2550_v38 = vadd.f32 %v2549_v63, %v2434_v23  ;;  %9098 = vmatprep.subr.bf16.mxu0 %v10298_v28  ;;  %v16234_v3 = vld [vmem:[#allocation37_spill] sm:$0xff] }
 0x226   :  { %v3330_v36 = vmul.f32 %v12970_v47, %v16228_v25  ;;  %v2662_v61 = vrot.slane %v2661_v7, 2  ;;  %v2811_v11 = vsub.f32 %v16231_v13, %v12450_v17  ;;  %v3234_v10 = vadd.f32 %v3233_v4, %v3225_v41  ;;  %9099 = vmatpush3.bf16.msra.mxu0 %v10299_v27  ;;  %v10301_v63 = vld [vmem:[%s15583_s5 + $0xb8] sm:$0xff]   ;;  %v10302_v4 = vld [vmem:[%s15583_s5 + $0x140] sm:$0xff]   ;;  %9144 = vmatprep.subr.bf16.mxu1 %v10300_v57  ;;  %v16236_v41 = vld [vmem:[#allocation93_spill] sm:$0xff] }
 0x227   :  { %v2766_v59 = vmul.f32 %v2756_v33, %v2756_v33  ;;  %v3110_v1 = vmul.f32 %v3100_v58, %v3100_v58  ;;  %v2986_v49 = vmul.f32 %v16232_v40, %v2926_v22  ;;  %v16233_v23 = vld [vmem:[#allocation15_spill] sm:$0xff]  ;;  %v3156_v33 = vsub.f32 %v16234_v3, %v12450_v17  ;;  %9176 = vmatprep.subr.bf16.mxu0 %v10302_v4 }
 0x228   :  { %v3340_v47 = vmul.f32 %v3330_v36, %v3330_v36  ;;  %v2663_v45 = vadd.f32 %v2662_v61, %v2661_v7  ;;  %v2871_v15 = vmul.f32 %v16233_v23, %v2811_v11  ;;  %v16235_v36 = vld [vmem:[#allocation113_spill] sm:$0xff]  ;;  %v16237_v30 = vsub.f32 %v16236_v41, %v12450_v17  ;;  %9145 = vmatpush3.bf16.msra.mxu1 %v10301_v63 }
 0x229   :  { %v2775_v24 = vadd.f32 %v2774_v29, %v2766_v59  ;;  %v3119_v52 = vadd.f32 %v13185_v9, %v3110_v1  ;;  %v2996_v25 = vmul.f32 %v2986_v49, %v2986_v49  ;;  %v3041_v28 = vsub.f32 %v16235_v36, %v12450_v17  ;;  %v16238_v9 = vld [vmem:[#allocation137_spill] sm:$0xff]  ;;  %v3093_v49 = vpop.permute.xlu0 %3092 }
 0x22a   :  { %v3349_v44 = vadd.f32 %v13208_v34, %v3340_v47  ;;  %v2664_v7 = vrot.slane %v2663_v45, 1  ;;  %v2881_v34 = vmul.f32 %v2871_v15, %v2871_v15  ;;  %v3216_v61 = vmul.f32 %v13055_v43, %v3156_v33  ;;  %v3204_v43 = vpop.permute.xlu1 %3203 }
 0x22b   :  { %v2776_v29 = vrot.slane %v2775_v24, 4  ;;  %v2872_v2 = vmul.f32 %v13099_v18, %v16237_v30  ;;  %v3005_v22 = vadd.f32 %v3004_v56, %v2996_v25  ;;  %v3101_v27 = vmul.f32 %v13057_v39, %v3041_v28  ;;  %v10306_v18 = vld [vmem:[%s15583_s5 + $0x1c0] sm:$0xff]   ;;  %v16240_v39 = vld [vmem:[#allocation115_spill] sm:$0xff]  ;;  %v16242_v28 = vld [vmem:[#allocation138_spill] sm:$0xff] }
 0x22c   :  { %v2665_v58 = vadd.f32 %v2664_v7, %v2663_v45  ;;  %v16239_v59 = vsub.f32 %v16238_v9, %v12450_v17  ;;  %v2890_v57 = vadd.f32 %v2889_v50, %v2881_v34  ;;  %v3226_v1 = vmul.f32 %v3216_v61, %v3216_v61  ;;  %v16241_v50 = vld [vmem:[#allocation119_spill] sm:$0xff]  ;;  %9222 = vmatprep.subr.bf16.mxu1 %v10306_v18 }
 0x22d   :  { %v2777_v11 = vadd.f32 %v2776_v29, %v2775_v24  ;;  %v2882_v40 = vmul.f32 %v2872_v2, %v2872_v2  ;;  %v3111_v56 = vmul.f32 %v3101_v27, %v3101_v27  ;;  %v3042_v15 = vsub.f32 %v16240_v39, %v12450_v17  ;;  %v16245_v27 = vld [vmem:[#allocation120_spill] sm:$0xff] }
 0x22e   :  { %v3331_v47 = vmul.f32 %v13101_v6, %v16239_v59  ;;  %v2666_v45 = vadd.f32 %v2665_v58, %v2550_v38  ;;  %v3235_v4 = vadd.f32 %v3234_v10, %v3226_v1  ;;  %v2927_v24 = vsub.f32 %v16241_v50, %v12450_v17  ;;  %v16244_v10 = vld [vmem:[#allocation143_spill] sm:$0xff] }
 0x22f   :  { %v2778_v33 = vrot.slane %v2777_v11, 2  ;;  %v2891_v6 = vadd.f32 %v2890_v57, %v2882_v40  ;;  %v3120_v7 = vadd.f32 %v3119_v52, %v3111_v56  ;;  %v3102_v63 = vmul.f32 %v13148_v32, %v3042_v15  ;;  %v3209_v57 = vpop.permute.xlu1 %3208 }
 0x230   :  { %v3341_v23 = vmul.f32 %v3331_v47, %v3331_v47  ;;  %v16243_v29 = vsub.f32 %v16242_v28, %v12450_v17  ;;  %v2987_v41 = vmul.f32 %v13150_v16, %v2927_v24  ;;  %v3157_v30 = vsub.f32 %v16244_v10, %v12450_v17  ;;  %v3315_v16 = vpop.permute.xlu0 %3314  ;;  %v16248_v28 = vld [vmem:[#allocation144_spill] sm:$0xff] }
 0x231   :  { %v2779_v34 = vadd.f32 %v2778_v33, %v2777_v11  ;;  %v2892_v61 = vrot.slane %v2891_v6, 4  ;;  %v3112_v2 = vmul.f32 %v3102_v63, %v3102_v63  ;;  %v3043_v52 = vsub.f32 %v16245_v27, %v12450_v17 }
 0x232   :  { %v3350_v25 = vadd.f32 %v3349_v44, %v3341_v23  ;;  %v3332_v38 = vmul.f32 %v13189_v62, %v16243_v29  ;;  %v16246_v44 = vld [vmem:[#allocation121_spill] sm:$0xff]  ;;  %v2997_v62 = vmul.f32 %v2987_v41, %v2987_v41  ;;  %v3217_v11 = vmul.f32 %v13191_v14, %v3157_v30 }
 0x233   :  { %v16247_v32 = vsub.f32 %v16246_v44, %v12450_v17  ;;  %v2780_v59 = vrot.slane %v2779_v34, 1  ;;  %v2893_v47 = vadd.f32 %v2892_v61, %v2891_v6  ;;  %v3121_v1 = vadd.f32 %v3120_v7, %v3112_v2  ;;  %v16250_v29 = vld [vmem:[#allocation145_spill] sm:$0xff]  ;;  %v16252_v44 = vld [vmem:[#allocation122_spill] sm:$0xff] }
 0x234   :  { %v3342_v58 = vmul.f32 %v3332_v38, %v3332_v38  ;;  %v3103_v18 = vmul.f32 %v13230_v19, %v3043_v52  ;;  %v3006_v33 = vadd.f32 %v3005_v22, %v2997_v62  ;;  %v3227_v24 = vmul.f32 %v3217_v11, %v3217_v11  ;;  %v16251_v38 = vld [vmem:[#allocation150_spill] sm:$0xff]  ;;  %v3325_v11 = vpop.permute.xlu1 %3324 }
 0x235   :  { %v2988_v9 = vmul.f32 %v13232_v60, %v16247_v32  ;;  %v2781_v23 = vadd.f32 %v2780_v59, %v2779_v34  ;;  %v2894_v15 = vrot.slane %v2893_v47, 2  ;;  %v16249_v60 = vsub.f32 %v16248_v28, %v12450_v17 }
 0x236   :  { %v3351_v40 = vadd.f32 %v3350_v25, %v3342_v58  ;;  %v3113_v63 = vmul.f32 %v3103_v18, %v3103_v18  ;;  %v3158_v14 = vsub.f32 %v16250_v29, %v12450_v17  ;;  %v3159_v7 = vsub.f32 %v16251_v38, %v12450_v17 }
 0x237   :  { %v2998_v56 = vmul.f32 %v2988_v9, %v2988_v9  ;;  %v3333_v6 = vmul.f32 %v13271_v35, %v16249_v60  ;;  %v2782_v25 = vadd.f32 %v2781_v23, %v2666_v45  ;;  %v2895_v61 = vadd.f32 %v2894_v15, %v2893_v47  ;;  %v16254_v9 = vld [vmem:[#allocation152_spill] sm:$0xff]  ;;  %v3320_v45 = vpop.permute.xlu0 %3319 }
 0x238   :  { %v3236_v19 = vadd.f32 %v3235_v4, %v3227_v24  ;;  %v3122_v34 = vadd.f32 %v3121_v1, %v3113_v63  ;;  %v3218_v22 = vmul.f32 %v13273_v31, %v3158_v14  ;;  %v3219_v2 = vmul.f32 %v3204_v43, %v3159_v7  ;;  %v16256_v1 = vld [vmem:[#allocation146_spill] sm:$0xff] }
 0x239   :  { %v3007_v41 = vadd.f32 %v3006_v33, %v2998_v56  ;;  %v3343_v30 = vmul.f32 %v3333_v6, %v3333_v6  ;;  %v2896_v58 = vrot.slane %v2895_v61, 1  ;;  %v16253_v35 = vsub.f32 %v16252_v44, %v12450_v17 }
 0x23a   :  { %v16255_v59 = vsub.f32 %v16254_v9, %v12450_v17  ;;  %v3228_v4 = vmul.f32 %v3218_v22, %v3218_v22  ;;  %v3229_v18 = vmul.f32 %v3219_v2, %v3219_v2  ;;  %v16257_v56 = vsub.f32 %v16256_v1, %v12450_v17 }
 0x23b   :  { %v3008_v52 = vrot.slane %v3007_v41, 4  ;;  %v3104_v32 = vmul.f32 %v3093_v49, %v16253_v35  ;;  %v3352_v47 = vadd.f32 %v3351_v40, %v3343_v30  ;;  %v2897_v43 = vadd.f32 %v2896_v58, %v2895_v61  ;;  %v16258_v49 = vld [vmem:[#allocation153_spill] sm:$0xff] }
 0x23c   :  { %v3220_v62 = vmul.f32 %v3209_v57, %v16255_v59  ;;  %v3334_v31 = vmul.f32 %v3315_v16, %v16257_v56  ;;  %v3237_v24 = vadd.f32 %v3236_v19, %v3228_v4  ;;  %v16259_v28 = vsub.f32 %v16258_v49, %v12450_v17  ;;  %v16260_v57 = vld [vmem:[#allocation151_spill] sm:$0xff] }
 0x23d   :  { %v3009_v23 = vadd.f32 %v3008_v52, %v3007_v41  ;;  %v3114_v15 = vmul.f32 %v3104_v32, %v3104_v32  ;;  %v16261_v6 = vsub.f32 %v16260_v57, %v12450_v17  ;;  %v2898_v14 = vadd.f32 %v2897_v43, %v2782_v25 }
 0x23e   :  { %v3230_v33 = vmul.f32 %v3220_v62, %v3220_v62  ;;  %v3344_v63 = vmul.f32 %v3334_v31, %v3334_v31  ;;  %v3336_v60 = vmul.f32 %v3325_v11, %v16259_v28  ;;  %v3238_v22 = vadd.f32 %v3237_v24, %v3229_v18 }
 0x23f   :  { %v3335_v40 = vmul.f32 %v3320_v45, %v16261_v6  ;;  %v3010_v7 = vrot.slane %v3009_v23, 2  ;;  %v3123_v30 = vadd.f32 %v3122_v34, %v3114_v15  ;;  %v3372_v6 = vlaneseq }
 0x240   :  { %v3353_v2 = vadd.f32 %v3352_v47, %v3344_v63  ;;  %v3239_v58 = vadd.f32 %v3238_v22, %v3230_v33  ;;  %v3346_v52 = vmul.f32 %v3336_v60, %v3336_v60 }
 0x241   :  { %v3345_v16 = vmul.f32 %v3335_v40, %v3335_v40  ;;  %v3011_v61 = vadd.f32 %v3010_v7, %v3009_v23  ;;  %v3124_v41 = vrot.slane %v3123_v30, 4  ;;  %v3373_v40 = vshrl.u32 %v3372_v6, 7 }
 0x242   :  { %v3240_v32 = vrot.slane %v3239_v58, 4 }
 0x243   :  { %v3354_v19 = vadd.f32 %v3353_v2, %v3345_v16  ;;  %v3012_v44 = vrot.slane %v3011_v61, 1  ;;  %v3125_v35 = vadd.f32 %v3124_v41, %v3123_v30  ;;  %v13352_v7 = vsub.s32 0, %v3373_v40  ;;  %v3368_v2 = vld [vmem:[%s15585_s4] sm:$0x1]  ;;  %v16279_v40 = vld [vmem:[#allocation30_spill] sm:$0xff] }
 0x244   :  { %v3241_v11 = vadd.f32 %v3240_v32, %v3239_v58  ;;  %v16263_v58 = vld [vmem:[#allocation16_spill] sm:$0xff] }
 0x245   :  { %v3355_v9 = vadd.f32 %v3354_v19, %v3346_v52  ;;  %v3013_v59 = vadd.f32 %v3012_v44, %v3011_v61  ;;  %v3126_v62 = vrot.slane %v3125_v35, 2  ;;  %16262 = vst [vmem:[#allocation89_spill] sm:$0xff] %v13352_v7  ;;  %v16264_v19 = vld [vmem:[#allocation18_spill] sm:$0xff] }
 0x246   :  { %v3242_v1 = vrot.slane %v3241_v11, 2 }
 0x247   :  { %v3356_v4 = vrot.slane %v3355_v9, 4  ;;  %v3014_v45 = vadd.f32 %v3013_v59, %v2898_v14  ;;  %v3127_v25 = vadd.f32 %v3126_v62, %v3125_v35  ;;  %v3363_v14 = vld [vmem:[%s15584_s3] sm:$0x1] }
 0x248   :  { %v3243_v47 = vadd.f32 %v3242_v1, %v3241_v11  ;;  %v16265_v35 = vld [vmem:[#allocation20_spill] sm:$0xff]  ;;  %v16268_v11 = vld [vmem:[#allocation26_spill] sm:$0xff] }
 0x249   :  { %v3357_v34 = vadd.f32 %v3356_v4, %v3355_v9  ;;  %v3128_v18 = vrot.slane %v3127_v25, 1  ;;  %v16266_v9 = vld [vmem:[#allocation22_spill] sm:$0xff] }
 0x24a   :  { %v3244_v43 = vrot.slane %v3243_v47, 1 }
 0x24b   :  { %v3358_v56 = vrot.slane %v3357_v34, 2  ;;  %v3129_v31 = vadd.f32 %v3128_v18, %v3127_v25 }
 0x24c   :  { %v3245_v33 = vadd.f32 %v3244_v43, %v3243_v47  ;;  %v16272_v47 = vld [vmem:[#allocation33_spill] sm:$0xff] }
 0x24d   :  { %v3359_v23 = vadd.f32 %v3358_v56, %v3357_v34  ;;  %v3130_v15 = vadd.f32 %v3129_v31, %v3014_v45  ;;  %v16269_v45 = vld [vmem:[#allocation29_spill] sm:$0xff]  ;;  %v16271_v34 = vld [vmem:[#allocation31_spill] sm:$0xff] }
 0x24e   :  { %v16273_v31 = vld [vmem:[#allocation17_spill] sm:$0xff] }
 0x24f   :  { %v3360_v24 = vrot.slane %v3359_v23, 1  ;;  %v3246_v63 = vadd.f32 %v3245_v33, %v3130_v15  ;;  %v16275_v33 = vld [vmem:[#allocation21_spill] sm:$0xff] }
 0x251   :  { %v3361_v49 = vadd.f32 %v3360_v24, %v3359_v23  ;;  %v16274_v23 = vld [vmem:[#allocation19_spill] sm:$0xff] }
 0x253   :  { %v3362_v28 = vadd.f32 %v3361_v49, %v3246_v63  ;;  %v16276_v63 = vld [vmem:[#allocation23_spill] sm:$0xff] }
 0x255   :  { %v3364_v60 = vmul.f32 0.005, %v3362_v28  ;;  %v16277_v28 = vld [vmem:[#allocation25_spill] sm:$0xff] }
 0x257   :  { %v3365_v57 = vadd.f32 1e-05, %v3364_v60 }
 0x259   :  { %10550 = vrsqrt.f32 %v3365_v57  ;;  %v16278_v57 = vld [vmem:[#allocation27_spill] sm:$0xff] }
 0x263   :  { %v10551_v30 = vpop.eup %10550 }
 0x264   :  { %v3367_v22 = vmul.f32 %v10551_v30, %v3363_v14  ;;  %v16280_v30 = vld [vmem:[#allocation32_spill] sm:$0xff] }
 0x266   :  { %v3369_v16 = vmul.f32 %v3367_v22, %v12450_v17  ;;  %v13359_v61 = vrot.slane %v3367_v22, %v13352_v7  ;;  %v16267_v17 = vld [vmem:[#allocation24_spill] sm:$0xff] }
 0x268   :  { %v3370_v41 = vsub.f32 %v3368_v2, %v3369_v16  ;;  %v13363_v52 = vmul.f32 %v13359_v61, %v16263_v58  ;;  %v13367_v44 = vmul.f32 %v13359_v61, %v16264_v19  ;;  %v13371_v32 = vmul.f32 %v13359_v61, %v16265_v35  ;;  %v16281_v2 = vld [vmem:[#allocation34_spill] sm:$0xff]  ;;  %v16283_v19 = vld [vmem:[#allocation41_spill] sm:$0xff] }
 0x269   :  { %v13375_v59 = vmul.f32 %v13359_v61, %v16266_v9  ;;  %v13379_v62 = vmul.f32 %v13359_v61, %v16267_v17  ;;  %v13383_v4 = vmul.f32 %v13359_v61, %v16268_v11  ;;  %v13387_v25 = vmul.f32 %v13359_v61, %v16269_v45  ;;  %v16284_v9 = vld [vmem:[#allocation43_spill] sm:$0xff]  ;;  %v16285_v11 = vld [vmem:[#allocation45_spill] sm:$0xff] }
 0x26a   :  { %v13390_v1 = vrot.slane %v3370_v41, %v13352_v7  ;;  %v13394_v18 = vmul.f32 %v13359_v61, %v16271_v34  ;;  %v13398_v56 = vmul.f32 %v13359_v61, %v16272_v47  ;;  %v13402_v43 = vmul.f32 %v13359_v61, %v16273_v31  ;;  %v16282_v41 = vld [vmem:[#allocation39_spill] sm:$0xff]  ;;  %v16287_v31 = vld [vmem:[#allocation49_spill] sm:$0xff]  ;;  %v16300_v7 = vld [vmem:[#allocation50_spill] sm:$0xff] }
 0x26b   :  { %v13406_v15 = vmul.f32 %v13359_v61, %v16274_v23  ;;  %v13410_v24 = vmul.f32 %v13359_v61, %v16275_v33  ;;  %v13414_v49 = vmul.f32 %v13359_v61, %v16276_v63  ;;  %v13418_v60 = vmul.f32 %v13359_v61, %v16277_v28  ;;  %v16286_v34 = vld [vmem:[#allocation47_spill] sm:$0xff]  ;;  %v16289_v28 = vld [vmem:[#allocation53_spill] sm:$0xff] }
 0x26c   :  { %16270 = vst [vmem:[#allocation8_spill] sm:$0xff] %v13390_v1  ;;  %v13422_v6 = vmul.f32 %v13359_v61, %v16278_v57  ;;  %v13426_v14 = vmul.f32 %v13359_v61, %v16279_v40  ;;  %v13430_v22 = vmul.f32 %v13359_v61, %v16280_v30  ;;  %v13434_v16 = vmul.f32 %v13359_v61, %v16281_v2  ;;  %v16288_v33 = vld [vmem:[#allocation51_spill] sm:$0xff]  ;;  %v16291_v2 = vld [vmem:[#allocation40_spill] sm:$0xff] }
 0x26d   :  { %v13438_v58 = vmul.f32 %v13359_v61, %v16282_v41  ;;  %v13442_v35 = vmul.f32 %v13359_v61, %v16283_v19  ;;  %v13446_v17 = vmul.f32 %v13359_v61, %v16284_v9  ;;  %v13450_v45 = vmul.f32 %v13359_v61, %v16285_v11  ;;  %v16290_v40 = vld [vmem:[#allocation55_spill] sm:$0xff]  ;;  %v16293_v19 = vld [vmem:[#allocation42_spill] sm:$0xff]  ;;  %v16295_v11 = vld [vmem:[#allocation44_spill] sm:$0xff] }
 0x26e   :  { %v13454_v47 = vmul.f32 %v13359_v61, %v16286_v34  ;;  %v13458_v23 = vmul.f32 %v13359_v61, %v16287_v31  ;;  %v13462_v63 = vmul.f32 %v13359_v61, %v16288_v33  ;;  %v13466_v57 = vmul.f32 %v13359_v61, %v16289_v28  ;;  %v16296_v31 = vld [vmem:[#allocation46_spill] sm:$0xff]  ;;  %v16298_v28 = vld [vmem:[#allocation48_spill] sm:$0xff] }
 0x26f   :  { %v13470_v30 = vmul.f32 %v13359_v61, %v16290_v40  ;;  %v13474_v41 = vmul.f32 %v13359_v61, %v16291_v2  ;;  %v13478_v9 = vmul.f32 %v13359_v61, %v16293_v19  ;;  %v13482_v34 = vmul.f32 %v13359_v61, %v16295_v11 }
 0x270   :  { %v13486_v33 = vmul.f32 %v13359_v61, %v16296_v31  ;;  %v13490_v40 = vmul.f32 %v13359_v61, %v16298_v28  ;;  %v13494_v2 = vmul.f32 %v13359_v61, %v16300_v7  ;;  %v13506_v31 = vmul.f32 %v13359_v61, %v16195_v55 }
 0x271   :  { %16292 = vst [vmem:[#allocation105_spill] sm:$0xff] %v13474_v41  ;;  %16294 = vst [vmem:[#allocation118_spill] sm:$0xff] %v13478_v9  ;;  %v16302_v41 = vld [vmem:[#allocation52_spill] sm:$0xff]  ;;  %v16304_v9 = vld [vmem:[#allocation54_spill] sm:$0xff] }
 0x272   :  { %16297 = vst [vmem:[#allocation135_spill] sm:$0xff] %v13486_v33  ;;  %16299 = vst [vmem:[#allocation36_spill] sm:$0xff] %v13490_v40  ;;  %v13498_v19 = vmul.f32 %v13359_v61, %v16302_v41  ;;  %v13502_v11 = vmul.f32 %v13359_v61, %v16304_v9  ;;  %v16307_v33 = vld [vmem:[#allocation60_spill] sm:$0xff]  ;;  %v16309_v40 = vld [vmem:[#allocation62_spill] sm:$0xff] }
 0x273   :  { %16301 = vst [vmem:[#allocation149_spill] sm:$0xff] %v13494_v2  ;;  %16306 = vst [vmem:[#allocation82_spill] sm:$0xff] %v13506_v31  ;;  %v13510_v28 = vmul.f32 %v13359_v61, %v16307_v33  ;;  %v13514_v7 = vmul.f32 %v13359_v61, %v16309_v40  ;;  %v16310_v2 = vld [vmem:[#allocation68_spill] sm:$0xff]  ;;  %v16315_v31 = vld [vmem:[#allocation78_spill] sm:$0xff] }
 0x274   :  { %16303 = vst [vmem:[#allocation75_spill] sm:$0xff] %v13498_v19  ;;  %16305 = vst [vmem:[#allocation74_spill] sm:$0xff] %v13502_v11  ;;  %v13518_v41 = vmul.f32 %v13359_v61, %v16310_v2  ;;  %v16311_v19 = vld [vmem:[#allocation70_spill] sm:$0xff]  ;;  %v16313_v11 = vld [vmem:[#allocation76_spill] sm:$0xff]  ;;  %v13530_v33 = vmul.f32 %v13359_v61, %v16315_v31  ;;  %v13538_v2 = vmul.f32 %v13359_v61, %v16202_v54 }
 0x275   :  { %16308 = vst [vmem:[#allocation88_spill] sm:$0xff] %v13510_v28  ;;  %v13522_v9 = vmul.f32 %v13359_v61, %v16311_v19  ;;  %v13526_v55 = vmul.f32 %v13359_v61, %v16313_v11  ;;  %v16317_v28 = vld [vmem:[#allocation83_spill] sm:$0xff]  ;;  %v13542_v19 = vmul.f32 %v13359_v61, %v16214_v8 }
 0x276   :  { %16316 = vst [vmem:[#allocation124_spill] sm:$0xff] %v13530_v33  ;;  %v13534_v40 = vmul.f32 %v13359_v61, %v16317_v28  ;;  %16319 = vst [vmem:[#allocation148_spill] sm:$0xff] %v13538_v2  ;;  %v16323_v33 = vld [vmem:[#allocation69_spill] sm:$0xff] }
 0x277   :  { %16312 = vst [vmem:[#allocation4_spill] sm:$0xff] %v13522_v9  ;;  %16314 = vst [vmem:[#allocation110_spill] sm:$0xff] %v13526_v55  ;;  %v16321_v9 = vld [vmem:[#allocation61_spill] sm:$0xff]  ;;  %v16322_v55 = vld [vmem:[#allocation63_spill] sm:$0xff]  ;;  %v13554_v28 = vmul.f32 %v13359_v61, %v16323_v33  ;;  %v13574_v33 = vmul.f32 %v13359_v61, %v16220_v5 }
 0x278   :  { %16318 = vst [vmem:[#allocation28_spill] sm:$0xff] %v13534_v40  ;;  %16320 = vst [vmem:[#allocation81_spill] sm:$0xff] %v13542_v19  ;;  %v13546_v11 = vmul.f32 %v13359_v61, %v16321_v9  ;;  %v13550_v31 = vmul.f32 %v13359_v61, %v16322_v55  ;;  %v16324_v40 = vld [vmem:[#allocation71_spill] sm:$0xff]  ;;  %v16325_v2 = vld [vmem:[#allocation77_spill] sm:$0xff]  ;;  %v13566_v9 = vmul.f32 %v13359_v61, %v16183_v0 }
 0x279   :  { %v13558_v54 = vmul.f32 %v13359_v61, %v16324_v40  ;;  %v13562_v8 = vmul.f32 %v13359_v61, %v16325_v2  ;;  %v13570_v55 = vmul.f32 %v13359_v61, %v16199_v26  ;;  %16329 = vst [vmem:[#allocation109_spill] sm:$0xff] %v13574_v33  ;;  %v13578_v40 = vmul.f32 %v13359_v61, %v16231_v13  ;;  %v16330_v19 = vld [vmem:[#allocation98_spill] sm:$0xff] }
 0x27a   :  { %16327 = vst [vmem:[#allocation95_spill] sm:$0xff] %v13566_v9  ;;  %v13582_v2 = vmul.f32 %v13359_v61, %v16330_v19  ;;  %v16332_v9 = vld [vmem:[#allocation102_spill] sm:$0xff]  ;;  %v13602_v19 = vmul.f32 %v13359_v61, %v16206_v46 }
 0x27b   :  { %16326 = vst [vmem:[#allocation87_spill] sm:$0xff] %v13562_v8  ;;  %16328 = vst [vmem:[#allocation101_spill] sm:$0xff] %v13570_v55  ;;  %v16331_v8 = vld [vmem:[#allocation5_spill] sm:$0xff]  ;;  %v13590_v26 = vmul.f32 %v13359_v61, %v16332_v9  ;;  %v16333_v55 = vld [vmem:[#allocation7_spill] sm:$0xff]  ;;  %v13610_v9 = vmul.f32 %v13359_v61, %v16230_v42  ;;  %v13630_v42 = vmul.f32 %v13359_v61, %v16187_v48 }
 0x27c   :  { %v13586_v0 = vmul.f32 %v13359_v61, %v16331_v8  ;;  %v13594_v5 = vmul.f32 %v13359_v61, %v16333_v55  ;;  %v16335_v33 = vld [vmem:[#allocation106_spill] sm:$0xff]  ;;  %16337 = vst [vmem:[#allocation104_spill] sm:$0xff] %v13602_v19  ;;  %v13606_v8 = vmul.f32 %v13359_v61, %v16219_v53  ;;  %v13614_v55 = vmul.f32 %v13359_v61, %v16241_v50  ;;  %v16340_v19 = vld [vmem:[#allocation103_spill] sm:$0xff] }
 0x27d   :  { %v13598_v13 = vmul.f32 %v13359_v61, %v16335_v33  ;;  %v13626_v53 = vmul.f32 %v13359_v61, %v16340_v19  ;;  %16341 = vst [vmem:[#allocation9_spill] sm:$0xff] %v13630_v42  ;;  %v13634_v50 = vmul.f32 %v13359_v61, %v16203_v20  ;;  %v13646_v19 = vmul.f32 %v13359_v61, %v16240_v39  ;;  %v16343_v42 = vld [vmem:[#allocation126_spill] sm:$0xff] }
 0x27e   :  { %16334 = vst [vmem:[#allocation123_spill] sm:$0xff] %v13594_v5  ;;  %v16338_v5 = vld [vmem:[#allocation99_spill] sm:$0xff]  ;;  %v13650_v48 = vmul.f32 %v13359_v61, %v16245_v27  ;;  %v13654_v20 = vmul.f32 %v13359_v61, %v16343_v42  ;;  %v13666_v39 = vmul.f32 %v13359_v61, %v16212_v37  ;;  %v13670_v27 = vmul.f32 %v13359_v61, %v16223_v51 }
 0x27f   :  { %16336 = vst [vmem:[#allocation38_spill] sm:$0xff] %v13598_v13  ;;  %v13618_v33 = vmul.f32 %v13359_v61, %v16338_v5  ;;  %v16339_v13 = vld [vmem:[#allocation6_spill] sm:$0xff]  ;;  %16342 = vst [vmem:[#allocation111_spill] sm:$0xff] %v13634_v50  ;;  %v13638_v5 = vmul.f32 %v13359_v61, %v16224_v12  ;;  %v13674_v42 = vmul.f32 %v13359_v61, %v16234_v3 }
 0x280   :  { %v13622_v46 = vmul.f32 %v13359_v61, %v16339_v13  ;;  %v13642_v13 = vmul.f32 %v13359_v61, %v16235_v36  ;;  %v16344_v50 = vld [vmem:[#allocation10_spill] sm:$0xff]  ;;  %v13662_v36 = vmul.f32 %v13359_v61, %v16185_v21  ;;  %16345 = vst [vmem:[#allocation125_spill] sm:$0xff] %v13670_v27  ;;  %v13682_v21 = vmul.f32 %v13359_v61, %v16250_v29  ;;  %v16354_v27 = vld [vmem:[#allocation135_spill] sm:$0xff] }
 0x281   :  { %v13658_v12 = vmul.f32 %v13359_v61, %v16344_v50  ;;  %v13678_v50 = vmul.f32 %v13359_v61, %v16244_v10  ;;  %v13686_v37 = vmul.f32 %v13359_v61, %v16251_v38  ;;  %v13690_v51 = vadd.f32 %v13390_v1, %v13363_v52 }
 0x282   :  { %v13694_v3 = vadd.f32 %v13390_v1, %v13367_v44  ;;  %v13698_v10 = vadd.f32 %v13390_v1, %v13371_v32  ;;  %v13702_v29 = vadd.f32 %v13390_v1, %v13375_v59  ;;  %v13706_v38 = vadd.f32 %v13390_v1, %v13379_v62 }
 0x283   :  { %16346 = vst [vmem:[#allocation140_spill] sm:$0xff] %v13686_v37  ;;  %v13710_v61 = vadd.f32 %v13390_v1, %v13383_v4  ;;  %v13714_v52 = vadd.f32 %v13390_v1, %v13387_v25  ;;  %v13718_v44 = vadd.f32 %v13390_v1, %v13394_v18  ;;  %v13722_v32 = vadd.f32 %v13390_v1, %v13398_v56  ;;  %v16352_v37 = vld [vmem:[#allocation118_spill] sm:$0xff] }
 0x284   :  { %16347 = vst [vmem:[#allocation117_spill] sm:$0xff] %v13706_v38  ;;  %v13726_v59 = vadd.f32 %v13402_v43, %v13390_v1  ;;  %v13730_v62 = vadd.f32 %v13406_v15, %v13390_v1  ;;  %v13734_v4 = vadd.f32 %v13410_v24, %v13390_v1  ;;  %v13738_v25 = vadd.f32 %v13414_v49, %v13390_v1  ;;  %v16358_v38 = vld [vmem:[#allocation149_spill] sm:$0xff] }
 0x285   :  { %v13742_v18 = vadd.f32 %v13418_v60, %v13390_v1  ;;  %v13746_v56 = vadd.f32 %v13422_v6, %v13390_v1  ;;  %v13750_v43 = vadd.f32 %v13426_v14, %v13390_v1  ;;  %v13754_v15 = vadd.f32 %v13430_v22, %v13390_v1 }
 0x286   :  { %v13758_v24 = vadd.f32 %v13434_v16, %v13390_v1  ;;  %v13762_v49 = vadd.f32 %v13438_v58, %v13390_v1  ;;  %v13766_v60 = vadd.f32 %v13442_v35, %v13390_v1  ;;  %v13770_v6 = vadd.f32 %v13446_v17, %v13390_v1 }
 0x287   :  { %16348 = vst [vmem:[#allocation116_spill] sm:$0xff] %v13742_v18  ;;  %v13774_v14 = vadd.f32 %v13450_v45, %v13390_v1  ;;  %v13778_v22 = vadd.f32 %v13454_v47, %v13390_v1  ;;  %v13782_v16 = vadd.f32 %v13458_v23, %v13390_v1  ;;  %v13786_v58 = vadd.f32 %v13462_v63, %v13390_v1  ;;  %v16350_v45 = vld [vmem:[#allocation105_spill] sm:$0xff]  ;;  %v16356_v18 = vld [vmem:[#allocation36_spill] sm:$0xff] }
 0x288   :  { %16349 = vst [vmem:[#allocation129_spill] sm:$0xff] %v13762_v49  ;;  %v13790_v35 = vadd.f32 %v13466_v57, %v13390_v1  ;;  %v13794_v17 = vadd.f32 %v13470_v30, %v13390_v1  ;;  %v13798_v47 = vadd.f32 %v16350_v45, %v13390_v1  ;;  %v13802_v23 = vadd.f32 %v16352_v37, %v13390_v1  ;;  %v16361_v49 = vld [vmem:[#allocation74_spill] sm:$0xff] }
 0x289   :  { %v13806_v63 = vadd.f32 %v13482_v34, %v13390_v1  ;;  %v13810_v57 = vadd.f32 %v16354_v27, %v13390_v1  ;;  %v13814_v30 = vadd.f32 %v16356_v18, %v13390_v1  ;;  %v13818_v45 = vadd.f32 %v16358_v38, %v13390_v1 }
 0x28a   :  { %16351 = vst [vmem:[#allocation139_spill] sm:$0xff] %v13798_v47  ;;  %v16360_v47 = vld [vmem:[#allocation75_spill] sm:$0xff]  ;;  %v13826_v34 = vadd.f32 %v16361_v49, %v13390_v1  ;;  %v13838_v38 = vadd.f32 %v13514_v7, %v13390_v1 }
 0x28b   :  { %16353 = vst [vmem:[#allocation12_spill] sm:$0xff] %v13806_v63  ;;  %16355 = vst [vmem:[#allocation130_spill] sm:$0xff] %v13810_v57  ;;  %v13822_v37 = vadd.f32 %v16360_v47, %v13390_v1  ;;  %v16363_v63 = vld [vmem:[#allocation82_spill] sm:$0xff]  ;;  %v16365_v57 = vld [vmem:[#allocation88_spill] sm:$0xff]  ;;  %v13842_v47 = vadd.f32 %v13518_v41, %v13390_v1  ;;  %v13862_v41 = vadd.f32 %v13546_v11, %v13390_v1 }
 0x28c   :  { %16357 = vst [vmem:[#allocation142_spill] sm:$0xff] %v13814_v30  ;;  %16359 = vst [vmem:[#allocation141_spill] sm:$0xff] %v13818_v45  ;;  %v13830_v27 = vadd.f32 %v16363_v63, %v13390_v1  ;;  %v13834_v18 = vadd.f32 %v16365_v57, %v13390_v1  ;;  %v16369_v30 = vld [vmem:[#allocation4_spill] sm:$0xff]  ;;  %v16379_v11 = vld [vmem:[#allocation101_spill] sm:$0xff] }
 0x28d   :  { %16362 = vst [vmem:[#allocation147_spill] sm:$0xff] %v13826_v34  ;;  %16367 = vst [vmem:[#allocation73_spill] sm:$0xff] %v13838_v38  ;;  %v13846_v49 = vadd.f32 %v16369_v30, %v13390_v1  ;;  %v16371_v34 = vld [vmem:[#allocation124_spill] sm:$0xff]  ;;  %v13866_v30 = vadd.f32 %v13550_v31, %v13390_v1  ;;  %v16380_v31 = vld [vmem:[#allocation109_spill] sm:$0xff] }
 0x28e   :  { %16364 = vst [vmem:[#allocation59_spill] sm:$0xff] %v13830_v27  ;;  %16366 = vst [vmem:[#allocation64_spill] sm:$0xff] %v13834_v18  ;;  %v13850_v63 = vadd.f32 %v16371_v34, %v13390_v1  ;;  %v16373_v27 = vld [vmem:[#allocation28_spill] sm:$0xff]  ;;  %v3645_v34 = vadd.f32 %v13554_v28, %v13390_v1  ;;  %v13890_v28 = vadd.f32 %v13578_v40, %v13390_v1 }
 0x28f   :  { %16368 = vst [vmem:[#allocation67_spill] sm:$0xff] %v13842_v47  ;;  %16370 = vst [vmem:[#allocation154_spill] sm:$0xff] %v13846_v49  ;;  %v13854_v57 = vadd.f32 %v16373_v27, %v13390_v1  ;;  %v16375_v18 = vld [vmem:[#allocation148_spill] sm:$0xff]  ;;  %v13872_v49 = vadd.f32 %v13558_v54, %v13390_v1  ;;  %v16377_v27 = vld [vmem:[#allocation87_spill] sm:$0xff]  ;;  %v13894_v54 = vadd.f32 %v13582_v2, %v13390_v1 }
 0x290   :  { %16372 = vst [vmem:[#allocation79_spill] sm:$0xff] %v13850_v63  ;;  %v13858_v7 = vadd.f32 %v16375_v18, %v13390_v1  ;;  %v13876_v38 = vadd.f32 %v16377_v27, %v13390_v1  ;;  %v16378_v18 = vld [vmem:[#allocation95_spill] sm:$0xff]  ;;  %16381 = vst [vmem:[#allocation156_spill] sm:$0xff] %v13890_v28  ;;  %v3694_v27 = vadd.f32 %v13586_v0, %v13390_v1  ;;  %v16385_v40 = vld [vmem:[#allocation104_spill] sm:$0xff] }
 0x291   :  { %16374 = vst [vmem:[#allocation155_spill] sm:$0xff] %v13854_v57  ;;  %v3648_v47 = vadd.f32 %v16378_v18, %v13390_v1  ;;  %v13886_v57 = vadd.f32 %v16380_v31, %v13390_v1  ;;  %v3695_v18 = vadd.f32 %v13590_v26, %v13390_v1  ;;  %v16383_v31 = vld [vmem:[#allocation38_spill] sm:$0xff]  ;;  %v13908_v28 = vadd.f32 %v16385_v40, %v13390_v1 }
 0x292   :  { %16376 = vst [vmem:[#allocation131_spill] sm:$0xff] %v13858_v7  ;;  %v13882_v7 = vadd.f32 %v16379_v11, %v13390_v1  ;;  %v16382_v11 = vld [vmem:[#allocation123_spill] sm:$0xff]  ;;  %v13904_v45 = vadd.f32 %v16383_v31, %v13390_v1  ;;  %v3699_v2 = vadd.f32 %v13606_v8, %v13390_v1  ;;  %v3700_v0 = vadd.f32 %v13610_v9, %v13390_v1  ;;  %v16386_v8 = vld [vmem:[#allocation9_spill] sm:$0xff] }
 0x293   :  { %v3696_v63 = vadd.f32 %v16382_v11, %v13390_v1  ;;  %v13916_v26 = vadd.f32 %v13614_v55, %v13390_v1  ;;  %v13920_v11 = vadd.f32 %v13618_v33, %v13390_v1  ;;  %v13924_v31 = vadd.f32 %v13622_v46, %v13390_v1  ;;  %v16387_v9 = vld [vmem:[#allocation111_spill] sm:$0xff] }
 0x294   :  { %16384 = vst [vmem:[#allocation11_spill] sm:$0xff] %v13904_v45  ;;  %v13928_v40 = vadd.f32 %v13626_v53, %v13390_v1  ;;  %v13932_v45 = vadd.f32 %v16386_v8, %v13390_v1  ;;  %v13936_v55 = vadd.f32 %v16387_v9, %v13390_v1  ;;  %v13940_v33 = vadd.f32 %v13638_v5, %v13390_v1 }
 0x295   :  { %v13944_v46 = vadd.f32 %v13642_v13, %v13390_v1  ;;  %v13948_v53 = vadd.f32 %v13646_v19, %v13390_v1  ;;  %v13952_v8 = vadd.f32 %v13650_v48, %v13390_v1  ;;  %v13956_v9 = vadd.f32 %v13654_v20, %v13390_v1 }
 0x296   :  { %v13960_v5 = vadd.f32 %v13658_v12, %v13390_v1  ;;  %v13964_v13 = vadd.f32 %v13662_v36, %v13390_v1  ;;  %v13968_v19 = vadd.f32 %v13666_v39, %v13390_v1  ;;  %v13972_v48 = vadd.f32 %v13674_v42, %v13390_v1 }
 0x297   :  { %16388 = vst [vmem:[#allocation157_spill] sm:$0xff] %v13952_v8  ;;  %v13976_v20 = vadd.f32 %v13678_v50, %v13390_v1  ;;  %v13980_v12 = vadd.f32 %v13682_v21, %v13390_v1  ;;  %v3404_v36 = vmax.f32 %v13694_v3, 0.0  ;;  %v3405_v8 = vmax.f32 %v13698_v10, 0.0 }
 0x298   :  { %16389 = vst [vmem:[#allocation128_spill] sm:$0xff] %v13960_v5  ;;  %16390 = vst [vmem:[#allocation158_spill] sm:$0xff] %v13968_v19  ;;  %v3403_v5 = vmax.f32 %v13690_v51, 0.0  ;;  %v3454_v39 = vmax.f32 %v13730_v62, 0.0  ;;  %v13987_v19 = vmax.f32 %v13734_v4, 0.0  ;;  %v13990_v42 = vmax.f32 %v13738_v25, 0.0 }
 0x299   :  { %16391 = vst [vmem:[#allocation127_spill] sm:$0xff] %v13972_v48  ;;  %16392 = vst [vmem:[#allocation159_spill] sm:$0xff] %v13976_v20  ;;  %v13993_v50 = vmax.f32 %v13750_v43, 0.0  ;;  %v13996_v21 = vmax.f32 %v13754_v15, 0.0  ;;  %v13999_v51 = vmax.f32 %v13766_v60, 0.0  ;;  %v14002_v3 = vmax.f32 %v13770_v6, 0.0 }
 0x29a   :  { %16393 = vst [vmem:[#allocation56_spill] sm:$0xff] %v13980_v12  ;;  %16394 = vst [vmem:[#allocation57_spill] sm:$0xff] %v13990_v42  ;;  %v14005_v10 = vmax.f32 %v13774_v14, 0.0  ;;  %v3658_v62 = vmax.f32 %v3648_v47, 0.0  ;;  %v14009_v25 = vmax.f32 %v13778_v22, 0.0  ;;  %v14012_v43 = vmax.f32 %v13786_v58, 0.0 }
 0x29b   :  { %16395 = vst [vmem:[#allocation161_spill] sm:$0xff] %v13999_v51  ;;  %v14015_v15 = vmax.f32 %v13790_v35, 0.0  ;;  %v14018_v60 = vmax.f32 %v13794_v17, 0.0  ;;  %v14021_v6 = vmax.f32 %v13802_v23, 0.0  ;;  %v14023_v14 = vmax.f32 %v3645_v34, 0.0 }
 0x29c   :  { %16396 = vst [vmem:[#allocation84_spill] sm:$0xff] %v14009_v25  ;;  %v14025_v47 = vmax.f32 %v3694_v27, 0.0  ;;  %v14027_v4 = vmax.f32 %v3695_v18, 0.0  ;;  %v14029_v22 = vmax.f32 %v3696_v63, 0.0  ;;  %v14031_v12 = vmax.f32 %v3699_v2, 0.0  ;;  %v10303_v27 = vld [vmem:[%s15583_s5 + $0x100] sm:$0xff]  }
 0x29d   :  { %16397 = vst [vmem:[#allocation160_spill] sm:$0xff] %v14021_v6  ;;  %v14033_v58 = vmax.f32 %v3700_v0, 0.0  ;;  %v3891_v35 = vpack.c.bf16 %v3404_v36, %v3403_v5  ;;  %v4148_v20 = vpack.c.bf16 %v3405_v8, %v3404_v36  ;;  %v16398_v17 = vmax.f32 %v13882_v7, 0.0  ;;  %v10304_v36 = vld [vmem:[%s15583_s5 + $0x148] sm:$0xff]  }
 0x29e   :  { %v3408_v23 = vmax.f32 %v13710_v61, 0.0  ;;  %v3409_v34 = vmax.f32 %v13714_v52, 0.0  ;;  %v3410_v63 = vmax.f32 %v13718_v44, 0.0  ;;  %v15785_v18 = vmax.f32 %v13746_v56, 0.0  ;;  %v10308_v44 = vld [vmem:[%s15583_s5 + $0x180] sm:$0xff]  }
 0x29f   :  { %v14037_v48 = vpack.c.bf16 %v16398_v17, %v3658_v62  ;;  %v3411_v2 = vmax.f32 %v13722_v32, 0.0  ;;  %v3453_v0 = vmax.f32 %v13726_v59, 0.0  ;;  %v3406_v61 = vmax.f32 %v13702_v29, 0.0  ;;  %v10305_v29 = vld [vmem:[%s15583_s5 + $0x108] sm:$0xff]  }
 0x2a0   :  { %v3906_v5 = vpack.c.bf16 %v3409_v34, %v3408_v23  ;;  %v14054_v52 = vpack.c.bf16 %v13996_v21, %v13993_v50  ;;  %v4163_v32 = vpack.c.bf16 %v3410_v63, %v3409_v34  ;;  %v3907_v59 = vpack.c.bf16 %v15785_v18, %v3410_v63  ;;  %v10310_v63 = vld [vmem:[%s15583_s5 + $0x1c8] sm:$0xff]  }
 0x2a1   :  { %16399 = vst [vmem:[#allocation35_spill] sm:$0xff] %v14037_v48  ;;  %v4164_v17 = vpack.c.bf16 %v13993_v50, %v3411_v2  ;;  %v3892_v23 = vpack.c.bf16 %v3453_v0, %v3405_v8  ;;  %v14066_v48 = vpack.c.bf16 %v3454_v39, %v3453_v0  ;;  %v4149_v1 = vpack.c.bf16 %v3454_v39, %v3406_v61 }
 0x2a2   :  { %16400 = vst [vmem:[#allocation13_spill] sm:$0xff] %v14054_v52  ;;  %4080 = vmatprep.mubr.bf16.mxu0 %v3906_v5  ;;  %v14068_v62 = vpack.c.bf16 %v3406_v61, %v3405_v8  ;;  %v16403_v25 = vmax.f32 %v13758_v24, 0.0  ;;  %4338 = vmatprep.mubr.bf16.mxu1 %v4163_v32  ;;  %v14079_v2 = vpack.c.bf16 %v13987_v19, %v3454_v39  ;;  %v15786_v8 = vmax.f32 %v13782_v16, 0.0 }
 0x2a3   :  { %16401 = vst [vmem:[#allocation107_spill] sm:$0xff] %v14066_v48  ;;  %4081 = vmatmul.mubr.bf16.vlgmr.msra.gmra.mrb[100].mxu0 %v3891_v35  ;;  %v14083_v0 = vpack.c.bf16 %v13990_v42, %v13987_v19  ;;  %v14088_v5 = vpack.c.bf16 %v14015_v15, %v14012_v43  ;;  %4339 = vmatmul.mubr.bf16.vlgmr.msra.gmra.mrb[100].mxu1 %v4148_v20  ;;  %v16404_v35 = vld [vmem:[#allocation129_spill] sm:$0xff]  ;;  %v14099_v32 = vmax.f32 %v13928_v40, 0.0  ;;  %v14102_v18 = vmax.f32 %v13944_v46, 0.0 }
 0x2a4   :  { %16402 = vst [vmem:[#allocation162_spill] sm:$0xff] %v14068_v62  ;;  %v14073_v34 = vpack.c.bf16 %v16403_v25, %v13996_v21  ;;  %v14091_v25 = vmax.f32 %v13924_v31, 0.0  ;;  %9177 = vmatpush3.bf16.msra.mxu0 %v10303_v27  ;;  %v15787_v61 = vmax.f32 %v16404_v35, 0.0  ;;  %v14096_v39 = vpack.c.bf16 %v14002_v3, %v13999_v51  ;;  %4088 = vmatprep.mubr.bf16.mxu0 %v3907_v59  ;;  %v10307_v31 = vld [vmem:[%s15583_s5 + $0x150] sm:$0xff]   ;;  %v10311_v40 = vld [vmem:[%s15583_s5 + $0x188] sm:$0xff]  }
 0x2a5   :  { %4346 = vmatprep.mubr.bf16.mxu1 %v4164_v17  ;;  %v14110_v20 = vpack.c.bf16 %v14012_v43, %v15786_v8  ;;  %v3653_v27 = vmax.f32 %v13862_v41, 0.0  ;;  %9178 = vmatprep.subr.bf16.mxu0 %v10304_v36  ;;  %v3654_v59 = vmax.f32 %v13866_v30, 0.0  ;;  %v3656_v8 = vmax.f32 %v13872_v49, 0.0  ;;  %v10309_v41 = vld [vmem:[%s15583_s5 + $0x110] sm:$0xff]   ;;  %v10312_v49 = vld [vmem:[%s15583_s5 + $0x158] sm:$0xff]  }
 0x2a6   :  { %16405 = vst [vmem:[#allocation163_spill] sm:$0xff] %v14096_v39  ;;  %9223 = vmatpush3.bf16.msra.mxu1 %v10308_v44  ;;  %v14119_v46 = vpack.c.bf16 %v13999_v51, %v15787_v61  ;;  %v10314_v36 = vld [vmem:[%s15583_s5 + $0x1d0] sm:$0xff]   ;;  %v16407_v44 = vld [vmem:[#allocation117_spill] sm:$0xff]  ;;  %v3660_v61 = vmax.f32 %v13886_v57, 0.0  ;;  %v3708_v62 = vmax.f32 %v13908_v28, 0.0  ;;  %v14135_v30 = vpack.c.bf16 %v14027_v4, %v14025_v47  ;;  %v10332_v51 = vld [vmem:[%s15583_s5 + $0x1f8] sm:$0xff]  }
 0x2a7   :  { %16406 = vst [vmem:[#allocation14_spill] sm:$0xff] %v14110_v20  ;;  %9224 = vmatprep.subr.bf16.mxu1 %v10310_v63  ;;  %v3407_v48 = vmax.f32 %v16407_v44, 0.0  ;;  %v10315_v63 = vld [vmem:[%s15583_s5 + $0x190] sm:$0xff]   ;;  %v14143_v17 = vpack.c.bf16 %v3654_v59, %v3653_v27  ;;  %v14146_v44 = vpack.c.bf16 %v14023_v14, %v3654_v59  ;;  %v16410_v57 = vmax.f32 %v13894_v54, 0.0 }
 0x2a8   :  { %16408 = vst [vmem:[#allocation164_spill] sm:$0xff] %v14135_v30  ;;  %9179 = vmatpush3.bf16.msra.mxu0 %v10305_v29  ;;  %v14154_v29 = vpack.c.bf16 %v14025_v47, %v3656_v8  ;;  %v10318_v30 = vld [vmem:[%s15583_s5 + $0x1d8] sm:$0xff]   ;;  %v14162_v27 = vpack.c.bf16 %v3708_v62, %v3660_v61  ;;  %v16414_v59 = vmax.f32 %v13882_v7, 0.0  ;;  %v14182_v7 = vmax.f32 %v13932_v45, 0.0 }
 0x2a9   :  { %16409 = vst [vmem:[#allocation132_spill] sm:$0xff] %v14146_v44  ;;  %v14151_v28 = vpack.c.bf16 %v16410_v57, %v14023_v14  ;;  %9180 = vmatprep.subr.bf16.mxu0 %v10307_v31  ;;  %v14160_v39 = vpack.c.bf16 %v13987_v19, %v3407_v48  ;;  %v14169_v57 = vpack.c.bf16 %v14031_v12, %v3708_v62 }
 0x2aa   :  { %16412 = vst [vmem:[#allocation96_spill] sm:$0xff] %v14154_v29  ;;  %16413 = vst [vmem:[#allocation133_spill] sm:$0xff] %v14162_v27  ;;  %v14166_v44 = vpack.c.bf16 %v3660_v61, %v16414_v59  ;;  %9225 = vmatpush3.bf16.msra.mxu1 %v10311_v40  ;;  %v14173_v31 = vpack.c.bf16 %v14029_v22, %v14027_v4  ;;  %v16417_v29 = vld [vmem:[#allocation116_spill] sm:$0xff]  ;;  %v14178_v48 = vpack.c.bf16 %v14033_v58, %v14031_v12 }
 0x2ab   :  { %16411 = vst [vmem:[#allocation94_spill] sm:$0xff] %v14151_v28  ;;  %16416 = vst [vmem:[#allocation90_spill] sm:$0xff] %v14169_v57  ;;  %v15790_v28 = vmax.f32 %v16417_v29, 0.0  ;;  %v3753_v27 = vmax.f32 %v13920_v11, 0.0  ;;  %4089 = vmatmul.mubr.bf16.gmra.mrb[104].mxu0 %v3892_v23  ;;  %9226 = vmatprep.subr.bf16.mxu1 %v10314_v36  ;;  %v14186_v62 = vpack.c.bf16 %v14099_v32, %v14091_v25  ;;  %v14194_v59 = vmax.f32 %v13948_v53, 0.0  ;;  %v16418_v36 = vld [vmem:[#allocation12_spill] sm:$0xff] }
 0x2ac   :  { %16415 = vst [vmem:[#allocation97_spill] sm:$0xff] %v14166_v44  ;;  %v14190_v61 = vpack.c.bf16 %v14005_v10, %v14002_v3  ;;  %4347 = vmatmul.mubr.bf16.gmra.mrb[104].mxu1 %v4149_v1  ;;  %4096 = vmatprep.mubr.bf16.mxu0 %v14054_v52  ;;  %v3657_v23 = vmax.f32 %v13876_v38, 0.0  ;;  %v14207_v57 = vmax.f32 %v16418_v36, 0.0  ;;  %v14210_v40 = vmax.f32 %v13822_v37, 0.0  ;;  %v10313_v1 = vld [vmem:[%s15583_s5 + $0x118] sm:$0xff]   ;;  %v16421_v52 = vld [vmem:[#allocation156_spill] sm:$0xff] }
 0x2ad   :  { %v14200_v45 = vpack.c.bf16 %v15790_v28, %v13990_v42  ;;  %v14203_v11 = vpack.c.bf16 %v14091_v25, %v3753_v27  ;;  %4354 = vmatprep.mubr.bf16.mxu1 %v14073_v34  ;;  %9181 = vmatpush3.bf16.msra.mxu0 %v10309_v41  ;;  %v16420_v53 = vmax.f32 %v13940_v33, 0.0  ;;  %v3661_v38 = vmax.f32 %v16421_v52, 0.0  ;;  %v10316_v37 = vld [vmem:[%s15583_s5 + $0x160] sm:$0xff]   ;;  %v10319_v34 = vld [vmem:[%s15583_s5 + $0x198] sm:$0xff]  }
 0x2ae   :  { %16419 = vst [vmem:[#allocation58_spill] sm:$0xff] %v14210_v40  ;;  %9182 = vmatprep.subr.bf16.mxu0 %v10312_v49  ;;  %9227 = vmatpush3.bf16.msra.mxu1 %v10315_v63  ;;  %v14229_v41 = vpack.c.bf16 %v3656_v8, %v14023_v14  ;;  %v16422_v36 = vmax.f32 %v13746_v56, 0.0  ;;  %v14237_v52 = vpack.c.bf16 %v14027_v4, %v3657_v23  ;;  %v16423_v49 = vld [vmem:[#allocation11_spill] sm:$0xff]  ;;  %v10317_v44 = vld [vmem:[%s15583_s5 + $0x120] sm:$0xff]   ;;  %v16424_v56 = vmax.f32 %v13782_v16, 0.0 }
 0x2af   :  { %v14219_v28 = vpack.c.bf16 %v14102_v18, %v16420_v53  ;;  %v3707_v63 = vmax.f32 %v16423_v49, 0.0  ;;  %9228 = vmatprep.subr.bf16.mxu1 %v10318_v30  ;;  %v10321_v14 = vld [vmem:[%s15583_s5 + $0x1e0] sm:$0xff]   ;;  %v16427_v23 = vmax.f32 %v16404_v35, 0.0  ;;  %v3711_v49 = vmax.f32 %v13916_v26, 0.0  ;;  %v10320_v30 = vld [vmem:[%s15583_s5 + $0x168] sm:$0xff]  }
 0x2b0   :  { %v14234_v53 = vpack.c.bf16 %v13993_v50, %v16422_v36  ;;  %v14249_v8 = vpack.c.bf16 %v16424_v56, %v13996_v21  ;;  %v14252_v50 = vpack.c.bf16 %v14031_v12, %v3661_v38  ;;  %v10323_v16 = vld [vmem:[%s15583_s5 + $0x1a0] sm:$0xff]   ;;  %v14271_v12 = vpack.c.bf16 %v14182_v7, %v14099_v32  ;;  %v16431_v35 = vld [vmem:[#allocation141_spill] sm:$0xff]  ;;  %v16433_v38 = vld [vmem:[#allocation130_spill] sm:$0xff] }
 0x2b1   :  { %v14257_v36 = vpack.c.bf16 %v16427_v23, %v13987_v19  ;;  %v14267_v21 = vpack.c.bf16 %v3707_v63, %v14029_v22  ;;  %v3558_v19 = vmax.f32 %v16431_v35, 0.0  ;;  %v14276_v26 = vpack.c.bf16 %v14194_v59, %v14102_v18  ;;  %9183 = vmatpush3.bf16.msra.mxu0 %v10313_v1  ;;  %v10324_v23 = vld [vmem:[%s15583_s5 + $0x1e8] sm:$0xff]  }
 0x2b2   :  { %16425 = vst [vmem:[#allocation65_spill] sm:$0xff] %v14249_v8  ;;  %16426 = vst [vmem:[#allocation100_spill] sm:$0xff] %v14252_v50  ;;  %v14279_v56 = vmax.f32 %v16433_v38, 0.0  ;;  %v14292_v35 = vmax.f32 %v13964_v13, 0.0  ;;  %9184 = vmatprep.subr.bf16.mxu0 %v10316_v37  ;;  %9229 = vmatpush3.bf16.msra.mxu1 %v10319_v34  ;;  %v16436_v1 = vmax.f32 %v13894_v54, 0.0  ;;  %v16437_v13 = vmax.f32 %v13758_v24, 0.0 }
 0x2b3   :  { %16428 = vst [vmem:[#allocation112_spill] sm:$0xff] %v14257_v36  ;;  %16429 = vst [vmem:[#allocation85_spill] sm:$0xff] %v14267_v21  ;;  %v14285_v21 = vpack.c.bf16 %v3711_v49, %v14033_v58  ;;  %v16434_v36 = vld [vmem:[#allocation139_spill] sm:$0xff]  ;;  %v14295_v38 = vpack.c.bf16 %v14210_v40, %v3558_v19  ;;  %4097 = vmatmul.mubr.bf16.gmra.mrb[108].mxu0 %v14079_v2  ;;  %9230 = vmatprep.subr.bf16.mxu1 %v10321_v14  ;;  %v3803_v34 = vmax.f32 %v13956_v9, 0.0  ;;  %v16439_v54 = vld [vmem:[#allocation157_spill] sm:$0xff] }
 0x2b4   :  { %16430 = vst [vmem:[#allocation80_spill] sm:$0xff] %v14271_v12  ;;  %16432 = vst [vmem:[#allocation86_spill] sm:$0xff] %v14276_v26  ;;  %v3553_v50 = vmax.f32 %v16434_v36, 0.0  ;;  %v16435_v12 = vld [vmem:[#allocation147_spill] sm:$0xff]  ;;  %v14300_v26 = vpack.c.bf16 %v14025_v47, %v16436_v1  ;;  %v14312_v37 = vpack.c.bf16 %v14012_v43, %v16437_v13  ;;  %4355 = vmatmul.mubr.bf16.gmra.mrb[108].mxu1 %v14083_v0  ;;  %4104 = vmatprep.mubr.bf16.mxu0 %v14110_v20  ;;  %v16441_v1 = vld [vmem:[#allocation128_spill] sm:$0xff] }
 0x2b5   :  { %v14289_v8 = vmax.f32 %v16435_v12, 0.0  ;;  %v14307_v12 = vmax.f32 %v13936_v55, 0.0  ;;  %v14318_v47 = vmax.f32 %v16439_v54, 0.0  ;;  %v14321_v14 = vpack.c.bf16 %v3753_v27, %v14027_v4  ;;  %4362 = vmatprep.mubr.bf16.mxu1 %v14088_v5  ;;  %9185 = vmatpush3.bf16.msra.mxu0 %v10317_v44  ;;  %v10322_v9 = vld [vmem:[%s15583_s5 + $0x128] sm:$0xff]   ;;  %v16444_v27 = vld [vmem:[#allocation84_spill] sm:$0xff]  ;;  %v16445_v55 = vld [vmem:[#allocation59_spill] sm:$0xff] }
 0x2b6   :  { %v14304_v36 = vpack.c.bf16 %v14021_v6, %v3553_v50  ;;  %16438 = vst [vmem:[#allocation136_spill] sm:$0xff] %v14312_v37  ;;  %v3804_v24 = vmax.f32 %v16441_v1, 0.0  ;;  %v16442_v43 = vmax.f32 %v16417_v29, 0.0  ;;  %v14340_v1 = vmax.f32 %v16445_v55, 0.0  ;;  %9186 = vmatprep.subr.bf16.mxu0 %v10320_v30  ;;  %9231 = vmatpush3.bf16.msra.mxu1 %v10323_v16  ;;  %v10325_v44 = vld [vmem:[%s15583_s5 + $0x170] sm:$0xff]   ;;  %v10326_v29 = vld [vmem:[%s15583_s5 + $0x1a8] sm:$0xff]  }
 0x2b7   :  { %16440 = vst [vmem:[#allocation108_spill] sm:$0xff] %v14321_v14  ;;  %v14353_v54 = vpack.c.bf16 %v14289_v8, %v14210_v40  ;;  %v14359_v30 = vpack.c.bf16 %v14207_v57, %v14021_v6  ;;  %v16449_v16 = vld [vmem:[#allocation142_spill] sm:$0xff]  ;;  %v3910_v20 = vpack.c.bf16 %v14015_v15, %v14015_v15  ;;  %9232 = vmatprep.subr.bf16.mxu1 %v10324_v23  ;;  %v16460_v37 = vld [vmem:[#allocation81_spill] sm:$0xff] }
 0x2b8   :  { %v14333_v13 = vpack.c.bf16 %v14002_v3, %v16442_v43  ;;  %v10328_v43 = vld [vmem:[%s15583_s5 + $0x1f0] sm:$0xff]   ;;  %v14355_v55 = vpack.c.bf16 %v3804_v24, %v3803_v34  ;;  %v14362_v4 = vmax.f32 %v16449_v16, 0.0  ;;  %v4167_v34 = vpack.c.bf16 %v14018_v60, %v14018_v60 }
 0x2b9   :  { %16446 = vst [vmem:[#allocation134_spill] sm:$0xff] %v14353_v54  ;;  %16448 = vst [vmem:[#allocation114_spill] sm:$0xff] %v14359_v30  ;;  %v14371_v54 = vpack.c.bf16 %v14279_v56, %v14207_v57  ;;  %v10329_v16 = vld [vmem:[%s15583_s5 + $0x1b0] sm:$0xff]   ;;  %v10330_v30 = vld [vmem:[%s15583_s5 + $0x178] sm:$0xff]   ;;  %9187 = vmatpush3.bf16.msra.mxu0 %v10322_v9  ;;  %v14395_v14 = vpack.c.bf16 %v14102_v18, %v3711_v49  ;;  %v14402_v23 = vpack.c.bf16 %v14292_v35, %v3804_v24 }
 0x2ba   :  { %16443 = vst [vmem:[#allocation92_spill] sm:$0xff] %v14333_v13  ;;  %16447 = vst [vmem:[#allocation66_spill] sm:$0xff] %v14355_v55  ;;  %v10327_v13 = vld [vmem:[%s15583_s5 + $0x130] sm:$0xff]   ;;  %v14384_v55 = vpack.c.bf16 %v14099_v32, %v3707_v63  ;;  %9188 = vmatprep.subr.bf16.mxu0 %v10325_v44  ;;  %9233 = vmatpush3.bf16.msra.mxu1 %v10326_v29  ;;  %v14413_v18 = vpack.c.bf16 %v3558_v19, %v14015_v15  ;;  %v16457_v29 = vld [vmem:[#allocation163_spill] sm:$0xff] }
 0x2bb   :  { %16450 = vst [vmem:[#allocation91_spill] sm:$0xff] %v14371_v54  ;;  %v16451_v54 = vmax.f32 %v13940_v33, 0.0  ;;  %v16453_v33 = vld [vmem:[#allocation8_spill] sm:$0xff]  ;;  %4105 = vmatmul.mubr.bf16.gmra.mrb[112].mxu0 %v14119_v46  ;;  %9234 = vmatprep.subr.bf16.mxu1 %v10328_v43  ;;  %v14419_v24 = vpack.c.bf16 %v3553_v50, %v14002_v3  ;;  %v16459_v19 = vld [vmem:[#allocation127_spill] sm:$0xff] }
 0x2bc   :  { %4363 = vmatmul.mubr.bf16.gmra.mrb[112].mxu1 %v16457_v29  ;;  %4112 = vmatprep.mubr.bf16.mxu0 %v3910_v20  ;;  %v3808_v63 = vmax.f32 %v16459_v19, 0.0  ;;  %v14432_v49 = vadd.f32 %v16460_v37, %v16453_v33  ;;  %v10331_v50 = vld [vmem:[%s15583_s5 + $0x138] sm:$0xff]   ;;  %v16463_v19 = vld [vmem:[#allocation56_spill] sm:$0xff] }
 0x2bd   :  { %v14389_v42 = vpack.c.bf16 %v16451_v54, %v14033_v58  ;;  %v16454_v58 = vld [vmem:[#allocation125_spill] sm:$0xff]  ;;  %v16455_v54 = vld [vmem:[#allocation140_spill] sm:$0xff]  ;;  %16456 = vst [vmem:[#allocation15_spill] sm:$0xff] %v14419_v24  ;;  %4370 = vmatprep.mubr.bf16.mxu1 %v4167_v34  ;;  %9189 = vmatpush3.bf16.msra.mxu0 %v10327_v13  ;;  %v10333_v20 = vld [vmem:[%s15583_s5 + $0x1b8] sm:$0xff]   ;;  %v14442_v6 = vmax.f32 %v16463_v19, 0.0 }
 0x2be   :  { %v14406_v9 = vadd.f32 %v16454_v58, %v16453_v33  ;;  %v16458_v58 = vld [vmem:[#allocation158_spill] sm:$0xff]  ;;  %16461 = vst [vmem:[#allocation37_spill] sm:$0xff] %v14432_v49  ;;  %9235 = vmatpush3.bf16.msra.mxu1 %v10329_v16  ;;  %9190 = vmatprep.subr.bf16.mxu0 %v10330_v30  ;;  %v10334_v37 = vld [vmem:[%s15583_s5 + $0x240] sm:$0xff]   ;;  %v16464_v43 = vld [vmem:[#allocation79_spill] sm:$0xff]  ;;  %v14460_v30 = vpack.c.bf16 %v14207_v57, %v16444_v27 }
 0x2bf   :  { %16452 = vst [vmem:[#allocation72_spill] sm:$0xff] %v14389_v42  ;;  %v14410_v42 = vadd.f32 %v16455_v54, %v16453_v33  ;;  %v14425_v54 = vmax.f32 %v16458_v58, 0.0  ;;  %v16462_v58 = vld [vmem:[#allocation159_spill] sm:$0xff]  ;;  %v10338_v13 = vld [vmem:[%s15583_s5 + $0x2c0] sm:$0xff]   ;;  %v3608_v49 = vmax.f32 %v16464_v43, 0.0  ;;  %9236 = vmatprep.subr.bf16.mxu1 %v10332_v51  ;;  %v14464_v16 = vpack.c.bf16 %v14362_v4, %v14279_v56  ;;  %v16467_v24 = vld [vmem:[#allocation110_spill] sm:$0xff] }
 0x2c0   :  { %v3809_v44 = vmax.f32 %v16462_v58, 0.0  ;;  %16465 = vst [vmem:[#allocation113_spill] sm:$0xff] %v14460_v30  ;;  %v14468_v40 = vadd.f32 %v16467_v24, %v16453_v33  ;;  %v3895_v51 = vpack.c.bf16 %v14002_v3, %v14002_v3  ;;  %v16470_v34 = vld [vmem:[#allocation132_spill] sm:$0xff]  ;;  %v16471_v33 = vld [vmem:[#allocation131_spill] sm:$0xff]  ;;  %v10339_v30 = vld [vmem:[%s15583_s5 + $0x250] sm:$0xff]  }
 0x2c1   :  { %16466 = vst [vmem:[#allocation93_spill] sm:$0xff] %v14464_v16  ;;  %9191 = vmatpush3.bf16.msra.mxu0 %v10331_v50  ;;  %v14478_v24 = vmax.f32 %v16471_v33, 0.0  ;;  %v10335_v50 = vld [vmem:[%s15583_s5 + $0x200] sm:$0xff]  }
 0x2c2   :  { %v14453_v58 = vpack.c.bf16 %v3809_v44, %v3808_v63  ;;  %v14456_v19 = vpack.c.bf16 %v14442_v6, %v3809_v44  ;;  %16468 = vst [vmem:[#allocation137_spill] sm:$0xff] %v14468_v40  ;;  %v4152_v63 = vpack.c.bf16 %v14005_v10, %v14005_v10  ;;  %9237 = vmatpush3.bf16.msra.mxu1 %v10333_v20  ;;  %v16469_v44 = vld [vmem:[#allocation155_spill] sm:$0xff]  ;;  %v16480_v16 = vld [vmem:[#allocation96_spill] sm:$0xff] }
 0x2c3   :  { %9268 = vmatprep.subr.bf16.mxu0 %v10334_v37  ;;  %4113 = vmatmul.mubr.bf16.gmra.mrb[116].mxu0 %v3895_v51  ;;  %v3609_v43 = vmax.f32 %v16469_v44, 0.0  ;;  %16472 = vst [vmem:[#allocation115_spill] sm:$0xff] %v14478_v24  ;;  %v16473_v40 = vld [vmem:[#allocation67_spill] sm:$0xff]  ;;  %v16474_v37 = vld [vmem:[#allocation64_spill] sm:$0xff]  ;;  %v10342_v51 = vld [vmem:[%s15583_s5 + $0x2c8] sm:$0xff]  }
 0x2c4   :  { %9314 = vmatprep.subr.bf16.mxu1 %v10338_v13  ;;  %4371 = vmatmul.mubr.bf16.gmra.mrb[116].mxu1 %v4152_v63  ;;  %v14481_v3 = vmax.f32 %v16473_v40, 0.0  ;;  %v3603_v13 = vmax.f32 %v16474_v37, 0.0  ;;  %v10340_v40 = vld [vmem:[%s15583_s5 + $0x280] sm:$0xff]   ;;  %v16476_v63 = vld [vmem:[#allocation162_spill] sm:$0xff]  ;;  %v10337_v44 = vld [vmem:[%s15583_s5 + $0x208] sm:$0xff]  }
 0x2c5   :  { %4595 = vmatprep.mubr.bf16.mxu0 %v14143_v17  ;;  %4853 = vmatprep.mubr.bf16.mxu1 %v16470_v34  ;;  %v14486_v20 = vpack.c.bf16 %v3609_v43, %v3608_v49  ;;  %v14490_v17 = vpack.c.bf16 %v14478_v24, %v3609_v43  ;;  %v10336_v34 = vld [vmem:[%s15583_s5 + $0x248] sm:$0xff]   ;;  %v16477_v49 = vld [vmem:[#allocation35_spill] sm:$0xff]  ;;  %v16479_v37 = vld [vmem:[#allocation94_spill] sm:$0xff] }
 0x2c6   :  { %v16478_v43 = vld [vmem:[#allocation73_spill] sm:$0xff]  ;;  %v16481_v24 = vld [vmem:[#allocation154_spill] sm:$0xff] }
 0x2c7   :  { %16475 = vst [vmem:[#allocation119_spill] sm:$0xff] %v14490_v17  ;;  %v3604_v33 = vmax.f32 %v16478_v43, 0.0  ;;  %v14513_v17 = vmax.f32 %v16481_v24, 0.0  ;;  %v10346_v24 = vld [vmem:[%s15583_s5 + $0x2d0] sm:$0xff]   ;;  %v16482_v43 = vld [vmem:[#allocation133_spill] sm:$0xff] }
 0x2cb   :  { %4596 = vmatmul.mubr.bf16.vlgmr.msra.gmra.mrb[120].mxu0 %v16476_v63  ;;  %v14518_v63 = vpack.c.bf16 %v3604_v33, %v3603_v13  ;;  %v10344_v13 = vld [vmem:[%s15583_s5 + $0x258] sm:$0xff]  }
 0x2cc   :  { %4854 = vmatmul.mubr.bf16.vlgmr.msra.gmra.mrb[120].mxu1 %v16477_v49  ;;  %9269 = vmatpush3.bf16.msra.mxu0 %v10335_v50  ;;  %v10343_v50 = vld [vmem:[%s15583_s5 + $0x288] sm:$0xff]   ;;  %v14521_v49 = vpack.c.bf16 %v14481_v3, %v3604_v33  ;;  %v10345_v33 = vld [vmem:[%s15583_s5 + $0x218] sm:$0xff]  }
 0x2cd   :  { %4603 = vmatprep.mubr.bf16.mxu0 %v16479_v37  ;;  %4861 = vmatprep.mubr.bf16.mxu1 %v16480_v16  ;;  %v10341_v16 = vld [vmem:[%s15583_s5 + $0x210] sm:$0xff]   ;;  %v10353_v37 = vld [vmem:[%s15583_s5 + $0x2e0] sm:$0xff]  }
 0x2ce   :  { %9270 = vmatprep.subr.bf16.mxu0 %v10336_v34  ;;  %9315 = vmatpush3.bf16.msra.mxu1 %v10340_v40  ;;  %v14531_v34 = vpack.c.bf16 %v14513_v17, %v14481_v3  ;;  %v10347_v40 = vld [vmem:[%s15583_s5 + $0x290] sm:$0xff]  }
 0x2cf   :  { %9316 = vmatprep.subr.bf16.mxu1 %v10342_v51  ;;  %v10350_v51 = vld [vmem:[%s15583_s5 + $0x2d8] sm:$0xff]  }
 0x2d0   :  { %9271 = vmatpush3.bf16.msra.mxu0 %v10337_v44  ;;  %v16483_v44 = vld [vmem:[#allocation164_spill] sm:$0xff] }
 0x2d1   :  { %9272 = vmatprep.subr.bf16.mxu0 %v10339_v30  ;;  %v10348_v30 = vld [vmem:[%s15583_s5 + $0x260] sm:$0xff]  }
 0x2d2   :  { %9317 = vmatpush3.bf16.msra.mxu1 %v10343_v50  ;;  %v10349_v50 = vld [vmem:[%s15583_s5 + $0x220] sm:$0xff]  }
 0x2d3   :  { %4604 = vmatmul.mubr.bf16.gmra.mrb[124].mxu0 %v14160_v39  ;;  %9318 = vmatprep.subr.bf16.mxu1 %v10346_v24  ;;  %v10351_v39 = vld [vmem:[%s15583_s5 + $0x298] sm:$0xff]   ;;  %v10355_v24 = vld [vmem:[%s15583_s5 + $0x2a0] sm:$0xff]  }
 0x2d4   :  { %4862 = vmatmul.mubr.bf16.gmra.mrb[124].mxu1 %v16482_v43  ;;  %4611 = vmatprep.mubr.bf16.mxu0 %v16483_v44  ;;  %v10359_v43 = vld [vmem:[%s15583_s5 + $0x230] sm:$0xff]  }
 0x2d5   :  { %4869 = vmatprep.mubr.bf16.mxu1 %v14173_v31  ;;  %9273 = vmatpush3.bf16.msra.mxu0 %v10341_v16  ;;  %v10352_v16 = vld [vmem:[%s15583_s5 + $0x268] sm:$0xff]  }
 0x2d6   :  { %9274 = vmatprep.subr.bf16.mxu0 %v10344_v13  ;;  %9319 = vmatpush3.bf16.msra.mxu1 %v10347_v40  ;;  %v10356_v13 = vld [vmem:[%s15583_s5 + $0x2e8] sm:$0xff]  }
 0x2d7   :  { %9320 = vmatprep.subr.bf16.mxu1 %v10350_v51  ;;  %v10354_v40 = vld [vmem:[%s15583_s5 + $0x228] sm:$0xff]   ;;  %v10357_v51 = vld [vmem:[%s15583_s5 + $0x270] sm:$0xff]  }
 0x2d9   :  { %9275 = vmatpush3.bf16.msra.mxu0 %v10345_v33  ;;  %v10361_v33 = vld [vmem:[%s15583_s5 + $0x2b0] sm:$0xff]  }
 0x2da   :  { %9276 = vmatprep.subr.bf16.mxu0 %v10348_v30  ;;  %9321 = vmatpush3.bf16.msra.mxu1 %v10351_v39  ;;  %v10362_v30 = vld [vmem:[%s15583_s5 + $0x278] sm:$0xff]   ;;  %v4424_v39 = vpack.c.bf16 %v14099_v32, %v14099_v32 }
 0x2db   :  { %4612 = vmatmul.mubr.bf16.gmra.mrb[128].mxu0 %v14200_v45  ;;  %9322 = vmatprep.subr.bf16.mxu1 %v10353_v37  ;;  %v10358_v45 = vld [vmem:[%s15583_s5 + $0x2a8] sm:$0xff]   ;;  %v4682_v37 = vpack.c.bf16 %v14182_v7, %v14182_v7  ;;  %v10363_v32 = vld [vmem:[%s15583_s5 + $0x238] sm:$0xff]  }
 0x2dc   :  { %4870 = vmatmul.mubr.bf16.gmra.mrb[128].mxu1 %v14178_v48  ;;  %4619 = vmatprep.mubr.bf16.mxu0 %v14203_v11  ;;  %v10360_v11 = vld [vmem:[%s15583_s5 + $0x2f0] sm:$0xff]  }
 0x2dd   :  { %4877 = vmatprep.mubr.bf16.mxu1 %v14186_v62  ;;  %9277 = vmatpush3.bf16.msra.mxu0 %v10349_v50  ;;  %v10364_v50 = vld [vmem:[%s15583_s5 + $0x2f8] sm:$0xff]  }
 0x2de   :  { %9278 = vmatprep.subr.bf16.mxu0 %v10352_v16  ;;  %9323 = vmatpush3.bf16.msra.mxu1 %v10355_v24  ;;  %v10365_v16 = vld [vmem:[%s15583_s5 + $0x2b8] sm:$0xff]   ;;  %v10366_v24 = vld [vmem:[%s15583_s5 + $0x340] sm:$0xff]  }
 0x2df   :  { %9324 = vmatprep.subr.bf16.mxu1 %v10356_v13  ;;  %v4410_v13 = vpack.c.bf16 %v16444_v27, %v16444_v27 }
 0x2e1   :  { %9279 = vmatpush3.bf16.msra.mxu0 %v10354_v40  ;;  %v4667_v40 = vpack.c.bf16 %v14194_v59, %v14194_v59 }
 0x2e2   :  { %9280 = vmatprep.subr.bf16.mxu0 %v10357_v51  ;;  %9325 = vmatpush3.bf16.msra.mxu1 %v10358_v45  ;;  %v10367_v51 = vld [vmem:[%s15583_s5 + $0x300] sm:$0xff]   ;;  %v10368_v45 = vld [vmem:[%s15583_s5 + $0x348] sm:$0xff]  }
 0x2e3   :  { %4620 = vmatmul.mubr.bf16.gmra.mrb[132].mxu0 %v14190_v61  ;;  %9326 = vmatprep.subr.bf16.mxu1 %v10360_v11  ;;  %v10372_v11 = vld [vmem:[%s15583_s5 + $0x380] sm:$0xff]  }
 0x2e4   :  { %4878 = vmatmul.mubr.bf16.gmra.mrb[132].mxu1 %v14219_v28  ;;  %4627 = vmatprep.mubr.bf16.mxu0 %v4424_v39  ;;  %v10370_v28 = vld [vmem:[%s15583_s5 + $0x3c0] sm:$0xff]   ;;  %v10371_v39 = vld [vmem:[%s15583_s5 + $0x350] sm:$0xff]  }
 0x2e5   :  { %4885 = vmatprep.mubr.bf16.mxu1 %v4682_v37  ;;  %9281 = vmatpush3.bf16.msra.mxu0 %v10359_v43  ;;  %v16484_v43 = vld [vmem:[#allocation97_spill] sm:$0xff] }
 0x2e6   :  { %9327 = vmatpush3.bf16.msra.mxu1 %v10361_v33  ;;  %9282 = vmatprep.subr.bf16.mxu0 %v10362_v30  ;;  %v16485_v33 = vld [vmem:[#allocation107_spill] sm:$0xff]  ;;  %v16486_v30 = vld [vmem:[#allocation65_spill] sm:$0xff] }
 0x2e7   :  { %9328 = vmatprep.subr.bf16.mxu1 %v10364_v50  ;;  %v10375_v37 = vld [vmem:[%s15583_s5 + $0x388] sm:$0xff]   ;;  %v10378_v50 = vld [vmem:[%s15583_s5 + $0x3d0] sm:$0xff]  }
 0x2e9   :  { %9283 = vmatpush3.bf16.msra.mxu0 %v10363_v32  ;;  %v10376_v32 = vld [vmem:[%s15583_s5 + $0x358] sm:$0xff]  }
 0x2ea   :  { %9329 = vmatpush3.bf16.msra.mxu1 %v10365_v16  ;;  %9360 = vmatprep.subr.bf16.mxu0 %v10366_v24  ;;  %v10379_v16 = vld [vmem:[%s15583_s5 + $0x390] sm:$0xff]   ;;  %v16487_v24 = vld [vmem:[#allocation100_spill] sm:$0xff] }
 0x2eb   :  { %4628 = vmatmul.mubr.bf16.gmra.mrb[136].mxu0 %v4410_v13  ;;  %9406 = vmatprep.subr.bf16.mxu1 %v10370_v28  ;;  %v10382_v28 = vld [vmem:[%s15583_s5 + $0x3d8] sm:$0xff]   ;;  %v16488_v13 = vld [vmem:[#allocation112_spill] sm:$0xff] }
 0x2ec   :  { %4886 = vmatmul.mubr.bf16.gmra.mrb[136].mxu1 %v4667_v40  ;;  %5111 = vmatprep.mubr.bf16.mxu0 %v14229_v41  ;;  %v10374_v41 = vld [vmem:[%s15583_s5 + $0x3c8] sm:$0xff]  }
 0x2ed   :  { %5368 = vmatprep.mubr.bf16.mxu1 %v14234_v53  ;;  %v10369_v53 = vld [vmem:[%s15583_s5 + $0x308] sm:$0xff]  }
 0x2ee   :  { %v16489_v40 = vld [vmem:[#allocation85_spill] sm:$0xff] }
 0x2f3   :  { %5112 = vmatmul.mubr.bf16.vlgmr.msra.gmra.mrb[140].mxu0 %v16484_v43  ;;  %v10385_v43 = vld [vmem:[%s15583_s5 + $0x3e0] sm:$0xff]  }
 0x2f4   :  { %5369 = vmatmul.mubr.bf16.vlgmr.msra.gmra.mrb[140].mxu1 %v16485_v33  ;;  %9361 = vmatpush3.bf16.msra.mxu0 %v10367_v51  ;;  %v10377_v51 = vld [vmem:[%s15583_s5 + $0x318] sm:$0xff]   ;;  %v10384_v33 = vld [vmem:[%s15583_s5 + $0x368] sm:$0xff]  }
 0x2f5   :  { %5119 = vmatprep.mubr.bf16.mxu0 %v14237_v52  ;;  %5376 = vmatprep.mubr.bf16.mxu1 %v16486_v30  ;;  %v10373_v52 = vld [vmem:[%s15583_s5 + $0x310] sm:$0xff]   ;;  %v10388_v30 = vld [vmem:[%s15583_s5 + $0x3e8] sm:$0xff]  }
 0x2f6   :  { %9362 = vmatprep.subr.bf16.mxu0 %v10368_v45  ;;  %9407 = vmatpush3.bf16.msra.mxu1 %v10372_v11  ;;  %v10380_v45 = vld [vmem:[%s15583_s5 + $0x360] sm:$0xff]   ;;  %v10383_v11 = vld [vmem:[%s15583_s5 + $0x398] sm:$0xff]  }
 0x2f7   :  { %9408 = vmatprep.subr.bf16.mxu1 %v10374_v41  ;;  %v10381_v41 = vld [vmem:[%s15583_s5 + $0x320] sm:$0xff]  }
 0x2f8   :  { %9363 = vmatpush3.bf16.msra.mxu0 %v10369_v53  ;;  %v10387_v53 = vld [vmem:[%s15583_s5 + $0x3a0] sm:$0xff]  }
 0x2f9   :  { %9364 = vmatprep.subr.bf16.mxu0 %v10371_v39  ;;  %v16490_v39 = vld [vmem:[#allocation80_spill] sm:$0xff] }
 0x2fa   :  { %9409 = vmatpush3.bf16.msra.mxu1 %v10375_v37  ;;  %v10386_v37 = vld [vmem:[%s15583_s5 + $0x328] sm:$0xff]  }
 0x2fb   :  { %5120 = vmatmul.mubr.bf16.gmra.mrb[144].mxu0 %v16487_v24  ;;  %9410 = vmatprep.subr.bf16.mxu1 %v10378_v50  ;;  %v10390_v50 = vld [vmem:[%s15583_s5 + $0x3a8] sm:$0xff]   ;;  %v10394_v24 = vld [vmem:[%s15583_s5 + $0x378] sm:$0xff]  }
 0x2fc   :  { %5377 = vmatmul.mubr.bf16.gmra.mrb[144].mxu1 %v16488_v13  ;;  %5127 = vmatprep.mubr.bf16.mxu0 %v16489_v40  ;;  %v5197_v13 = vpack.c.bf16 %v14289_v8, %v14289_v8  ;;  %v10396_v40 = vld [vmem:[%s15583_s5 + $0x3f8] sm:$0xff]  }
 0x2fd   :  { %5384 = vmatprep.mubr.bf16.mxu1 %v14088_v5  ;;  %9365 = vmatpush3.bf16.msra.mxu0 %v10373_v52  ;;  %v10391_v52 = vld [vmem:[%s15583_s5 + $0x330] sm:$0xff]  }
 0x2fe   :  { %9366 = vmatprep.subr.bf16.mxu0 %v10376_v32  ;;  %9411 = vmatpush3.bf16.msra.mxu1 %v10379_v16  ;;  %v4940_v32 = vpack.c.bf16 %v14307_v12, %v14307_v12  ;;  %v10393_v16 = vld [vmem:[%s15583_s5 + $0x3b0] sm:$0xff]  }
 0x2ff   :  { %9412 = vmatprep.subr.bf16.mxu1 %v10382_v28  ;;  %v16491_v28 = vld [vmem:[#allocation86_spill] sm:$0xff] }
 0x301   :  { %9367 = vmatpush3.bf16.msra.mxu0 %v10377_v51  ;;  %v10395_v51 = vld [vmem:[%s15583_s5 + $0x338] sm:$0xff]  }
 0x302   :  { %9368 = vmatprep.subr.bf16.mxu0 %v10380_v45  ;;  %9413 = vmatpush3.bf16.msra.mxu1 %v10383_v11  ;;  %v10397_v45 = vld [vmem:[%s15583_s5 + $0x3b8] sm:$0xff]   ;;  %v10398_v11 = vld [vmem:[%s15583_s5 + $0x440] sm:$0xff]  }
 0x303   :  { %5128 = vmatmul.mubr.bf16.gmra.mrb[148].mxu0 %v14285_v21  ;;  %9414 = vmatprep.subr.bf16.mxu1 %v10385_v43  ;;  %v10389_v21 = vld [vmem:[%s15583_s5 + $0x370] sm:$0xff]   ;;  %v4925_v43 = vpack.c.bf16 %v14318_v47, %v14318_v47 }
 0x304   :  { %5385 = vmatmul.mubr.bf16.gmra.mrb[148].mxu1 %v16457_v29  ;;  %5135 = vmatprep.mubr.bf16.mxu0 %v16490_v39 }
 0x305   :  { %5392 = vmatprep.mubr.bf16.mxu1 %v14295_v38  ;;  %9369 = vmatpush3.bf16.msra.mxu0 %v10381_v41  ;;  %v10392_v38 = vld [vmem:[%s15583_s5 + $0x3f0] sm:$0xff]   ;;  %v5182_v41 = vpack.c.bf16 %v14207_v57, %v14207_v57  ;;  %v10404_v57 = vld [vmem:[%s15583_s5 + $0x480] sm:$0xff]  }
 0x306   :  { %9370 = vmatprep.subr.bf16.mxu0 %v10384_v33  ;;  %9415 = vmatpush3.bf16.msra.mxu1 %v10387_v53  ;;  %v16492_v33 = vld [vmem:[#allocation13_spill] sm:$0xff]  ;;  %v10399_v53 = vld [vmem:[%s15583_s5 + $0x400] sm:$0xff]  }
 0x307   :  { %9416 = vmatprep.subr.bf16.mxu1 %v10388_v30  ;;  %v10400_v30 = vld [vmem:[%s15583_s5 + $0x448] sm:$0xff]  }
 0x309   :  { %9371 = vmatpush3.bf16.msra.mxu0 %v10386_v37  ;;  %v10406_v37 = vld [vmem:[%s15583_s5 + $0x4c8] sm:$0xff]  }
 0x30a   :  { %9372 = vmatprep.subr.bf16.mxu0 %v10389_v21  ;;  %9417 = vmatpush3.bf16.msra.mxu1 %v10390_v50  ;;  %v16493_v21 = vld [vmem:[#allocation136_spill] sm:$0xff] }
 0x30b   :  { %5136 = vmatmul.mubr.bf16.gmra.mrb[152].mxu0 %v16491_v28  ;;  %9418 = vmatprep.subr.bf16.mxu1 %v10392_v38  ;;  %v16494_v50 = vld [vmem:[#allocation108_spill] sm:$0xff]  ;;  %v10403_v38 = vld [vmem:[%s15583_s5 + $0x450] sm:$0xff]  }
 0x30c   :  { %5393 = vmatmul.mubr.bf16.gmra.mrb[152].mxu1 %v14304_v36  ;;  %5143 = vmatprep.mubr.bf16.mxu0 %v4940_v32  ;;  %v10402_v36 = vld [vmem:[%s15583_s5 + $0x4c0] sm:$0xff]   ;;  %v10408_v32 = vld [vmem:[%s15583_s5 + $0x458] sm:$0xff]  }
 0x30d   :  { %5400 = vmatprep.mubr.bf16.mxu1 %v5197_v13  ;;  %9373 = vmatpush3.bf16.msra.mxu0 %v10391_v52  ;;  %v10405_v52 = vld [vmem:[%s15583_s5 + $0x410] sm:$0xff]   ;;  %v16496_v13 = vld [vmem:[#allocation57_spill] sm:$0xff] }
 0x30e   :  { %9419 = vmatpush3.bf16.msra.mxu1 %v10393_v16  ;;  %9374 = vmatprep.subr.bf16.mxu0 %v10394_v24  ;;  %v10411_v16 = vld [vmem:[%s15583_s5 + $0x490] sm:$0xff]   ;;  %v16495_v24 = vld [vmem:[#allocation161_spill] sm:$0xff] }
 0x30f   :  { %9420 = vmatprep.subr.bf16.mxu1 %v10396_v40  ;;  %v16497_v40 = vpack.c.bf16 %v16495_v24, %v16496_v13  ;;  %v5712_v24 = vpack.c.bf16 %v14292_v35, %v14292_v35  ;;  %v10428_v13 = vld [vmem:[%s15583_s5 + $0x4f8] sm:$0xff]  }
 0x311   :  { %9375 = vmatpush3.bf16.msra.mxu0 %v10395_v51  ;;  %v10414_v51 = vld [vmem:[%s15583_s5 + $0x4d8] sm:$0xff]  }
 0x312   :  { %9421 = vmatpush3.bf16.msra.mxu1 %v10397_v45  ;;  %9452 = vmatprep.subr.bf16.mxu0 %v10398_v11  ;;  %v16498_v45 = vld [vmem:[#allocation92_spill] sm:$0xff]  ;;  %v16499_v11 = vpack.c.bf16 %v14018_v60, %v14015_v15 }
 0x313   :  { %5144 = vmatmul.mubr.bf16.gmra.mrb[156].mxu0 %v4925_v43  ;;  %9498 = vmatprep.subr.bf16.mxu1 %v10402_v36  ;;  %v10409_v36 = vld [vmem:[%s15583_s5 + $0x418] sm:$0xff]   ;;  %v10412_v43 = vld [vmem:[%s15583_s5 + $0x460] sm:$0xff]  }
 0x314   :  { %5401 = vmatmul.mubr.bf16.gmra.mrb[156].mxu1 %v5182_v41  ;;  %5626 = vmatprep.mubr.bf16.mxu0 %v16492_v33  ;;  %v10415_v41 = vld [vmem:[%s15583_s5 + $0x498] sm:$0xff]   ;;  %v10417_v15 = vld [vmem:[%s15583_s5 + $0x4e0] sm:$0xff]   ;;  %v10416_v33 = vld [vmem:[%s15583_s5 + $0x468] sm:$0xff]  }
 0x315   :  { %5883 = vmatprep.mubr.bf16.mxu1 %v14300_v26  ;;  %v10401_v26 = vld [vmem:[%s15583_s5 + $0x408] sm:$0xff]  }
 0x31b   :  { %5627 = vmatmul.mubr.bf16.vlgmr.msra.gmra.mrb[160].mxu0 %v14079_v2  ;;  %v10407_v2 = vld [vmem:[%s15583_s5 + $0x488] sm:$0xff]  }
 0x31c   :  { %5884 = vmatmul.mubr.bf16.vlgmr.msra.gmra.mrb[160].mxu1 %v14083_v0  ;;  %9453 = vmatpush3.bf16.msra.mxu0 %v10399_v53  ;;  %v10410_v0 = vld [vmem:[%s15583_s5 + $0x4d0] sm:$0xff]   ;;  %v10419_v53 = vld [vmem:[%s15583_s5 + $0x4a0] sm:$0xff]  }
 0x31d   :  { %5634 = vmatprep.mubr.bf16.mxu0 %v16493_v21  ;;  %5891 = vmatprep.mubr.bf16.mxu1 %v16494_v50  ;;  %v10418_v21 = vld [vmem:[%s15583_s5 + $0x428] sm:$0xff]   ;;  %v10421_v50 = vld [vmem:[%s15583_s5 + $0x470] sm:$0xff]  }
 0x31e   :  { %9454 = vmatprep.subr.bf16.mxu0 %v10400_v30  ;;  %9499 = vmatpush3.bf16.msra.mxu1 %v10404_v57  ;;  %v10420_v30 = vld [vmem:[%s15583_s5 + $0x4e8] sm:$0xff]   ;;  %v16500_v57 = vpack.c.bf16 %v16444_v27, %v14005_v10 }
 0x31f   :  { %9500 = vmatprep.subr.bf16.mxu1 %v10406_v37  ;;  %v16501_v37 = vld [vmem:[#allocation134_spill] sm:$0xff]  ;;  %v10422_v27 = vld [vmem:[%s15583_s5 + $0x4a8] sm:$0xff]  }
 0x320   :  { %9455 = vmatpush3.bf16.msra.mxu0 %v10401_v26  ;;  %v16502_v26 = vld [vmem:[#allocation66_spill] sm:$0xff] }
 0x321   :  { %9456 = vmatprep.subr.bf16.mxu0 %v10403_v38  ;;  %v10424_v38 = vld [vmem:[%s15583_s5 + $0x4f0] sm:$0xff]  }
 0x322   :  { %9501 = vmatpush3.bf16.msra.mxu1 %v10407_v2  ;;  %v10423_v2 = vld [vmem:[%s15583_s5 + $0x430] sm:$0xff]  }
 0x323   :  { %5635 = vmatmul.mubr.bf16.gmra.mrb[164].mxu0 %v16497_v40  ;;  %9502 = vmatprep.subr.bf16.mxu1 %v10410_v0  ;;  %v5455_v0 = vpack.c.bf16 %v14340_v1, %v14340_v1  ;;  %v16504_v40 = vld [vmem:[#allocation91_spill] sm:$0xff] }
 0x324   :  { %5892 = vmatmul.mubr.bf16.gmra.mrb[164].mxu1 %v16498_v45  ;;  %5642 = vmatprep.mubr.bf16.mxu0 %v16499_v11  ;;  %v10429_v45 = vld [vmem:[%s15583_s5 + $0x4b8] sm:$0xff]   ;;  %v10430_v11 = vld [vmem:[%s15583_s5 + $0x540] sm:$0xff]  }
 0x325   :  { %5899 = vmatprep.mubr.bf16.mxu1 %v14186_v62  ;;  %9457 = vmatpush3.bf16.msra.mxu0 %v10405_v52  ;;  %v10413_v62 = vld [vmem:[%s15583_s5 + $0x420] sm:$0xff]   ;;  %v10425_v52 = vld [vmem:[%s15583_s5 + $0x4b0] sm:$0xff]  }
 0x326   :  { %9458 = vmatprep.subr.bf16.mxu0 %v10408_v32  ;;  %9503 = vmatpush3.bf16.msra.mxu1 %v10411_v16  ;;  %v10426_v32 = vld [vmem:[%s15583_s5 + $0x478] sm:$0xff]   ;;  %v16503_v16 = vld [vmem:[#allocation114_spill] sm:$0xff] }
 0x327   :  { %9504 = vmatprep.subr.bf16.mxu1 %v10414_v51  ;;  %v10427_v51 = vld [vmem:[%s15583_s5 + $0x438] sm:$0xff]  }
 0x329   :  { %9459 = vmatpush3.bf16.msra.mxu0 %v10409_v36  ;;  %v10434_v36 = vld [vmem:[%s15583_s5 + $0x5c0] sm:$0xff]  }
 0x32a   :  { %9460 = vmatprep.subr.bf16.mxu0 %v10412_v43  ;;  %9505 = vmatpush3.bf16.msra.mxu1 %v10415_v41  ;;  %v5440_v43 = vpack.c.bf16 %v14279_v56, %v14279_v56  ;;  %v5698_v41 = vpack.c.bf16 %v14362_v4, %v14362_v4  ;;  %v10432_v56 = vld [vmem:[%s15583_s5 + $0x548] sm:$0xff]   ;;  %v10436_v4 = vld [vmem:[%s15583_s5 + $0x580] sm:$0xff]  }
 0x32b   :  { %5643 = vmatmul.mubr.bf16.gmra.mrb[168].mxu0 %v14190_v61  ;;  %9506 = vmatprep.subr.bf16.mxu1 %v10417_v15  ;;  %v10431_v15 = vld [vmem:[%s15583_s5 + $0x500] sm:$0xff]  }
 0x32c   :  { %5900 = vmatmul.mubr.bf16.gmra.mrb[168].mxu1 %v16500_v57  ;;  %5650 = vmatprep.mubr.bf16.mxu0 %v16501_v37  ;;  %v16507_v57 = vld [vmem:[#allocation72_spill] sm:$0xff] }
 0x32d   :  { %5907 = vmatprep.mubr.bf16.mxu1 %v16502_v26  ;;  %9461 = vmatpush3.bf16.msra.mxu0 %v10413_v62  ;;  %v16505_v62 = vld [vmem:[#allocation90_spill] sm:$0xff]  ;;  %v10446_v26 = vld [vmem:[%s15583_s5 + $0x5d8] sm:$0xff]  }
 0x32e   :  { %9462 = vmatprep.subr.bf16.mxu0 %v10416_v33  ;;  %9507 = vmatpush3.bf16.msra.mxu1 %v10419_v53  ;;  %v16506_v33 = vpack.c.bf16 %v14091_v25, %v14029_v22  ;;  %v10435_v53 = vld [vmem:[%s15583_s5 + $0x550] sm:$0xff]   ;;  %v10440_v25 = vld [vmem:[%s15583_s5 + $0x558] sm:$0xff]  }
 0x32f   :  { %9508 = vmatprep.subr.bf16.mxu1 %v10420_v30  ;;  %v10442_v30 = vld [vmem:[%s15583_s5 + $0x5d0] sm:$0xff]  }
 0x330   :  { %v10437_v22 = vld [vmem:[%s15583_s5 + $0x510] sm:$0xff]  }
 0x331   :  { %9463 = vmatpush3.bf16.msra.mxu0 %v10418_v21  ;;  %v16508_v21 = vpack.c.bf16 %v14307_v12, %v14182_v7  ;;  %v10449_v7 = vld [vmem:[%s15583_s5 + $0x5e0] sm:$0xff]  }
 0x332   :  { %9464 = vmatprep.subr.bf16.mxu0 %v10421_v50  ;;  %9509 = vmatpush3.bf16.msra.mxu1 %v10422_v27  ;;  %v10441_v50 = vld [vmem:[%s15583_s5 + $0x518] sm:$0xff]   ;;  %v10444_v27 = vld [vmem:[%s15583_s5 + $0x560] sm:$0xff]  }
 0x333   :  { %5651 = vmatmul.mubr.bf16.gmra.mrb[172].mxu0 %v16503_v16  ;;  %9510 = vmatprep.subr.bf16.mxu1 %v10424_v38  ;;  %v10445_v12 = vld [vmem:[%s15583_s5 + $0x520] sm:$0xff]  }
 0x334   :  { %5908 = vmatmul.mubr.bf16.gmra.mrb[172].mxu1 %v16504_v40  ;;  %5658 = vmatprep.mubr.bf16.mxu0 %v5455_v0  ;;  %v10451_v38 = vld [vmem:[%s15583_s5 + $0x5a0] sm:$0xff]   ;;  %v16509_v0 = vpack.c.bf16 %v14318_v47, %v14194_v59  ;;  %v10454_v59 = vld [vmem:[%s15583_s5 + $0x5a8] sm:$0xff]   ;;  %v3807_v47 = vmax.f32 %v14406_v9, 0.0  ;;  %v10458_v9 = vld [vmem:[%s15583_s5 + $0x578] sm:$0xff]  }
 0x335   :  { %5915 = vmatprep.mubr.bf16.mxu1 %v5712_v24  ;;  %9465 = vmatpush3.bf16.msra.mxu0 %v10423_v2  ;;  %v10452_v2 = vld [vmem:[%s15583_s5 + $0x5e8] sm:$0xff]   ;;  %v5970_v24 = vpack.c.bf16 %v14425_v54, %v14425_v54 }
 0x336   :  { %9511 = vmatpush3.bf16.msra.mxu1 %v10425_v52  ;;  %9466 = vmatprep.subr.bf16.mxu0 %v10426_v32  ;;  %v16510_v52 = vpack.c.bf16 %v14425_v54, %v14292_v35  ;;  %v10453_v32 = vld [vmem:[%s15583_s5 + $0x570] sm:$0xff]   ;;  %v10459_v54 = vld [vmem:[%s15583_s5 + $0x538] sm:$0xff]  }
 0x337   :  { %9512 = vmatprep.subr.bf16.mxu1 %v10428_v13  ;;  %v10456_v35 = vld [vmem:[%s15583_s5 + $0x5f0] sm:$0xff]  }
 0x338   :  { %v10457_v13 = vld [vmem:[%s15583_s5 + $0x5b0] sm:$0xff]  }
 0x339   :  { %9467 = vmatpush3.bf16.msra.mxu0 %v10427_v51  ;;  %v6228_v51 = vpack.c.bf16 %v3807_v47, %v3807_v47 }
 0x33a   :  { %9513 = vmatpush3.bf16.msra.mxu1 %v10429_v45  ;;  %9544 = vmatprep.subr.bf16.mxu0 %v10430_v11  ;;  %v10460_v45 = vld [vmem:[%s15583_s5 + $0x5f8] sm:$0xff]   ;;  %v3811_v11 = vmax.f32 %v14410_v42, 0.0  ;;  %v16511_v42 = vld [vmem:[#allocation14_spill] sm:$0xff] }
 0x33b   :  { %5659 = vmatmul.mubr.bf16.gmra.mrb[176].mxu0 %v5440_v43  ;;  %9590 = vmatprep.subr.bf16.mxu1 %v10434_v36  ;;  %v10462_v36 = vld [vmem:[%s15583_s5 + $0x640] sm:$0xff]  }
 0x33c   :  { %5916 = vmatmul.mubr.bf16.gmra.mrb[176].mxu1 %v5698_v41  ;;  %6141 = vmatprep.mubr.bf16.mxu0 %v16483_v44  ;;  %v10438_v44 = vld [vmem:[%s15583_s5 + $0x5c8] sm:$0xff]   ;;  %v6213_v43 = vpack.c.bf16 %v3811_v11, %v3811_v11  ;;  %v10463_v41 = vld [vmem:[%s15583_s5 + $0x600] sm:$0xff]  }
 0x33d   :  { %6399 = vmatprep.mubr.bf16.mxu1 %v14173_v31  ;;  %v10433_v31 = vld [vmem:[%s15583_s5 + $0x508] sm:$0xff]  }
 0x343   :  { %6142 = vmatmul.mubr.bf16.vlgmr.msra.gmra.mrb[180].mxu0 %v16505_v62  ;;  %v16515_v62 = vld [vmem:[#allocation160_spill] sm:$0xff] }
 0x344   :  { %6400 = vmatmul.mubr.bf16.vlgmr.msra.gmra.mrb[180].mxu1 %v14178_v48  ;;  %9545 = vmatpush3.bf16.msra.mxu0 %v10431_v15  ;;  %v10439_v48 = vld [vmem:[%s15583_s5 + $0x588] sm:$0xff]  }
 0x345   :  { %6149 = vmatprep.mubr.bf16.mxu0 %v16506_v33  ;;  %6407 = vmatprep.mubr.bf16.mxu1 %v14384_v55  ;;  %v10443_v55 = vld [vmem:[%s15583_s5 + $0x590] sm:$0xff]   ;;  %v10464_v15 = vld [vmem:[%s15583_s5 + $0x648] sm:$0xff]  }
 0x346   :  { %9546 = vmatprep.subr.bf16.mxu0 %v10432_v56  ;;  %9591 = vmatpush3.bf16.msra.mxu1 %v10436_v4  ;;  %v10466_v4 = vld [vmem:[%s15583_s5 + $0x650] sm:$0xff]  }
 0x347   :  { %9592 = vmatprep.subr.bf16.mxu1 %v10438_v44  ;;  %v16517_v44 = vpack.c.bf16 %v14340_v1, %v14289_v8  ;;  %v10471_v1 = vld [vmem:[%s15583_s5 + $0x620] sm:$0xff]  }
 0x348   :  { %9547 = vmatpush3.bf16.msra.mxu0 %v10433_v31  ;;  %v10469_v31 = vld [vmem:[%s15583_s5 + $0x618] sm:$0xff]  }
 0x349   :  { %9548 = vmatprep.subr.bf16.mxu0 %v10435_v53  ;;  %v10470_v53 = vld [vmem:[%s15583_s5 + $0x660] sm:$0xff]  }
 0x34a   :  { %9593 = vmatpush3.bf16.msra.mxu1 %v10439_v48 }
 0x34b   :  { %6150 = vmatmul.mubr.bf16.gmra.mrb[184].mxu0 %v16507_v57  ;;  %9594 = vmatprep.subr.bf16.mxu1 %v10442_v30 }
 0x34c   :  { %6408 = vmatmul.mubr.bf16.gmra.mrb[184].mxu1 %v14395_v14  ;;  %6157 = vmatprep.mubr.bf16.mxu0 %v16490_v39  ;;  %v10447_v14 = vld [vmem:[%s15583_s5 + $0x598] sm:$0xff]   ;;  %v10448_v39 = vld [vmem:[%s15583_s5 + $0x568] sm:$0xff]  }
 0x34d   :  { %6415 = vmatprep.mubr.bf16.mxu1 %v16508_v21  ;;  %9549 = vmatpush3.bf16.msra.mxu0 %v10437_v22  ;;  %v10472_v21 = vld [vmem:[%s15583_s5 + $0x668] sm:$0xff]  }
 0x34e   :  { %9550 = vmatprep.subr.bf16.mxu0 %v10440_v25  ;;  %9595 = vmatpush3.bf16.msra.mxu1 %v10443_v55 }
 0x34f   :  { %9596 = vmatprep.subr.bf16.mxu1 %v10446_v26 }
 0x351   :  { %9551 = vmatpush3.bf16.msra.mxu0 %v10441_v50 }
 0x352   :  { %9552 = vmatprep.subr.bf16.mxu0 %v10444_v27  ;;  %9597 = vmatpush3.bf16.msra.mxu1 %v10447_v14 }
 0x353   :  { %6158 = vmatmul.mubr.bf16.gmra.mrb[188].mxu0 %v16491_v28  ;;  %9598 = vmatprep.subr.bf16.mxu1 %v10449_v7  ;;  %v10450_v28 = vld [vmem:[%s15583_s5 + $0x528] sm:$0xff]   ;;  %v16518_v7 = vld [vmem:[#allocation119_spill] sm:$0xff] }
 0x354   :  { %6416 = vmatmul.mubr.bf16.gmra.mrb[188].mxu1 %v16509_v0  ;;  %6165 = vmatprep.mubr.bf16.mxu0 %v14402_v23  ;;  %v10455_v23 = vld [vmem:[%s15583_s5 + $0x530] sm:$0xff]  }
 0x355   :  { %6423 = vmatprep.mubr.bf16.mxu1 %v16510_v52  ;;  %9553 = vmatpush3.bf16.msra.mxu0 %v10445_v12  ;;  %v10473_v12 = vld [vmem:[%s15583_s5 + $0x628] sm:$0xff]  }
 0x356   :  { %9554 = vmatprep.subr.bf16.mxu0 %v10448_v39  ;;  %9599 = vmatpush3.bf16.msra.mxu1 %v10451_v38  ;;  %v10474_v38 = vld [vmem:[%s15583_s5 + $0x670] sm:$0xff]  }
 0x357   :  { %9600 = vmatprep.subr.bf16.mxu1 %v10452_v2 }
 0x359   :  { %9555 = vmatpush3.bf16.msra.mxu0 %v10450_v28 }
 0x35a   :  { %9556 = vmatprep.subr.bf16.mxu0 %v10453_v32  ;;  %9601 = vmatpush3.bf16.msra.mxu1 %v10454_v59 }
 0x35b   :  { %6166 = vmatmul.mubr.bf16.gmra.mrb[192].mxu0 %v14453_v58  ;;  %9602 = vmatprep.subr.bf16.mxu1 %v10456_v35  ;;  %v10461_v58 = vld [vmem:[%s15583_s5 + $0x5b8] sm:$0xff]   ;;  %v10475_v35 = vld [vmem:[%s15583_s5 + $0x630] sm:$0xff]  }
 0x35c   :  { %6424 = vmatmul.mubr.bf16.gmra.mrb[192].mxu1 %v14456_v19  ;;  %6173 = vmatprep.mubr.bf16.mxu0 %v5970_v24  ;;  %v5955_v19 = vpack.c.bf16 %v14442_v6, %v14442_v6  ;;  %v10465_v6 = vld [vmem:[%s15583_s5 + $0x608] sm:$0xff]  }
 0x35d   :  { %6431 = vmatprep.mubr.bf16.mxu1 %v6228_v51  ;;  %9557 = vmatpush3.bf16.msra.mxu0 %v10455_v23  ;;  %v10476_v51 = vld [vmem:[%s15583_s5 + $0x678] sm:$0xff]  }
 0x35e   :  { %9603 = vmatpush3.bf16.msra.mxu1 %v10457_v13  ;;  %9558 = vmatprep.subr.bf16.mxu0 %v10458_v9  ;;  %v16520_v13 = vld [vmem:[#allocation115_spill] sm:$0xff] }
 0x35f   :  { %9604 = vmatprep.subr.bf16.mxu1 %v10460_v45  ;;  %v6485_v9 = vpack.c.bf16 %v16520_v13, %v16520_v13 }
 0x361   :  { %9559 = vmatpush3.bf16.msra.mxu0 %v10459_v54 }
 0x362   :  { %9605 = vmatpush3.bf16.msra.mxu1 %v10461_v58  ;;  %9636 = vmatprep.subr.bf16.mxu0 %v10462_v36  ;;  %v10477_v36 = vld [vmem:[%s15583_s5 + $0x638] sm:$0xff]  }
 0x363   :  { %6174 = vmatmul.mubr.bf16.gmra.mrb[196].mxu0 %v5955_v19 }
 0x364   :  { %6432 = vmatmul.mubr.bf16.gmra.mrb[196].mxu1 %v6213_v43  ;;  %6656 = vmatprep.mubr.bf16.mxu0 %v16511_v42 }
 0x365   :  { %6914 = vmatprep.mubr.bf16.mxu1 %v14088_v5  ;;  %v16512_v5 = vld [vmem:[#allocation58_spill] sm:$0xff] }
 0x366   :  { %v16513_v56 = vpack.c.bf16 %v16512_v5, %v14018_v60  ;;  %v16516_v60 = vpack.c.bf16 %v16515_v62, %v14005_v10 }
 0x36b   :  { %6657 = vmatmul.mubr.bf16.vlgmr.msra.gmra.mrb[200].mxu0 %v14119_v46  ;;  %v10467_v46 = vld [vmem:[%s15583_s5 + $0x610] sm:$0xff]  }
 0x36c   :  { %6915 = vmatmul.mubr.bf16.vlgmr.msra.gmra.mrb[200].mxu1 %v16457_v29  ;;  %9637 = vmatpush3.bf16.msra.mxu0 %v10463_v41  ;;  %v10468_v29 = vld [vmem:[%s15583_s5 + $0x658] sm:$0xff]  }
 0x36d   :  { %6664 = vmatprep.mubr.bf16.mxu0 %v14413_v18  ;;  %6922 = vmatprep.mubr.bf16.mxu1 %v16513_v56  ;;  %v16514_v18 = vld [vmem:[#allocation15_spill] sm:$0xff] }
 0x36e   :  { %9638 = vmatprep.subr.bf16.mxu0 %v10464_v15 }
 0x370   :  { %9639 = vmatpush3.bf16.msra.mxu0 %v10465_v6 }
 0x371   :  { %9640 = vmatprep.subr.bf16.mxu0 %v10466_v4 }
 0x373   :  { %6665 = vmatmul.mubr.bf16.gmra.mrb[204].mxu0 %v16514_v18 }
 0x374   :  { %6923 = vmatmul.mubr.bf16.gmra.mrb[204].mxu1 %v16516_v60  ;;  %6672 = vmatprep.mubr.bf16.mxu0 %v16501_v37 }
 0x375   :  { %6930 = vmatprep.mubr.bf16.mxu1 %v16517_v44  ;;  %9641 = vmatpush3.bf16.msra.mxu0 %v10467_v46 }
 0x376   :  { %v9100_v33 = vpop.f32.mrb[100].mxu0  ;;  %9642 = vmatprep.subr.bf16.mxu0 %v10468_v29  ;;  %v9146_v48 = vpop.f32.mrb[100].mxu1  ;;  %v6728_v29 = vpack.c.bf16 %v14513_v17, %v14513_v17 }
 0x377   :  { %v9101_v10 = vpop.f32.mrb[101].mxu0  ;;  %v9147_v22 = vpop.f32.mrb[101].mxu1 }
 0x378   :  { %v9102_v30 = vadd.f32 %v9101_v10, %v9100_v33  ;;  %v9103_v37 = vpop.f32.mrb[102].mxu0  ;;  %v9148_v25 = vadd.f32 %v9147_v22, %v9146_v48  ;;  %v9149_v55 = vpop.f32.mrb[102].mxu1 }
 0x379   :  { %v9104_v8 = vpop.f32.mrb[103].mxu0  ;;  %9643 = vmatpush3.bf16.msra.mxu0 %v10469_v31  ;;  %v9150_v26 = vpop.f32.mrb[103].mxu1 }
 0x37a   :  { %v9105_v57 = vadd.f32 %v9104_v8, %v9103_v37  ;;  %9644 = vmatprep.subr.bf16.mxu0 %v10470_v53  ;;  %v15035_v50 = vadd.f32 %v9148_v25, %v9102_v30  ;;  %v9151_v27 = vadd.f32 %v9150_v26, %v9149_v55  ;;  %v16521_v8 = vld [vmem:[#allocation113_spill] sm:$0xff] }
 0x37b   :  { %6673 = vmatmul.mubr.bf16.gmra.mrb[208].mxu0 %v16503_v16 }
 0x37c   :  { %6931 = vmatmul.mubr.bf16.gmra.mrb[208].mxu1 %v16504_v40  ;;  %6680 = vmatprep.mubr.bf16.mxu0 %v14486_v20  ;;  %v15040_v14 = vadd.f32 %v9151_v27, %v9105_v57  ;;  %v16519_v40 = vld [vmem:[#allocation37_spill] sm:$0xff] }
 0x37d   :  { %6938 = vmatprep.mubr.bf16.mxu1 %v16518_v7  ;;  %9645 = vmatpush3.bf16.msra.mxu0 %v10471_v1  ;;  %v3611_v0 = vmax.f32 %v16519_v40, 0.0 }
 0x37e   :  { %v9106_v39 = vpop.f32.mrb[104].mxu0  ;;  %9646 = vmatprep.subr.bf16.mxu0 %v10472_v21 }
 0x37f   :  { %v9152_v16 = vpop.f32.mrb[104].mxu1  ;;  %v9107_v2 = vpop.f32.mrb[105].mxu0  ;;  %v6743_v11 = vpack.c.bf16 %v3611_v0, %v3611_v0  ;;  %v16522_v0 = vld [vmem:[#allocation93_spill] sm:$0xff] }
 0x380   :  { %v9108_v20 = vadd.f32 %v9107_v2, %v9106_v39  ;;  %v9153_v52 = vpop.f32.mrb[105].mxu1  ;;  %v9109_v28 = vpop.f32.mrb[106].mxu0 }
 0x381   :  { %v9154_v32 = vadd.f32 %v9153_v52, %v9152_v16  ;;  %v9155_v59 = vpop.f32.mrb[106].mxu1  ;;  %v9110_v47 = vpop.f32.mrb[107].mxu0  ;;  %9647 = vmatpush3.bf16.msra.mxu0 %v10473_v12 }
 0x382   :  { %v9111_v23 = vadd.f32 %v9110_v47, %v9109_v28  ;;  %v9156_v24 = vpop.f32.mrb[107].mxu1  ;;  %9648 = vmatprep.subr.bf16.mxu0 %v10474_v38 }
 0x383   :  { %v15058_v45 = vadd.f32 %v9154_v32, %v9108_v20  ;;  %v9157_v54 = vadd.f32 %v9156_v24, %v9155_v59  ;;  %6681 = vmatmul.mubr.bf16.gmra.mrb[212].mxu0 %v14518_v63 }
 0x384   :  { %6939 = vmatmul.mubr.bf16.gmra.mrb[212].mxu1 %v14521_v49  ;;  %6688 = vmatprep.mubr.bf16.mxu0 %v6485_v9  ;;  %v6470_v49 = vpack.c.bf16 %v14481_v3, %v14481_v3 }
 0x385   :  { %v15062_v58 = vadd.f32 %v9157_v54, %v9111_v23  ;;  %6946 = vmatprep.mubr.bf16.mxu1 %v6743_v11  ;;  %9649 = vmatpush3.bf16.msra.mxu0 %v10475_v35 }
 0x386   :  { %v9112_v19 = vpop.f32.mrb[108].mxu0  ;;  %9650 = vmatprep.subr.bf16.mxu0 %v10476_v51 }
 0x387   :  { %v9158_v43 = vpop.f32.mrb[108].mxu1  ;;  %v9113_v42 = vpop.f32.mrb[109].mxu0 }
 0x388   :  { %v9114_v41 = vadd.f32 %v9113_v42, %v9112_v19  ;;  %v9159_v15 = vpop.f32.mrb[109].mxu1  ;;  %v9115_v6 = vpop.f32.mrb[110].mxu0 }
 0x389   :  { %v9160_v63 = vadd.f32 %v9159_v15, %v9158_v43  ;;  %v9161_v5 = vpop.f32.mrb[110].mxu1  ;;  %v9116_v56 = vpop.f32.mrb[111].mxu0  ;;  %9651 = vmatpush3.bf16.msra.mxu0 %v10477_v36  ;;  %v16523_v43 = vld [vmem:[#allocation137_spill] sm:$0xff] }
 0x38a   :  { %v9117_v4 = vadd.f32 %v9116_v56, %v9115_v6  ;;  %v9162_v46 = vpop.f32.mrb[111].mxu1  ;;  %v3607_v42 = vmax.f32 %v16523_v43, 0.0 }
 0x38b   :  { %v15071_v18 = vadd.f32 %v9160_v63, %v9114_v41  ;;  %v9163_v62 = vadd.f32 %v9162_v46, %v9161_v5  ;;  %6689 = vmatmul.mubr.bf16.gmra.mrb[216].mxu0 %v6470_v49 }
 0x38c   :  { %6947 = vmatmul.mubr.bf16.gmra.mrb[216].mxu1 %v6728_v29  ;;  %7157 = vmatprep.mubr.bf16.mxu0 %v14190_v61 }
 0x38d   :  { %v15074_v60 = vadd.f32 %v9163_v62, %v9117_v4 }
 0x38e   :  { %v9118_v44 = vpop.f32.mrb[112].mxu0 }
 0x38f   :  { %v9164_v31 = vpop.f32.mrb[112].mxu1  ;;  %v9119_v33 = vpop.f32.mrb[113].mxu0 }
 0x390   :  { %v9120_v53 = vadd.f32 %v9119_v33, %v9118_v44  ;;  %v9165_v3 = vpop.f32.mrb[113].mxu1  ;;  %v9121_v48 = vpop.f32.mrb[114].mxu0 }
 0x391   :  { %v9166_v10 = vadd.f32 %v9165_v3, %v9164_v31  ;;  %v9167_v30 = vpop.f32.mrb[114].mxu1  ;;  %v9122_v22 = vpop.f32.mrb[115].mxu0 }
 0x392   :  { %v9123_v37 = vadd.f32 %v9122_v22, %v9121_v48  ;;  %v9168_v17 = vpop.f32.mrb[115].mxu1 }
 0x393   :  { %v15076_v25 = vadd.f32 %v9166_v10, %v9120_v53  ;;  %v9169_v55 = vadd.f32 %v9168_v17, %v9167_v30  ;;  %7158 = vmatmul.mubr.bf16.vlgmr.msra.gmra.mrb[220].mxu0 %v14190_v61 }
 0x394   :  { %7165 = vmatprep.mubr.bf16.mxu0 %v16521_v8 }
 0x395   :  { %v15080_v1 = vadd.f32 %v9169_v55, %v9123_v37 }
 0x396   :  { %v9124_v57 = vpop.f32.mrb[116].mxu0 }
 0x397   :  { %v9170_v26 = vpop.f32.mrb[116].mxu1  ;;  %v9125_v21 = vpop.f32.mrb[117].mxu0 }
 0x398   :  { %v9126_v27 = vadd.f32 %v9125_v21, %v9124_v57  ;;  %v9171_v7 = vpop.f32.mrb[117].mxu1  ;;  %v9127_v12 = vpop.f32.mrb[118].mxu0 }
 0x399   :  { %v9172_v39 = vadd.f32 %v9171_v7, %v9170_v26  ;;  %v9173_v38 = vpop.f32.mrb[118].mxu1  ;;  %v9128_v16 = vpop.f32.mrb[119].mxu0 }
 0x39a   :  { %v9174_v2 = vpop.f32.mrb[119].mxu1 }
 0x39b   :  { %v15082_v40 = vadd.f32 %v9172_v39, %v9126_v27  ;;  %7166 = vmatmul.mubr.bf16.gmra.mrb[224].mxu0 %v16521_v8 }
 0x39c   :  { %7173 = vmatprep.mubr.bf16.mxu0 %v16522_v0 }
 0x39e   :  { %v9192_v61 = vpop.f32.mrb[120].mxu0 }
 0x39f   :  { %v9238_v20 = vpop.f32.mrb[120].mxu1  ;;  %v9193_v52 = vpop.f32.mrb[121].mxu0 }
 0x3a0   :  { %v9194_v28 = vadd.f32 %v9193_v52, %v9192_v61  ;;  %v9239_v32 = vpop.f32.mrb[121].mxu1  ;;  %v9195_v59 = vpop.f32.mrb[122].mxu0 }
 0x3a1   :  { %v9240_v47 = vadd.f32 %v9239_v32, %v9238_v20  ;;  %v9241_v35 = vpop.f32.mrb[122].mxu1  ;;  %v9196_v23 = vpop.f32.mrb[123].mxu0 }
 0x3a2   :  { %v4635_v24 = vadd.f32 %v9194_v28, %v15035_v50  ;;  %v9197_v13 = vadd.f32 %v9196_v23, %v9195_v59  ;;  %v9242_v9 = vpop.f32.mrb[123].mxu1 }
 0x3a3   :  { %v9243_v51 = vadd.f32 %v9242_v9, %v9241_v35  ;;  %7174 = vmatmul.mubr.bf16.gmra.mrb[228].mxu0 %v16522_v0 }
 0x3a4   :  { %v15088_v54 = vadd.f32 %v9240_v47, %v4635_v24  ;;  %v4636_v11 = vadd.f32 %v9197_v13, %v15040_v14  ;;  %7181 = vmatprep.mubr.bf16.mxu0 %v14531_v34  ;;  %v6986_v14 = vpack.c.bf16 %v3607_v42, %v3607_v42 }
 0x3a6   :  { %v15092_v36 = vadd.f32 %v9243_v51, %v4636_v11  ;;  %v9198_v19 = vpop.f32.mrb[124].mxu0 }
 0x3a7   :  { %v9244_v41 = vpop.f32.mrb[124].mxu1  ;;  %v9199_v15 = vpop.f32.mrb[125].mxu0 }
 0x3a8   :  { %v9200_v6 = vadd.f32 %v9199_v15, %v9198_v19  ;;  %v9245_v50 = vpop.f32.mrb[125].mxu1  ;;  %v9201_v63 = vpop.f32.mrb[126].mxu0 }
 0x3a9   :  { %v9246_v5 = vadd.f32 %v9245_v50, %v9244_v41  ;;  %v9247_v56 = vpop.f32.mrb[126].mxu1  ;;  %v9202_v49 = vpop.f32.mrb[127].mxu0 }
 0x3aa   :  { %v4637_v4 = vadd.f32 %v9200_v6, %v15058_v45  ;;  %v9203_v46 = vadd.f32 %v9202_v49, %v9201_v63  ;;  %v9248_v29 = vpop.f32.mrb[127].mxu1 }
 0x3ab   :  { %v9249_v62 = vadd.f32 %v9248_v29, %v9247_v56  ;;  %7182 = vmatmul.mubr.bf16.gmra.mrb[232].mxu0 %v14531_v34 }
 0x3ac   :  { %v15097_v44 = vadd.f32 %v9246_v5, %v4637_v4  ;;  %v4638_v31 = vadd.f32 %v9203_v46, %v15062_v58  ;;  %7189 = vmatprep.mubr.bf16.mxu0 %v6986_v14 }
 0x3ae   :  { %v15100_v33 = vadd.f32 %v9249_v62, %v4638_v31  ;;  %v9204_v53 = vpop.f32.mrb[128].mxu0 }
 0x3af   :  { %v9250_v3 = vpop.f32.mrb[128].mxu1  ;;  %v9205_v48 = vpop.f32.mrb[129].mxu0 }
 0x3b0   :  { %v9206_v10 = vadd.f32 %v9205_v48, %v9204_v53  ;;  %v9251_v30 = vpop.f32.mrb[129].mxu1  ;;  %v9207_v22 = vpop.f32.mrb[130].mxu0 }
 0x3b1   :  { %v9252_v45 = vadd.f32 %v9251_v30, %v9250_v3  ;;  %v9253_v37 = vpop.f32.mrb[130].mxu1  ;;  %v9208_v17 = vpop.f32.mrb[131].mxu0 }
 0x3b2   :  { %v4639_v55 = vadd.f32 %v9206_v10, %v15071_v18  ;;  %v9209_v8 = vadd.f32 %v9208_v17, %v9207_v22  ;;  %v9254_v34 = vpop.f32.mrb[131].mxu1 }
 0x3b3   :  { %v9255_v57 = vadd.f32 %v9254_v34, %v9253_v37  ;;  %7190 = vmatmul.mubr.bf16.gmra.mrb[236].mxu0 %v6986_v14 }
 0x3b4   :  { %v15103_v26 = vadd.f32 %v9252_v45, %v4639_v55  ;;  %v4640_v58 = vadd.f32 %v9209_v8, %v15074_v60 }
 0x3b6   :  { %v15106_v21 = vadd.f32 %v9255_v57, %v4640_v58  ;;  %v9210_v27 = vpop.f32.mrb[132].mxu0 }
 0x3b7   :  { %v9256_v7 = vpop.f32.mrb[132].mxu1  ;;  %v9211_v12 = vpop.f32.mrb[133].mxu0 }
 0x3b8   :  { %v9212_v39 = vadd.f32 %v9211_v12, %v9210_v27  ;;  %v9257_v38 = vpop.f32.mrb[133].mxu1  ;;  %v9213_v16 = vpop.f32.mrb[134].mxu0 }
 0x3b9   :  { %v9258_v2 = vadd.f32 %v9257_v38, %v9256_v7  ;;  %v9259_v0 = vpop.f32.mrb[134].mxu1  ;;  %v9214_v61 = vpop.f32.mrb[135].mxu0 }
 0x3ba   :  { %v4641_v18 = vadd.f32 %v9212_v39, %v15076_v25  ;;  %v9215_v20 = vadd.f32 %v9214_v61, %v9213_v16  ;;  %v9260_v52 = vpop.f32.mrb[135].mxu1 }
 0x3bb   :  { %v9261_v28 = vadd.f32 %v9260_v52, %v9259_v0 }
 0x3bc   :  { %v15109_v32 = vadd.f32 %v9258_v2, %v4641_v18  ;;  %v4642_v60 = vadd.f32 %v9215_v20, %v15080_v1 }
 0x3be   :  { %v15112_v59 = vadd.f32 %v9261_v28, %v4642_v60  ;;  %v9216_v47 = vpop.f32.mrb[136].mxu0 }
 0x3bf   :  { %v9262_v35 = vpop.f32.mrb[136].mxu1  ;;  %v9217_v23 = vpop.f32.mrb[137].mxu0 }
 0x3c0   :  { %v9218_v24 = vadd.f32 %v9217_v23, %v9216_v47  ;;  %v9263_v13 = vpop.f32.mrb[137].mxu1  ;;  %v9219_v9 = vpop.f32.mrb[138].mxu0 }
 0x3c1   :  { %v9264_v51 = vadd.f32 %v9263_v13, %v9262_v35  ;;  %v9265_v11 = vpop.f32.mrb[138].mxu1  ;;  %v9220_v19 = vpop.f32.mrb[139].mxu0 }
 0x3c2   :  { %v4643_v25 = vadd.f32 %v9218_v24, %v15082_v40  ;;  %v9266_v43 = vpop.f32.mrb[139].mxu1 }
 0x3c4   :  { %v15115_v42 = vadd.f32 %v9264_v51, %v4643_v25 }
 0x3c6   :  { %v9284_v41 = vpop.f32.mrb[140].mxu0 }
 0x3c7   :  { %v9330_v15 = vpop.f32.mrb[140].mxu1  ;;  %v9285_v6 = vpop.f32.mrb[141].mxu0 }
 0x3c8   :  { %v9286_v1 = vadd.f32 %v9285_v6, %v9284_v41  ;;  %v9331_v50 = vpop.f32.mrb[141].mxu1  ;;  %v9287_v63 = vpop.f32.mrb[142].mxu0 }
 0x3c9   :  { %v9332_v5 = vadd.f32 %v9331_v50, %v9330_v15  ;;  %v9333_v56 = vpop.f32.mrb[142].mxu1  ;;  %v9288_v49 = vpop.f32.mrb[143].mxu0 }
 0x3ca   :  { %v5151_v4 = vadd.f32 %v9286_v1, %v15088_v54  ;;  %v9289_v46 = vadd.f32 %v9288_v49, %v9287_v63  ;;  %v9334_v29 = vpop.f32.mrb[143].mxu1 }
 0x3cb   :  { %v9335_v14 = vadd.f32 %v9334_v29, %v9333_v56 }
 0x3cc   :  { %v15118_v62 = vadd.f32 %v9332_v5, %v5151_v4  ;;  %v5152_v40 = vadd.f32 %v9289_v46, %v15092_v36 }
 0x3ce   :  { %v15121_v31 = vadd.f32 %v9335_v14, %v5152_v40  ;;  %v9290_v53 = vpop.f32.mrb[144].mxu0 }
 0x3cf   :  { %v9336_v3 = vpop.f32.mrb[144].mxu1  ;;  %v9291_v48 = vpop.f32.mrb[145].mxu0 }
 0x3d0   :  { %v9292_v10 = vadd.f32 %v9291_v48, %v9290_v53  ;;  %v9337_v30 = vpop.f32.mrb[145].mxu1  ;;  %v9293_v22 = vpop.f32.mrb[146].mxu0 }
 0x3d1   :  { %v9338_v45 = vadd.f32 %v9337_v30, %v9336_v3  ;;  %v9339_v37 = vpop.f32.mrb[146].mxu1  ;;  %v9294_v17 = vpop.f32.mrb[147].mxu0 }
 0x3d2   :  { %v5153_v54 = vadd.f32 %v9292_v10, %v15097_v44  ;;  %v9295_v55 = vadd.f32 %v9294_v17, %v9293_v22  ;;  %v9340_v8 = vpop.f32.mrb[147].mxu1 }
 0x3d3   :  { %v9341_v34 = vadd.f32 %v9340_v8, %v9339_v37 }
 0x3d4   :  { %v15124_v57 = vadd.f32 %v9338_v45, %v5153_v54  ;;  %v5154_v36 = vadd.f32 %v9295_v55, %v15100_v33 }
 0x3d6   :  { %v15127_v58 = vadd.f32 %v9341_v34, %v5154_v36  ;;  %v9296_v27 = vpop.f32.mrb[148].mxu0 }
 0x3d7   :  { %v9342_v7 = vpop.f32.mrb[148].mxu1  ;;  %v9297_v12 = vpop.f32.mrb[149].mxu0 }
 0x3d8   :  { %v9298_v39 = vadd.f32 %v9297_v12, %v9296_v27  ;;  %v9343_v38 = vpop.f32.mrb[149].mxu1  ;;  %v9299_v16 = vpop.f32.mrb[150].mxu0 }
 0x3d9   :  { %v9344_v2 = vadd.f32 %v9343_v38, %v9342_v7  ;;  %v9345_v0 = vpop.f32.mrb[150].mxu1  ;;  %v9300_v61 = vpop.f32.mrb[151].mxu0 }
 0x3da   :  { %v5155_v44 = vadd.f32 %v9298_v39, %v15103_v26  ;;  %v9301_v18 = vadd.f32 %v9300_v61, %v9299_v16  ;;  %v9346_v20 = vpop.f32.mrb[151].mxu1 }
 0x3db   :  { %v9347_v52 = vadd.f32 %v9346_v20, %v9345_v0 }
 0x3dc   :  { %v15130_v28 = vadd.f32 %v9344_v2, %v5155_v44  ;;  %v5156_v33 = vadd.f32 %v9301_v18, %v15106_v21 }
 0x3de   :  { %v15133_v60 = vadd.f32 %v9347_v52, %v5156_v33  ;;  %v9302_v47 = vpop.f32.mrb[152].mxu0 }
 0x3df   :  { %v9348_v35 = vpop.f32.mrb[152].mxu1  ;;  %v9303_v23 = vpop.f32.mrb[153].mxu0 }
 0x3e0   :  { %v9304_v24 = vadd.f32 %v9303_v23, %v9302_v47  ;;  %v9349_v13 = vpop.f32.mrb[153].mxu1  ;;  %v9305_v9 = vpop.f32.mrb[154].mxu0 }
 0x3e1   :  { %v9350_v51 = vadd.f32 %v9349_v13, %v9348_v35  ;;  %v9351_v11 = vpop.f32.mrb[154].mxu1  ;;  %v9306_v19 = vpop.f32.mrb[155].mxu0 }
 0x3e2   :  { %v5157_v26 = vadd.f32 %v9304_v24, %v15109_v32  ;;  %v9307_v25 = vadd.f32 %v9306_v19, %v9305_v9  ;;  %v9352_v43 = vpop.f32.mrb[155].mxu1 }
 0x3e3   :  { %v9353_v41 = vadd.f32 %v9352_v43, %v9351_v11 }
 0x3e4   :  { %v15136_v15 = vadd.f32 %v9350_v51, %v5157_v26  ;;  %v5158_v21 = vadd.f32 %v9307_v25, %v15112_v59 }
 0x3e6   :  { %v15139_v6 = vadd.f32 %v9353_v41, %v5158_v21  ;;  %v9308_v1 = vpop.f32.mrb[156].mxu0 }
 0x3e7   :  { %v9354_v50 = vpop.f32.mrb[156].mxu1  ;;  %v9309_v63 = vpop.f32.mrb[157].mxu0 }
 0x3e8   :  { %v9310_v5 = vadd.f32 %v9309_v63, %v9308_v1  ;;  %v9355_v56 = vpop.f32.mrb[157].mxu1  ;;  %v9311_v49 = vpop.f32.mrb[158].mxu0 }
 0x3e9   :  { %v9356_v4 = vadd.f32 %v9355_v56, %v9354_v50  ;;  %v9357_v46 = vpop.f32.mrb[158].mxu1  ;;  %v9312_v29 = vpop.f32.mrb[159].mxu0 }
 0x3ea   :  { %v5159_v32 = vadd.f32 %v9310_v5, %v15115_v42  ;;  %v9358_v14 = vpop.f32.mrb[159].mxu1 }
 0x3ec   :  { %v15142_v40 = vadd.f32 %v9356_v4, %v5159_v32 }
 0x3ee   :  { %v9376_v53 = vpop.f32.mrb[160].mxu0 }
 0x3ef   :  { %v9422_v3 = vpop.f32.mrb[160].mxu1  ;;  %v9377_v48 = vpop.f32.mrb[161].mxu0 }
 0x3f0   :  { %v9378_v59 = vadd.f32 %v9377_v48, %v9376_v53  ;;  %v9423_v10 = vpop.f32.mrb[161].mxu1  ;;  %v9379_v30 = vpop.f32.mrb[162].mxu0 }
 0x3f1   :  { %v9424_v22 = vadd.f32 %v9423_v10, %v9422_v3  ;;  %v9425_v45 = vpop.f32.mrb[162].mxu1  ;;  %v9380_v37 = vpop.f32.mrb[163].mxu0 }
 0x3f2   :  { %v5666_v17 = vadd.f32 %v9378_v59, %v15118_v62  ;;  %v9381_v54 = vadd.f32 %v9380_v37, %v9379_v30  ;;  %v9426_v55 = vpop.f32.mrb[163].mxu1 }
 0x3f3   :  { %v9427_v8 = vadd.f32 %v9426_v55, %v9425_v45 }
 0x3f4   :  { %v15145_v34 = vadd.f32 %v9424_v22, %v5666_v17  ;;  %v5667_v42 = vadd.f32 %v9381_v54, %v15121_v31 }
 0x3f6   :  { %v15148_v36 = vadd.f32 %v9427_v8, %v5667_v42  ;;  %v9382_v27 = vpop.f32.mrb[164].mxu0 }
 0x3f7   :  { %v9428_v7 = vpop.f32.mrb[164].mxu1  ;;  %v9383_v12 = vpop.f32.mrb[165].mxu0 }
 0x3f8   :  { %v9384_v39 = vadd.f32 %v9383_v12, %v9382_v27  ;;  %v9429_v38 = vpop.f32.mrb[165].mxu1  ;;  %v9385_v16 = vpop.f32.mrb[166].mxu0 }
 0x3f9   :  { %v9430_v2 = vadd.f32 %v9429_v38, %v9428_v7  ;;  %v9431_v0 = vpop.f32.mrb[166].mxu1  ;;  %v9386_v61 = vpop.f32.mrb[167].mxu0 }
 0x3fa   :  { %v5668_v62 = vadd.f32 %v9384_v39, %v15124_v57  ;;  %v9387_v44 = vadd.f32 %v9386_v61, %v9385_v16  ;;  %v9432_v18 = vpop.f32.mrb[167].mxu1 }
 0x3fb   :  { %v9433_v20 = vadd.f32 %v9432_v18, %v9431_v0 }
 0x3fc   :  { %v15151_v52 = vadd.f32 %v9430_v2, %v5668_v62  ;;  %v5669_v31 = vadd.f32 %v9387_v44, %v15127_v58 }
 0x3fe   :  { %v15154_v33 = vadd.f32 %v9433_v20, %v5669_v31  ;;  %v9388_v47 = vpop.f32.mrb[168].mxu0 }
 0x3ff   :  { %v9434_v35 = vpop.f32.mrb[168].mxu1  ;;  %v9389_v23 = vpop.f32.mrb[169].mxu0 }
 0x400   :  { %v9390_v24 = vadd.f32 %v9389_v23, %v9388_v47  ;;  %v9435_v13 = vpop.f32.mrb[169].mxu1  ;;  %v9391_v9 = vpop.f32.mrb[170].mxu0 }
 0x401   :  { %v9436_v51 = vadd.f32 %v9435_v13, %v9434_v35  ;;  %v9437_v11 = vpop.f32.mrb[170].mxu1  ;;  %v9392_v19 = vpop.f32.mrb[171].mxu0 }
 0x402   :  { %v5670_v57 = vadd.f32 %v9390_v24, %v15130_v28  ;;  %v9393_v26 = vadd.f32 %v9392_v19, %v9391_v9  ;;  %v9438_v25 = vpop.f32.mrb[171].mxu1 }
 0x403   :  { %v9439_v43 = vadd.f32 %v9438_v25, %v9437_v11 }
 0x404   :  { %v15157_v41 = vadd.f32 %v9436_v51, %v5670_v57  ;;  %v5671_v58 = vadd.f32 %v9393_v26, %v15133_v60 }
 0x406   :  { %v15160_v21 = vadd.f32 %v9439_v43, %v5671_v58  ;;  %v9394_v1 = vpop.f32.mrb[172].mxu0 }
 0x407   :  { %v9440_v50 = vpop.f32.mrb[172].mxu1  ;;  %v9395_v63 = vpop.f32.mrb[173].mxu0 }
 0x408   :  { %v9396_v5 = vadd.f32 %v9395_v63, %v9394_v1  ;;  %v9441_v56 = vpop.f32.mrb[173].mxu1  ;;  %v9397_v49 = vpop.f32.mrb[174].mxu0 }
 0x409   :  { %v9442_v4 = vadd.f32 %v9441_v56, %v9440_v50  ;;  %v9443_v46 = vpop.f32.mrb[174].mxu1  ;;  %v9398_v29 = vpop.f32.mrb[175].mxu0 }
 0x40a   :  { %v5672_v28 = vadd.f32 %v9396_v5, %v15136_v15  ;;  %v9399_v32 = vadd.f32 %v9398_v29, %v9397_v49  ;;  %v9444_v14 = vpop.f32.mrb[175].mxu1 }
 0x40b   :  { %v9445_v53 = vadd.f32 %v9444_v14, %v9443_v46 }
 0x40c   :  { %v15163_v3 = vadd.f32 %v9442_v4, %v5672_v28  ;;  %v5673_v60 = vadd.f32 %v9399_v32, %v15139_v6 }
 0x40e   :  { %v15166_v48 = vadd.f32 %v9445_v53, %v5673_v60  ;;  %v9400_v59 = vpop.f32.mrb[176].mxu0 }
 0x40f   :  { %v9446_v10 = vpop.f32.mrb[176].mxu1  ;;  %v9401_v30 = vpop.f32.mrb[177].mxu0 }
 0x410   :  { %v9402_v22 = vadd.f32 %v9401_v30, %v9400_v59  ;;  %v9447_v45 = vpop.f32.mrb[177].mxu1  ;;  %v9403_v37 = vpop.f32.mrb[178].mxu0 }
 0x411   :  { %v9448_v17 = vadd.f32 %v9447_v45, %v9446_v10  ;;  %v9449_v54 = vpop.f32.mrb[178].mxu1  ;;  %v9404_v55 = vpop.f32.mrb[179].mxu0 }
 0x412   :  { %v5674_v15 = vadd.f32 %v9402_v22, %v15142_v40  ;;  %v9450_v8 = vpop.f32.mrb[179].mxu1 }
 0x414   :  { %v15169_v42 = vadd.f32 %v9448_v17, %v5674_v15 }
 0x416   :  { %v9468_v27 = vpop.f32.mrb[180].mxu0 }
 0x417   :  { %v9514_v7 = vpop.f32.mrb[180].mxu1  ;;  %v9469_v12 = vpop.f32.mrb[181].mxu0 }
 0x418   :  { %v9470_v6 = vadd.f32 %v9469_v12, %v9468_v27  ;;  %v9515_v39 = vpop.f32.mrb[181].mxu1  ;;  %v9471_v38 = vpop.f32.mrb[182].mxu0 }
 0x419   :  { %v9516_v16 = vadd.f32 %v9515_v39, %v9514_v7  ;;  %v9517_v2 = vpop.f32.mrb[182].mxu1  ;;  %v9472_v0 = vpop.f32.mrb[183].mxu0 }
 0x41a   :  { %v6181_v61 = vadd.f32 %v9470_v6, %v15145_v34  ;;  %v9473_v62 = vadd.f32 %v9472_v0, %v9471_v38  ;;  %v9518_v44 = vpop.f32.mrb[183].mxu1 }
 0x41b   :  { %v9519_v18 = vadd.f32 %v9518_v44, %v9517_v2 }
 0x41c   :  { %v15172_v20 = vadd.f32 %v9516_v16, %v6181_v61  ;;  %v6182_v40 = vadd.f32 %v9473_v62, %v15148_v36 }
 0x41e   :  { %v15175_v31 = vadd.f32 %v9519_v18, %v6182_v40  ;;  %v9474_v47 = vpop.f32.mrb[184].mxu0 }
 0x41f   :  { %v9520_v35 = vpop.f32.mrb[184].mxu1  ;;  %v9475_v23 = vpop.f32.mrb[185].mxu0 }
 0x420   :  { %v9476_v24 = vadd.f32 %v9475_v23, %v9474_v47  ;;  %v9521_v13 = vpop.f32.mrb[185].mxu1  ;;  %v9477_v9 = vpop.f32.mrb[186].mxu0 }
 0x421   :  { %v9522_v51 = vadd.f32 %v9521_v13, %v9520_v35  ;;  %v9523_v11 = vpop.f32.mrb[186].mxu1  ;;  %v9478_v19 = vpop.f32.mrb[187].mxu0 }
 0x422   :  { %v6183_v34 = vadd.f32 %v9476_v24, %v15151_v52  ;;  %v9479_v57 = vadd.f32 %v9478_v19, %v9477_v9  ;;  %v9524_v26 = vpop.f32.mrb[187].mxu1 }
 0x423   :  { %v9525_v25 = vadd.f32 %v9524_v26, %v9523_v11 }
 0x424   :  { %v15178_v43 = vadd.f32 %v9522_v51, %v6183_v34  ;;  %v6184_v36 = vadd.f32 %v9479_v57, %v15154_v33 }
 0x426   :  { %v15181_v58 = vadd.f32 %v9525_v25, %v6184_v36  ;;  %v9480_v1 = vpop.f32.mrb[188].mxu0 }
 0x427   :  { %v9526_v50 = vpop.f32.mrb[188].mxu1  ;;  %v9481_v63 = vpop.f32.mrb[189].mxu0 }
 0x428   :  { %v9482_v5 = vadd.f32 %v9481_v63, %v9480_v1  ;;  %v9527_v56 = vpop.f32.mrb[189].mxu1  ;;  %v9483_v49 = vpop.f32.mrb[190].mxu0 }
 0x429   :  { %v9528_v4 = vadd.f32 %v9527_v56, %v9526_v50  ;;  %v9529_v46 = vpop.f32.mrb[190].mxu1  ;;  %v9484_v29 = vpop.f32.mrb[191].mxu0 }
 0x42a   :  { %v6185_v52 = vadd.f32 %v9482_v5, %v15157_v41  ;;  %v9485_v28 = vadd.f32 %v9484_v29, %v9483_v49  ;;  %v9530_v32 = vpop.f32.mrb[191].mxu1 }
 0x42b   :  { %v9531_v14 = vadd.f32 %v9530_v32, %v9529_v46 }
 0x42c   :  { %v15184_v53 = vadd.f32 %v9528_v4, %v6185_v52  ;;  %v6186_v33 = vadd.f32 %v9485_v28, %v15160_v21 }
 0x42e   :  { %v15187_v60 = vadd.f32 %v9531_v14, %v6186_v33  ;;  %v9486_v59 = vpop.f32.mrb[192].mxu0 }
 0x42f   :  { %v9532_v10 = vpop.f32.mrb[192].mxu1  ;;  %v9487_v30 = vpop.f32.mrb[193].mxu0 }
 0x430   :  { %v9488_v22 = vadd.f32 %v9487_v30, %v9486_v59  ;;  %v9533_v45 = vpop.f32.mrb[193].mxu1  ;;  %v9489_v37 = vpop.f32.mrb[194].mxu0 }
 0x431   :  { %v9534_v17 = vadd.f32 %v9533_v45, %v9532_v10  ;;  %v9535_v54 = vpop.f32.mrb[194].mxu1  ;;  %v9490_v55 = vpop.f32.mrb[195].mxu0 }
 0x432   :  { %v6187_v41 = vadd.f32 %v9488_v22, %v15163_v3  ;;  %v9491_v15 = vadd.f32 %v9490_v55, %v9489_v37  ;;  %v9536_v8 = vpop.f32.mrb[195].mxu1 }
 0x433   :  { %v9537_v27 = vadd.f32 %v9536_v8, %v9535_v54 }
 0x434   :  { %v15190_v7 = vadd.f32 %v9534_v17, %v6187_v41  ;;  %v6188_v21 = vadd.f32 %v9491_v15, %v15166_v48 }
 0x436   :  { %v15193_v12 = vadd.f32 %v9537_v27, %v6188_v21  ;;  %v9492_v6 = vpop.f32.mrb[196].mxu0 }
 0x437   :  { %v9538_v39 = vpop.f32.mrb[196].mxu1  ;;  %v9493_v38 = vpop.f32.mrb[197].mxu0 }
 0x438   :  { %v9494_v16 = vadd.f32 %v9493_v38, %v9492_v6  ;;  %v9539_v2 = vpop.f32.mrb[197].mxu1  ;;  %v9495_v0 = vpop.f32.mrb[198].mxu0 }
 0x439   :  { %v9540_v61 = vadd.f32 %v9539_v2, %v9538_v39  ;;  %v9541_v62 = vpop.f32.mrb[198].mxu1  ;;  %v9496_v44 = vpop.f32.mrb[199].mxu0  ;;  %v10478_v39 = vld [vmem:[%s15586_s9 + $0x40] sm:$0xff]  }
 0x43a   :  { %v6189_v3 = vadd.f32 %v9494_v16, %v15169_v42  ;;  %v9542_v18 = vpop.f32.mrb[199].mxu1  ;;  %9682 = vmatprep.subr.bf16.mxu1 %v10478_v39 }
 0x43c   :  { %v15196_v40 = vadd.f32 %v9540_v61, %v6189_v3 }
 0x43e   :  { %v9560_v47 = vpop.f32.mrb[200].mxu0 }
 0x43f   :  { %v9606_v35 = vpop.f32.mrb[200].mxu1  ;;  %v9561_v23 = vpop.f32.mrb[201].mxu0 }
 0x440   :  { %v9562_v48 = vadd.f32 %v9561_v23, %v9560_v47  ;;  %v9607_v24 = vpop.f32.mrb[201].mxu1  ;;  %v9563_v13 = vpop.f32.mrb[202].mxu0  ;;  %v10481_v23 = vld [vmem:[%s15586_s9 + $0x8] sm:$0xff]  }
 0x441   :  { %v9608_v9 = vadd.f32 %v9607_v24, %v9606_v35  ;;  %v9609_v51 = vpop.f32.mrb[202].mxu1  ;;  %v9564_v11 = vpop.f32.mrb[203].mxu0  ;;  %v10482_v24 = vld [vmem:[%s15586_s9 + $0x100] sm:$0xff]  }
 0x442   :  { %v6696_v19 = vadd.f32 %v9562_v48, %v15172_v20  ;;  %v9565_v34 = vadd.f32 %v9564_v11, %v9563_v13  ;;  %v9610_v57 = vpop.f32.mrb[203].mxu1  ;;  %9713 = vmatprep.subr.bf16.mxu0 %v10482_v24 }
 0x443   :  { %v9611_v26 = vadd.f32 %v9610_v57, %v9609_v51  ;;  %v10484_v51 = vld [vmem:[%s15586_s9 + $0x50] sm:$0xff]  }
 0x444   :  { %v15199_v25 = vadd.f32 %v9608_v9, %v6696_v19  ;;  %v6697_v42 = vadd.f32 %v9565_v34, %v15175_v31  ;;  %v10485_v34 = vld [vmem:[%s15586_s9 + $0x10] sm:$0xff]  }
 0x446   :  { %v15202_v36 = vadd.f32 %v9611_v26, %v6697_v42  ;;  %v9566_v1 = vpop.f32.mrb[204].mxu0  ;;  %v10486_v26 = vld [vmem:[%s15586_s9 + $0x108] sm:$0xff]  }
 0x447   :  { %v9612_v50 = vpop.f32.mrb[204].mxu1  ;;  %v9567_v63 = vpop.f32.mrb[205].mxu0  ;;  %v10487_v42 = vld [vmem:[%s15586_s9 + $0xc8] sm:$0xff]  }
 0x448   :  { %v9568_v5 = vadd.f32 %v9567_v63, %v9566_v1  ;;  %v9613_v56 = vpop.f32.mrb[205].mxu1  ;;  %v9569_v49 = vpop.f32.mrb[206].mxu0 }
 0x449   :  { %v9614_v4 = vadd.f32 %v9613_v56, %v9612_v50  ;;  %v9615_v46 = vpop.f32.mrb[206].mxu1  ;;  %v9570_v29 = vpop.f32.mrb[207].mxu0 }
 0x44a   :  { %v6698_v20 = vadd.f32 %v9568_v5, %v15178_v43  ;;  %v9571_v52 = vadd.f32 %v9570_v29, %v9569_v49  ;;  %v9616_v28 = vpop.f32.mrb[207].mxu1  ;;  %v10488_v29 = vld [vmem:[%s15586_s9 + $0x58] sm:$0xff]  }
 0x44b   :  { %v9617_v32 = vadd.f32 %v9616_v28, %v9615_v46  ;;  %v10490_v28 = vld [vmem:[%s15586_s9 + $0x110] sm:$0xff]  }
 0x44c   :  { %v15205_v14 = vadd.f32 %v9614_v4, %v6698_v20  ;;  %v6699_v31 = vadd.f32 %v9571_v52, %v15181_v58  ;;  %v10489_v20 = vld [vmem:[%s15586_s9 + $0x18] sm:$0xff]  }
 0x44e   :  { %v15208_v33 = vadd.f32 %v9617_v32, %v6699_v31  ;;  %v9572_v59 = vpop.f32.mrb[208].mxu0  ;;  %v10492_v31 = vld [vmem:[%s15586_s9 + $0x60] sm:$0xff]  }
 0x44f   :  { %v9618_v10 = vpop.f32.mrb[208].mxu1  ;;  %v9573_v30 = vpop.f32.mrb[209].mxu0 }
 0x450   :  { %v9574_v22 = vadd.f32 %v9573_v30, %v9572_v59  ;;  %v9619_v45 = vpop.f32.mrb[209].mxu1  ;;  %v9575_v37 = vpop.f32.mrb[210].mxu0 }
 0x451   :  { %v9620_v17 = vadd.f32 %v9619_v45, %v9618_v10  ;;  %v9621_v54 = vpop.f32.mrb[210].mxu1  ;;  %v9576_v55 = vpop.f32.mrb[211].mxu0  ;;  %v10493_v10 = vld [vmem:[%s15586_s9 + $0x118] sm:$0xff]   ;;  %v10494_v45 = vld [vmem:[%s15586_s9 + $0x20] sm:$0xff]  }
 0x452   :  { %v6700_v43 = vadd.f32 %v9574_v22, %v15184_v53  ;;  %v9577_v41 = vadd.f32 %v9576_v55, %v9575_v37  ;;  %v9622_v15 = vpop.f32.mrb[211].mxu1  ;;  %v10479_v53 = vld [vmem:[%s15586_s9] sm:$0xff]  }
 0x453   :  { %v9623_v8 = vadd.f32 %v9622_v15, %v9621_v54  ;;  %9683 = vmatpush3.bf16.msra.mxu1 %v10479_v53  ;;  %v10503_v53 = vld [vmem:[%s15586_s9 + $0x30] sm:$0xff]  }
 0x454   :  { %v15211_v27 = vadd.f32 %v9620_v17, %v6700_v43  ;;  %v6701_v58 = vadd.f32 %v9577_v41, %v15187_v60  ;;  %v10480_v60 = vld [vmem:[%s15586_s9 + $0x48] sm:$0xff]   ;;  %v10495_v17 = vld [vmem:[%s15586_s9 + $0xd8] sm:$0xff]   ;;  %v10496_v43 = vld [vmem:[%s15586_s9 + $0x120] sm:$0xff]  }
 0x455   :  { %9684 = vmatprep.subr.bf16.mxu1 %v10480_v60  ;;  %v10497_v41 = vld [vmem:[%s15586_s9 + $0x68] sm:$0xff]  }
 0x456   :  { %v15214_v21 = vadd.f32 %v9623_v8, %v6701_v58  ;;  %v9578_v6 = vpop.f32.mrb[212].mxu0  ;;  %v10499_v8 = vld [vmem:[%s15586_s9 + $0x28] sm:$0xff]  }
 0x457   :  { %v9624_v38 = vpop.f32.mrb[212].mxu1  ;;  %v9579_v16 = vpop.f32.mrb[213].mxu0  ;;  %9685 = vmatpush3.bf16.msra.mxu1 %v10481_v23 }
 0x458   :  { %v9580_v2 = vadd.f32 %v9579_v16, %v9578_v6  ;;  %v9625_v0 = vpop.f32.mrb[213].mxu1  ;;  %v9581_v61 = vpop.f32.mrb[214].mxu0  ;;  %9686 = vmatprep.subr.bf16.mxu1 %v10484_v51  ;;  %v10500_v6 = vld [vmem:[%s15586_s9 + $0x128] sm:$0xff]  }
 0x459   :  { %v9626_v62 = vadd.f32 %v9625_v0, %v9624_v38  ;;  %v9627_v44 = vpop.f32.mrb[214].mxu1  ;;  %v9582_v3 = vpop.f32.mrb[215].mxu0 }
 0x45a   :  { %v6702_v18 = vadd.f32 %v9580_v2, %v15190_v7  ;;  %v9583_v47 = vadd.f32 %v9582_v3, %v9581_v61  ;;  %v9628_v35 = vpop.f32.mrb[215].mxu1  ;;  %v10483_v7 = vld [vmem:[%s15586_s9 + $0xc0] sm:$0xff]   ;;  %v10502_v2 = vld [vmem:[%s15586_s9 + $0x70] sm:$0xff]   ;;  %v15306_v0 = vpop.permute.xlu0 %7235 }
 0x45b   :  { %v9629_v48 = vadd.f32 %v9628_v35, %v9627_v44  ;;  %9714 = vmatpush3.bf16.msra.mxu0 %v10483_v7  ;;  %9687 = vmatpush3.bf16.msra.mxu1 %v10485_v34  ;;  %v10504_v44 = vld [vmem:[%s15586_s9 + $0x130] sm:$0xff]   ;;  %v10507_v35 = vld [vmem:[%s15586_s9 + $0x38] sm:$0xff]  }
 0x45c   :  { %v15232_v13 = vadd.f32 %v9626_v62, %v6702_v18  ;;  %v6703_v9 = vadd.f32 %v9583_v47, %v15193_v12  ;;  %9715 = vmatprep.subr.bf16.mxu0 %v10486_v26  ;;  %9688 = vmatprep.subr.bf16.mxu1 %v10488_v29  ;;  %v10505_v3 = vld [vmem:[%s15586_s9 + $0xf0] sm:$0xff]   ;;  %v15326_v47 = vpop.permute.xlu1 %7240  ;;  %v10509_v7 = vld [vmem:[%s15586_s9 + $0xf8] sm:$0xff]   ;;  %v10510_v26 = vld [vmem:[%s15586_s9 + $0x1c0] sm:$0xff]  }
 0x45e   :  { %v15241_v11 = vadd.f32 %v9629_v48, %v6703_v9  ;;  %v9584_v19 = vpop.f32.mrb[216].mxu0  ;;  %v15336_v24 = vpop.permute.xlu0 %7245 }
 0x45f   :  { %v9630_v57 = vpop.f32.mrb[216].mxu1  ;;  %v9585_v12 = vpop.f32.mrb[217].mxu0  ;;  %9716 = vmatpush3.bf16.msra.mxu0 %v10487_v42  ;;  %9689 = vmatpush3.bf16.msra.mxu1 %v10489_v20 }
 0x460   :  { %v9586_v1 = vadd.f32 %v9585_v12, %v9584_v19  ;;  %v9631_v50 = vpop.f32.mrb[217].mxu1  ;;  %v9587_v63 = vpop.f32.mrb[218].mxu0  ;;  %9717 = vmatprep.subr.bf16.mxu0 %v10490_v28  ;;  %9690 = vmatprep.subr.bf16.mxu1 %v10492_v31  ;;  %v16524_v12 = vmov 0.0  }
 0x461   :  { %v9632_v5 = vadd.f32 %v9631_v50, %v9630_v57  ;;  %v9633_v56 = vpop.f32.mrb[218].mxu1  ;;  %v9588_v49 = vpop.f32.mrb[219].mxu0 }
 0x462   :  { %v6704_v4 = vadd.f32 %v9586_v1, %v15196_v40  ;;  %v9634_v46 = vpop.f32.mrb[219].mxu1  ;;  %v10491_v40 = vld [vmem:[%s15586_s9 + $0xd0] sm:$0xff]  }
 0x463   :  { %9718 = vmatpush3.bf16.msra.mxu0 %v10491_v40  ;;  %9691 = vmatpush3.bf16.msra.mxu1 %v10494_v45  ;;  %v7256_v46 = vpop.permute.xlu0 %7255 }
 0x464   :  { %v15259_v52 = vadd.f32 %v9632_v5, %v6704_v4  ;;  %9719 = vmatprep.subr.bf16.mxu0 %v10493_v10  ;;  %9692 = vmatprep.subr.bf16.mxu1 %v10497_v41  ;;  %v7251_v5 = vpop.permute.xlu1 %7250 }
 0x466   :  { %v9652_v32 = vpop.f32.mrb[220].mxu0 }
 0x467   :  { %v9653_v59 = vpop.f32.mrb[221].mxu0  ;;  %9720 = vmatpush3.bf16.msra.mxu0 %v10495_v17  ;;  %9693 = vmatpush3.bf16.msra.mxu1 %v10499_v8 }
 0x468   :  { %v9654_v30 = vadd.f32 %v9653_v59, %v9652_v32  ;;  %v9655_v22 = vpop.f32.mrb[222].mxu0  ;;  %9721 = vmatprep.subr.bf16.mxu0 %v10496_v43  ;;  %9694 = vmatprep.subr.bf16.mxu1 %v10502_v2 }
 0x469   :  { %v9656_v37 = vpop.f32.mrb[223].mxu0 }
 0x46a   :  { %v15280_v54 = vadd.f32 %v9654_v30, %v15199_v25  ;;  %v9657_v55 = vadd.f32 %v9656_v37, %v9655_v22  ;;  %v10498_v25 = vld [vmem:[%s15586_s9 + $0xe0] sm:$0xff]  }
 0x46b   :  { %9722 = vmatpush3.bf16.msra.mxu0 %v10498_v25  ;;  %9695 = vmatpush3.bf16.msra.mxu1 %v10503_v53 }
 0x46c   :  { %v15289_v15 = vadd.f32 %v9657_v55, %v15202_v36  ;;  %v10501_v36 = vld [vmem:[%s15586_s9 + $0xe8] sm:$0xff]   ;;  %9723 = vmatprep.subr.bf16.mxu0 %v10500_v6  ;;  %v7278_v51 = vmul.f32 %v15306_v0, %v15280_v54 }
 0x46e   :  { %v9658_v58 = vpop.f32.mrb[224].mxu0  ;;  %v7279_v23 = vmul.f32 %v15326_v47, %v15289_v15 }
 0x46f   :  { %v9659_v39 = vpop.f32.mrb[225].mxu0  ;;  %9724 = vmatpush3.bf16.msra.mxu0 %v10501_v36 }
 0x470   :  { %v9660_v38 = vadd.f32 %v9659_v39, %v9658_v58  ;;  %v9661_v16 = vpop.f32.mrb[226].mxu0  ;;  %9725 = vmatprep.subr.bf16.mxu0 %v10504_v44  ;;  %v7287_v1 = vadd.f32 %v7279_v23, %v7278_v51 }
 0x471   :  { %v9662_v61 = vpop.f32.mrb[227].mxu0 }
 0x472   :  { %v15312_v60 = vadd.f32 %v9660_v38, %v15205_v14  ;;  %v9663_v62 = vadd.f32 %v9662_v61, %v9661_v16  ;;  %v10506_v14 = vld [vmem:[%s15586_s9 + $0x78] sm:$0xff]  }
 0x473   :  { %9696 = vmatprep.subr.bf16.mxu1 %v10506_v14  ;;  %9726 = vmatpush3.bf16.msra.mxu0 %v10505_v3 }
 0x474   :  { %v15321_v18 = vadd.f32 %v9663_v62, %v15208_v33  ;;  %v10508_v33 = vld [vmem:[%s15586_s9 + $0x138] sm:$0xff]   ;;  %9697 = vmatpush3.bf16.msra.mxu1 %v10507_v35  ;;  %v7280_v19 = vmul.f32 %v15336_v24, %v15312_v60 }
 0x475   :  { %9727 = vmatprep.subr.bf16.mxu0 %v10508_v33  ;;  %10135 = vmatprep.subr.bf16.mxu1 %v16524_v12 }
 0x476   :  { %v9664_v48 = vpop.f32.mrb[228].mxu0  ;;  %v7288_v56 = vadd.f32 %v7287_v1, %v7280_v19  ;;  %v7281_v49 = vmul.f32 %v7251_v5, %v15321_v18 }
 0x477   :  { %v9665_v9 = vpop.f32.mrb[229].mxu0  ;;  %9728 = vmatpush3.bf16.msra.mxu0 %v10509_v7 }
 0x478   :  { %v9666_v34 = vadd.f32 %v9665_v9, %v9664_v48  ;;  %v9667_v57 = vpop.f32.mrb[230].mxu0  ;;  %9744 = vmatprep.subr.bf16.mxu0 %v10510_v26  ;;  %v7289_v40 = vadd.f32 %v7288_v56, %v7281_v49 }
 0x479   :  { %v9668_v42 = vpop.f32.mrb[231].mxu0 }
 0x47a   :  { %v15350_v50 = vadd.f32 %v9666_v34, %v15211_v27  ;;  %v9669_v63 = vadd.f32 %v9668_v42, %v9667_v57  ;;  %v7261_v27 = vpop.permute.xlu1 %7260 }
 0x47c   :  { %v15354_v4 = vadd.f32 %v9669_v63, %v15214_v21  ;;  %v7282_v29 = vmul.f32 %v7256_v46, %v15350_v50  ;;  %v7266_v21 = vpop.permute.xlu0 %7265 }
 0x47e   :  { %v9670_v20 = vpop.f32.mrb[232].mxu0  ;;  %v7290_v10 = vadd.f32 %v7289_v40, %v7282_v29  ;;  %v7283_v30 = vmul.f32 %v7261_v27, %v15354_v4  ;;  %v7271_v41 = vpop.permute.xlu1 %7270 }
 0x47f   :  { %v9671_v28 = vpop.f32.mrb[233].mxu0 }
 0x480   :  { %v9672_v32 = vadd.f32 %v9671_v28, %v9670_v20  ;;  %v9673_v31 = vpop.f32.mrb[234].mxu0  ;;  %v7291_v55 = vadd.f32 %v7290_v10, %v7283_v30  ;;  %v7276_v38 = vpop.permute.xlu0 %7275 }
 0x481   :  { %v9674_v59 = vpop.f32.mrb[235].mxu0 }
 0x482   :  { %v15359_v22 = vadd.f32 %v9672_v32, %v15232_v13  ;;  %v9675_v45 = vadd.f32 %v9674_v59, %v9673_v31 }
 0x484   :  { %v7284_v37 = vmul.f32 %v7266_v21, %v15359_v22  ;;  %v15363_v17 = vadd.f32 %v9675_v45, %v15241_v11 }
 0x486   :  { %v9676_v43 = vpop.f32.mrb[236].mxu0  ;;  %v7292_v8 = vadd.f32 %v7291_v55, %v7284_v37  ;;  %v7285_v58 = vmul.f32 %v7271_v41, %v15363_v17 }
 0x487   :  { %v9677_v25 = vpop.f32.mrb[237].mxu0 }
 0x488   :  { %v9678_v6 = vadd.f32 %v9677_v25, %v9676_v43  ;;  %v9679_v39 = vpop.f32.mrb[238].mxu0  ;;  %v7293_v16 = vadd.f32 %v7292_v8, %v7285_v58 }
 0x489   :  { %v9680_v36 = vpop.f32.mrb[239].mxu0 }
 0x48a   :  { %v15367_v13 = vadd.f32 %v9678_v6, %v15259_v52 }
 0x48c   :  { %v7286_v2 = vmul.f32 %v7276_v38, %v15367_v13 }
 0x48e   :  { %v7294_v61 = vadd.f32 %v7293_v16, %v7286_v2 }
 0x490   :  { %v7295_v11 = vrot.slane %v7294_v61, 4 }
 0x492   :  { %v7296_v53 = vadd.f32 %v7295_v11, %v7294_v61  ;;  %v7348_v61 = vld [vmem:[%s15588_s7] sm:$0x1] }
 0x494   :  { %v7297_v62 = vrot.slane %v7296_v53, 2 }
 0x496   :  { %v7298_v44 = vadd.f32 %v7297_v62, %v7296_v53  ;;  %v16525_v53 = vld [vmem:[#allocation89_spill] sm:$0xff] }
 0x498   :  { %v7299_v3 = vrot.slane %v7298_v44, 1 }
 0x49a   :  { %v7300_v14 = vadd.f32 %v7299_v3, %v7298_v44 }
 0x49c   :  { %v7301_v35 = vmul.f32 0.055555556, %v7300_v14 }
 0x49e   :  { %v7302_v23 = vsub.f32 %v15280_v54, %v7301_v35  ;;  %v7303_v48 = vsub.f32 %v15289_v15, %v7301_v35  ;;  %v7304_v33 = vsub.f32 %v15312_v60, %v7301_v35  ;;  %v7305_v52 = vsub.f32 %v15321_v18, %v7301_v35 }
 0x49f   :  { %v7306_v9 = vsub.f32 %v15350_v50, %v7301_v35  ;;  %v7307_v34 = vsub.f32 %v15354_v4, %v7301_v35  ;;  %v7308_v1 = vsub.f32 %v15359_v22, %v7301_v35  ;;  %v7309_v29 = vsub.f32 %v15363_v17, %v7301_v35 }
 0x4a0   :  { %v7311_v7 = vmul.f32 %v7302_v23, %v15306_v0  ;;  %v7312_v51 = vmul.f32 %v7303_v48, %v15326_v47  ;;  %v7313_v19 = vmul.f32 %v7304_v33, %v15336_v24  ;;  %v7314_v57 = vmul.f32 %v7305_v52, %v7251_v5 }
 0x4a1   :  { %v7315_v63 = vmul.f32 %v7306_v9, %v7256_v46  ;;  %v7316_v20 = vmul.f32 %v7307_v34, %v7261_v27  ;;  %v7310_v0 = vsub.f32 %v15367_v13, %v7301_v35  ;;  %v7317_v47 = vmul.f32 %v7308_v1, %v7266_v21 }
 0x4a2   :  { %v7320_v26 = vmul.f32 %v7311_v7, %v7311_v7  ;;  %v7321_v42 = vmul.f32 %v7312_v51, %v7312_v51  ;;  %v7322_v56 = vmul.f32 %v7313_v19, %v7313_v19  ;;  %v7323_v28 = vmul.f32 %v7314_v57, %v7314_v57 }
 0x4a3   :  { %v7324_v32 = vmul.f32 %v7315_v63, %v7315_v63  ;;  %v7318_v31 = vmul.f32 %v7309_v29, %v7271_v41  ;;  %v7325_v59 = vmul.f32 %v7316_v20, %v7316_v20  ;;  %v7319_v10 = vmul.f32 %v7310_v0, %v7276_v38  ;;  %v7344_v41 = vld [vmem:[%s15587_s6] sm:$0x1]  ;;  %v10513_v29 = vld [vmem:[%s15586_s9 + $0x1c8] sm:$0xff]   ;;  %v10516_v0 = vld [vmem:[%s15586_s9 + $0x1d0] sm:$0xff]  }
 0x4a4   :  { %v7329_v49 = vadd.f32 %v7321_v42, %v7320_v26  ;;  %v7326_v30 = vmul.f32 %v7317_v47, %v7317_v47  ;;  %v10511_v63 = vld [vmem:[%s15586_s9 + $0x80] sm:$0xff]   ;;  %v10517_v47 = vld [vmem:[%s15586_s9 + $0x90] sm:$0xff]  }
 0x4a5   :  { %v7327_v37 = vmul.f32 %v7318_v31, %v7318_v31  ;;  %v7328_v55 = vmul.f32 %v7319_v10, %v7319_v10  ;;  %v10520_v31 = vld [vmem:[%s15586_s9 + $0x98] sm:$0xff]   ;;  %v10523_v10 = vld [vmem:[%s15586_s9 + $0xa0] sm:$0xff]  }
 0x4a6   :  { %v7330_v40 = vadd.f32 %v7329_v49, %v7322_v56  ;;  %v10512_v49 = vld [vmem:[%s15586_s9 + $0x180] sm:$0xff]  }
 0x4a8   :  { %v7331_v24 = vadd.f32 %v7330_v40, %v7323_v28  ;;  %v10514_v28 = vld [vmem:[%s15586_s9 + $0x88] sm:$0xff]  }
 0x4a9   :  { %v10515_v40 = vld [vmem:[%s15586_s9 + $0x188] sm:$0xff]  }
 0x4aa   :  { %v7332_v5 = vadd.f32 %v7331_v24, %v7324_v32  ;;  %v10518_v32 = vld [vmem:[%s15586_s9 + $0x190] sm:$0xff]   ;;  %v10519_v24 = vld [vmem:[%s15586_s9 + $0x1d8] sm:$0xff]  }
 0x4ac   :  { %v7333_v45 = vadd.f32 %v7332_v5, %v7325_v59  ;;  %v10521_v59 = vld [vmem:[%s15586_s9 + $0x198] sm:$0xff]   ;;  %v10522_v5 = vld [vmem:[%s15586_s9 + $0x1e0] sm:$0xff]  }
 0x4ae   :  { %v7334_v46 = vadd.f32 %v7333_v45, %v7326_v30  ;;  %v10524_v30 = vld [vmem:[%s15586_s9 + $0x1a0] sm:$0xff]   ;;  %v10525_v45 = vld [vmem:[%s15586_s9 + $0x1e8] sm:$0xff]  }
 0x4b0   :  { %v7335_v43 = vadd.f32 %v7334_v46, %v7327_v37  ;;  %v10526_v37 = vld [vmem:[%s15586_s9 + $0xa8] sm:$0xff]  }
 0x4b1   :  { %v10527_v46 = vld [vmem:[%s15586_s9 + $0x1a8] sm:$0xff]  }
 0x4b2   :  { %v7336_v25 = vadd.f32 %v7335_v43, %v7328_v55  ;;  %v10528_v55 = vld [vmem:[%s15586_s9 + $0x1f0] sm:$0xff]  }
 0x4b4   :  { %v7337_v8 = vrot.slane %v7336_v25, 4 }
 0x4b6   :  { %v7338_v27 = vadd.f32 %v7337_v8, %v7336_v25  ;;  %v10529_v8 = vld [vmem:[%s15586_s9 + $0xb0] sm:$0xff]  }
 0x4b8   :  { %v7339_v58 = vrot.slane %v7338_v27, 2 }
 0x4ba   :  { %v7340_v6 = vadd.f32 %v7339_v58, %v7338_v27  ;;  %v10530_v27 = vld [vmem:[%s15586_s9 + $0x1b0] sm:$0xff]  }
 0x4bc   :  { %v7341_v39 = vrot.slane %v7340_v6, 1 }
 0x4be   :  { %v7342_v36 = vadd.f32 %v7341_v39, %v7340_v6  ;;  %v10532_v6 = vld [vmem:[%s15586_s9 + $0xb8] sm:$0xff]  }
 0x4bf   :  { %v10533_v39 = vld [vmem:[%s15586_s9 + $0x1b8] sm:$0xff]  }
 0x4c0   :  { %v7343_v21 = vmul.f32 0.055555556, %v7342_v36 }
 0x4c2   :  { %v7345_v16 = vadd.f32 1e-05, %v7343_v21 }
 0x4c4   :  { %10552 = vrsqrt.f32 %v7345_v16  ;;  %v10534_v16 = vld [vmem:[%s15586_s9 + $0x140] sm:$0xff]  }
 0x4ce   :  { %v10553_v38 = vpop.eup %10552 }
 0x4cf   :  { %v7347_v2 = vmul.f32 %v10553_v38, %v7344_v41 }
 0x4d1   :  { %v7349_v11 = vmul.f32 %v7347_v2, %v7301_v35  ;;  %v15389_v62 = vrot.slane %v7347_v2, %v16525_v53  ;;  %v10535_v2 = vld [vmem:[%s15586_s9 + $0x148] sm:$0xff]  }
 0x4d3   :  { %v7350_v44 = vsub.f32 %v7348_v61, %v7349_v11  ;;  %v7358_v3 = vmul.f32 %v15389_v62, %v15289_v15  ;;  %v7361_v23 = vmul.f32 %v15389_v62, %v15350_v50  ;;  %v7357_v48 = vmul.f32 %v15389_v62, %v15280_v54  ;;  %v10536_v61 = vld [vmem:[%s15586_s9 + $0x150] sm:$0xff]   ;;  %v10537_v11 = vld [vmem:[%s15586_s9 + $0x158] sm:$0xff]  }
 0x4d4   :  { %v7360_v33 = vmul.f32 %v15389_v62, %v15321_v18  ;;  %v7364_v35 = vmul.f32 %v15389_v62, %v15363_v17  ;;  %v7362_v52 = vmul.f32 %v15389_v62, %v15354_v4  ;;  %v7365_v4 = vmul.f32 %v15389_v62, %v15367_v13 }
 0x4d5   :  { %v15394_v14 = vrot.slane %v7350_v44, %v16525_v53  ;;  %v7359_v43 = vmul.f32 %v15389_v62, %v15312_v60  ;;  %v7363_v25 = vmul.f32 %v15389_v62, %v15359_v22  ;;  %v10531_v60 = vld [vmem:[%s15586_s9 + $0x1f8] sm:$0xff]   ;;  %v10538_v53 = vld [vmem:[%s15586_s9 + $0x160] sm:$0xff]   ;;  %v10539_v62 = vld [vmem:[%s15586_s9 + $0x168] sm:$0xff]  }
 0x4d6   :  { %v10540_v44 = vld [vmem:[%s15586_s9 + $0x170] sm:$0xff]  }
 0x4d7   :  { %v7373_v15 = vadd.f32 %v15394_v14, %v7358_v3  ;;  %v7376_v9 = vadd.f32 %v15394_v14, %v7361_v23  ;;  %v7372_v7 = vadd.f32 %v15394_v14, %v7357_v48  ;;  %v7375_v50 = vadd.f32 %v15394_v14, %v7360_v33  ;;  %v10541_v3 = vld [vmem:[%s15586_s9 + $0x178] sm:$0xff]   ;;  %v10542_v23 = vld [vmem:[%s15586_s9 + $0x200] sm:$0xff]   ;;  %v10543_v33 = vld [vmem:[%s15586_s9 + $0x208] sm:$0xff]  }
 0x4d8   :  { %v7379_v51 = vadd.f32 %v15394_v14, %v7364_v35  ;;  %v15412_v54 = vadd.f32 %v15394_v14, %v7362_v52  ;;  %v15426_v13 = vadd.f32 %v15394_v14, %v7365_v4  ;;  %v7374_v58 = vadd.f32 %v15394_v14, %v7359_v43  ;;  %v10544_v35 = vld [vmem:[%s15586_s9 + $0x210] sm:$0xff]   ;;  %v10545_v52 = vld [vmem:[%s15586_s9 + $0x218] sm:$0xff]  }
 0x4d9   :  { %v7382_v18 = vmax.f32 %v7373_v15, 0.0  ;;  %v7385_v19 = vmax.f32 %v7376_v9, 0.0  ;;  %v7381_v34 = vmax.f32 %v7372_v7, 0.0  ;;  %v7384_v17 = vmax.f32 %v7375_v50, 0.0  ;;  %v10546_v15 = vld [vmem:[%s15586_s9 + $0x220] sm:$0xff]   ;;  %v10547_v9 = vld [vmem:[%s15586_s9 + $0x228] sm:$0xff]  }
 0x4da   :  { %v7388_v57 = vmax.f32 %v7379_v51, 0.0  ;;  %v7378_v22 = vadd.f32 %v15394_v14, %v7363_v25  ;;  %v7383_v36 = vmax.f32 %v7374_v58, 0.0  ;;  %v7386_v14 = vmax.f32 %v15412_v54, 0.0  ;;  %v10548_v7 = vld [vmem:[%s15586_s9 + $0x230] sm:$0xff]   ;;  %v10549_v50 = vld [vmem:[%s15586_s9 + $0x238] sm:$0xff]  }
 0x4db   :  { %v7447_v26 = vpack.c.bf16 %v7382_v18, %v7382_v18  ;;  %v7723_v42 = vpack.c.bf16 %v7385_v19, %v7385_v19  ;;  %v7446_v1 = vpack.c.bf16 %v7381_v34, %v7381_v34  ;;  %v7722_v56 = vpack.c.bf16 %v7384_v17, %v7384_v17  ;;  %v8881_v34 = vld [vmem:[%s15589_s10] ss:$0 sm:$0xff] }
 0x4dc   :  { %v7999_v20 = vpack.c.bf16 %v7388_v57, %v7388_v57  ;;  %v7387_v21 = vmax.f32 %v7378_v22, 0.0  ;;  %v7448_v41 = vpack.c.bf16 %v7383_v36, %v7383_v36  ;;  %v7724_v48 = vpack.c.bf16 %v7386_v14, %v7386_v14 }
 0x4dd   :  { %7625 = vmatprep.mubr.bf16.mxu1 %v7447_v26  ;;  %7901 = vmatprep.mubr.bf16.mxu0 %v7723_v42  ;;  %v7389_v51 = vmax.f32 %v15426_v13, 0.0 }
 0x4de   :  { %7626 = vmatmul.mubr.bf16.vlgmr.msra.gmra.mrb[220].mxu1 %v7446_v1  ;;  %7902 = vmatmul.mubr.bf16.vlgmr.msra.gmra.mrb[240].mxu0 %v7722_v56  ;;  %v7998_v38 = vpack.c.bf16 %v7387_v21, %v7387_v21 }
 0x4df   :  { %10136 = vmatpush3.bf16.msra.mxu1 %v10511_v63  ;;  %9745 = vmatpush3.bf16.msra.mxu0 %v10512_v49  ;;  %v8000_v54 = vpack.c.bf16 %v7389_v51, %v7389_v51 }
 0x4e0   :  { %8177 = vmatprep.mubr.bf16.mxu0 %v7999_v20  ;;  %10137 = vmatprep.subr.bf16.mxu1 %v16524_v12 }
 0x4e1   :  { %9746 = vmatprep.subr.bf16.mxu0 %v10513_v29  ;;  %10151 = vmatprep.mubr.msk.bf16.mxu1 %vm10564_vm0, %v16524_v12 }
 0x4e3   :  { %10138 = vmatpush3.bf16.msra.mxu1 %v10514_v28  ;;  %9747 = vmatpush3.bf16.msra.mxu0 %v10515_v40 }
 0x4e4   :  { %10139 = vmatprep.subr.bf16.mxu1 %v16524_v12  ;;  %9748 = vmatprep.subr.bf16.mxu0 %v10516_v0 }
 0x4e7   :  { %10140 = vmatpush3.bf16.msra.mxu1 %v10517_v47  ;;  %9749 = vmatpush3.bf16.msra.mxu0 %v10518_v32 }
 0x4e8   :  { %10141 = vmatprep.subr.bf16.mxu1 %v16524_v12  ;;  %9750 = vmatprep.subr.bf16.mxu0 %v10519_v24 }
 0x4eb   :  { %10142 = vmatpush3.bf16.msra.mxu1 %v10520_v31  ;;  %9751 = vmatpush3.bf16.msra.mxu0 %v10521_v59 }
 0x4ec   :  { %10143 = vmatprep.subr.bf16.mxu1 %v16524_v12  ;;  %9752 = vmatprep.subr.bf16.mxu0 %v10522_v5 }
 0x4ef   :  { %10144 = vmatpush3.bf16.msra.mxu1 %v10523_v10  ;;  %9753 = vmatpush3.bf16.msra.mxu0 %v10524_v30 }
 0x4f0   :  { %10145 = vmatprep.subr.bf16.mxu1 %v16524_v12  ;;  %9754 = vmatprep.subr.bf16.mxu0 %v10525_v45 }
 0x4f3   :  { %10146 = vmatpush3.bf16.msra.mxu1 %v10526_v37  ;;  %9755 = vmatpush3.bf16.msra.mxu0 %v10527_v46 }
 0x4f4   :  { %10147 = vmatprep.subr.bf16.mxu1 %v16524_v12  ;;  %9756 = vmatprep.subr.bf16.mxu0 %v10528_v55 }
 0x4f7   :  { %10148 = vmatpush3.bf16.msra.mxu1 %v10529_v8  ;;  %9757 = vmatpush3.bf16.msra.mxu0 %v10530_v27 }
 0x4f8   :  { %10149 = vmatprep.subr.bf16.mxu1 %v16524_v12  ;;  %9758 = vmatprep.subr.bf16.mxu0 %v10531_v60 }
 0x4fb   :  { %10150 = vmatpush3.bf16.msra.mxu1 %v10532_v6  ;;  %9759 = vmatpush3.bf16.msra.mxu0 %v10533_v39 }
 0x4fc   :  { %10155 = vmatprep.subr.bf16.mxu1 %v16524_v12 }
 0x4fe   :  { %10152 = vmatmul.mubr.bf16.vlgmr.msra.gmra.mrb[224].mxu1 %v7448_v41  ;;  %8178 = vmatmul.mubr.bf16.vlgmr.msra.gmra.mrb[244].mxu0 %v7998_v38 }
 0x4ff   :  { %10156 = vmatpush3.bf16.msra.mxu1 %v10534_v16  ;;  %10171 = vmatprep.mubr.msk.bf16.mxu1 %vm10564_vm0, %v16524_v12 }
 0x500   :  { %10157 = vmatprep.subr.bf16.mxu1 %v16524_v12 }
 0x503   :  { %10158 = vmatpush3.bf16.msra.mxu1 %v10535_v2 }
 0x504   :  { %10159 = vmatprep.subr.bf16.mxu1 %v16524_v12 }
 0x507   :  { %10160 = vmatpush3.bf16.msra.mxu1 %v10536_v61 }
 0x508   :  { %10161 = vmatprep.subr.bf16.mxu1 %v16524_v12 }
 0x50b   :  { %10162 = vmatpush3.bf16.msra.mxu1 %v10537_v11 }
 0x50c   :  { %10163 = vmatprep.subr.bf16.mxu1 %v16524_v12 }
 0x50f   :  { %10164 = vmatpush3.bf16.msra.mxu1 %v10538_v53 }
 0x510   :  { %10165 = vmatprep.subr.bf16.mxu1 %v16524_v12 }
 0x513   :  { %10166 = vmatpush3.bf16.msra.mxu1 %v10539_v62 }
 0x514   :  { %10167 = vmatprep.subr.bf16.mxu1 %v16524_v12 }
 0x517   :  { %10168 = vmatpush3.bf16.msra.mxu1 %v10540_v44 }
 0x518   :  { %10169 = vmatprep.subr.bf16.mxu1 %v16524_v12 }
 0x51b   :  { %10170 = vmatpush3.bf16.msra.mxu1 %v10541_v3 }
 0x51c   :  { %10175 = vmatprep.subr.bf16.mxu1 %v16524_v12 }
 0x51e   :  { %10172 = vmatmul.mubr.bf16.vlgmr.msra.gmra.mrb[224].mxu1 %v7724_v48 }
 0x51f   :  { %10176 = vmatpush3.bf16.msra.mxu1 %v10542_v23  ;;  %10191 = vmatprep.mubr.msk.bf16.mxu1 %vm10564_vm0, %v16524_v12 }
 0x520   :  { %10177 = vmatprep.subr.bf16.mxu1 %v16524_v12 }
 0x523   :  { %10178 = vmatpush3.bf16.msra.mxu1 %v10543_v33 }
 0x524   :  { %10179 = vmatprep.subr.bf16.mxu1 %v16524_v12 }
 0x527   :  { %10180 = vmatpush3.bf16.msra.mxu1 %v10544_v35 }
 0x528   :  { %10181 = vmatprep.subr.bf16.mxu1 %v16524_v12 }
 0x52b   :  { %10182 = vmatpush3.bf16.msra.mxu1 %v10545_v52 }
 0x52c   :  { %10183 = vmatprep.subr.bf16.mxu1 %v16524_v12 }
 0x52f   :  { %10184 = vmatpush3.bf16.msra.mxu1 %v10546_v15 }
 0x530   :  { %10185 = vmatprep.subr.bf16.mxu1 %v16524_v12 }
 0x533   :  { %10186 = vmatpush3.bf16.msra.mxu1 %v10547_v9 }
 0x534   :  { %10187 = vmatprep.subr.bf16.mxu1 %v16524_v12 }
 0x537   :  { %10188 = vmatpush3.bf16.msra.mxu1 %v10548_v7 }
 0x538   :  { %10189 = vmatprep.subr.bf16.mxu1 %v16524_v12 }
 0x53b   :  { %10190 = vmatpush3.bf16.msra.mxu1 %v10549_v50 }
 0x53e   :  { %10192 = vmatmul.mubr.bf16.vlgmr.msra.gmra.mrb[224].mxu1 %v8000_v54 }
 0x5b1   :  { %v9698_v18 = vpop.f32.mrb[220].mxu1  ;;  %v9729_v19 = vpop.f32.mrb[240].mxu0 }
 0x5b2   :  { %v9699_v17 = vpop.f32.mrb[221].mxu1  ;;  %v9730_v4 = vpop.f32.mrb[241].mxu0 }
 0x5b3   :  { %v9700_v57 = vadd.f32 %v9699_v17, %v9698_v18  ;;  %v9731_v26 = vadd.f32 %v9730_v4, %v9729_v19  ;;  %v9701_v42 = vpop.f32.mrb[222].mxu1  ;;  %v9732_v1 = vpop.f32.mrb[242].mxu0 }
 0x5b4   :  { %v9702_v63 = vpop.f32.mrb[223].mxu1  ;;  %v9733_v56 = vpop.f32.mrb[243].mxu0 }
 0x5b5   :  { %v10195_v12 = vadd.f32 %v9700_v57, %v8881_v34 }
 0x5b7   :  { %v10196_v49 = vadd.f32 %v10195_v12, %v9731_v26 }
 0x5d1   :  { %v9760_v29 = vpop.f32.mrb[244].mxu0 }
 0x5d2   :  { %v9761_v13 = vpop.f32.mrb[245].mxu0 }
 0x5d3   :  { %v9762_v20 = vadd.f32 %v9761_v13, %v9760_v29  ;;  %v9763_v28 = vpop.f32.mrb[246].mxu0 }
 0x5d4   :  { %v9764_v40 = vpop.f32.mrb[247].mxu0 }
 0x5d5   :  { %v10197_v0 = vadd.f32 %v10196_v49, %v9762_v20 }
 0x611   :  { %v8219_v47 = vpop.f32.mrb[224].mxu1 }
 0x612   :  { %v10198_v32 = vadd.f32 %v10197_v0, %v8219_v47  ;;  %v10193_v24 = vpop.f32.mrb[225].mxu1 }
 0x613   :  { %v8222_v31 = vpop.f32.mrb[226].mxu1 }
 0x614   :  { %8226 = vst [vmem:[%s15590_s11] sm:$0xff] %v10198_v32  ;;  %v10194_v59 = vpop.f32.mrb[227].mxu1 }

</bundles_post_ra>
